<compile_context>
chip_gen: v7x
topology: tpu7x:2x2x1
jax: 0.10.0
libtpu: 0.0.40
codegen_flags: <defaults>
</compile_context>

<pallas_src>
import functools

import jax
import jax.numpy as jnp
from jax import lax
from jax.experimental import pallas as pl
from jax.experimental.pallas import tpu as pltpu

IMG_FEATURE_DIM = 256              # self.img_feature_dim
HIDDEN = IMG_FEATURE_DIM           # LSTM hidden size
NUM_LAYERS = 2                     # num_layers=2
NUM_DIRS = 2                       # bidirectional=True
GATES = 4 * HIDDEN                 # 1024  (i, f, g, o)
GATES_BOTH = NUM_DIRS * GATES      # 2048  ([fwd | bwd])
VMEM_LIMIT = 32 * 1024 * 1024      # explicit scoped-VMEM budget (fits all gens)


# ---------------------------------------------------------------------------
# Pallas kernels
# ---------------------------------------------------------------------------
def _base_gates0_kernel(x_ref, bw_ref, bb_ref, wih_ref, bih_ref, o_ref, acc_ref):
    """Fused base-model projection + layer-0 LSTM input-gate precompute.

    grid = (D, CHW // tk); reduction (k) axis last.
    x_ref   : (Npad, tk)        bf16 frame slice for timestep d, K-chunk k
    bw_ref  : (tk, 256)         bf16 base-model weight K-chunk
    bb_ref  : (1, 256)          f32 base-model bias
    wih_ref : (256, 8H)         bf16  [W_ih_fwd | W_ih_bwd] (layer 0)
    bih_ref : (1, 8H)           f32   (b_ih + b_hh, both directions)
    o_ref   : (1, Npad, 8H)     f32 time-major gates_x block for timestep d
    acc_ref : (Npad, 256)       f32 VMEM accumulator for base features
    """
    k = pl.program_id(1)

    @pl.when(k == 0)
    def _():
        acc_ref[...] = jnp.zeros_like(acc_ref)

    acc_ref[...] += jnp.dot(x_ref[...], bw_ref[...],
                            preferred_element_type=jnp.float32)

    @pl.when(k == pl.num_programs(1) - 1)
    def _():
        base = (acc_ref[...] + bb_ref[...]).astype(jnp.bfloat16)
        o_ref[0] = (
            jnp.dot(base, wih_ref[...], preferred_element_type=jnp.float32)
            + bih_ref[...]
        ).astype(o_ref.dtype)


def _gates_linear_kernel(x_ref, w_ref, b_ref, o_ref):
    """Layer-1 input projection: gates_x[d] = seq[d] @ W_ih_both + b_both."""
    o_ref[0] = (
        jnp.dot(x_ref[0], w_ref[...], preferred_element_type=jnp.float32)
        + b_ref[...]
    ).astype(o_ref.dtype)


def _bilstm_dir_kernel(gx_ref, whh_ref, y_ref):
    """One direction of a bidirectional LSTM layer; the full time recurrence
    runs inside the kernel (grid = (NUM_DIRS,), 'parallel').

    gx_ref  : (T, Npad, 4H)  f32  precomputed x-side gates (+bias), this dir
    whh_ref : (1, H, 4H)     bf16 recurrent weight of this direction
    y_ref   : (T, Npad, H)   bf16 output half-column of the (T, Npad, 2H) output
    Gate order follows PyTorch: i, f, g, o.
    """
    di = pl.program_id(0)
    t_len, n, hdim = y_ref.shape

    def step(i, carry):
        h, c = carry
        # forward direction (di=0): t = i ; backward direction (di=1): t = T-1-i
        t = i + di * (t_len - 1 - 2 * i)
        gates = gx_ref[t] + jnp.dot(h.astype(jnp.bfloat16), whh_ref[0],
                                    preferred_element_type=jnp.float32)
        i_g = jax.nn.sigmoid(gates[:, 0 * hdim:1 * hdim])
        f_g = jax.nn.sigmoid(gates[:, 1 * hdim:2 * hdim])
        g_g = jnp.tanh(gates[:, 2 * hdim:3 * hdim])
        o_g = jax.nn.sigmoid(gates[:, 3 * hdim:4 * hdim])
        c_new = f_g * c + i_g * g_g
        h_new = o_g * jnp.tanh(c_new)
        y_ref[t] = h_new.astype(y_ref.dtype)
        return (h_new, c_new)

    zero = jnp.zeros((n, hdim), jnp.float32)
    lax.fori_loop(0, t_len, step, (zero, zero), unroll=True)


def _head_kernel(x_ref, w1_ref, b1_ref, w2_ref, b2_ref, o_ref):
    """Fused last_layer1 + last_layer2: ((x @ W1 + b1) @ W2 + b2)."""
    hid = (jnp.dot(x_ref[...], w1_ref[...],
                   preferred_element_type=jnp.float32) + b1_ref[...])
    o_ref[...] = (
        jnp.dot(hid.astype(jnp.bfloat16), w2_ref[...],
                preferred_element_type=jnp.float32)
        + b2_ref[...]
    ).astype(o_ref.dtype)


# ---------------------------------------------------------------------------
# Pallas wrappers
# ---------------------------------------------------------------------------
def base_and_gates0(frames, base_w, base_b, w_ih0, b0, *, d_len, n_pad, chw, tk):
    """frames: (Npad, D*CHW) bf16 (N outer, D then CHW inner) -> (D, Npad, 8H) f32."""
    n_k = chw // tk
    return pl.pallas_call(
        _base_gates0_kernel,
        out_shape=jax.ShapeDtypeStruct((d_len, n_pad, GATES_BOTH), jnp.float32),
        grid=(d_len, n_k),
        in_specs=[
            # frame slice for (d, k): columns [d*CHW + k*tk : d*CHW + (k+1)*tk]
            pl.BlockSpec((n_pad, tk), lambda d, k: (0, d * n_k + k)),
            pl.BlockSpec((tk, IMG_FEATURE_DIM), lambda d, k: (k, 0)),
            pl.BlockSpec((1, IMG_FEATURE_DIM), lambda d, k: (0, 0)),
            pl.BlockSpec((IMG_FEATURE_DIM, GATES_BOTH), lambda d, k: (0, 0)),
            pl.BlockSpec((1, GATES_BOTH), lambda d, k: (0, 0)),
        ],
        out_specs=pl.BlockSpec((1, n_pad, GATES_BOTH), lambda d, k: (d, 0, 0)),
        scratch_shapes=[pltpu.VMEM((n_pad, IMG_FEATURE_DIM), jnp.float32)],
        compiler_params=pltpu.CompilerParams(
            dimension_semantics=("parallel", "arbitrary"),
            vmem_limit_bytes=VMEM_LIMIT),
    )(frames, base_w, base_b, w_ih0, b0)


def gates_linear(seq, w_ih, b):
    """seq: (D, Npad, 2H) bf16 -> time-major gates (D, Npad, 8H) f32."""
    d_len, n_pad, in_dim = seq.shape
    return pl.pallas_call(
        _gates_linear_kernel,
        out_shape=jax.ShapeDtypeStruct((d_len, n_pad, GATES_BOTH), jnp.float32),
        grid=(d_len,),
        in_specs=[
            pl.BlockSpec((1, n_pad, in_dim), lambda d: (d, 0, 0)),
            pl.BlockSpec((in_dim, GATES_BOTH), lambda d: (0, 0)),
            pl.BlockSpec((1, GATES_BOTH), lambda d: (0, 0)),
        ],
        out_specs=pl.BlockSpec((1, n_pad, GATES_BOTH), lambda d: (d, 0, 0)),
        compiler_params=pltpu.CompilerParams(
            dimension_semantics=("parallel",),
            vmem_limit_bytes=VMEM_LIMIT),
    )(seq, w_ih, b)


def bilstm_layer(gx, w_hh):
    """Bidirectional LSTM layer; recurrence fully inside the kernel.

    gx   : (T, Npad, 8H) f32 precomputed x-side gates, [fwd | bwd] along last dim
    w_hh : (2, H, 4H)    bf16 recurrent weights, stacked [fwd, bwd]
    ->     (T, Npad, 2H) bf16 output, [h_fwd | h_bwd] along last dim
    """
    t_len, n_pad, _ = gx.shape
    hdim = w_hh.shape[1]
    # TODO(synk): for very large T*Npad, chunk the time axis with
    # pltpu.emit_pipeline instead of holding the whole slab in VMEM.
    return pl.pallas_call(
        _bilstm_dir_kernel,
        out_shape=jax.ShapeDtypeStruct((t_len, n_pad, NUM_DIRS * hdim),
                                       jnp.bfloat16),
        grid=(NUM_DIRS,),
        in_specs=[
            pl.BlockSpec((t_len, n_pad, 4 * hdim), lambda di: (0, 0, di)),
            pl.BlockSpec((1, hdim, 4 * hdim), lambda di: (di, 0, 0)),
        ],
        out_specs=pl.BlockSpec((t_len, n_pad, hdim), lambda di: (0, 0, di)),
        compiler_params=pltpu.CompilerParams(
            dimension_semantics=("parallel",),   # 2 TCs on v7x, 2 serial steps else
            vmem_limit_bytes=VMEM_LIMIT),
    )(gx, w_hh)


def head(x, w1, b1, w2, b2):
    n = x.shape[0]
    return pl.pallas_call(
        _head_kernel,
        out_shape=jax.ShapeDtypeStruct((n, 2), jnp.float32),
    )(x, w1, b1, w2, b2)


# ---------------------------------------------------------------------------
# Helpers / parameter construction (deterministic, synthetic)
# ---------------------------------------------------------------------------
def _round_up(v, m):
    return (v + m - 1) // m * m


def _pick_tk(chw, max_tk=2048):
    """K-tile for the base projection (must divide CHW)."""
    if chw <= max_tk:
        return chw
    for tk in range(max_tk, 127, -128):
        if chw % tk == 0:
            return tk
    return chw  # TODO(synk): pad CHW to a 128-multiple for awkward frame sizes


def init_params(key, frame_flat_dim):
    def u(k, shape, scale):
        return jax.random.uniform(k, shape, jnp.float32, -scale, scale)

    keys = iter(jax.random.split(key, 16))
    params = {}

    # Stand-in base model: Linear(C*H*W -> 256). Weight bf16 for the MXU path.
    s = 1.0 / jnp.sqrt(frame_flat_dim)
    params["base_w"] = u(next(keys), (frame_flat_dim, IMG_FEATURE_DIM), s).astype(jnp.bfloat16)
    params["base_b"] = u(next(keys), (1, IMG_FEATURE_DIM), s)

    # 2-layer bidirectional LSTM (PyTorch gate layout i,f,g,o).
    # W_ih of both directions concatenated along the gate axis -> (In, 8H),
    # combined bias (b_ih + b_hh) for both directions -> (1, 8H),
    # W_hh stacked per direction -> (2, H, 4H).
    lstm_layers = []
    scale = 1.0 / jnp.sqrt(HIDDEN)
    for layer in range(NUM_LAYERS):
        in_dim = IMG_FEATURE_DIM if layer == 0 else NUM_DIRS * HIDDEN
        lstm_layers.append({
            "w_ih": u(next(keys), (in_dim, GATES_BOTH), scale).astype(jnp.bfloat16),
            "b":    u(next(keys), (1, GATES_BOTH), scale),
            "w_hh": u(next(keys), (NUM_DIRS, HIDDEN, GATES), scale).astype(jnp.bfloat16),
        })
    params["lstm"] = lstm_layers

    # last_layer1: Linear(2*256 -> 128); last_layer2: Linear(128 -> 2)
    s1 = 1.0 / jnp.sqrt(NUM_DIRS * HIDDEN)
    params["l1_w"] = u(next(keys), (NUM_DIRS * HIDDEN, 128), s1).astype(jnp.bfloat16)
    params["l1_b"] = u(next(keys), (1, 128), s1)
    s2 = 1.0 / jnp.sqrt(128)
    params["l2_w"] = u(next(keys), (128, 2), s2).astype(jnp.bfloat16)
    params["l2_b"] = u(next(keys), (1, 2), s2)
    return params


# ---------------------------------------------------------------------------
# Forward pass (glue in JAX, hot paths in Pallas)
# ---------------------------------------------------------------------------
@jax.jit
def forward(params, x):
    # x: (N, D, C, H, W)
    n, d, c, h, w = x.shape
    assert d >= 4, "forward() uses lstm_out[:, 3, :], so D >= 4 is required"
    chw = c * h * w
    n_pad = max(8, _round_up(n, 8))       # sublane/MXU-row alignment of the batch
    tk = _pick_tk(chw)

    # (N, D*CHW) bf16, batch padded with zero rows (discarded at the end).
    frames = x.reshape(n, d * chw).astype(jnp.bfloat16)
    if n_pad != n:
        frames = jnp.pad(frames, ((0, n_pad - n), (0, 0)))

    # --- fused base projection + layer-0 gate precompute, emitted time-major ---
    gx = base_and_gates0(frames, params["base_w"], params["base_b"],
                         params["lstm"][0]["w_ih"], params["lstm"][0]["b"],
                         d_len=d, n_pad=n_pad, chw=chw, tk=tk)     # (D, Npad, 8H)

    # --- layer 0: bidirectional recurrence (time loop inside kernel) ---
    seq = bilstm_layer(gx, params["lstm"][0]["w_hh"])              # (D, Npad, 2H) bf16

    # --- layer 1: input projection (batched matmul, time-major) + recurrence ---
    gx = gates_linear(seq, params["lstm"][1]["w_ih"], params["lstm"][1]["b"])
    seq = bilstm_layer(gx, params["lstm"][1]["w_hh"])              # (D, Npad, 2H) bf16

    # --- lstm_out[:, 3, :] then fused last_layer1 + last_layer2 ---
    feat = seq[3]                                                  # (Npad, 2H)
    out = head(feat, params["l1_w"], params["l1_b"],
               params["l2_w"], params["l2_b"])                     # (Npad, 2)
    return out[:n]


# ---------------------------------------------------------------------------
if __name__ == "__main__":
    key = jax.random.PRNGKey(0)
    k_x, k_p = jax.random.split(key)

    # Small shapes consistent with the module's forward: N, D, C, H, W
    N, D, C, H, W = 2, 8, 3, 16, 16        # D > 3 so lstm_out[:, 3, :] is valid
    x = jax.random.normal(k_x, (N, D, C, H, W), jnp.float32)

    params = init_params(k_p, C * H * W)

    out = forward(params, x)
    out = jax.block_until_ready(out)
    assert out.shape == (N, 2) and out.dtype == jnp.float32
    print("KERNEL_OK")
</pallas_src>

<mosaic_0001>
module attributes {stable_mosaic.version = 11 : i64} {
  func.func @_base_gates0_kernel(%arg0: i32, %arg1: i32, %arg2: memref<8x768xbf16, #tpu.memory_space<vmem>>, %arg3: memref<768x256xbf16, #tpu.memory_space<vmem>>, %arg4: memref<1x256xf32, #tpu.memory_space<vmem>>, %arg5: memref<256x2048xbf16, #tpu.memory_space<vmem>>, %arg6: memref<1x2048xf32, #tpu.memory_space<vmem>>, %arg7: memref<1x8x2048xf32, #tpu.memory_space<vmem>>, %arg8: memref<8x256xf32, #tpu.memory_space<vmem>>) attributes {dimension_semantics = [#tpu.dimension_semantics<parallel>, #tpu.dimension_semantics<arbitrary>], iteration_bounds = array<i64: 8, 1>, scalar_prefetch = 0 : i64, scratch_operands = 1 : i64, tpu.core_type = #tpu.core_type<tc>, window_params = [{transform_indices = @transform_0, window_bounds = array<i64: 8, 768>}, {transform_indices = @transform_1, window_bounds = array<i64: 768, 256>}, {pipeline_mode = #tpu.pipeline_mode<synchronous>, transform_indices = @transform_2, window_bounds = array<i64: 1, 256>}, {pipeline_mode = #tpu.pipeline_mode<synchronous>, transform_indices = @transform_3, window_bounds = array<i64: 256, 2048>}, {pipeline_mode = #tpu.pipeline_mode<synchronous>, transform_indices = @transform_4, window_bounds = array<i64: 1, 2048>}, {transform_indices = @transform_5, window_bounds = array<i64: 1, 8, 2048>}]} {
    %c0_i32 = arith.constant 0 : i32
    %0 = arith.cmpi eq, %arg1, %c0_i32 : i32
    %1 = arith.extui %0 : i1 to i32
    %c0_i32_0 = arith.constant 0 : i32
    %2 = arith.cmpi ne, %1, %c0_i32_0 : i32
    scf.if %2 {
      %cst_10 = arith.constant 0.000000e+00 : f32
      %12 = vector.broadcast %cst_10 : f32 to vector<8x256xf32>
      %c0_11 = arith.constant 0 : index
      %c0_12 = arith.constant 0 : index
      %13 = vector.load %arg8[%c0_11, %c0_12] : memref<8x256xf32, #tpu.memory_space<vmem>>, vector<8x256xf32>
      tpu.vector_store %arg8[%c0_11, %c0_12], %12 {strides = array<i32>} : memref<8x256xf32, #tpu.memory_space<vmem>>, vector<8x256xf32>,
    } else {
    }
    %c0 = arith.constant 0 : index
    %c0_1 = arith.constant 0 : index
    %3 = vector.load %arg8[%c0, %c0_1] : memref<8x256xf32, #tpu.memory_space<vmem>>, vector<8x256xf32>
    %c0_2 = arith.constant 0 : index
    %c0_3 = arith.constant 0 : index
    %4 = vector.load %arg2[%c0_2, %c0_3] : memref<8x768xbf16, #tpu.memory_space<vmem>>, vector<8x768xbf16>
    %c0_4 = arith.constant 0 : index
    %c0_5 = arith.constant 0 : index
    %5 = vector.load %arg3[%c0_4, %c0_5] : memref<768x256xbf16, #tpu.memory_space<vmem>>, vector<768x256xbf16>
    %cst = arith.constant dense<0.000000e+00> : vector<8x256xf32>
    %6 = tpu.matmul %4, %5, %cst {dimension_numbers = #tpu.dot_dimension_numbers<[1], [0], [0], [1], [0, 0, 1, 1], [], []>} : vector<8x768xbf16>, vector<768x256xbf16>, vector<8x256xf32> -> vector<8x256xf32>
    %7 = arith.addf %3, %6 : vector<8x256xf32>
    %c0_6 = arith.constant 0 : index
    %c0_7 = arith.constant 0 : index
    %8 = vector.load %arg8[%c0_6, %c0_7] : memref<8x256xf32, #tpu.memory_space<vmem>>, vector<8x256xf32>
    tpu.vector_store %arg8[%c0_6, %c0_7], %7 {strides = array<i32>} : memref<8x256xf32, #tpu.memory_space<vmem>>, vector<8x256xf32>,
    %c0_i32_8 = arith.constant 0 : i32
    %9 = arith.cmpi eq, %arg1, %c0_i32_8 : i32
    %10 = arith.extui %9 : i1 to i32
    %c0_i32_9 = arith.constant 0 : i32
    %11 = arith.cmpi ne, %10, %c0_i32_9 : i32
    scf.if %11 {
      %c0_10 = arith.constant 0 : index
      %c0_11 = arith.constant 0 : index
      %12 = vector.load %arg8[%c0_10, %c0_11] : memref<8x256xf32, #tpu.memory_space<vmem>>, vector<8x256xf32>
      %c0_12 = arith.constant 0 : index
      %c0_13 = arith.constant 0 : index
      %13 = vector.load %arg4[%c0_12, %c0_13] : memref<1x256xf32, #tpu.memory_space<vmem>>, vector<1x256xf32>
      %14 = vector.broadcast %13 : vector<1x256xf32> to vector<8x256xf32>
      %15 = arith.addf %12, %14 : vector<8x256xf32>
      %16 = arith.truncf %15 : vector<8x256xf32> to vector<8x256xbf16>
      %c0_14 = arith.constant 0 : index
      %c0_15 = arith.constant 0 : index
      %17 = vector.load %arg5[%c0_14, %c0_15] : memref<256x2048xbf16, #tpu.memory_space<vmem>>, vector<256x2048xbf16>
      %cst_16 = arith.constant dense<0.000000e+00> : vector<8x2048xf32>
      %18 = tpu.matmul %16, %17, %cst_16 {dimension_numbers = #tpu.dot_dimension_numbers<[1], [0], [0], [1], [0, 0, 1, 1], [], []>} : vector<8x256xbf16>, vector<256x2048xbf16>, vector<8x2048xf32> -> vector<8x2048xf32>
      %c0_17 = arith.constant 0 : index
      %c0_18 = arith.constant 0 : index
      %19 = vector.load %arg6[%c0_17, %c0_18] : memref<1x2048xf32, #tpu.memory_space<vmem>>, vector<1x2048xf32>
      %20 = vector.broadcast %19 : vector<1x2048xf32> to vector<8x2048xf32>
      %21 = arith.addf %18, %20 : vector<8x2048xf32>
      %c0_19 = arith.constant 0 : index
      %c0_20 = arith.constant 0 : index
      %c0_21 = arith.constant 0 : index
      %22 = vector.load %arg7[%c0_19, %c0_20, %c0_21] : memref<1x8x2048xf32, #tpu.memory_space<vmem>>, vector<1x8x2048xf32>
      %23 = vector.shape_cast %22 : vector<1x8x2048xf32> to vector<8x2048xf32>
      %24 = vector.shape_cast %21 : vector<8x2048xf32> to vector<1x8x2048xf32>
      tpu.vector_store %arg7[%c0_19, %c0_20, %c0_21], %24 {strides = array<i32>} : memref<1x8x2048xf32, #tpu.memory_space<vmem>>, vector<1x8x2048xf32>,
    } else {
    }
    return
  }
  func.func @transform_0(%arg0: i32, %arg1: i32) -> (i32, i32) {
    %c1_i32 = arith.constant 1 : i32
    %0 = arith.muli %arg0, %c1_i32 : i32
    %1 = arith.addi %0, %arg1 : i32
    %c0_i32 = arith.constant 0 : i32
    %c0_i32_0 = arith.constant 0 : i32
    return %c0_i32, %1 : i32, i32
  }
  func.func @transform_1(%arg0: i32, %arg1: i32) -> (i32, i32) {
    %c0_i32 = arith.constant 0 : i32
    %c0_i32_0 = arith.constant 0 : i32
    return %arg1, %c0_i32 : i32, i32
  }
  func.func @transform_2(%arg0: i32, %arg1: i32) -> (i32, i32) {
    %c0_i32 = arith.constant 0 : i32
    %c0_i32_0 = arith.constant 0 : i32
    %c0_i32_1 = arith.constant 0 : i32
    return %c0_i32, %c0_i32_0 : i32, i32
  }
  func.func @transform_3(%arg0: i32, %arg1: i32) -> (i32, i32) {
    %c0_i32 = arith.constant 0 : i32
    %c0_i32_0 = arith.constant 0 : i32
    %c0_i32_1 = arith.constant 0 : i32
    return %c0_i32, %c0_i32_0 : i32, i32
  }
  func.func @transform_4(%arg0: i32, %arg1: i32) -> (i32, i32) {
    %c0_i32 = arith.constant 0 : i32
    %c0_i32_0 = arith.constant 0 : i32
    %c0_i32_1 = arith.constant 0 : i32
    return %c0_i32, %c0_i32_0 : i32, i32
  }
  func.func @transform_5(%arg0: i32, %arg1: i32) -> (i32, i32, i32) {
    %c0_i32 = arith.constant 0 : i32
    %c0_i32_0 = arith.constant 0 : i32
    %c0_i32_1 = arith.constant 0 : i32
    return %arg0, %c0_i32, %c0_i32_0 : i32, i32, i32
  }
}

module attributes {stable_mosaic.version = 11 : i64} {
  func.func @_bilstm_dir_kernel(%arg0: i32, %arg1: memref<8x8x1024xf32, #tpu.memory_space<vmem>>, %arg2: memref<1x256x1024xbf16, #tpu.memory_space<vmem>>, %arg3: memref<8x8x256xbf16, #tpu.memory_space<vmem>>) attributes {dimension_semantics = [#tpu.dimension_semantics<parallel>], iteration_bounds = array<i64: 2>, scalar_prefetch = 0 : i64, scratch_operands = 0 : i64, tpu.core_type = #tpu.core_type<tc>, window_params = [{transform_indices = @transform_0, window_bounds = array<i64: 8, 8, 1024>}, {transform_indices = @transform_1, window_bounds = array<i64: 1, 256, 1024>}, {transform_indices = @transform_2, window_bounds = array<i64: 8, 8, 256>}]} {
    %cst = arith.constant 0.000000e+00 : f32
    %0 = vector.broadcast %cst : f32 to vector<8x256xf32>
    %c0_i32 = arith.constant 0 : i32
    %c2_i32 = arith.constant 2 : i32
    %1 = arith.muli %c2_i32, %c0_i32 : i32
    %c7_i32 = arith.constant 7 : i32
    %2 = arith.subi %c7_i32, %1 : i32
    %3 = arith.muli %arg0, %2 : i32
    %4 = arith.addi %c0_i32, %3 : i32
    %5 = arith.index_cast %4 : i32 to index
    %c0 = arith.constant 0 : index
    %c0_0 = arith.constant 0 : index
    %6 = vector.load %arg1[%5, %c0, %c0_0] : memref<8x8x1024xf32, #tpu.memory_space<vmem>>, vector<1x8x1024xf32>
    %7 = vector.shape_cast %6 : vector<1x8x1024xf32> to vector<8x1024xf32>
    %8 = arith.truncf %0 : vector<8x256xf32> to vector<8x256xbf16>
    %c0_1 = arith.constant 0 : index
    %c0_2 = arith.constant 0 : index
    %c0_3 = arith.constant 0 : index
    %9 = vector.load %arg2[%c0_1, %c0_2, %c0_3] : memref<1x256x1024xbf16, #tpu.memory_space<vmem>>, vector<1x256x1024xbf16>
    %10 = vector.shape_cast %9 : vector<1x256x1024xbf16> to vector<256x1024xbf16>
    %cst_4 = arith.constant dense<0.000000e+00> : vector<8x1024xf32>
    %11 = tpu.matmul %8, %10, %cst_4 {dimension_numbers = #tpu.dot_dimension_numbers<[1], [0], [0], [1], [0, 0, 1, 1], [], []>} : vector<8x256xbf16>, vector<256x1024xbf16>, vector<8x1024xf32> -> vector<8x1024xf32>
    %12 = arith.addf %7, %11 : vector<8x1024xf32>
    %13 = vector.extract_strided_slice %12 {offsets = [0, 0], sizes = [8, 256], strides = [1, 1]} : vector<8x1024xf32> to vector<8x256xf32>
    %14 = arith.negf %13 : vector<8x256xf32>
    %15 = math.exp %14 : vector<8x256xf32>
    %cst_5 = arith.constant 1.000000e+00 : f32
    %16 = vector.broadcast %cst_5 : f32 to vector<8x256xf32>
    %17 = arith.addf %16, %15 : vector<8x256xf32>
    %18 = arith.divf %16, %17 : vector<8x256xf32>
    %19 = vector.extract_strided_slice %12 {offsets = [0, 256], sizes = [8, 256], strides = [1, 1]} : vector<8x1024xf32> to vector<8x256xf32>
    %20 = arith.negf %19 : vector<8x256xf32>
    %21 = math.exp %20 : vector<8x256xf32>
    %cst_6 = arith.constant 1.000000e+00 : f32
    %22 = vector.broadcast %cst_6 : f32 to vector<8x256xf32>
    %23 = arith.addf %22, %21 : vector<8x256xf32>
    %24 = arith.divf %22, %23 : vector<8x256xf32>
    %25 = vector.extract_strided_slice %12 {offsets = [0, 512], sizes = [8, 256], strides = [1, 1]} : vector<8x1024xf32> to vector<8x256xf32>
    %26 = math.tanh %25 : vector<8x256xf32>
    %27 = vector.extract_strided_slice %12 {offsets = [0, 768], sizes = [8, 256], strides = [1, 1]} : vector<8x1024xf32> to vector<8x256xf32>
    %28 = arith.negf %27 : vector<8x256xf32>
    %29 = math.exp %28 : vector<8x256xf32>
    %cst_7 = arith.constant 1.000000e+00 : f32
    %30 = vector.broadcast %cst_7 : f32 to vector<8x256xf32>
    %31 = arith.addf %30, %29 : vector<8x256xf32>
    %32 = arith.divf %30, %31 : vector<8x256xf32>
    %33 = arith.mulf %24, %0 : vector<8x256xf32>
    %34 = arith.mulf %18, %26 : vector<8x256xf32>
    %35 = arith.addf %33, %34 : vector<8x256xf32>
    %36 = math.tanh %35 : vector<8x256xf32>
    %37 = arith.mulf %32, %36 : vector<8x256xf32>
    %38 = arith.truncf %37 : vector<8x256xf32> to vector<8x256xbf16>
    %39 = arith.index_cast %4 : i32 to index
    %c0_8 = arith.constant 0 : index
    %c0_9 = arith.constant 0 : index
    %40 = vector.load %arg3[%39, %c0_8, %c0_9] : memref<8x8x256xbf16, #tpu.memory_space<vmem>>, vector<1x8x256xbf16>
    %41 = vector.shape_cast %40 : vector<1x8x256xbf16> to vector<8x256xbf16>
    %42 = vector.shape_cast %38 : vector<8x256xbf16> to vector<1x8x256xbf16>
    tpu.vector_store %arg3[%39, %c0_8, %c0_9], %42 {strides = array<i32>} : memref<8x8x256xbf16, #tpu.memory_space<vmem>>, vector<1x8x256xbf16>,
    %c1_i32 = arith.constant 1 : i32
    %c2_i32_10 = arith.constant 2 : i32
    %43 = arith.muli %c2_i32_10, %c1_i32 : i32
    %c7_i32_11 = arith.constant 7 : i32
    %44 = arith.subi %c7_i32_11, %43 : i32
    %45 = arith.muli %arg0, %44 : i32
    %46 = arith.addi %c1_i32, %45 : i32
    %47 = arith.index_cast %46 : i32 to index
    %c0_12 = arith.constant 0 : index
    %c0_13 = arith.constant 0 : index
    %48 = vector.load %arg1[%47, %c0_12, %c0_13] : memref<8x8x1024xf32, #tpu.memory_space<vmem>>, vector<1x8x1024xf32>
    %49 = vector.shape_cast %48 : vector<1x8x1024xf32> to vector<8x1024xf32>
    %50 = arith.truncf %37 : vector<8x256xf32> to vector<8x256xbf16>
    %c0_14 = arith.constant 0 : index
    %c0_15 = arith.constant 0 : index
    %c0_16 = arith.constant 0 : index
    %51 = vector.load %arg2[%c0_14, %c0_15, %c0_16] : memref<1x256x1024xbf16, #tpu.memory_space<vmem>>, vector<1x256x1024xbf16>
    %52 = vector.shape_cast %51 : vector<1x256x1024xbf16> to vector<256x1024xbf16>
    %cst_17 = arith.constant dense<0.000000e+00> : vector<8x1024xf32>
    %53 = tpu.matmul %50, %52, %cst_17 {dimension_numbers = #tpu.dot_dimension_numbers<[1], [0], [0], [1], [0, 0, 1, 1], [], []>} : vector<8x256xbf16>, vector<256x1024xbf16>, vector<8x1024xf32> -> vector<8x1024xf32>
    %54 = arith.addf %49, %53 : vector<8x1024xf32>
    %55 = vector.extract_strided_slice %54 {offsets = [0, 0], sizes = [8, 256], strides = [1, 1]} : vector<8x1024xf32> to vector<8x256xf32>
    %56 = arith.negf %55 : vector<8x256xf32>
    %57 = math.exp %56 : vector<8x256xf32>
    %cst_18 = arith.constant 1.000000e+00 : f32
    %58 = vector.broadcast %cst_18 : f32 to vector<8x256xf32>
    %59 = arith.addf %58, %57 : vector<8x256xf32>
    %60 = arith.divf %58, %59 : vector<8x256xf32>
    %61 = vector.extract_strided_slice %54 {offsets = [0, 256], sizes = [8, 256], strides = [1, 1]} : vector<8x1024xf32> to vector<8x256xf32>
    %62 = arith.negf %61 : vector<8x256xf32>
    %63 = math.exp %62 : vector<8x256xf32>
    %cst_19 = arith.constant 1.000000e+00 : f32
    %64 = vector.broadcast %cst_19 : f32 to vector<8x256xf32>
    %65 = arith.addf %64, %63 : vector<8x256xf32>
    %66 = arith.divf %64, %65 : vector<8x256xf32>
    %67 = vector.extract_strided_slice %54 {offsets = [0, 512], sizes = [8, 256], strides = [1, 1]} : vector<8x1024xf32> to vector<8x256xf32>
    %68 = math.tanh %67 : vector<8x256xf32>
    %69 = vector.extract_strided_slice %54 {offsets = [0, 768], sizes = [8, 256], strides = [1, 1]} : vector<8x1024xf32> to vector<8x256xf32>
    %70 = arith.negf %69 : vector<8x256xf32>
    %71 = math.exp %70 : vector<8x256xf32>
    %cst_20 = arith.constant 1.000000e+00 : f32
    %72 = vector.broadcast %cst_20 : f32 to vector<8x256xf32>
    %73 = arith.addf %72, %71 : vector<8x256xf32>
    %74 = arith.divf %72, %73 : vector<8x256xf32>
    %75 = arith.mulf %66, %35 : vector<8x256xf32>
    %76 = arith.mulf %60, %68 : vector<8x256xf32>
    %77 = arith.addf %75, %76 : vector<8x256xf32>
    %78 = math.tanh %77 : vector<8x256xf32>
    %79 = arith.mulf %74, %78 : vector<8x256xf32>
    %80 = arith.truncf %79 : vector<8x256xf32> to vector<8x256xbf16>
    %81 = arith.index_cast %46 : i32 to index
    %c0_21 = arith.constant 0 : index
    %c0_22 = arith.constant 0 : index
    %82 = vector.load %arg3[%81, %c0_21, %c0_22] : memref<8x8x256xbf16, #tpu.memory_space<vmem>>, vector<1x8x256xbf16>
    %83 = vector.shape_cast %82 : vector<1x8x256xbf16> to vector<8x256xbf16>
    %84 = vector.shape_cast %80 : vector<8x256xbf16> to vector<1x8x256xbf16>
    tpu.vector_store %arg3[%81, %c0_21, %c0_22], %84 {strides = array<i32>} : memref<8x8x256xbf16, #tpu.memory_space<vmem>>, vector<1x8x256xbf16>,
    %c2_i32_23 = arith.constant 2 : i32
    %c2_i32_24 = arith.constant 2 : i32
    %85 = arith.muli %c2_i32_24, %c2_i32_23 : i32
    %c7_i32_25 = arith.constant 7 : i32
    %86 = arith.subi %c7_i32_25, %85 : i32
    %87 = arith.muli %arg0, %86 : i32
    %88 = arith.addi %c2_i32_23, %87 : i32
    %89 = arith.index_cast %88 : i32 to index
    %c0_26 = arith.constant 0 : index
    %c0_27 = arith.constant 0 : index
    %90 = vector.load %arg1[%89, %c0_26, %c0_27] : memref<8x8x1024xf32, #tpu.memory_space<vmem>>, vector<1x8x1024xf32>
    %91 = vector.shape_cast %90 : vector<1x8x1024xf32> to vector<8x1024xf32>
    %92 = arith.truncf %79 : vector<8x256xf32> to vector<8x256xbf16>
    %c0_28 = arith.constant 0 : index
    %c0_29 = arith.constant 0 : index
    %c0_30 = arith.constant 0 : index
    %93 = vector.load %arg2[%c0_28, %c0_29, %c0_30] : memref<1x256x1024xbf16, #tpu.memory_space<vmem>>, vector<1x256x1024xbf16>
    %94 = vector.shape_cast %93 : vector<1x256x1024xbf16> to vector<256x1024xbf16>
    %cst_31 = arith.constant dense<0.000000e+00> : vector<8x1024xf32>
    %95 = tpu.matmul %92, %94, %cst_31 {dimension_numbers = #tpu.dot_dimension_numbers<[1], [0], [0], [1], [0, 0, 1, 1], [], []>} : vector<8x256xbf16>, vector<256x1024xbf16>, vector<8x1024xf32> -> vector<8x1024xf32>
    %96 = arith.addf %91, %95 : vector<8x1024xf32>
    %97 = vector.extract_strided_slice %96 {offsets = [0, 0], sizes = [8, 256], strides = [1, 1]} : vector<8x1024xf32> to vector<8x256xf32>
    %98 = arith.negf %97 : vector<8x256xf32>
    %99 = math.exp %98 : vector<8x256xf32>
    %cst_32 = arith.constant 1.000000e+00 : f32
    %100 = vector.broadcast %cst_32 : f32 to vector<8x256xf32>
    %101 = arith.addf %100, %99 : vector<8x256xf32>
    %102 = arith.divf %100, %101 : vector<8x256xf32>
    %103 = vector.extract_strided_slice %96 {offsets = [0, 256], sizes = [8, 256], strides = [1, 1]} : vector<8x1024xf32> to vector<8x256xf32>
    %104 = arith.negf %103 : vector<8x256xf32>
    %105 = math.exp %104 : vector<8x256xf32>
    %cst_33 = arith.constant 1.000000e+00 : f32
    %106 = vector.broadcast %cst_33 : f32 to vector<8x256xf32>
    %107 = arith.addf %106, %105 : vector<8x256xf32>
    %108 = arith.divf %106, %107 : vector<8x256xf32>
    %109 = vector.extract_strided_slice %96 {offsets = [0, 512], sizes = [8, 256], strides = [1, 1]} : vector<8x1024xf32> to vector<8x256xf32>
    %110 = math.tanh %109 : vector<8x256xf32>
    %111 = vector.extract_strided_slice %96 {offsets = [0, 768], sizes = [8, 256], strides = [1, 1]} : vector<8x1024xf32> to vector<8x256xf32>
    %112 = arith.negf %111 : vector<8x256xf32>
    %113 = math.exp %112 : vector<8x256xf32>
    %cst_34 = arith.constant 1.000000e+00 : f32
    %114 = vector.broadcast %cst_34 : f32 to vector<8x256xf32>
    %115 = arith.addf %114, %113 : vector<8x256xf32>
    %116 = arith.divf %114, %115 : vector<8x256xf32>
    %117 = arith.mulf %108, %77 : vector<8x256xf32>
    %118 = arith.mulf %102, %110 : vector<8x256xf32>
    %119 = arith.addf %117, %118 : vector<8x256xf32>
    %120 = math.tanh %119 : vector<8x256xf32>
    %121 = arith.mulf %116, %120 : vector<8x256xf32>
    %122 = arith.truncf %121 : vector<8x256xf32> to vector<8x256xbf16>
    %123 = arith.index_cast %88 : i32 to index
    %c0_35 = arith.constant 0 : index
    %c0_36 = arith.constant 0 : index
    %124 = vector.load %arg3[%123, %c0_35, %c0_36] : memref<8x8x256xbf16, #tpu.memory_space<vmem>>, vector<1x8x256xbf16>
    %125 = vector.shape_cast %124 : vector<1x8x256xbf16> to vector<8x256xbf16>
    %126 = vector.shape_cast %122 : vector<8x256xbf16> to vector<1x8x256xbf16>
    tpu.vector_store %arg3[%123, %c0_35, %c0_36], %126 {strides = array<i32>} : memref<8x8x256xbf16, #tpu.memory_space<vmem>>, vector<1x8x256xbf16>,
    %c3_i32 = arith.constant 3 : i32
    %c2_i32_37 = arith.constant 2 : i32
    %127 = arith.muli %c2_i32_37, %c3_i32 : i32
    %c7_i32_38 = arith.constant 7 : i32
    %128 = arith.subi %c7_i32_38, %127 : i32
    %129 = arith.muli %arg0, %128 : i32
    %130 = arith.addi %c3_i32, %129 : i32
    %131 = arith.index_cast %130 : i32 to index
    %c0_39 = arith.constant 0 : index
    %c0_40 = arith.constant 0 : index
    %132 = vector.load %arg1[%131, %c0_39, %c0_40] : memref<8x8x1024xf32, #tpu.memory_space<vmem>>, vector<1x8x1024xf32>
    %133 = vector.shape_cast %132 : vector<1x8x1024xf32> to vector<8x1024xf32>
    %134 = arith.truncf %121 : vector<8x256xf32> to vector<8x256xbf16>
    %c0_41 = arith.constant 0 : index
    %c0_42 = arith.constant 0 : index
    %c0_43 = arith.constant 0 : index
    %135 = vector.load %arg2[%c0_41, %c0_42, %c0_43] : memref<1x256x1024xbf16, #tpu.memory_space<vmem>>, vector<1x256x1024xbf16>
    %136 = vector.shape_cast %135 : vector<1x256x1024xbf16> to vector<256x1024xbf16>
    %cst_44 = arith.constant dense<0.000000e+00> : vector<8x1024xf32>
    %137 = tpu.matmul %134, %136, %cst_44 {dimension_numbers = #tpu.dot_dimension_numbers<[1], [0], [0], [1], [0, 0, 1, 1], [], []>} : vector<8x256xbf16>, vector<256x1024xbf16>, vector<8x1024xf32> -> vector<8x1024xf32>
    %138 = arith.addf %133, %137 : vector<8x1024xf32>
    %139 = vector.extract_strided_slice %138 {offsets = [0, 0], sizes = [8, 256], strides = [1, 1]} : vector<8x1024xf32> to vector<8x256xf32>
    %140 = arith.negf %139 : vector<8x256xf32>
    %141 = math.exp %140 : vector<8x256xf32>
    %cst_45 = arith.constant 1.000000e+00 : f32
    %142 = vector.broadcast %cst_45 : f32 to vector<8x256xf32>
    %143 = arith.addf %142, %141 : vector<8x256xf32>
    %144 = arith.divf %142, %143 : vector<8x256xf32>
    %145 = vector.extract_strided_slice %138 {offsets = [0, 256], sizes = [8, 256], strides = [1, 1]} : vector<8x1024xf32> to vector<8x256xf32>
    %146 = arith.negf %145 : vector<8x256xf32>
    %147 = math.exp %146 : vector<8x256xf32>
    %cst_46 = arith.constant 1.000000e+00 : f32
    %148 = vector.broadcast %cst_46 : f32 to vector<8x256xf32>
    %149 = arith.addf %148, %147 : vector<8x256xf32>
    %150 = arith.divf %148, %149 : vector<8x256xf32>
    %151 = vector.extract_strided_slice %138 {offsets = [0, 512], sizes = [8, 256], strides = [1, 1]} : vector<8x1024xf32> to vector<8x256xf32>
    %152 = math.tanh %151 : vector<8x256xf32>
    %153 = vector.extract_strided_slice %138 {offsets = [0, 768], sizes = [8, 256], strides = [1, 1]} : vector<8x1024xf32> to vector<8x256xf32>
    %154 = arith.negf %153 : vector<8x256xf32>
    %155 = math.exp %154 : vector<8x256xf32>
    %cst_47 = arith.constant 1.000000e+00 : f32
    %156 = vector.broadcast %cst_47 : f32 to vector<8x256xf32>
    %157 = arith.addf %156, %155 : vector<8x256xf32>
    %158 = arith.divf %156, %157 : vector<8x256xf32>
    %159 = arith.mulf %150, %119 : vector<8x256xf32>
    %160 = arith.mulf %144, %152 : vector<8x256xf32>
    %161 = arith.addf %159, %160 : vector<8x256xf32>
    %162 = math.tanh %161 : vector<8x256xf32>
    %163 = arith.mulf %158, %162 : vector<8x256xf32>
    %164 = arith.truncf %163 : vector<8x256xf32> to vector<8x256xbf16>
    %165 = arith.index_cast %130 : i32 to index
    %c0_48 = arith.constant 0 : index
    %c0_49 = arith.constant 0 : index
    %166 = vector.load %arg3[%165, %c0_48, %c0_49] : memref<8x8x256xbf16, #tpu.memory_space<vmem>>, vector<1x8x256xbf16>
    %167 = vector.shape_cast %166 : vector<1x8x256xbf16> to vector<8x256xbf16>
    %168 = vector.shape_cast %164 : vector<8x256xbf16> to vector<1x8x256xbf16>
    tpu.vector_store %arg3[%165, %c0_48, %c0_49], %168 {strides = array<i32>} : memref<8x8x256xbf16, #tpu.memory_space<vmem>>, vector<1x8x256xbf16>,
    %c4_i32 = arith.constant 4 : i32
    %c2_i32_50 = arith.constant 2 : i32
    %169 = arith.muli %c2_i32_50, %c4_i32 : i32
    %c7_i32_51 = arith.constant 7 : i32
    %170 = arith.subi %c7_i32_51, %169 : i32
    %171 = arith.muli %arg0, %170 : i32
    %172 = arith.addi %c4_i32, %171 : i32
    %173 = arith.index_cast %172 : i32 to index
    %c0_52 = arith.constant 0 : index
    %c0_53 = arith.constant 0 : index
    %174 = vector.load %arg1[%173, %c0_52, %c0_53] : memref<8x8x1024xf32, #tpu.memory_space<vmem>>, vector<1x8x1024xf32>
    %175 = vector.shape_cast %174 : vector<1x8x1024xf32> to vector<8x1024xf32>
    %176 = arith.truncf %163 : vector<8x256xf32> to vector<8x256xbf16>
    %c0_54 = arith.constant 0 : index
    %c0_55 = arith.constant 0 : index
    %c0_56 = arith.constant 0 : index
    %177 = vector.load %arg2[%c0_54, %c0_55, %c0_56] : memref<1x256x1024xbf16, #tpu.memory_space<vmem>>, vector<1x256x1024xbf16>
    %178 = vector.shape_cast %177 : vector<1x256x1024xbf16> to vector<256x1024xbf16>
    %cst_57 = arith.constant dense<0.000000e+00> : vector<8x1024xf32>
    %179 = tpu.matmul %176, %178, %cst_57 {dimension_numbers = #tpu.dot_dimension_numbers<[1], [0], [0], [1], [0, 0, 1, 1], [], []>} : vector<8x256xbf16>, vector<256x1024xbf16>, vector<8x1024xf32> -> vector<8x1024xf32>
    %180 = arith.addf %175, %179 : vector<8x1024xf32>
    %181 = vector.extract_strided_slice %180 {offsets = [0, 0], sizes = [8, 256], strides = [1, 1]} : vector<8x1024xf32> to vector<8x256xf32>
    %182 = arith.negf %181 : vector<8x256xf32>
    %183 = math.exp %182 : vector<8x256xf32>
    %cst_58 = arith.constant 1.000000e+00 : f32
    %184 = vector.broadcast %cst_58 : f32 to vector<8x256xf32>
    %185 = arith.addf %184, %183 : vector<8x256xf32>
    %186 = arith.divf %184, %185 : vector<8x256xf32>
    %187 = vector.extract_strided_slice %180 {offsets = [0, 256], sizes = [8, 256], strides = [1, 1]} : vector<8x1024xf32> to vector<8x256xf32>
    %188 = arith.negf %187 : vector<8x256xf32>
    %189 = math.exp %188 : vector<8x256xf32>
    %cst_59 = arith.constant 1.000000e+00 : f32
    %190 = vector.broadcast %cst_59 : f32 to vector<8x256xf32>
    %191 = arith.addf %190, %189 : vector<8x256xf32>
    %192 = arith.divf %190, %191 : vector<8x256xf32>
    %193 = vector.extract_strided_slice %180 {offsets = [0, 512], sizes = [8, 256], strides = [1, 1]} : vector<8x1024xf32> to vector<8x256xf32>
    %194 = math.tanh %193 : vector<8x256xf32>
    %195 = vector.extract_strided_slice %180 {offsets = [0, 768], sizes = [8, 256], strides = [1, 1]} : vector<8x1024xf32> to vector<8x256xf32>
    %196 = arith.negf %195 : vector<8x256xf32>
    %197 = math.exp %196 : vector<8x256xf32>
    %cst_60 = arith.constant 1.000000e+00 : f32
    %198 = vector.broadcast %cst_60 : f32 to vector<8x256xf32>
    %199 = arith.addf %198, %197 : vector<8x256xf32>
    %200 = arith.divf %198, %199 : vector<8x256xf32>
    %201 = arith.mulf %192, %161 : vector<8x256xf32>
    %202 = arith.mulf %186, %194 : vector<8x256xf32>
    %203 = arith.addf %201, %202 : vector<8x256xf32>
    %204 = math.tanh %203 : vector<8x256xf32>
    %205 = arith.mulf %200, %204 : vector<8x256xf32>
    %206 = arith.truncf %205 : vector<8x256xf32> to vector<8x256xbf16>
    %207 = arith.index_cast %172 : i32 to index
    %c0_61 = arith.constant 0 : index
    %c0_62 = arith.constant 0 : index
    %208 = vector.load %arg3[%207, %c0_61, %c0_62] : memref<8x8x256xbf16, #tpu.memory_space<vmem>>, vector<1x8x256xbf16>
    %209 = vector.shape_cast %208 : vector<1x8x256xbf16> to vector<8x256xbf16>
    %210 = vector.shape_cast %206 : vector<8x256xbf16> to vector<1x8x256xbf16>
    tpu.vector_store %arg3[%207, %c0_61, %c0_62], %210 {strides = array<i32>} : memref<8x8x256xbf16, #tpu.memory_space<vmem>>, vector<1x8x256xbf16>,
    %c5_i32 = arith.constant 5 : i32
    %c2_i32_63 = arith.constant 2 : i32
    %211 = arith.muli %c2_i32_63, %c5_i32 : i32
    %c7_i32_64 = arith.constant 7 : i32
    %212 = arith.subi %c7_i32_64, %211 : i32
    %213 = arith.muli %arg0, %212 : i32
    %214 = arith.addi %c5_i32, %213 : i32
    %215 = arith.index_cast %214 : i32 to index
    %c0_65 = arith.constant 0 : index
    %c0_66 = arith.constant 0 : index
    %216 = vector.load %arg1[%215, %c0_65, %c0_66] : memref<8x8x1024xf32, #tpu.memory_space<vmem>>, vector<1x8x1024xf32>
    %217 = vector.shape_cast %216 : vector<1x8x1024xf32> to vector<8x1024xf32>
    %218 = arith.truncf %205 : vector<8x256xf32> to vector<8x256xbf16>
    %c0_67 = arith.constant 0 : index
    %c0_68 = arith.constant 0 : index
    %c0_69 = arith.constant 0 : index
    %219 = vector.load %arg2[%c0_67, %c0_68, %c0_69] : memref<1x256x1024xbf16, #tpu.memory_space<vmem>>, vector<1x256x1024xbf16>
    %220 = vector.shape_cast %219 : vector<1x256x1024xbf16> to vector<256x1024xbf16>
    %cst_70 = arith.constant dense<0.000000e+00> : vector<8x1024xf32>
    %221 = tpu.matmul %218, %220, %cst_70 {dimension_numbers = #tpu.dot_dimension_numbers<[1], [0], [0], [1], [0, 0, 1, 1], [], []>} : vector<8x256xbf16>, vector<256x1024xbf16>, vector<8x1024xf32> -> vector<8x1024xf32>
    %222 = arith.addf %217, %221 : vector<8x1024xf32>
    %223 = vector.extract_strided_slice %222 {offsets = [0, 0], sizes = [8, 256], strides = [1, 1]} : vector<8x1024xf32> to vector<8x256xf32>
    %224 = arith.negf %223 : vector<8x256xf32>
    %225 = math.exp %224 : vector<8x256xf32>
    %cst_71 = arith.constant 1.000000e+00 : f32
    %226 = vector.broadcast %cst_71 : f32 to vector<8x256xf32>
    %227 = arith.addf %226, %225 : vector<8x256xf32>
    %228 = arith.divf %226, %227 : vector<8x256xf32>
    %229 = vector.extract_strided_slice %222 {offsets = [0, 256], sizes = [8, 256], strides = [1, 1]} : vector<8x1024xf32> to vector<8x256xf32>
    %230 = arith.negf %229 : vector<8x256xf32>
    %231 = math.exp %230 : vector<8x256xf32>
    %cst_72 = arith.constant 1.000000e+00 : f32
    %232 = vector.broadcast %cst_72 : f32 to vector<8x256xf32>
    %233 = arith.addf %232, %231 : vector<8x256xf32>
    %234 = arith.divf %232, %233 : vector<8x256xf32>
    %235 = vector.extract_strided_slice %222 {offsets = [0, 512], sizes = [8, 256], strides = [1, 1]} : vector<8x1024xf32> to vector<8x256xf32>
    %236 = math.tanh %235 : vector<8x256xf32>
    %237 = vector.extract_strided_slice %222 {offsets = [0, 768], sizes = [8, 256], strides = [1, 1]} : vector<8x1024xf32> to vector<8x256xf32>
    %238 = arith.negf %237 : vector<8x256xf32>
    %239 = math.exp %238 : vector<8x256xf32>
    %cst_73 = arith.constant 1.000000e+00 : f32
    %240 = vector.broadcast %cst_73 : f32 to vector<8x256xf32>
    %241 = arith.addf %240, %239 : vector<8x256xf32>
    %242 = arith.divf %240, %241 : vector<8x256xf32>
    %243 = arith.mulf %234, %203 : vector<8x256xf32>
    %244 = arith.mulf %228, %236 : vector<8x256xf32>
    %245 = arith.addf %243, %244 : vector<8x256xf32>
    %246 = math.tanh %245 : vector<8x256xf32>
    %247 = arith.mulf %242, %246 : vector<8x256xf32>
    %248 = arith.truncf %247 : vector<8x256xf32> to vector<8x256xbf16>
    %249 = arith.index_cast %214 : i32 to index
    %c0_74 = arith.constant 0 : index
    %c0_75 = arith.constant 0 : index
    %250 = vector.load %arg3[%249, %c0_74, %c0_75] : memref<8x8x256xbf16, #tpu.memory_space<vmem>>, vector<1x8x256xbf16>
    %251 = vector.shape_cast %250 : vector<1x8x256xbf16> to vector<8x256xbf16>
    %252 = vector.shape_cast %248 : vector<8x256xbf16> to vector<1x8x256xbf16>
    tpu.vector_store %arg3[%249, %c0_74, %c0_75], %252 {strides = array<i32>} : memref<8x8x256xbf16, #tpu.memory_space<vmem>>, vector<1x8x256xbf16>,
    %c6_i32 = arith.constant 6 : i32
    %c2_i32_76 = arith.constant 2 : i32
    %253 = arith.muli %c2_i32_76, %c6_i32 : i32
    %c7_i32_77 = arith.constant 7 : i32
    %254 = arith.subi %c7_i32_77, %253 : i32
    %255 = arith.muli %arg0, %254 : i32
    %256 = arith.addi %c6_i32, %255 : i32
    %257 = arith.index_cast %256 : i32 to index
    %c0_78 = arith.constant 0 : index
    %c0_79 = arith.constant 0 : index
    %258 = vector.load %arg1[%257, %c0_78, %c0_79] : memref<8x8x1024xf32, #tpu.memory_space<vmem>>, vector<1x8x1024xf32>
    %259 = vector.shape_cast %258 : vector<1x8x1024xf32> to vector<8x1024xf32>
    %260 = arith.truncf %247 : vector<8x256xf32> to vector<8x256xbf16>
    %c0_80 = arith.constant 0 : index
    %c0_81 = arith.constant 0 : index
    %c0_82 = arith.constant 0 : index
    %261 = vector.load %arg2[%c0_80, %c0_81, %c0_82] : memref<1x256x1024xbf16, #tpu.memory_space<vmem>>, vector<1x256x1024xbf16>
    %262 = vector.shape_cast %261 : vector<1x256x1024xbf16> to vector<256x1024xbf16>
    %cst_83 = arith.constant dense<0.000000e+00> : vector<8x1024xf32>
    %263 = tpu.matmul %260, %262, %cst_83 {dimension_numbers = #tpu.dot_dimension_numbers<[1], [0], [0], [1], [0, 0, 1, 1], [], []>} : vector<8x256xbf16>, vector<256x1024xbf16>, vector<8x1024xf32> -> vector<8x1024xf32>
    %264 = arith.addf %259, %263 : vector<8x1024xf32>
    %265 = vector.extract_strided_slice %264 {offsets = [0, 0], sizes = [8, 256], strides = [1, 1]} : vector<8x1024xf32> to vector<8x256xf32>
    %266 = arith.negf %265 : vector<8x256xf32>
    %267 = math.exp %266 : vector<8x256xf32>
    %cst_84 = arith.constant 1.000000e+00 : f32
    %268 = vector.broadcast %cst_84 : f32 to vector<8x256xf32>
    %269 = arith.addf %268, %267 : vector<8x256xf32>
    %270 = arith.divf %268, %269 : vector<8x256xf32>
    %271 = vector.extract_strided_slice %264 {offsets = [0, 256], sizes = [8, 256], strides = [1, 1]} : vector<8x1024xf32> to vector<8x256xf32>
    %272 = arith.negf %271 : vector<8x256xf32>
    %273 = math.exp %272 : vector<8x256xf32>
    %cst_85 = arith.constant 1.000000e+00 : f32
    %274 = vector.broadcast %cst_85 : f32 to vector<8x256xf32>
    %275 = arith.addf %274, %273 : vector<8x256xf32>
    %276 = arith.divf %274, %275 : vector<8x256xf32>
    %277 = vector.extract_strided_slice %264 {offsets = [0, 512], sizes = [8, 256], strides = [1, 1]} : vector<8x1024xf32> to vector<8x256xf32>
    %278 = math.tanh %277 : vector<8x256xf32>
    %279 = vector.extract_strided_slice %264 {offsets = [0, 768], sizes = [8, 256], strides = [1, 1]} : vector<8x1024xf32> to vector<8x256xf32>
    %280 = arith.negf %279 : vector<8x256xf32>
    %281 = math.exp %280 : vector<8x256xf32>
    %cst_86 = arith.constant 1.000000e+00 : f32
    %282 = vector.broadcast %cst_86 : f32 to vector<8x256xf32>
    %283 = arith.addf %282, %281 : vector<8x256xf32>
    %284 = arith.divf %282, %283 : vector<8x256xf32>
    %285 = arith.mulf %276, %245 : vector<8x256xf32>
    %286 = arith.mulf %270, %278 : vector<8x256xf32>
    %287 = arith.addf %285, %286 : vector<8x256xf32>
    %288 = math.tanh %287 : vector<8x256xf32>
    %289 = arith.mulf %284, %288 : vector<8x256xf32>
    %290 = arith.truncf %289 : vector<8x256xf32> to vector<8x256xbf16>
    %291 = arith.index_cast %256 : i32 to index
    %c0_87 = arith.constant 0 : index
    %c0_88 = arith.constant 0 : index
    %292 = vector.load %arg3[%291, %c0_87, %c0_88] : memref<8x8x256xbf16, #tpu.memory_space<vmem>>, vector<1x8x256xbf16>
    %293 = vector.shape_cast %292 : vector<1x8x256xbf16> to vector<8x256xbf16>
    %294 = vector.shape_cast %290 : vector<8x256xbf16> to vector<1x8x256xbf16>
    tpu.vector_store %arg3[%291, %c0_87, %c0_88], %294 {strides = array<i32>} : memref<8x8x256xbf16, #tpu.memory_space<vmem>>, vector<1x8x256xbf16>,
    %c7_i32_89 = arith.constant 7 : i32
    %c2_i32_90 = arith.constant 2 : i32
    %295 = arith.muli %c2_i32_90, %c7_i32_89 : i32
    %c7_i32_91 = arith.constant 7 : i32
    %296 = arith.subi %c7_i32_91, %295 : i32
    %297 = arith.muli %arg0, %296 : i32
    %298 = arith.addi %c7_i32_89, %297 : i32
    %299 = arith.index_cast %298 : i32 to index
    %c0_92 = arith.constant 0 : index
    %c0_93 = arith.constant 0 : index
    %300 = vector.load %arg1[%299, %c0_92, %c0_93] : memref<8x8x1024xf32, #tpu.memory_space<vmem>>, vector<1x8x1024xf32>
    %301 = vector.shape_cast %300 : vector<1x8x1024xf32> to vector<8x1024xf32>
    %302 = arith.truncf %289 : vector<8x256xf32> to vector<8x256xbf16>
    %c0_94 = arith.constant 0 : index
    %c0_95 = arith.constant 0 : index
    %c0_96 = arith.constant 0 : index
    %303 = vector.load %arg2[%c0_94, %c0_95, %c0_96] : memref<1x256x1024xbf16, #tpu.memory_space<vmem>>, vector<1x256x1024xbf16>
    %304 = vector.shape_cast %303 : vector<1x256x1024xbf16> to vector<256x1024xbf16>
    %cst_97 = arith.constant dense<0.000000e+00> : vector<8x1024xf32>
    %305 = tpu.matmul %302, %304, %cst_97 {dimension_numbers = #tpu.dot_dimension_numbers<[1], [0], [0], [1], [0, 0, 1, 1], [], []>} : vector<8x256xbf16>, vector<256x1024xbf16>, vector<8x1024xf32> -> vector<8x1024xf32>
    %306 = arith.addf %301, %305 : vector<8x1024xf32>
    %307 = vector.extract_strided_slice %306 {offsets = [0, 0], sizes = [8, 256], strides = [1, 1]} : vector<8x1024xf32> to vector<8x256xf32>
    %308 = arith.negf %307 : vector<8x256xf32>
    %309 = math.exp %308 : vector<8x256xf32>
    %cst_98 = arith.constant 1.000000e+00 : f32
    %310 = vector.broadcast %cst_98 : f32 to vector<8x256xf32>
    %311 = arith.addf %310, %309 : vector<8x256xf32>
    %312 = arith.divf %310, %311 : vector<8x256xf32>
    %313 = vector.extract_strided_slice %306 {offsets = [0, 256], sizes = [8, 256], strides = [1, 1]} : vector<8x1024xf32> to vector<8x256xf32>
    %314 = arith.negf %313 : vector<8x256xf32>
    %315 = math.exp %314 : vector<8x256xf32>
    %cst_99 = arith.constant 1.000000e+00 : f32
    %316 = vector.broadcast %cst_99 : f32 to vector<8x256xf32>
    %317 = arith.addf %316, %315 : vector<8x256xf32>
    %318 = arith.divf %316, %317 : vector<8x256xf32>
    %319 = vector.extract_strided_slice %306 {offsets = [0, 512], sizes = [8, 256], strides = [1, 1]} : vector<8x1024xf32> to vector<8x256xf32>
    %320 = math.tanh %319 : vector<8x256xf32>
    %321 = vector.extract_strided_slice %306 {offsets = [0, 768], sizes = [8, 256], strides = [1, 1]} : vector<8x1024xf32> to vector<8x256xf32>
    %322 = arith.negf %321 : vector<8x256xf32>
    %323 = math.exp %322 : vector<8x256xf32>
    %cst_100 = arith.constant 1.000000e+00 : f32
    %324 = vector.broadcast %cst_100 : f32 to vector<8x256xf32>
    %325 = arith.addf %324, %323 : vector<8x256xf32>
    %326 = arith.divf %324, %325 : vector<8x256xf32>
    %327 = arith.mulf %318, %287 : vector<8x256xf32>
    %328 = arith.mulf %312, %320 : vector<8x256xf32>
    %329 = arith.addf %327, %328 : vector<8x256xf32>
    %330 = math.tanh %329 : vector<8x256xf32>
    %331 = arith.mulf %326, %330 : vector<8x256xf32>
    %332 = arith.truncf %331 : vector<8x256xf32> to vector<8x256xbf16>
    %333 = arith.index_cast %298 : i32 to index
    %c0_101 = arith.constant 0 : index
    %c0_102 = arith.constant 0 : index
    %334 = vector.load %arg3[%333, %c0_101, %c0_102] : memref<8x8x256xbf16, #tpu.memory_space<vmem>>, vector<1x8x256xbf16>
    %335 = vector.shape_cast %334 : vector<1x8x256xbf16> to vector<8x256xbf16>
    %336 = vector.shape_cast %332 : vector<8x256xbf16> to vector<1x8x256xbf16>
    tpu.vector_store %arg3[%333, %c0_101, %c0_102], %336 {strides = array<i32>} : memref<8x8x256xbf16, #tpu.memory_space<vmem>>, vector<1x8x256xbf16>,
    %c8_i32 = arith.constant 8 : i32
    return
  }
  func.func @transform_0(%arg0: i32) -> (i32, i32, i32) {
    %c0_i32 = arith.constant 0 : i32
    %c0_i32_0 = arith.constant 0 : i32
    %c0_i32_1 = arith.constant 0 : i32
    return %c0_i32, %c0_i32_0, %arg0 : i32, i32, i32
  }
  func.func @transform_1(%arg0: i32) -> (i32, i32, i32) {
    %c0_i32 = arith.constant 0 : i32
    %c0_i32_0 = arith.constant 0 : i32
    %c0_i32_1 = arith.constant 0 : i32
    return %arg0, %c0_i32, %c0_i32_0 : i32, i32, i32
  }
  func.func @transform_2(%arg0: i32) -> (i32, i32, i32) {
    %c0_i32 = arith.constant 0 : i32
    %c0_i32_0 = arith.constant 0 : i32
    %c0_i32_1 = arith.constant 0 : i32
    return %c0_i32, %c0_i32_0, %arg0 : i32, i32, i32
  }
}

module attributes {stable_mosaic.version = 11 : i64} {
  func.func @_gates_linear_kernel(%arg0: i32, %arg1: memref<1x8x512xbf16, #tpu.memory_space<vmem>>, %arg2: memref<512x2048xbf16, #tpu.memory_space<vmem>>, %arg3: memref<1x2048xf32, #tpu.memory_space<vmem>>, %arg4: memref<1x8x2048xf32, #tpu.memory_space<vmem>>) attributes {dimension_semantics = [#tpu.dimension_semantics<parallel>], iteration_bounds = array<i64: 8>, scalar_prefetch = 0 : i64, scratch_operands = 0 : i64, tpu.core_type = #tpu.core_type<tc>, window_params = [{transform_indices = @transform_0, window_bounds = array<i64: 1, 8, 512>}, {pipeline_mode = #tpu.pipeline_mode<synchronous>, transform_indices = @transform_1, window_bounds = array<i64: 512, 2048>}, {pipeline_mode = #tpu.pipeline_mode<synchronous>, transform_indices = @transform_2, window_bounds = array<i64: 1, 2048>}, {transform_indices = @transform_3, window_bounds = array<i64: 1, 8, 2048>}]} {
    %c0 = arith.constant 0 : index
    %c0_0 = arith.constant 0 : index
    %c0_1 = arith.constant 0 : index
    %0 = vector.load %arg1[%c0, %c0_0, %c0_1] : memref<1x8x512xbf16, #tpu.memory_space<vmem>>, vector<1x8x512xbf16>
    %1 = vector.shape_cast %0 : vector<1x8x512xbf16> to vector<8x512xbf16>
    %c0_2 = arith.constant 0 : index
    %c0_3 = arith.constant 0 : index
    %2 = vector.load %arg2[%c0_2, %c0_3] : memref<512x2048xbf16, #tpu.memory_space<vmem>>, vector<512x2048xbf16>
    %cst = arith.constant dense<0.000000e+00> : vector<8x2048xf32>
    %3 = tpu.matmul %1, %2, %cst {dimension_numbers = #tpu.dot_dimension_numbers<[1], [0], [0], [1], [0, 0, 1, 1], [], []>} : vector<8x512xbf16>, vector<512x2048xbf16>, vector<8x2048xf32> -> vector<8x2048xf32>
    %c0_4 = arith.constant 0 : index
    %c0_5 = arith.constant 0 : index
    %4 = vector.load %arg3[%c0_4, %c0_5] : memref<1x2048xf32, #tpu.memory_space<vmem>>, vector<1x2048xf32>
    %5 = vector.broadcast %4 : vector<1x2048xf32> to vector<8x2048xf32>
    %6 = arith.addf %3, %5 : vector<8x2048xf32>
    %c0_6 = arith.constant 0 : index
    %c0_7 = arith.constant 0 : index
    %c0_8 = arith.constant 0 : index
    %7 = vector.load %arg4[%c0_6, %c0_7, %c0_8] : memref<1x8x2048xf32, #tpu.memory_space<vmem>>, vector<1x8x2048xf32>
    %8 = vector.shape_cast %7 : vector<1x8x2048xf32> to vector<8x2048xf32>
    %9 = vector.shape_cast %6 : vector<8x2048xf32> to vector<1x8x2048xf32>
    tpu.vector_store %arg4[%c0_6, %c0_7, %c0_8], %9 {strides = array<i32>} : memref<1x8x2048xf32, #tpu.memory_space<vmem>>, vector<1x8x2048xf32>,
    return
  }
  func.func @transform_0(%arg0: i32) -> (i32, i32, i32) {
    %c0_i32 = arith.constant 0 : i32
    %c0_i32_0 = arith.constant 0 : i32
    %c0_i32_1 = arith.constant 0 : i32
    return %arg0, %c0_i32, %c0_i32_0 : i32, i32, i32
  }
  func.func @transform_1(%arg0: i32) -> (i32, i32) {
    %c0_i32 = arith.constant 0 : i32
    %c0_i32_0 = arith.constant 0 : i32
    %c0_i32_1 = arith.constant 0 : i32
    return %c0_i32, %c0_i32_0 : i32, i32
  }
  func.func @transform_2(%arg0: i32) -> (i32, i32) {
    %c0_i32 = arith.constant 0 : i32
    %c0_i32_0 = arith.constant 0 : i32
    %c0_i32_1 = arith.constant 0 : i32
    return %c0_i32, %c0_i32_0 : i32, i32
  }
  func.func @transform_3(%arg0: i32) -> (i32, i32, i32) {
    %c0_i32 = arith.constant 0 : i32
    %c0_i32_0 = arith.constant 0 : i32
    %c0_i32_1 = arith.constant 0 : i32
    return %arg0, %c0_i32, %c0_i32_0 : i32, i32, i32
  }
}

module attributes {stable_mosaic.version = 11 : i64} {
  func.func @_head_kernel(%arg0: memref<8x512xbf16, #tpu.memory_space<vmem>>, %arg1: memref<512x128xbf16, #tpu.memory_space<vmem>>, %arg2: memref<1x128xf32, #tpu.memory_space<vmem>>, %arg3: memref<128x2xbf16, #tpu.memory_space<vmem>>, %arg4: memref<1x2xf32, #tpu.memory_space<vmem>>, %arg5: memref<8x2xf32, #tpu.memory_space<vmem>>) attributes {dimension_semantics = [], scalar_prefetch = 0 : i64, scratch_operands = 0 : i64, tpu.core_type = #tpu.core_type<tc>} {
    %c0 = arith.constant 0 : index
    %c0_0 = arith.constant 0 : index
    %0 = vector.load %arg0[%c0, %c0_0] : memref<8x512xbf16, #tpu.memory_space<vmem>>, vector<8x512xbf16>
    %c0_1 = arith.constant 0 : index
    %c0_2 = arith.constant 0 : index
    %1 = vector.load %arg1[%c0_1, %c0_2] : memref<512x128xbf16, #tpu.memory_space<vmem>>, vector<512x128xbf16>
    %cst = arith.constant dense<0.000000e+00> : vector<8x128xf32>
    %2 = tpu.matmul %0, %1, %cst {dimension_numbers = #tpu.dot_dimension_numbers<[1], [0], [0], [1], [0, 0, 1, 1], [], []>} : vector<8x512xbf16>, vector<512x128xbf16>, vector<8x128xf32> -> vector<8x128xf32>
    %c0_3 = arith.constant 0 : index
    %c0_4 = arith.constant 0 : index
    %3 = vector.load %arg2[%c0_3, %c0_4] : memref<1x128xf32, #tpu.memory_space<vmem>>, vector<1x128xf32>
    %4 = vector.broadcast %3 : vector<1x128xf32> to vector<8x128xf32>
    %5 = arith.addf %2, %4 : vector<8x128xf32>
    %6 = arith.truncf %5 : vector<8x128xf32> to vector<8x128xbf16>
    %c0_5 = arith.constant 0 : index
    %c0_6 = arith.constant 0 : index
    %7 = vector.load %arg3[%c0_5, %c0_6] : memref<128x2xbf16, #tpu.memory_space<vmem>>, vector<128x2xbf16>
    %cst_7 = arith.constant dense<0.000000e+00> : vector<8x2xf32>
    %8 = tpu.matmul %6, %7, %cst_7 {dimension_numbers = #tpu.dot_dimension_numbers<[1], [0], [0], [1], [0, 0, 1, 1], [], []>} : vector<8x128xbf16>, vector<128x2xbf16>, vector<8x2xf32> -> vector<8x2xf32>
    %c0_8 = arith.constant 0 : index
    %c0_9 = arith.constant 0 : index
    %9 = vector.load %arg4[%c0_8, %c0_9] : memref<1x2xf32, #tpu.memory_space<vmem>>, vector<1x2xf32>
    %10 = vector.broadcast %9 : vector<1x2xf32> to vector<8x2xf32>
    %11 = arith.addf %8, %10 : vector<8x2xf32>
    %c0_10 = arith.constant 0 : index
    %c0_11 = arith.constant 0 : index
    %12 = vector.load %arg5[%c0_10, %c0_11] : memref<8x2xf32, #tpu.memory_space<vmem>>, vector<8x2xf32>
    tpu.vector_store %arg5[%c0_10, %c0_11], %11 {strides = array<i32>} : memref<8x2xf32, #tpu.memory_space<vmem>>, vector<8x2xf32>,
    return
  }
}

</mosaic_0001>

<bundles_post_ra>
// kernel: forward.9
= control target key start
LH: loop header
LB: loop body
LE: loop exit
PB: predicated region body
PF: predicated region fallthrough
CT: control target
= control target key end

     0   :  { %v663_v39 = vmov 0.0   ;;  %vm664_vm0 = vmmov 0   ;;  %vm492_vm1 = vcmask 15360   ;;  %s830_s1 = inlined_call_operand.vmem [shape: bf16[512,128], index: 1, kind: input, shape index: {}]   ;;  %s831_s0 = inlined_call_operand.vmem [shape: bf16[8,512], index: 0, kind: input, shape index: {}]   ;;  %s832_s3 = inlined_call_operand.vmem [shape: bf16[128,2], index: 3, kind: input, shape index: {}]   ;;  %s833_s2 = inlined_call_operand.vmem [shape: f32[1,128], index: 2, kind: input, shape index: {}]   ;;  %s834_s4 = inlined_call_operand.vmem [shape: f32[1,2], index: 4, kind: input, shape index: {}]   ;;  %s835_s5 = inlined_call_operand.vmem [shape: f32[8,2], index: 5, kind: output, shape index: {}]  }
   0x1   :  { %v619_v0 = vld [vmem:[%s830_s1 + $0x40] sm:$0xff]   ;;  %v623_v4 = vld [vmem:[%s830_s1 + $0x48] sm:$0xff]   ;;  %v627_v8 = vld [vmem:[%s830_s1 + $0x50] sm:$0xff]  }
   0x2   :  { %v620_v1 = vld [vmem:[%s830_s1 + $0xc0] sm:$0xff]   ;;  %544 = vmatprep.subr.bf16.mxu0 %v619_v0  ;;  %v624_v5 = vld [vmem:[%s830_s1 + $0xc8] sm:$0xff]   ;;  %v628_v9 = vld [vmem:[%s830_s1 + $0xd0] sm:$0xff]  }
   0x3   :  { %v621_v2 = vld [vmem:[%s830_s1] sm:$0xff]   ;;  %566 = vmatprep.subr.bf16.mxu1 %v620_v1  ;;  %v625_v6 = vld [vmem:[%s830_s1 + $0x8] sm:$0xff]   ;;  %v629_v10 = vld [vmem:[%s830_s1 + $0x10] sm:$0xff]  }
   0x4   :  { %v622_v3 = vld [vmem:[%s830_s1 + $0x80] sm:$0xff]   ;;  %545 = vmatpush3.bf16.msra.mxu0 %v621_v2  ;;  %v626_v7 = vld [vmem:[%s830_s1 + $0x88] sm:$0xff]   ;;  %v630_v11 = vld [vmem:[%s830_s1 + $0x90] sm:$0xff]  }
   0x5   :  { %567 = vmatpush3.bf16.msra.mxu1 %v622_v3  ;;  %546 = vmatprep.subr.bf16.mxu0 %v623_v4  ;;  %v631_v12 = vld [vmem:[%s830_s1 + $0x58] sm:$0xff]   ;;  %v635_v16 = vld [vmem:[%s830_s1 + $0x60] sm:$0xff]   ;;  %v639_v20 = vld [vmem:[%s830_s1 + $0x68] sm:$0xff]  }
   0x6   :  { %568 = vmatprep.subr.bf16.mxu1 %v624_v5  ;;  %v632_v13 = vld [vmem:[%s830_s1 + $0xd8] sm:$0xff]   ;;  %v636_v17 = vld [vmem:[%s830_s1 + $0xe0] sm:$0xff]   ;;  %v640_v21 = vld [vmem:[%s830_s1 + $0xe8] sm:$0xff]  }
   0x7   :  { %v633_v14 = vld [vmem:[%s830_s1 + $0x18] sm:$0xff]   ;;  %v637_v18 = vld [vmem:[%s830_s1 + $0x20] sm:$0xff]   ;;  %v641_v22 = vld [vmem:[%s830_s1 + $0x28] sm:$0xff]  }
   0x8   :  { %547 = vmatpush3.bf16.msra.mxu0 %v625_v6  ;;  %v634_v15 = vld [vmem:[%s830_s1 + $0x98] sm:$0xff]   ;;  %v638_v19 = vld [vmem:[%s830_s1 + $0xa0] sm:$0xff]   ;;  %v642_v23 = vld [vmem:[%s830_s1 + $0xa8] sm:$0xff]  }
   0x9   :  { %569 = vmatpush3.bf16.msra.mxu1 %v626_v7  ;;  %548 = vmatprep.subr.bf16.mxu0 %v627_v8  ;;  %v643_v24 = vld [vmem:[%s830_s1 + $0x70] sm:$0xff]   ;;  %v647_v28 = vld [vmem:[%s830_s1 + $0x78] sm:$0xff]   ;;  %v21_v32 = vld [vmem:[%s831_s0] sm:$0xff] }
   0xa   :  { %570 = vmatprep.subr.bf16.mxu1 %v628_v9  ;;  %v644_v25 = vld [vmem:[%s830_s1 + $0xf0] sm:$0xff]   ;;  %v648_v29 = vld [vmem:[%s830_s1 + $0xf8] sm:$0xff]   ;;  %v22_v33 = vld [vmem:[%s831_s0 + $0x8] sm:$0xff]  ;;  %v499_v34 = vcombine.low %v21_v32, %v21_v32  ;;  %v500_v35 = vcombine.high %v21_v32, %v21_v32 }
   0xb   :  { %v645_v26 = vld [vmem:[%s830_s1 + $0x30] sm:$0xff]   ;;  %v649_v30 = vld [vmem:[%s830_s1 + $0x38] sm:$0xff]   ;;  %v501_v36 = vcombine.low %v22_v33, %v22_v33  ;;  %v502_v37 = vcombine.high %v22_v33, %v22_v33  ;;  %v655_v38 = vld [vmem:[%s832_s3] sm:$0xff]  }
   0xc   :  { %549 = vmatpush3.bf16.msra.mxu0 %v629_v10  ;;  %v646_v27 = vld [vmem:[%s830_s1 + $0xb0] sm:$0xff]   ;;  %v650_v31 = vld [vmem:[%s830_s1 + $0xb8] sm:$0xff]   ;;  %332 = vmatprep.mubr.bf16.mxu0 %v500_v35  ;;  %v656_v40 = vld [vmem:[%s832_s3 + $0x8] sm:$0xff]  }
   0xd   :  { %571 = vmatpush3.bf16.msra.mxu1 %v630_v11  ;;  %550 = vmatprep.subr.bf16.mxu0 %v631_v12  ;;  %v657_v41 = vld [vmem:[%s832_s3 + $0x10] sm:$0xff]   ;;  %v658_v42 = vld [vmem:[%s832_s3 + $0x18] sm:$0xff]   ;;  %v659_v43 = vld [vmem:[%s832_s3 + $0x20] sm:$0xff]  }
   0xe   :  { %572 = vmatprep.subr.bf16.mxu1 %v632_v13  ;;  %372 = vmatprep.mubr.bf16.mxu1 %v502_v37  ;;  %v660_v44 = vld [vmem:[%s832_s3 + $0x28] sm:$0xff]   ;;  %v661_v45 = vld [vmem:[%s832_s3 + $0x30] sm:$0xff]   ;;  %v662_v46 = vld [vmem:[%s832_s3 + $0x38] sm:$0xff]  }
   0xf   :  { %v498_v49 = vld [vmem:[%s833_s2] ss:$0 sm:$0xff] }
  0x10   :  { %551 = vmatpush3.bf16.msra.mxu0 %v633_v14  ;;  %v535_v61 = vld [vmem:[%s834_s4] ss:$0 sm:$0xff] }
  0x11   :  { %573 = vmatpush3.bf16.msra.mxu1 %v634_v15  ;;  %552 = vmatprep.subr.bf16.mxu0 %v635_v16 }
  0x12   :  { %574 = vmatprep.subr.bf16.mxu1 %v636_v17 }
  0x14   :  { %553 = vmatpush3.bf16.msra.mxu0 %v637_v18 }
  0x15   :  { %575 = vmatpush3.bf16.msra.mxu1 %v638_v19  ;;  %554 = vmatprep.subr.bf16.mxu0 %v639_v20 }
  0x16   :  { %576 = vmatprep.subr.bf16.mxu1 %v640_v21 }
  0x18   :  { %555 = vmatpush3.bf16.msra.mxu0 %v641_v22 }
  0x19   :  { %577 = vmatpush3.bf16.msra.mxu1 %v642_v23  ;;  %556 = vmatprep.subr.bf16.mxu0 %v643_v24 }
  0x1a   :  { %578 = vmatprep.subr.bf16.mxu1 %v644_v25 }
  0x1c   :  { %557 = vmatpush3.bf16.msra.mxu0 %v645_v26 }
  0x1d   :  { %579 = vmatpush3.bf16.msra.mxu1 %v646_v27  ;;  %558 = vmatprep.subr.bf16.mxu0 %v647_v28 }
  0x1e   :  { %580 = vmatprep.subr.bf16.mxu1 %v648_v29 }
  0x20   :  { %559 = vmatpush3.bf16.msra.mxu0 %v649_v30 }
  0x21   :  { %581 = vmatpush3.bf16.msra.mxu1 %v650_v31  ;;  %597 = vmatprep.subr.bf16.mxu0 %v663_v39 }
  0x23   :  { %333 = vmatmul.mubr.bf16.vlgmr.msra.gmra.mrb[0].mxu0 %v499_v34 }
  0x24   :  { %373 = vmatmul.mubr.bf16.vlgmr.msra.gmra.mrb[0].mxu1 %v501_v36  ;;  %598 = vmatpush3.bf16.msra.mxu0 %v655_v38 }
  0x25   :  { %599 = vmatprep.subr.bf16.mxu0 %v663_v39  ;;  %613 = vmatprep.mubr.msk.bf16.mxu0 %vm664_vm0, %v663_v39 }
  0x28   :  { %600 = vmatpush3.bf16.msra.mxu0 %v656_v40 }
  0x29   :  { %601 = vmatprep.subr.bf16.mxu0 %v663_v39 }
  0x2c   :  { %602 = vmatpush3.bf16.msra.mxu0 %v657_v41 }
  0x2d   :  { %603 = vmatprep.subr.bf16.mxu0 %v663_v39 }
  0x30   :  { %604 = vmatpush3.bf16.msra.mxu0 %v658_v42 }
  0x31   :  { %605 = vmatprep.subr.bf16.mxu0 %v663_v39 }
  0x34   :  { %606 = vmatpush3.bf16.msra.mxu0 %v659_v43 }
  0x35   :  { %607 = vmatprep.subr.bf16.mxu0 %v663_v39 }
  0x38   :  { %608 = vmatpush3.bf16.msra.mxu0 %v660_v44 }
  0x39   :  { %609 = vmatprep.subr.bf16.mxu0 %v663_v39 }
  0x3c   :  { %610 = vmatpush3.bf16.msra.mxu0 %v661_v45 }
  0x3d   :  { %611 = vmatprep.subr.bf16.mxu0 %v663_v39 }
  0x40   :  { %612 = vmatpush3.bf16.msra.mxu0 %v662_v46 }
  0xf6   :  { %v560_v47 = vpop.f32.mrb[0].mxu0 }
  0xf7   :  { %v582_v48 = vpop.f32.mrb[0].mxu1  ;;  %v561_v50 = vpop.f32.mrb[1].mxu0 }
  0xf8   :  { %v583_v51 = vpop.f32.mrb[1].mxu1  ;;  %v562_v52 = vadd.f32 %v561_v50, %v560_v47  ;;  %v563_v54 = vpop.f32.mrb[2].mxu0 }
  0xf9   :  { %v584_v53 = vadd.f32 %v583_v51, %v582_v48  ;;  %v585_v55 = vpop.f32.mrb[2].mxu1  ;;  %v564_v56 = vpop.f32.mrb[3].mxu0 }
  0xfa   :  { %v586_v57 = vpop.f32.mrb[3].mxu1  ;;  %v335_v58 = vadd.f32 %v562_v52, %v498_v49 }
  0xfc   :  { %v375_v59 = vadd.f32 %v584_v53, %v335_v58 }
  0xfe   :  { %v380_v60 = vpack.c.bf16 %v375_v59, %v375_v59 }
 0x100   :  { %614 = vmatmul.mubr.bf16.vlgmr.msra.gmra.mrb[4].mxu0 %v380_v60 }
 0x1d3   :  { %v486_v62 = vpop.f32.mrb[4].mxu0 }
 0x1d4   :  { %v487_v63 = vadd.f32 %v535_v61, %v486_v62  ;;  %v615_v0 = vpop.f32.mrb[5].mxu0 }
 0x1d5   :  { %v489_v1 = vpop.f32.mrb[6].mxu0 }
 0x1d6   :  { %493 = vst.msk [vmem:[%s835_s5] sm:$0xff] %vm492_vm1, %v487_v63  ;;  %v616_v2 = vpop.f32.mrb[7].mxu0 }

// kernel: forward.5
= control target key start
LH: loop header
LB: loop body
LE: loop exit
PB: predicated region body
PF: predicated region fallthrough
CT: control target
= control target key end

     0   :  { %10 = vsyncpa [#allocation4], 0  ;;  %s4149_s0 = inlined_call_operand.vmem [shape: bf16[8,6144], index: 0, kind: input, shape index: {}]   ;;  %s4150_s1 = inlined_call_operand.hbm [shape: bf16[768,256], index: 1, kind: input, shape index: {}]   ;;  %s4151_s2 = inlined_call_operand.hbm [shape: f32[1,256], index: 2, kind: input, shape index: {}]   ;;  %s4152_s3 = inlined_call_operand.hbm [shape: bf16[256,2048], index: 3, kind: input, shape index: {}]   ;;  %s4153_s4 = inlined_call_operand.hbm [shape: f32[1,2048], index: 4, kind: input, shape index: {}]   ;;  %s4154_s5 = inlined_call_operand.vmem [shape: f32[8,8,2048], index: 5, kind: output, shape index: {}]  }
   0x1   :  { %11 = vsyncpa [#allocation6], 0 }
   0x2   :  { %12 = vsyncpa [#allocation9], 0  ;;  %s3920_s18 = smov 0   ;;  %s3922_s19 = smov 0  }
   0x3   :  { %s3924_s20 = smov 0  }
   0x4 LB: > { %s3882_s21 = smov [#allocation5]   ;;  %s3138_s23 = sadd.s32 4294967295, %s3880_s20   ;;  %s3880_s20 = sphi %s3924_s20, %s18_s20   ;;  %s3876_s19 = sphi %s3922_s19, %s4167_s19   ;;  %s3872_s18 = sphi %s3920_s18, %s4166_s18  }
   0x5   : > { %s208_s22 = sshll.u32 %s3882_s21, 4  ;;  %p3140_p0 = scmp.ge.s32.totalorder %s3880_s20, 1  ;;  %s209_s22 = int_to_ptr.vmem [resolvable:$true] %s208_s22 }
   0x6   : > { %p178_p1 = scmp.lt.s32.totalorder %s3880_s20, 9  ;;  %p3938_p2 = scmp.eq.s32.totalorder %s3138_s23, 0 }
   0x7   : > { %s30_s26 = sadd.s32 1, %s3876_s19  ;;  %s3883_s29 = smov [#allocation3]  }
   0x8   : > { %s4158_s24 = scalar_select %p3938_p2, 1, 0 }
   0x9   : > { %p3942_p3 = pnand %p3140_p0, %p178_p1  ;;  %p3955_p6 = scmp.ge.s32.totalorder %s30_s26, 8 }
   0xa   : > { %s194_s30 = sshll.u32 %s3883_s29, 4  ;;  %s3734_s8 = scalar_lea.hbm %s4151_s2, 32  ;;  %s3959_s30 = int_to_ptr.vmem [resolvable:$true] %s194_s30 }
   0xb   : > { %s4159_s25 = scalar_select %p3942_p3, 1, 0 }
   0xc   : > { %p3531_p4 = pneg %p3942_p3  ;;  %p3735_p7 = scmp.ne.s32.totalorder %s4151_s2, %s3734_s8 }
   0xd   : > { %s4161_s28 = scalar_select %p3955_p6, 1, 0 }
   0xe   : > { %p3951_p5 = pnand %p3938_p2, %p3531_p4  ;;  %p3741_p11 = scmp.lt.u32.totalorder %s3734_s8, %s4151_s2 }
  0x10   : > { %p3969_p8 = pneg %p3951_p5 }
  0x12   : > { %p3737_p9 = pnand %p3969_p8, %p3735_p7 }
  0x14   : > { %p3738_p10 = pneg %p3737_p9 }
  0x16   : > { %p3743_p12 = pnand %p3741_p11, %p3738_p10 }
  0x18   : > { %3746 = shalt.err (!%p3743_p12)
}
  0x19   : > { %s3747_s14 = scalar_lea.vmem %s209_s22, 32  ;;  %p3755_p4 = scmp.lt.s32.totalorder %s209_s22, %s209_s22 }
  0x1a   : > { %p3748_p13 = scmp.ne.s32.totalorder %s209_s22, %s3747_s14  ;;  %p3756_p2 = scmp.lt.s32.totalorder %s3747_s14, %s3747_s14 }
  0x1c   : > { %p3750_p0 = pnand %p3748_p13, %p3969_p8  ;;  %p3757_p3 = por %p3756_p2, %p3755_p4 }
  0x1e   : > { %p3751_p1 = pneg %p3750_p0 }
  0x20   : > { %p3758_p6 = pnand %p3757_p3, %p3751_p1 }
  0x22   : > { %3761 = shalt.err (!%p3758_p6)
}
  0x23   : > { %3537 = dma.hbm_to_vmem [thread:$0]  (!%p3951_p5), %s4151_s2, 32, %s209_s22, [#allocation6]  }
  0x24   : > { %p4163_p7 = scmp.ne.s32.totalorder %s4161_s28, 0  ;;  %s3762_s23 = scalar_lea.hbm %s4150_s1, 12288 }
  0x25   : > { %p3763_p2 = scmp.ne.s32.totalorder %s4150_s1, %s3762_s23  ;;  %p3769_p9 = scmp.lt.u32.totalorder %s3762_s23, %s4150_s1 }
  0x26   : > { %s4169_s26 = smov (%p4163_p7, %s30_s26), 0 }
  0x27   : > { %p3765_p3 = pnand %p3763_p2, %p3969_p8 }
  0x29   : > { %p3766_p6 = pneg %p3765_p3 }
  0x2b   : > { %p3771_p10 = pnand %p3769_p9, %p3766_p6 }
  0x2d   : > { %3774 = shalt.err (!%p3771_p10)
}
  0x2e   : > { %s3775_s22 = scalar_lea.vmem %s3959_s30, 12288  ;;  %p3783_p0 = scmp.lt.s32.totalorder %s3959_s30, %s3959_s30 }
  0x2f   : > { %p3776_p11 = scmp.ne.s32.totalorder %s3959_s30, %s3775_s22  ;;  %p3784_p1 = scmp.lt.s32.totalorder %s3775_s22, %s3775_s22 }
  0x31   : > { %p3778_p12 = pnand %p3776_p11, %p3969_p8  ;;  %p3785_p4 = por %p3784_p1, %p3783_p0 }
  0x33   : > { %p3779_p13 = pneg %p3778_p12 }
  0x35   : > { %p3786_p7 = pnand %p3785_p4, %p3779_p13 }
  0x37   : > { %3789 = shalt.err (!%p3786_p7)
}
  0x38   : > { %s3884_s28 = smov 128   ;;  %s3885_s9 = smov 8  }
  0x39   : > { %3534 = dma.hbm_to_vmem [thread:$0]  (!%p3951_p5), %s4150_s1, 12288, %s3959_s30, [#allocation4], %s3884_s28, %s3884_s28, %s3885_s9  }
  0x3a   : > { %s3886_s13 = smov [#allocation7]   ;;  %s3790_s17 = scalar_lea.hbm %s4152_s3, 32768 }
  0x3b   : > { %s218_s14 = sshll.u32 %s3886_s13, 4  ;;  %p3791_p2 = scmp.ne.s32.totalorder %s4152_s3, %s3790_s17  ;;  %s219_s14 = int_to_ptr.vmem [resolvable:$true] %s218_s14 }
  0x3c   : > { %p3797_p9 = scmp.lt.u32.totalorder %s3790_s17, %s4152_s3 }
  0x3d   : > { %p3793_p3 = pnand %p3791_p2, %p3969_p8 }
  0x3f   : > { %p3794_p6 = pneg %p3793_p3 }
  0x41   : > { %p3799_p10 = pnand %p3797_p9, %p3794_p6 }
  0x43   : > { %3802 = shalt.err (!%p3799_p10)
}
  0x44   : > { %s3803_s30 = scalar_lea.vmem %s219_s14, 32768  ;;  %p3811_p0 = scmp.lt.s32.totalorder %s219_s14, %s219_s14 }
  0x45   : > { %p3804_p11 = scmp.ne.s32.totalorder %s219_s14, %s3803_s30  ;;  %p3812_p1 = scmp.lt.s32.totalorder %s3803_s30, %s3803_s30 }
  0x47   : > { %p3806_p12 = pnand %p3804_p11, %p3969_p8  ;;  %p3813_p4 = por %p3812_p1, %p3811_p0 }
  0x49   : > { %p3807_p13 = pneg %p3806_p12 }
  0x4b   : > { %p3814_p7 = pnand %p3813_p4, %p3807_p13 }
  0x4d   : > { %3817 = shalt.err (!%p3814_p7)
}
  0x4e   : > { %s3887_s7 = smov 1024   ;;  %s3888_s8 = smov 64  }
  0x4f   : > { %3540 = dma.hbm_to_vmem [thread:$0]  (!%p3951_p5), %s4152_s3, 32768, %s219_s14, [#allocation6], %s3887_s7, %s3887_s7, %s3888_s8  }
  0x50   : > { %s3889_s9 = smov [#allocation8]   ;;  %s3818_s15 = scalar_lea.hbm %s4153_s4, 256 }
  0x51   : > { %s232_s10 = sshll.u32 %s3889_s9, 4  ;;  %p3819_p2 = scmp.ne.s32.totalorder %s4153_s4, %s3818_s15  ;;  %s233_s10 = int_to_ptr.vmem [resolvable:$true] %s232_s10 }
  0x52   : > { %p3825_p9 = scmp.lt.u32.totalorder %s3818_s15, %s4153_s4 }
  0x53   : > { %p3821_p3 = pnand %p3819_p2, %p3969_p8 }
  0x55   : > { %p3822_p6 = pneg %p3821_p3 }
  0x57   : > { %p3827_p10 = pnand %p3825_p9, %p3822_p6 }
  0x59   : > { %3830 = shalt.err (!%p3827_p10)
}
  0x5a   : > { %s3831_s14 = scalar_lea.vmem %s233_s10, 256  ;;  %p3839_p0 = scmp.lt.s32.totalorder %s233_s10, %s233_s10 }
  0x5b   : > { %p3832_p11 = scmp.ne.s32.totalorder %s233_s10, %s3831_s14  ;;  %p3840_p1 = scmp.lt.s32.totalorder %s3831_s14, %s3831_s14 }
  0x5d   : > { %p3834_p12 = pnand %p3832_p11, %p3969_p8  ;;  %p3841_p4 = por %p3840_p1, %p3839_p0 }
  0x5f   : > { %p3835_p13 = pneg %p3834_p12 }
  0x61   : > { %p3842_p7 = pnand %p3841_p4, %p3835_p13 }
  0x63   : > { %3845 = shalt.err (!%p3842_p7)
}
  0x64   : > { %3543 = dma.hbm_to_vmem [thread:$0]  (!%p3951_p5), %s4153_s4, 256, %s233_s10, [#allocation9]  }
  0x65   : > { %p4164_p2 = scmp.ne.s32.totalorder %s4159_s25, 0 }
  0x66   : > { %p4165_p3 = scmp.ne.s32.totalorder (!%p4164_p2), %s4158_s24, 0 }
  0x67   : > { %256 = sbr.rel (%p4164_p2) target bundleno = 873 (0x369), region = 40 }
  0x6e   : > { %3859 = dma.done.wait (%p4165_p3), [#allocation4], 12288  }
  0x6f   : > { %3861 = vsyncadd (%p4165_p3), [#allocation4], 4294955008 }
  0x70   : > { %3863 = dma.done.wait (%p4165_p3), [#allocation6], 32800  }
  0x71   : > { %3865 = vsyncadd (%p4165_p3), [#allocation6], 4294934496 }
  0x72   : > { %3867 = dma.done.wait (%p4165_p3), [#allocation9], 256  }
  0x73   : > { %3869 = vsyncadd (%p4165_p3), [#allocation9], 4294967040  ;;  %v3584_v0 = vld [vmem:[#allocation3 + $0x4] ss:$8 sps:$4 sm:$0xff]   ;;  %v3588_v2 = vld [vmem:[#allocation3] ss:$8 sps:$4 sm:$0xff]  }
  0x74   : > { %v3586_v1 = vld [vmem:[#allocation3 + $0x104] ss:$8 sps:$4 sm:$0xff]   ;;  %919 = vmatprep.subr.bf16.mxu0 %v3584_v0  ;;  %v3589_v3 = vld [vmem:[#allocation3 + $0x100] ss:$8 sps:$4 sm:$0xff]   ;;  %v3590_v4 = vld [vmem:[#allocation3 + $0x14] ss:$8 sps:$4 sm:$0xff]  }
  0x75   : > { %960 = vmatprep.subr.bf16.mxu1 %v3586_v1  ;;  %920 = vmatpush1.bf16.msra.mxu0 %v3588_v2  ;;  %v3592_v5 = vld [vmem:[#allocation3 + $0x114] ss:$8 sps:$4 sm:$0xff]   ;;  %v3594_v6 = vld [vmem:[#allocation3 + $0x10] ss:$8 sps:$4 sm:$0xff]   ;;  %v3596_v8 = vld [vmem:[#allocation3 + $0x24] ss:$8 sps:$4 sm:$0xff]  }
  0x76   : > { %961 = vmatpush1.bf16.msra.mxu1 %v3589_v3  ;;  %921 = vmatprep.subr.bf16.mxu0 %v3590_v4  ;;  %v3595_v7 = vld [vmem:[#allocation3 + $0x110] ss:$8 sps:$4 sm:$0xff]   ;;  %v3598_v9 = vld [vmem:[#allocation3 + $0x124] ss:$8 sps:$4 sm:$0xff]   ;;  %v3600_v10 = vld [vmem:[#allocation3 + $0x20] ss:$8 sps:$4 sm:$0xff]  }
  0x77   : > { %962 = vmatprep.subr.bf16.mxu1 %v3592_v5  ;;  %v3601_v11 = vld [vmem:[#allocation3 + $0x120] ss:$8 sps:$4 sm:$0xff]   ;;  %v3602_v12 = vld [vmem:[#allocation3 + $0x34] ss:$8 sps:$4 sm:$0xff]   ;;  %v3606_v14 = vld [vmem:[#allocation3 + $0x30] ss:$8 sps:$4 sm:$0xff]  }
  0x78   : > { %v3604_v13 = vld [vmem:[#allocation3 + $0x134] ss:$8 sps:$4 sm:$0xff]   ;;  %v3607_v15 = vld [vmem:[#allocation3 + $0x130] ss:$8 sps:$4 sm:$0xff]   ;;  %v3608_v16 = vld [vmem:[#allocation3 + $0x44] ss:$8 sps:$4 sm:$0xff]  }
  0x79   : > { %922 = vmatpush1.bf16.msra.mxu0 %v3594_v6  ;;  %v3610_v17 = vld [vmem:[#allocation3 + $0x144] ss:$8 sps:$4 sm:$0xff]   ;;  %v3612_v18 = vld [vmem:[#allocation3 + $0x40] ss:$8 sps:$4 sm:$0xff]   ;;  %v3614_v20 = vld [vmem:[#allocation3 + $0x54] ss:$8 sps:$4 sm:$0xff]  }
  0x7a   : > { %963 = vmatpush1.bf16.msra.mxu1 %v3595_v7  ;;  %923 = vmatprep.subr.bf16.mxu0 %v3596_v8  ;;  %v3613_v19 = vld [vmem:[#allocation3 + $0x140] ss:$8 sps:$4 sm:$0xff]   ;;  %v3616_v21 = vld [vmem:[#allocation3 + $0x154] ss:$8 sps:$4 sm:$0xff]   ;;  %v3618_v22 = vld [vmem:[#allocation3 + $0x50] ss:$8 sps:$4 sm:$0xff]  }
  0x7b   : > { %964 = vmatprep.subr.bf16.mxu1 %v3598_v9  ;;  %v3619_v23 = vld [vmem:[#allocation3 + $0x150] ss:$8 sps:$4 sm:$0xff]   ;;  %v3620_v24 = vld [vmem:[#allocation3 + $0x64] ss:$8 sps:$4 sm:$0xff]   ;;  %v3624_v26 = vld [vmem:[#allocation3 + $0x60] ss:$8 sps:$4 sm:$0xff]  }
  0x7c   : > { %v3622_v25 = vld [vmem:[#allocation3 + $0x164] ss:$8 sps:$4 sm:$0xff]   ;;  %v3625_v27 = vld [vmem:[#allocation3 + $0x160] ss:$8 sps:$4 sm:$0xff]   ;;  %v3626_v28 = vld [vmem:[#allocation3 + $0x74] ss:$8 sps:$4 sm:$0xff]  }
  0x7d   : > { %924 = vmatpush1.bf16.msra.mxu0 %v3600_v10  ;;  %s298_s24 = smul.u32 6, %s3872_s18  ;;  %v3628_v29 = vld [vmem:[#allocation3 + $0x174] ss:$8 sps:$4 sm:$0xff]   ;;  %v3630_v30 = vld [vmem:[#allocation3 + $0x70] ss:$8 sps:$4 sm:$0xff]   ;;  %p306_p8 = scmp.lt.s32.totalorder %s3872_s18, 7 }
  0x7e   : > { %965 = vmatpush1.bf16.msra.mxu1 %v3601_v11  ;;  %925 = vmatprep.subr.bf16.mxu0 %v3602_v12  ;;  %v3631_v31 = vld [vmem:[#allocation3 + $0x170] ss:$8 sps:$4 sm:$0xff]   ;;  %v3632_v32 = vld [vmem:[#allocation3 + $0x84] ss:$8 sps:$4 sm:$0xff]   ;;  %v3636_v34 = vld [vmem:[#allocation3 + $0x80] ss:$8 sps:$4 sm:$0xff]  }
  0x7f   : > { %966 = vmatprep.subr.bf16.mxu1 %v3604_v13  ;;  %p299_p5 = scmp.lt.s32.totalorder %s298_s24, 47  ;;  %v3634_v33 = vld [vmem:[#allocation3 + $0x184] ss:$8 sps:$4 sm:$0xff]   ;;  %v3637_v35 = vld [vmem:[#allocation3 + $0x180] ss:$8 sps:$4 sm:$0xff]   ;;  %s4173_s18 = smov (!%p306_p8, %s3872_s18), 7 }
  0x80   : > { %v3638_v36 = vld [vmem:[#allocation3 + $0x94] ss:$8 sps:$4 sm:$0xff]   ;;  %v3642_v38 = vld [vmem:[#allocation3 + $0x90] ss:$8 sps:$4 sm:$0xff]   ;;  %v3644_v40 = vld [vmem:[#allocation3 + $0xa4] ss:$8 sps:$4 sm:$0xff]  }
  0x81   : > { %926 = vmatpush1.bf16.msra.mxu0 %v3606_v14  ;;  %s4171_s24 = smov (!%p299_p5, %s298_s24), 47  ;;  %v3640_v37 = vld [vmem:[#allocation3 + $0x194] ss:$8 sps:$4 sm:$0xff]   ;;  %v3643_v39 = vld [vmem:[#allocation3 + $0x190] ss:$8 sps:$4 sm:$0xff]   ;;  %s3514_s7 = sshll.u32 %s4173_s18, 7 }
  0x82   : > { %967 = vmatpush1.bf16.msra.mxu1 %v3607_v15  ;;  %927 = vmatprep.subr.bf16.mxu0 %v3608_v16  ;;  %s3151_s25 = sshll.u32 %s4171_s24, 2  ;;  %v3646_v41 = vld [vmem:[#allocation3 + $0x1a4] ss:$8 sps:$4 sm:$0xff]   ;;  %v3648_v42 = vld [vmem:[#allocation3 + $0xa0] ss:$8 sps:$4 sm:$0xff]   ;;  %s4116_s28 = scalar_lea.vmem %s4154_s5, %s3514_s7 }
  0x83   : > { %968 = vmatprep.subr.bf16.mxu1 %v3610_v17  ;;  %v3649_v43 = vld [vmem:[#allocation3 + $0x1a0] ss:$8 sps:$4 sm:$0xff]   ;;  %s4066_s30 = scalar_lea.vmem %s4149_s0, %s3151_s25  ;;  %v3650_v44 = vld [vmem:[#allocation3 + $0xb4] ss:$8 sps:$4 sm:$0xff]   ;;  %v3654_v49 = vld [vmem:[#allocation3 + $0xb0] ss:$8 sps:$4 sm:$0xff]  }
  0x84   : > { %v3652_v45 = vld [vmem:[#allocation3 + $0x1b4] ss:$8 sps:$4 sm:$0xff]   ;;  %v319_v46 = vld [vmem:[%s4066_s30] sm:$0xff]  ;;  %v320_v48 = vld [vmem:[%s4066_s30 + $0x8] sm:$0xff] }
  0x85   : > { %928 = vmatpush1.bf16.msra.mxu0 %v3612_v18  ;;  %v3155_v47 = vcombine.high %v319_v46, %v319_v46  ;;  %v3655_v50 = vld [vmem:[#allocation3 + $0x1b0] ss:$8 sps:$4 sm:$0xff]   ;;  %v3157_v51 = vcombine.high %v320_v48, %v320_v48  ;;  %v3656_v52 = vld [vmem:[#allocation3 + $0xc4] ss:$8 sps:$4 sm:$0xff]   ;;  %v3660_v54 = vld [vmem:[#allocation3 + $0xc0] ss:$8 sps:$4 sm:$0xff]   ;;  %v3154_v5 = vcombine.low %v319_v46, %v319_v46  ;;  %v3156_v6 = vcombine.low %v320_v48, %v320_v48 }
  0x86   : > { %969 = vmatpush1.bf16.msra.mxu1 %v3613_v19  ;;  %929 = vmatprep.subr.bf16.mxu0 %v3614_v20  ;;  %v3658_v53 = vld [vmem:[#allocation3 + $0x1c4] ss:$8 sps:$4 sm:$0xff]   ;;  %v3661_v55 = vld [vmem:[#allocation3 + $0x1c0] ss:$8 sps:$4 sm:$0xff]   ;;  %v3662_v56 = vld [vmem:[#allocation3 + $0xd4] ss:$8 sps:$4 sm:$0xff]  }
  0x87   : > { %970 = vmatprep.subr.bf16.mxu1 %v3616_v21  ;;  %951 = vmatprep.mubr.bf16.mxu0 %v3155_v47  ;;  %v3664_v57 = vld [vmem:[#allocation3 + $0x1d4] ss:$8 sps:$4 sm:$0xff]   ;;  %v3666_v58 = vld [vmem:[#allocation3 + $0xd0] ss:$8 sps:$4 sm:$0xff]   ;;  %v3668_v60 = vld [vmem:[#allocation3 + $0xe4] ss:$8 sps:$4 sm:$0xff]  }
  0x88   : > { %992 = vmatprep.mubr.bf16.mxu1 %v3157_v51  ;;  %v3667_v59 = vld [vmem:[#allocation3 + $0x1d0] ss:$8 sps:$4 sm:$0xff]   ;;  %v3670_v61 = vld [vmem:[#allocation3 + $0x1e4] ss:$8 sps:$4 sm:$0xff]   ;;  %v3672_v62 = vld [vmem:[#allocation3 + $0xe0] ss:$8 sps:$4 sm:$0xff]  }
  0x89   : > { %930 = vmatpush1.bf16.msra.mxu0 %v3618_v22  ;;  %v3673_v63 = vld [vmem:[#allocation3 + $0x1e0] ss:$8 sps:$4 sm:$0xff]   ;;  %v3674_v0 = vld [vmem:[#allocation3 + $0xf4] ss:$8 sps:$4 sm:$0xff]   ;;  %v3678_v2 = vld [vmem:[#allocation3 + $0xf0] ss:$8 sps:$4 sm:$0xff]  }
  0x8a   : > { %971 = vmatpush1.bf16.msra.mxu1 %v3619_v23  ;;  %931 = vmatprep.subr.bf16.mxu0 %v3620_v24  ;;  %v3676_v1 = vld [vmem:[#allocation3 + $0x1f4] ss:$8 sps:$4 sm:$0xff]   ;;  %v3679_v3 = vld [vmem:[#allocation3 + $0x1f0] ss:$8 sps:$4 sm:$0xff]   ;;  %v3686_v4 = vld [vmem:[#allocation3 + $0x204] ss:$8 sps:$4 sm:$0xff]  }
  0x8b   : > { %972 = vmatprep.subr.bf16.mxu1 %v3622_v25  ;;  %v3684_v7 = vld [vmem:[#allocation3 + $0x200] ss:$8 sps:$4 sm:$0xff]   ;;  %v4071_v8 = vld [vmem:[%s4066_s30 + $0x10] sm:$0xff]  ;;  %v3692_v12 = vld [vmem:[#allocation3 + $0x224] ss:$8 sps:$4 sm:$0xff]  }
  0x8c   : > { %v3689_v9 = vld [vmem:[#allocation3 + $0x214] ss:$8 sps:$4 sm:$0xff]   ;;  %v3159_v10 = vcombine.high %v4071_v8, %v4071_v8  ;;  %v3687_v11 = vld [vmem:[#allocation3 + $0x210] ss:$8 sps:$4 sm:$0xff]   ;;  %v3690_v13 = vld [vmem:[#allocation3 + $0x220] ss:$8 sps:$4 sm:$0xff]  }
  0x8d   : > { %932 = vmatpush1.bf16.msra.mxu0 %v3624_v26  ;;  %v3695_v14 = vld [vmem:[#allocation3 + $0x234] ss:$8 sps:$4 sm:$0xff]   ;;  %v3693_v15 = vld [vmem:[#allocation3 + $0x230] ss:$8 sps:$4 sm:$0xff]   ;;  %v3698_v16 = vld [vmem:[#allocation3 + $0x244] ss:$8 sps:$4 sm:$0xff]  }
  0x8e   : > { %973 = vmatpush1.bf16.msra.mxu1 %v3625_v27  ;;  %933 = vmatprep.subr.bf16.mxu0 %v3626_v28  ;;  %v3696_v17 = vld [vmem:[#allocation3 + $0x240] ss:$8 sps:$4 sm:$0xff]   ;;  %v3701_v18 = vld [vmem:[#allocation3 + $0x254] ss:$8 sps:$4 sm:$0xff]   ;;  %v3699_v19 = vld [vmem:[#allocation3 + $0x250] ss:$8 sps:$4 sm:$0xff]  }
  0x8f   : > { %974 = vmatprep.subr.bf16.mxu1 %v3628_v29  ;;  %v3704_v20 = vld [vmem:[#allocation3 + $0x264] ss:$8 sps:$4 sm:$0xff]   ;;  %v3702_v21 = vld [vmem:[#allocation3 + $0x260] ss:$8 sps:$4 sm:$0xff]   ;;  %v3707_v22 = vld [vmem:[#allocation3 + $0x274] ss:$8 sps:$4 sm:$0xff]  }
  0x90   : > { %v3705_v23 = vld [vmem:[#allocation3 + $0x270] ss:$8 sps:$4 sm:$0xff]   ;;  %v3710_v24 = vld [vmem:[#allocation3 + $0x284] ss:$8 sps:$4 sm:$0xff]   ;;  %v3708_v25 = vld [vmem:[#allocation3 + $0x280] ss:$8 sps:$4 sm:$0xff]  }
  0x91   : > { %934 = vmatpush1.bf16.msra.mxu0 %v3630_v30  ;;  %v3713_v26 = vld [vmem:[#allocation3 + $0x294] ss:$8 sps:$4 sm:$0xff]   ;;  %v3711_v27 = vld [vmem:[#allocation3 + $0x290] ss:$8 sps:$4 sm:$0xff]   ;;  %v3716_v28 = vld [vmem:[#allocation3 + $0x2a4] ss:$8 sps:$4 sm:$0xff]  }
  0x92   : > { %975 = vmatpush1.bf16.msra.mxu1 %v3631_v31  ;;  %935 = vmatprep.subr.bf16.mxu0 %v3632_v32  ;;  %v3714_v29 = vld [vmem:[#allocation3 + $0x2a0] ss:$8 sps:$4 sm:$0xff]   ;;  %v3719_v30 = vld [vmem:[#allocation3 + $0x2b4] ss:$8 sps:$4 sm:$0xff]   ;;  %v3717_v31 = vld [vmem:[#allocation3 + $0x2b0] ss:$8 sps:$4 sm:$0xff]  }
  0x93   : > { %976 = vmatprep.subr.bf16.mxu1 %v3634_v33  ;;  %v3722_v32 = vld [vmem:[#allocation3 + $0x2c4] ss:$8 sps:$4 sm:$0xff]   ;;  %v3720_v33 = vld [vmem:[#allocation3 + $0x2c0] ss:$8 sps:$4 sm:$0xff]  }
  0x94   : > { %v1076_v46 = vld [vmem:[#allocation7 + $0x48] sm:$0xff]  ;;  %v1083_v47 = vld [vmem:[#allocation7 + $0x80] sm:$0xff] }
  0x95   : > { %936 = vmatpush1.bf16.msra.mxu0 %v3636_v34  ;;  %v3725_v34 = vld [vmem:[#allocation3 + $0x2d4] ss:$8 sps:$4 sm:$0xff]   ;;  %v1091_v48 = vld [vmem:[#allocation7 + $0xc0] sm:$0xff] }
  0x96   : > { %977 = vmatpush1.bf16.msra.mxu1 %v3637_v35  ;;  %937 = vmatprep.subr.bf16.mxu0 %v3638_v36  ;;  %v3723_v35 = vld [vmem:[#allocation3 + $0x2d0] ss:$8 sps:$4 sm:$0xff]   ;;  %v3728_v36 = vld [vmem:[#allocation3 + $0x2e4] ss:$8 sps:$4 sm:$0xff]   ;;  %v3273_v51 = vcombine.high %v1083_v47, %v1091_v48 }
  0x97   : > { %978 = vmatprep.subr.bf16.mxu1 %v3640_v37  ;;  %v3726_v37 = vld [vmem:[#allocation3 + $0x2e0] ss:$8 sps:$4 sm:$0xff]  }
  0x99   : > { %938 = vmatpush1.bf16.msra.mxu0 %v3642_v38  ;;  %v3731_v38 = vld [vmem:[#allocation3 + $0x2f4] ss:$8 sps:$4 sm:$0xff]  }
  0x9a   : > { %979 = vmatpush1.bf16.msra.mxu1 %v3643_v39  ;;  %939 = vmatprep.subr.bf16.mxu0 %v3644_v40  ;;  %v3729_v39 = vld [vmem:[#allocation3 + $0x2f0] ss:$8 sps:$4 sm:$0xff]   ;;  %v3158_v40 = vcombine.low %v4071_v8, %v4071_v8  ;;  %v1139_v8 = vld [vmem:[#allocation7 + $0x240] sm:$0xff] }
  0x9b   : > { %980 = vmatprep.subr.bf16.mxu1 %v3646_v41  ;;  %v1067_v41 = vld [vmem:[#allocation7] sm:$0xff] }
  0x9d   : > { %940 = vmatpush1.bf16.msra.mxu0 %v3648_v42  ;;  %v1075_v42 = vld [vmem:[#allocation7 + $0x40] sm:$0xff] }
  0x9e   : > { %981 = vmatpush1.bf16.msra.mxu1 %v3649_v43  ;;  %941 = vmatprep.subr.bf16.mxu0 %v3650_v44  ;;  %v1068_v43 = vld [vmem:[#allocation7 + $0x8] sm:$0xff]  ;;  %v3256_v44 = vcombine.low %v1067_v41, %v1075_v42 }
  0x9f   : > { %982 = vmatprep.subr.bf16.mxu1 %v3652_v45  ;;  %v3257_v45 = vcombine.high %v1067_v41, %v1075_v42  ;;  %v1196_v41 = vld [vmem:[#allocation7 + $0x408] sm:$0xff] }
  0xa0   : > { %v1204_v42 = vld [vmem:[#allocation7 + $0x448] sm:$0xff] }
  0xa1   : > { %942 = vmatpush1.bf16.msra.mxu0 %v3654_v49  ;;  %v3258_v49 = vcombine.low %v1068_v43, %v1076_v46 }
  0xa2   : > { %983 = vmatpush1.bf16.msra.mxu1 %v3655_v50  ;;  %943 = vmatprep.subr.bf16.mxu0 %v3656_v52  ;;  %v3259_v50 = vcombine.high %v1068_v43, %v1076_v46  ;;  %v1084_v52 = vld [vmem:[#allocation7 + $0x88] sm:$0xff]  ;;  %v3387_v46 = vcombine.high %v1196_v41, %v1204_v42 }
  0xa3   : > { %984 = vmatprep.subr.bf16.mxu1 %v3658_v53  ;;  %v1092_v53 = vld [vmem:[#allocation7 + $0xc8] sm:$0xff] }
  0xa5   : > { %944 = vmatpush1.bf16.msra.mxu0 %v3660_v54  ;;  %v1099_v54 = vld [vmem:[#allocation7 + $0x100] sm:$0xff] }
  0xa6   : > { %985 = vmatpush1.bf16.msra.mxu1 %v3661_v55  ;;  %945 = vmatprep.subr.bf16.mxu0 %v3662_v56  ;;  %v3275_v55 = vcombine.high %v1084_v52, %v1092_v53  ;;  %v1107_v56 = vld [vmem:[#allocation7 + $0x140] sm:$0xff] }
  0xa7   : > { %986 = vmatprep.subr.bf16.mxu1 %v3664_v57  ;;  %v1100_v57 = vld [vmem:[#allocation7 + $0x108] sm:$0xff] }
  0xa9   : > { %946 = vmatpush1.bf16.msra.mxu0 %v3666_v58  ;;  %v1108_v58 = vld [vmem:[#allocation7 + $0x148] sm:$0xff] }
  0xaa   : > { %987 = vmatpush1.bf16.msra.mxu1 %v3667_v59  ;;  %947 = vmatprep.subr.bf16.mxu0 %v3668_v60  ;;  %v3272_v59 = vcombine.low %v1083_v47, %v1091_v48  ;;  %v3274_v60 = vcombine.low %v1084_v52, %v1092_v53  ;;  %v1211_v47 = vld [vmem:[#allocation7 + $0x480] sm:$0xff]  ;;  %v3386_v52 = vcombine.low %v1196_v41, %v1204_v42  ;;  %v1069_v41 = vld [vmem:[#allocation7 + $0x10] sm:$0xff] }
  0xab   : > { %988 = vmatprep.subr.bf16.mxu1 %v3670_v61  ;;  %v3289_v61 = vcombine.high %v1099_v54, %v1107_v56  ;;  %v1219_v48 = vld [vmem:[#allocation7 + $0x4c0] sm:$0xff]  ;;  %v1077_v42 = vld [vmem:[#allocation7 + $0x50] sm:$0xff] }
  0xac   : > { %v3401_v53 = vcombine.high %v1211_v47, %v1219_v48 }
  0xad   : > { %948 = vmatpush1.bf16.msra.mxu0 %v3672_v62  ;;  %v3291_v62 = vcombine.high %v1100_v57, %v1108_v58 }
  0xae   : > { %989 = vmatpush1.bf16.msra.mxu1 %v3673_v63  ;;  %949 = vmatprep.subr.bf16.mxu0 %v3674_v0  ;;  %v1115_v63 = vld [vmem:[#allocation7 + $0x180] sm:$0xff] }
  0xaf   : > { %990 = vmatprep.subr.bf16.mxu1 %v3676_v1  ;;  %v1123_v0 = vld [vmem:[#allocation7 + $0x1c0] sm:$0xff]  ;;  %v1116_v1 = vld [vmem:[#allocation7 + $0x188] sm:$0xff] }
  0xb1   : > { %950 = vmatpush1.bf16.msra.mxu0 %v3678_v2  ;;  %v1124_v2 = vld [vmem:[#allocation7 + $0x1c8] sm:$0xff] }
  0xb2   : > { %991 = vmatpush1.bf16.msra.mxu1 %v3679_v3  ;;  %1001 = vmatprep.subr.bf16.mxu0 %v3686_v4  ;;  %v3288_v3 = vcombine.low %v1099_v54, %v1107_v56  ;;  %v3290_v4 = vcombine.low %v1100_v57, %v1108_v58  ;;  %v1235_v56 = vld [vmem:[#allocation7 + $0x540] sm:$0xff]  ;;  %v1228_v57 = vld [vmem:[#allocation7 + $0x508] sm:$0xff] }
  0xb3   : > { %2687 = vmatprep.subr.bf16.mxu1 %v3257_v45  ;;  %v1236_v58 = vld [vmem:[#allocation7 + $0x548] sm:$0xff] }
  0xb4   : > { %952 = vmatmul.mubr.bf16.vlgmr.msra.gmra.mrb[0].mxu0 %v3154_v5  ;;  %v3305_v5 = vcombine.high %v1115_v63, %v1123_v0 }
  0xb5   : > { %993 = vmatmul.mubr.bf16.vlgmr.msra.gmra.mrb[0].mxu1 %v3156_v6  ;;  %1002 = vmatpush1.bf16.msra.mxu0 %v3684_v7  ;;  %v3307_v6 = vcombine.high %v1116_v1, %v1124_v2  ;;  %v1131_v7 = vld [vmem:[#allocation7 + $0x200] sm:$0xff] }
  0xb6   : > { %1033 = vmatprep.mubr.bf16.mxu0 %v3159_v10  ;;  %1003 = vmatprep.subr.bf16.mxu0 %v3689_v9  ;;  %v1132_v9 = vld [vmem:[#allocation7 + $0x208] sm:$0xff] }
  0xb7   : > { %2688 = vmatpush1.bf16.msra.mxu1 %v3256_v44  ;;  %v1140_v10 = vld [vmem:[#allocation7 + $0x248] sm:$0xff] }
  0xb8   : > { %2689 = vmatprep.subr.bf16.mxu1 %v3273_v51 }
  0xb9   : > { %1004 = vmatpush1.bf16.msra.mxu0 %v3687_v11  ;;  %v3304_v11 = vcombine.low %v1115_v63, %v1123_v0  ;;  %v1243_v63 = vld [vmem:[#allocation7 + $0x580] sm:$0xff] }
  0xba   : > { %1005 = vmatprep.subr.bf16.mxu0 %v3692_v12  ;;  %v3306_v12 = vcombine.low %v1116_v1, %v1124_v2  ;;  %v1251_v0 = vld [vmem:[#allocation7 + $0x5c0] sm:$0xff]  ;;  %v1244_v1 = vld [vmem:[#allocation7 + $0x588] sm:$0xff] }
  0xbb   : > { %2690 = vmatpush1.bf16.msra.mxu1 %v3272_v59  ;;  %v3400_v59 = vcombine.low %v1211_v47, %v1219_v48  ;;  %v1252_v2 = vld [vmem:[#allocation7 + $0x5c8] sm:$0xff] }
  0xbc   : > { %2691 = vmatprep.subr.bf16.mxu1 %v3289_v61 }
  0xbd   : > { %1006 = vmatpush1.bf16.msra.mxu0 %v3690_v13  ;;  %v3321_v13 = vcombine.high %v1131_v7, %v1139_v8 }
  0xbe   : > { %1007 = vmatprep.subr.bf16.mxu0 %v3695_v14  ;;  %v3323_v14 = vcombine.high %v1132_v9, %v1140_v10 }
  0xbf   : > { %2692 = vmatpush1.bf16.msra.mxu1 %v3288_v3 }
  0xc0   : > { %2693 = vmatprep.subr.bf16.mxu1 %v3305_v5  ;;  %v3433_v5 = vcombine.high %v1243_v63, %v1251_v0 }
  0xc1   : > { %1008 = vmatpush1.bf16.msra.mxu0 %v3693_v15  ;;  %v1147_v15 = vld [vmem:[#allocation7 + $0x280] sm:$0xff] }
  0xc2   : > { %1009 = vmatprep.subr.bf16.mxu0 %v3698_v16  ;;  %v1155_v16 = vld [vmem:[#allocation7 + $0x2c0] sm:$0xff] }
  0xc3   : > { %2694 = vmatpush1.bf16.msra.mxu1 %v3304_v11  ;;  %v3432_v11 = vcombine.low %v1243_v63, %v1251_v0 }
  0xc4   : > { %2695 = vmatprep.subr.bf16.mxu1 %v3321_v13 }
  0xc5   : > { %1010 = vmatpush1.bf16.msra.mxu0 %v3696_v17  ;;  %v1148_v17 = vld [vmem:[#allocation7 + $0x288] sm:$0xff] }
  0xc6   : > { %1011 = vmatprep.subr.bf16.mxu0 %v3701_v18  ;;  %v1156_v18 = vld [vmem:[#allocation7 + $0x2c8] sm:$0xff] }
  0xc9   : > { %1012 = vmatpush1.bf16.msra.mxu0 %v3699_v19  ;;  %v3320_v19 = vcombine.low %v1131_v7, %v1139_v8  ;;  %v1259_v7 = vld [vmem:[#allocation7 + $0x600] sm:$0xff] }
  0xca   : > { %1013 = vmatprep.subr.bf16.mxu0 %v3704_v20  ;;  %v3322_v20 = vcombine.low %v1132_v9, %v1140_v10  ;;  %v1267_v8 = vld [vmem:[#allocation7 + $0x640] sm:$0xff]  ;;  %v1260_v9 = vld [vmem:[#allocation7 + $0x608] sm:$0xff] }
  0xcb   : > { %2696 = vmatpush1.bf16.msra.mxu1 %v3320_v19  ;;  %v1268_v10 = vld [vmem:[#allocation7 + $0x648] sm:$0xff]  ;;  %v3449_v13 = vcombine.high %v1259_v7, %v1267_v8  ;;  %v3448_v19 = vcombine.low %v1259_v7, %v1267_v8 }
  0xcd   : > { %1014 = vmatpush1.bf16.msra.mxu0 %v3702_v21  ;;  %v3337_v21 = vcombine.high %v1147_v15, %v1155_v16 }
  0xce   : > { %1015 = vmatprep.subr.bf16.mxu0 %v3707_v22  ;;  %v3339_v22 = vcombine.high %v1148_v17, %v1156_v18 }
  0xcf   : > { %2697 = vmatprep.subr.bf16.mxu1 %v3337_v21 }
  0xd1   : > { %1016 = vmatpush1.bf16.msra.mxu0 %v3705_v23  ;;  %v1163_v23 = vld [vmem:[#allocation7 + $0x300] sm:$0xff] }
  0xd2   : > { %1017 = vmatprep.subr.bf16.mxu0 %v3710_v24  ;;  %v1171_v24 = vld [vmem:[#allocation7 + $0x340] sm:$0xff] }
  0xd5   : > { %1018 = vmatpush1.bf16.msra.mxu0 %v3708_v25  ;;  %v1164_v25 = vld [vmem:[#allocation7 + $0x308] sm:$0xff] }
  0xd6   : > { %1019 = vmatprep.subr.bf16.mxu0 %v3713_v26  ;;  %v1172_v26 = vld [vmem:[#allocation7 + $0x348] sm:$0xff] }
  0xd9   : > { %1020 = vmatpush1.bf16.msra.mxu0 %v3711_v27  ;;  %v3336_v27 = vcombine.low %v1147_v15, %v1155_v16  ;;  %v1275_v15 = vld [vmem:[#allocation7 + $0x680] sm:$0xff] }
  0xda   : > { %1021 = vmatprep.subr.bf16.mxu0 %v3716_v28  ;;  %v3338_v28 = vcombine.low %v1148_v17, %v1156_v18  ;;  %v1283_v16 = vld [vmem:[#allocation7 + $0x6c0] sm:$0xff]  ;;  %v1276_v17 = vld [vmem:[#allocation7 + $0x688] sm:$0xff] }
  0xdb   : > { %2698 = vmatpush1.bf16.msra.mxu1 %v3336_v27  ;;  %v1284_v18 = vld [vmem:[#allocation7 + $0x6c8] sm:$0xff]  ;;  %v3465_v21 = vcombine.high %v1275_v15, %v1283_v16 }
  0xdc   : > { %v1292_v27 = vld [vmem:[#allocation7 + $0x708] sm:$0xff] }
  0xdd   : > { %1022 = vmatpush1.bf16.msra.mxu0 %v3714_v29  ;;  %v3353_v29 = vcombine.high %v1163_v23, %v1171_v24 }
  0xde   : > { %1023 = vmatprep.subr.bf16.mxu0 %v3719_v30  ;;  %v3355_v30 = vcombine.high %v1164_v25, %v1172_v26 }
  0xdf   : > { %2699 = vmatprep.subr.bf16.mxu1 %v3353_v29  ;;  %v1300_v29 = vld [vmem:[#allocation7 + $0x748] sm:$0xff] }
  0xe1   : > { %1024 = vmatpush1.bf16.msra.mxu0 %v3717_v31  ;;  %v1179_v31 = vld [vmem:[#allocation7 + $0x380] sm:$0xff] }
  0xe2   : > { %1025 = vmatprep.subr.bf16.mxu0 %v3722_v32  ;;  %v1187_v32 = vld [vmem:[#allocation7 + $0x3c0] sm:$0xff] }
  0xe3   : > { %v3368_v43 = vcombine.low %v1179_v31, %v1187_v32 }
  0xe5   : > { %1026 = vmatpush1.bf16.msra.mxu0 %v3720_v33  ;;  %v1180_v33 = vld [vmem:[#allocation7 + $0x388] sm:$0xff] }
  0xe6   : > { %1027 = vmatprep.subr.bf16.mxu0 %v3725_v34  ;;  %v1188_v34 = vld [vmem:[#allocation7 + $0x3c8] sm:$0xff] }
  0xe7   : > { %v3370_v44 = vcombine.low %v1180_v33, %v1188_v34 }
  0xe9   : > { %1028 = vmatpush1.bf16.msra.mxu0 %v3723_v35  ;;  %v3352_v35 = vcombine.low %v1163_v23, %v1171_v24  ;;  %v3464_v23 = vcombine.low %v1275_v15, %v1283_v16  ;;  %v3466_v24 = vcombine.low %v1276_v17, %v1284_v18  ;;  %v1101_v16 = vld [vmem:[#allocation7 + $0x110] sm:$0xff] }
  0xea   : > { %1029 = vmatprep.subr.bf16.mxu0 %v3728_v36  ;;  %v3354_v36 = vcombine.low %v1164_v25, %v1172_v26  ;;  %v1291_v25 = vld [vmem:[#allocation7 + $0x700] sm:$0xff] }
  0xeb   : > { %2700 = vmatpush1.bf16.msra.mxu1 %v3352_v35  ;;  %v1299_v26 = vld [vmem:[#allocation7 + $0x740] sm:$0xff]  ;;  %v1308_v35 = vld [vmem:[#allocation7 + $0x788] sm:$0xff] }
  0xed   : > { %1030 = vmatpush1.bf16.msra.mxu0 %v3726_v37  ;;  %v3369_v37 = vcombine.high %v1179_v31, %v1187_v32  ;;  %v3482_v31 = vcombine.low %v1292_v27, %v1300_v29  ;;  %v3483_v32 = vcombine.high %v1292_v27, %v1300_v29  ;;  %v1125_v27 = vld [vmem:[#allocation7 + $0x1d0] sm:$0xff]  ;;  %v1126_v29 = vld [vmem:[#allocation7 + $0x1d8] sm:$0xff] }
  0xee   : > { %1031 = vmatprep.subr.bf16.mxu0 %v3731_v38  ;;  %v3371_v38 = vcombine.high %v1180_v33, %v1188_v34  ;;  %v1307_v33 = vld [vmem:[#allocation7 + $0x780] sm:$0xff] }
  0xef   : > { %2701 = vmatprep.subr.bf16.mxu1 %v3369_v37  ;;  %v1315_v34 = vld [vmem:[#allocation7 + $0x7c0] sm:$0xff]  ;;  %v1316_v37 = vld [vmem:[#allocation7 + $0x7c8] sm:$0xff] }
  0xf0   : > { %2702 = vmatpush1.bf16.msra.mxu1 %v3368_v43  ;;  %v1070_v43 = vld [vmem:[#allocation7 + $0x18] sm:$0xff] }
  0xf1   : > { %1032 = vmatpush1.bf16.msra.mxu0 %v3729_v39  ;;  %v1195_v39 = vld [vmem:[#allocation7 + $0x400] sm:$0xff] }
  0xf2   : > { %2728 = vmatprep.subr.bf16.mxu0 %v3259_v50  ;;  %v1220_v50 = vld [vmem:[#allocation7 + $0x4c8] sm:$0xff] }
  0xf4   : > { %1034 = vmatmul.mubr.bf16.vlgmr.msra.gmra.mrb[4].mxu0 %v3158_v40  ;;  %v1203_v40 = vld [vmem:[#allocation7 + $0x440] sm:$0xff] }
  0xf5   : > { %2729 = vmatpush1.bf16.msra.mxu0 %v3258_v49  ;;  %v3385_v45 = vcombine.high %v1195_v39, %v1203_v40  ;;  %v1212_v49 = vld [vmem:[#allocation7 + $0x488] sm:$0xff]  ;;  %v3384_v51 = vcombine.low %v1195_v39, %v1203_v40  ;;  %v3498_v39 = vcombine.low %v1308_v35, %v1316_v37  ;;  %v3499_v40 = vcombine.high %v1308_v35, %v1316_v37  ;;  %v1141_v35 = vld [vmem:[#allocation7 + $0x250] sm:$0xff]  ;;  %v1142_v37 = vld [vmem:[#allocation7 + $0x258] sm:$0xff] }
  0xf6   : > { %2730 = vmatprep.subr.bf16.mxu0 %v3275_v55  ;;  %v3403_v54 = vcombine.high %v1212_v49, %v1220_v50  ;;  %v1227_v55 = vld [vmem:[#allocation7 + $0x500] sm:$0xff] }
  0xf7   : > { %2703 = vmatprep.subr.bf16.mxu1 %v3385_v45  ;;  %v3417_v61 = vcombine.high %v1227_v55, %v1235_v56  ;;  %v3416_v3 = vcombine.low %v1227_v55, %v1235_v56  ;;  %v1078_v45 = vld [vmem:[#allocation7 + $0x58] sm:$0xff] }
  0xf8   : > { %2704 = vmatpush1.bf16.msra.mxu1 %v3384_v51  ;;  %v3262_v47 = vcombine.low %v1070_v43, %v1078_v45  ;;  %v3263_v48 = vcombine.high %v1070_v43, %v1078_v45  ;;  %v1157_v43 = vld [vmem:[#allocation7 + $0x2d0] sm:$0xff]  ;;  %v1158_v45 = vld [vmem:[#allocation7 + $0x2d8] sm:$0xff] }
  0xf9   : > { %2731 = vmatpush1.bf16.msra.mxu0 %v3274_v60  ;;  %2705 = vmatprep.subr.bf16.mxu1 %v3401_v53  ;;  %v3402_v60 = vcombine.low %v1212_v49, %v1220_v50 }
  0xfa   : > { %2732 = vmatprep.subr.bf16.mxu0 %v3291_v62  ;;  %v3419_v62 = vcombine.high %v1228_v57, %v1236_v58 }
  0xfc   : > { %2706 = vmatpush1.bf16.msra.mxu1 %v3400_v59  ;;  %v1053_v59 = vlaneseq }
  0xfd   : > { %2733 = vmatpush1.bf16.msra.mxu0 %v3290_v4  ;;  %2707 = vmatprep.subr.bf16.mxu1 %v3417_v61  ;;  %v3418_v4 = vcombine.low %v1228_v57, %v1236_v58 }
  0xfe   : > { %2734 = vmatprep.subr.bf16.mxu0 %v3307_v6  ;;  %v3435_v6 = vcombine.high %v1244_v1, %v1252_v2 }
 0x100   : > { %2708 = vmatpush1.bf16.msra.mxu1 %v3416_v3 }
 0x101   : > { %2735 = vmatpush1.bf16.msra.mxu0 %v3306_v12  ;;  %2709 = vmatprep.subr.bf16.mxu1 %v3433_v5  ;;  %v3434_v12 = vcombine.low %v1244_v1, %v1252_v2 }
 0x102   : > { %2736 = vmatprep.subr.bf16.mxu0 %v3323_v14  ;;  %v3451_v14 = vcombine.high %v1260_v9, %v1268_v10 }
 0x104   : > { %2710 = vmatpush1.bf16.msra.mxu1 %v3432_v11  ;;  %v1093_v11 = vld [vmem:[#allocation7 + $0xd0] sm:$0xff] }
 0x105   : > { %2737 = vmatpush1.bf16.msra.mxu0 %v3322_v20  ;;  %2711 = vmatprep.subr.bf16.mxu1 %v3449_v13  ;;  %v3450_v20 = vcombine.low %v1260_v9, %v1268_v10  ;;  %v1085_v10 = vld [vmem:[#allocation7 + $0x90] sm:$0xff]  ;;  %v1094_v13 = vld [vmem:[#allocation7 + $0xd8] sm:$0xff] }
 0x106   : > { %2738 = vmatprep.subr.bf16.mxu0 %v3339_v22  ;;  %v3467_v22 = vcombine.high %v1276_v17, %v1284_v18  ;;  %v3277_v17 = vcombine.high %v1085_v10, %v1093_v11 }
 0x108   : > { %2712 = vmatpush1.bf16.msra.mxu1 %v3448_v19  ;;  %v1109_v19 = vld [vmem:[#allocation7 + $0x150] sm:$0xff] }
 0x109   : > { %2739 = vmatpush1.bf16.msra.mxu0 %v3338_v28  ;;  %2713 = vmatprep.subr.bf16.mxu1 %v3465_v21  ;;  %v3481_v28 = vcombine.high %v1291_v25, %v1299_v26  ;;  %v1110_v21 = vld [vmem:[#allocation7 + $0x158] sm:$0xff] }
 0x10a   : > { %2740 = vmatprep.subr.bf16.mxu0 %v3355_v30  ;;  %v3480_v30 = vcombine.low %v1291_v25, %v1299_v26  ;;  %v1117_v26 = vld [vmem:[#allocation7 + $0x190] sm:$0xff] }
 0x10c   : > { %2714 = vmatpush1.bf16.msra.mxu1 %v3464_v23 }
 0x10d   : > { %2741 = vmatpush1.bf16.msra.mxu0 %v3354_v36  ;;  %2715 = vmatprep.subr.bf16.mxu1 %v3481_v28  ;;  %v3497_v36 = vcombine.high %v1307_v33, %v1315_v34  ;;  %v1118_v28 = vld [vmem:[#allocation7 + $0x198] sm:$0xff] }
 0x10e   : > { %2742 = vmatprep.subr.bf16.mxu0 %v3371_v38  ;;  %v3496_v38 = vcombine.low %v1307_v33, %v1315_v34  ;;  %v3311_v33 = vcombine.high %v1118_v28, %v1126_v29  ;;  %v1133_v34 = vld [vmem:[#allocation7 + $0x210] sm:$0xff] }
 0x110   : > { %2716 = vmatpush1.bf16.msra.mxu1 %v3480_v30  ;;  %v3292_v30 = vcombine.low %v1101_v16, %v1109_v19 }
 0x111   : > { %2743 = vmatpush1.bf16.msra.mxu0 %v3370_v44  ;;  %2717 = vmatprep.subr.bf16.mxu1 %v3497_v36  ;;  %v3261_v44 = vcombine.high %v1069_v41, %v1077_v42  ;;  %v1134_v36 = vld [vmem:[#allocation7 + $0x218] sm:$0xff] }
 0x112   : > { %2744 = vmatprep.subr.bf16.mxu0 %v3387_v46  ;;  %v3260_v46 = vcombine.low %v1069_v41, %v1077_v42  ;;  %v3327_v41 = vcombine.high %v1134_v36, %v1142_v37  ;;  %v1149_v42 = vld [vmem:[#allocation7 + $0x290] sm:$0xff] }
 0x114   : > { %2718 = vmatpush1.bf16.msra.mxu1 %v3496_v38  ;;  %v3308_v38 = vcombine.low %v1117_v26, %v1125_v27 }
 0x115   : > { %2745 = vmatpush1.bf16.msra.mxu0 %v3386_v52  ;;  %2769 = vmatprep.subr.bf16.mxu1 %v3261_v44  ;;  %v1150_v44 = vld [vmem:[#allocation7 + $0x298] sm:$0xff] }
 0x116   : > { %2746 = vmatprep.subr.bf16.mxu0 %v3403_v54 }
 0x119   : > { %2747 = vmatpush1.bf16.msra.mxu0 %v3402_v60  ;;  %v4077_v60 = vshrl.u32 %v1053_v59, 7  ;;  %v1189_v59 = vld [vmem:[#allocation7 + $0x3d0] sm:$0xff] }
 0x11a   : > { %2748 = vmatprep.subr.bf16.mxu0 %v3419_v62  ;;  %v1051_v62 = vld [vmem:[#allocation5] sm:$0x3] }
 0x11b   : > { %v4080_v61 = vsub.s32 0, %v4077_v60  ;;  %v4083_v63 = vsub.s32 1, %v4077_v60 }
 0x11d   : > { %2749 = vmatpush1.bf16.msra.mxu0 %v3418_v4  ;;  %v1056_v0 = vrot.slane %v1051_v62, %v4080_v61  ;;  %v1060_v2 = vrot.slane %v1051_v62, %v4083_v63  ;;  %v1182_v62 = vld [vmem:[#allocation7 + $0x398] sm:$0xff] }
 0x11e   : > { %2750 = vmatprep.subr.bf16.mxu0 %v3435_v6 }
 0x121   : > { %2751 = vmatpush1.bf16.msra.mxu0 %v3434_v12  ;;  %v1086_v12 = vld [vmem:[#allocation7 + $0x98] sm:$0xff] }
 0x122   : > { %2752 = vmatprep.subr.bf16.mxu0 %v3451_v14  ;;  %v3279_v18 = vcombine.high %v1086_v12, %v1094_v13  ;;  %v3278_v23 = vcombine.low %v1086_v12, %v1094_v13  ;;  %v1213_v13 = vld [vmem:[#allocation7 + $0x490] sm:$0xff] }
 0x125   : > { %2753 = vmatpush1.bf16.msra.mxu0 %v3450_v20  ;;  %v1102_v20 = vld [vmem:[#allocation7 + $0x118] sm:$0xff] }
 0x126   : > { %2754 = vmatprep.subr.bf16.mxu0 %v3467_v22  ;;  %v3276_v22 = vcombine.low %v1085_v10, %v1093_v11  ;;  %v3295_v25 = vcombine.high %v1102_v20, %v1110_v21 }
 0x129   : > { %2755 = vmatpush1.bf16.msra.mxu0 %v3466_v24  ;;  %v3293_v24 = vcombine.high %v1101_v16, %v1109_v19  ;;  %v1221_v16 = vld [vmem:[#allocation7 + $0x4d0] sm:$0xff] }
 0x12a   : > { %2756 = vmatprep.subr.bf16.mxu0 %v3483_v32  ;;  %v3309_v32 = vcombine.high %v1117_v26, %v1125_v27  ;;  %v1238_v26 = vld [vmem:[#allocation7 + $0x558] sm:$0xff]  ;;  %v3404_v27 = vcombine.low %v1213_v13, %v1221_v16 }
 0x12d   : > { %2757 = vmatpush1.bf16.msra.mxu0 %v3482_v31  ;;  %v3294_v31 = vcombine.low %v1102_v20, %v1110_v21  ;;  %v3405_v21 = vcombine.high %v1213_v13, %v1221_v16  ;;  %v1080_v13 = vld [vmem:[#allocation7 + $0x68] sm:$0xff] }
 0x12e   : > { %2758 = vmatprep.subr.bf16.mxu0 %v3499_v40  ;;  %v3325_v40 = vcombine.high %v1133_v34, %v1141_v35 }
 0x131   : > { %2759 = vmatpush1.bf16.msra.mxu0 %v3498_v39  ;;  %v3310_v39 = vcombine.low %v1118_v28, %v1126_v29 }
 0x132   : > { %2810 = vmatprep.subr.bf16.mxu0 %v3263_v48  ;;  %v3341_v48 = vcombine.high %v1149_v42, %v1157_v43 }
 0x187   : > { %v953_v49 = vpop.f32.mrb[0].mxu0 }
 0x188   : > { %v994_v50 = vpop.f32.mrb[0].mxu1  ;;  %v955_v52 = vpop.f32.mrb[1].mxu0 }
 0x189   : > { %v995_v51 = vadd.f32 %v994_v50, %v953_v49  ;;  %v996_v53 = vpop.f32.mrb[1].mxu1  ;;  %v957_v55 = vpop.f32.mrb[2].mxu0  ;;  %v3343_v49 = vcombine.high %v1150_v44, %v1158_v45  ;;  %v1165_v50 = vld [vmem:[#allocation7 + $0x310] sm:$0xff] }
 0x18a   : > { %v997_v54 = vadd.f32 %v996_v53, %v955_v52  ;;  %v998_v56 = vpop.f32.mrb[2].mxu1  ;;  %v958_v57 = vpop.f32.mrb[3].mxu0  ;;  %v1166_v52 = vld [vmem:[#allocation7 + $0x318] sm:$0xff]  ;;  %v3342_v55 = vcombine.low %v1150_v44, %v1158_v45 }
 0x18b   : > { %v999_v58 = vpop.f32.mrb[3].mxu1  ;;  %v1174_v53 = vld [vmem:[#allocation7 + $0x358] sm:$0xff] }
 0x18c   : > { %v3359_v57 = vcombine.high %v1166_v52, %v1174_v53  ;;  %v1181_v58 = vld [vmem:[#allocation7 + $0x390] sm:$0xff] }
 0x1c7   : > { %v1035_v1 = vpop.f32.mrb[4].mxu0 }
 0x1c8   : > { %v1036_v3 = vadd.f32 %v1035_v1, %v995_v51  ;;  %v1037_v4 = vpop.f32.mrb[5].mxu0  ;;  %v1173_v51 = vld [vmem:[#allocation7 + $0x350] sm:$0xff] }
 0x1c9   : > { %v1038_v5 = vadd.f32 %v1037_v4, %v997_v54  ;;  %v1039_v6 = vpop.f32.mrb[6].mxu0  ;;  %v3340_v54 = vcombine.low %v1149_v42, %v1157_v43  ;;  %v3357_v56 = vcombine.high %v1165_v50, %v1173_v51  ;;  %v3356_v1 = vcombine.low %v1165_v50, %v1173_v51  ;;  %v1270_v42 = vld [vmem:[#allocation7 + $0x658] sm:$0xff] }
 0x1ca   : > { %v1063_v7 = vadd.f32 %v1056_v0, %v1036_v3  ;;  %v1040_v8 = vpop.f32.mrb[7].mxu0  ;;  %v1190_v0 = vld [vmem:[#allocation7 + $0x3d8] sm:$0xff]  ;;  %v3373_v3 = vcombine.high %v1181_v58, %v1189_v59  ;;  %v1205_v6 = vld [vmem:[#allocation7 + $0x450] sm:$0xff] }
 0x1cb   : > { %v1064_v9 = vadd.f32 %v1060_v2, %v1038_v5  ;;  %v3358_v2 = vcombine.low %v1166_v52, %v1174_v53  ;;  %v3375_v4 = vcombine.high %v1182_v62, %v1190_v0  ;;  %v1197_v5 = vld [vmem:[#allocation7 + $0x410] sm:$0xff]  ;;  %v1206_v8 = vld [vmem:[#allocation7 + $0x458] sm:$0xff]  ;;  %v3374_v10 = vcombine.low %v1182_v62, %v1190_v0 }
 0x1cc   : > { %v4089_v15 = vpack.c.bf16 %v1063_v7, %v1063_v7  ;;  %v1198_v7 = vld [vmem:[#allocation7 + $0x418] sm:$0xff]  ;;  %v3389_v11 = vcombine.high %v1197_v5, %v1205_v6  ;;  %v3388_v19 = vcombine.low %v1197_v5, %v1205_v6 }
 0x1cd   : > { %v4087_v14 = vpack.c.bf16 %v1064_v9, %v1064_v9  ;;  %v3372_v9 = vcombine.low %v1181_v58, %v1189_v59  ;;  %v3391_v12 = vcombine.high %v1198_v7, %v1206_v8  ;;  %v3390_v20 = vcombine.low %v1198_v7, %v1206_v8  ;;  %v1286_v50 = vld [vmem:[#allocation7 + $0x6d8] sm:$0xff] }
 0x1ce   : > { %v1302_v58 = vld [vmem:[#allocation7 + $0x758] sm:$0xff] }
 0x1cf   : > { %2719 = vmatprep.mubr.bf16.mxu1 %v4087_v14  ;;  %2760 = vmatprep.mubr.bf16.mxu0 %v4087_v14  ;;  %v1318_v5 = vld [vmem:[#allocation7 + $0x7d8] sm:$0xff] }
 0x1d0   : > { %2720 = vmatmul.mubr.bf16.vlgmr.msra.gmra.mrb[4].mxu1 %v4089_v15  ;;  %2761 = vmatmul.mubr.bf16.vlgmr.msra.gmra.mrb[8].mxu0 %v4089_v15 }
 0x1d1   : > { %2770 = vmatpush1.bf16.msra.mxu1 %v3260_v46  ;;  %2811 = vmatpush1.bf16.msra.mxu0 %v3262_v47  ;;  %v3324_v46 = vcombine.low %v1133_v34, %v1141_v35  ;;  %v3326_v47 = vcombine.low %v1134_v36, %v1142_v37  ;;  %v1254_v34 = vld [vmem:[#allocation7 + $0x5d8] sm:$0xff] }
 0x1d2   : > { %2801 = vmatprep.mubr.bf16.mxu1 %v4087_v14  ;;  %2842 = vmatprep.mubr.bf16.mxu0 %v4087_v14 }
 0x1d3   : > { %2771 = vmatprep.subr.bf16.mxu1 %v3277_v17  ;;  %2812 = vmatprep.subr.bf16.mxu0 %v3279_v18  ;;  %v1214_v17 = vld [vmem:[#allocation7 + $0x498] sm:$0xff] }
 0x1d4   : > { %v1222_v18 = vld [vmem:[#allocation7 + $0x4d8] sm:$0xff] }
 0x1d5   : > { %2772 = vmatpush1.bf16.msra.mxu1 %v3276_v22  ;;  %2813 = vmatpush1.bf16.msra.mxu0 %v3278_v23  ;;  %v3407_v22 = vcombine.high %v1214_v17, %v1222_v18  ;;  %v1229_v23 = vld [vmem:[#allocation7 + $0x510] sm:$0xff]  ;;  %v3406_v28 = vcombine.low %v1214_v17, %v1222_v18 }
 0x1d6   : > { %2773 = vmatprep.subr.bf16.mxu1 %v3293_v24  ;;  %2814 = vmatprep.subr.bf16.mxu0 %v3295_v25  ;;  %v1237_v24 = vld [vmem:[#allocation7 + $0x550] sm:$0xff]  ;;  %v1230_v25 = vld [vmem:[#allocation7 + $0x518] sm:$0xff] }
 0x1d7   : > { %v3421_v29 = vcombine.high %v1229_v23, %v1237_v24  ;;  %v3420_v35 = vcombine.low %v1229_v23, %v1237_v24  ;;  %v3422_v36 = vcombine.low %v1230_v25, %v1238_v26  ;;  %v1096_v23 = vld [vmem:[#allocation7 + $0xe8] sm:$0xff] }
 0x1d9   : > { %2774 = vmatpush1.bf16.msra.mxu1 %v3292_v30  ;;  %2815 = vmatpush1.bf16.msra.mxu0 %v3294_v31  ;;  %v3423_v30 = vcombine.high %v1230_v25, %v1238_v26  ;;  %v1245_v31 = vld [vmem:[#allocation7 + $0x590] sm:$0xff] }
 0x1da   : > { %2775 = vmatprep.subr.bf16.mxu1 %v3309_v32  ;;  %2816 = vmatprep.subr.bf16.mxu0 %v3311_v33  ;;  %v1253_v32 = vld [vmem:[#allocation7 + $0x5d0] sm:$0xff]  ;;  %v1246_v33 = vld [vmem:[#allocation7 + $0x598] sm:$0xff] }
 0x1db   : > { %v3437_v37 = vcombine.high %v1245_v31, %v1253_v32  ;;  %v3436_v43 = vcombine.low %v1245_v31, %v1253_v32  ;;  %v3438_v44 = vcombine.low %v1246_v33, %v1254_v34  ;;  %v1112_v31 = vld [vmem:[#allocation7 + $0x168] sm:$0xff] }
 0x1dd   : > { %2776 = vmatpush1.bf16.msra.mxu1 %v3308_v38  ;;  %2817 = vmatpush1.bf16.msra.mxu0 %v3310_v39  ;;  %v3439_v38 = vcombine.high %v1246_v33, %v1254_v34  ;;  %v1261_v39 = vld [vmem:[#allocation7 + $0x610] sm:$0xff] }
 0x1de   : > { %2777 = vmatprep.subr.bf16.mxu1 %v3325_v40  ;;  %2818 = vmatprep.subr.bf16.mxu0 %v3327_v41  ;;  %v1269_v40 = vld [vmem:[#allocation7 + $0x650] sm:$0xff]  ;;  %v1262_v41 = vld [vmem:[#allocation7 + $0x618] sm:$0xff] }
 0x1df   : > { %v3453_v45 = vcombine.high %v1261_v39, %v1269_v40  ;;  %v3452_v51 = vcombine.low %v1261_v39, %v1269_v40  ;;  %v3454_v52 = vcombine.low %v1262_v41, %v1270_v42  ;;  %v1128_v39 = vld [vmem:[#allocation7 + $0x1e8] sm:$0xff] }
 0x1e1   : > { %2778 = vmatpush1.bf16.msra.mxu1 %v3324_v46  ;;  %2819 = vmatpush1.bf16.msra.mxu0 %v3326_v47  ;;  %v3455_v46 = vcombine.high %v1262_v41, %v1270_v42  ;;  %v1277_v47 = vld [vmem:[#allocation7 + $0x690] sm:$0xff] }
 0x1e2   : > { %2779 = vmatprep.subr.bf16.mxu1 %v3341_v48  ;;  %2820 = vmatprep.subr.bf16.mxu0 %v3343_v49  ;;  %v1285_v48 = vld [vmem:[#allocation7 + $0x6d0] sm:$0xff]  ;;  %v1278_v49 = vld [vmem:[#allocation7 + $0x698] sm:$0xff] }
 0x1e3   : > { %v3469_v53 = vcombine.high %v1277_v47, %v1285_v48  ;;  %v3468_v59 = vcombine.low %v1277_v47, %v1285_v48  ;;  %v3470_v62 = vcombine.low %v1278_v49, %v1286_v50  ;;  %v1144_v47 = vld [vmem:[#allocation7 + $0x268] sm:$0xff] }
 0x1e5   : > { %2780 = vmatpush1.bf16.msra.mxu1 %v3340_v54  ;;  %2821 = vmatpush1.bf16.msra.mxu0 %v3342_v55  ;;  %v3471_v54 = vcombine.high %v1278_v49, %v1286_v50  ;;  %v1293_v55 = vld [vmem:[#allocation7 + $0x710] sm:$0xff] }
 0x1e6   : > { %2781 = vmatprep.subr.bf16.mxu1 %v3357_v56  ;;  %2822 = vmatprep.subr.bf16.mxu0 %v3359_v57  ;;  %v1301_v56 = vld [vmem:[#allocation7 + $0x750] sm:$0xff]  ;;  %v1294_v57 = vld [vmem:[#allocation7 + $0x718] sm:$0xff] }
 0x1e7   : > { %v3485_v0 = vcombine.high %v1293_v55, %v1301_v56  ;;  %v3484_v6 = vcombine.low %v1293_v55, %v1301_v56  ;;  %v3486_v7 = vcombine.low %v1294_v57, %v1302_v58  ;;  %v1160_v55 = vld [vmem:[#allocation7 + $0x2e8] sm:$0xff] }
 0x1e9   : > { %2782 = vmatpush1.bf16.msra.mxu1 %v3356_v1  ;;  %2823 = vmatpush1.bf16.msra.mxu0 %v3358_v2  ;;  %v3487_v1 = vcombine.high %v1294_v57, %v1302_v58  ;;  %v1309_v2 = vld [vmem:[#allocation7 + $0x790] sm:$0xff] }
 0x1ea   : > { %2783 = vmatprep.subr.bf16.mxu1 %v3373_v3  ;;  %2824 = vmatprep.subr.bf16.mxu0 %v3375_v4  ;;  %v1317_v3 = vld [vmem:[#allocation7 + $0x7d0] sm:$0xff]  ;;  %v1310_v4 = vld [vmem:[#allocation7 + $0x798] sm:$0xff] }
 0x1eb   : > { %v3501_v8 = vcombine.high %v1309_v2, %v1317_v3  ;;  %v3500_v16 = vcombine.low %v1309_v2, %v1317_v3  ;;  %v3502_v17 = vcombine.low %v1310_v4, %v1318_v5  ;;  %v1176_v2 = vld [vmem:[#allocation7 + $0x368] sm:$0xff] }
 0x1ed   : > { %2784 = vmatpush1.bf16.msra.mxu1 %v3372_v9  ;;  %2825 = vmatpush1.bf16.msra.mxu0 %v3374_v10  ;;  %v3503_v9 = vcombine.high %v1310_v4, %v1318_v5  ;;  %v1071_v10 = vld [vmem:[#allocation7 + $0x20] sm:$0xff] }
 0x1ee   : > { %2785 = vmatprep.subr.bf16.mxu1 %v3389_v11  ;;  %2826 = vmatprep.subr.bf16.mxu0 %v3391_v12  ;;  %v1079_v11 = vld [vmem:[#allocation7 + $0x60] sm:$0xff]  ;;  %v1072_v12 = vld [vmem:[#allocation7 + $0x28] sm:$0xff] }
 0x1ef   : > { %v3265_v18 = vcombine.high %v1071_v10, %v1079_v11  ;;  %v3264_v24 = vcombine.low %v1071_v10, %v1079_v11  ;;  %v3266_v25 = vcombine.low %v1072_v12, %v1080_v13  ;;  %v1192_v10 = vld [vmem:[#allocation7 + $0x3e8] sm:$0xff] }
 0x1f1   : > { %2786 = vmatpush1.bf16.msra.mxu1 %v3388_v19  ;;  %2827 = vmatpush1.bf16.msra.mxu0 %v3390_v20  ;;  %v3267_v19 = vcombine.high %v1072_v12, %v1080_v13  ;;  %v1087_v20 = vld [vmem:[#allocation7 + $0xa0] sm:$0xff] }
 0x1f2   : > { %2787 = vmatprep.subr.bf16.mxu1 %v3405_v21  ;;  %2828 = vmatprep.subr.bf16.mxu0 %v3407_v22  ;;  %v1095_v21 = vld [vmem:[#allocation7 + $0xe0] sm:$0xff]  ;;  %v1088_v22 = vld [vmem:[#allocation7 + $0xa8] sm:$0xff] }
 0x1f3   : > { %v3281_v26 = vcombine.high %v1087_v20, %v1095_v21  ;;  %v3280_v32 = vcombine.low %v1087_v20, %v1095_v21  ;;  %v3282_v33 = vcombine.low %v1088_v22, %v1096_v23  ;;  %v1208_v20 = vld [vmem:[#allocation7 + $0x468] sm:$0xff] }
 0x1f5   : > { %2788 = vmatpush1.bf16.msra.mxu1 %v3404_v27  ;;  %2829 = vmatpush1.bf16.msra.mxu0 %v3406_v28  ;;  %v3283_v27 = vcombine.high %v1088_v22, %v1096_v23  ;;  %v1103_v28 = vld [vmem:[#allocation7 + $0x120] sm:$0xff] }
 0x1f6   : > { %2789 = vmatprep.subr.bf16.mxu1 %v3421_v29  ;;  %2830 = vmatprep.subr.bf16.mxu0 %v3423_v30  ;;  %v1111_v29 = vld [vmem:[#allocation7 + $0x160] sm:$0xff]  ;;  %v1104_v30 = vld [vmem:[#allocation7 + $0x128] sm:$0xff] }
 0x1f7   : > { %v3297_v34 = vcombine.high %v1103_v28, %v1111_v29  ;;  %v3296_v40 = vcombine.low %v1103_v28, %v1111_v29  ;;  %v3298_v41 = vcombine.low %v1104_v30, %v1112_v31  ;;  %v1224_v28 = vld [vmem:[#allocation7 + $0x4e8] sm:$0xff] }
 0x1f9   : > { %2790 = vmatpush1.bf16.msra.mxu1 %v3420_v35  ;;  %2831 = vmatpush1.bf16.msra.mxu0 %v3422_v36  ;;  %v3299_v35 = vcombine.high %v1104_v30, %v1112_v31  ;;  %v1119_v36 = vld [vmem:[#allocation7 + $0x1a0] sm:$0xff] }
 0x1fa   : > { %2791 = vmatprep.subr.bf16.mxu1 %v3437_v37  ;;  %2832 = vmatprep.subr.bf16.mxu0 %v3439_v38  ;;  %v1127_v37 = vld [vmem:[#allocation7 + $0x1e0] sm:$0xff]  ;;  %v1120_v38 = vld [vmem:[#allocation7 + $0x1a8] sm:$0xff] }
 0x1fb   : > { %v3313_v42 = vcombine.high %v1119_v36, %v1127_v37  ;;  %v3312_v48 = vcombine.low %v1119_v36, %v1127_v37  ;;  %v3314_v49 = vcombine.low %v1120_v38, %v1128_v39  ;;  %v1240_v36 = vld [vmem:[#allocation7 + $0x568] sm:$0xff] }
 0x1fd   : > { %2792 = vmatpush1.bf16.msra.mxu1 %v3436_v43  ;;  %2833 = vmatpush1.bf16.msra.mxu0 %v3438_v44  ;;  %v3315_v43 = vcombine.high %v1120_v38, %v1128_v39  ;;  %v1135_v44 = vld [vmem:[#allocation7 + $0x220] sm:$0xff] }
 0x1fe   : > { %2793 = vmatprep.subr.bf16.mxu1 %v3453_v45  ;;  %2834 = vmatprep.subr.bf16.mxu0 %v3455_v46  ;;  %v1143_v45 = vld [vmem:[#allocation7 + $0x260] sm:$0xff]  ;;  %v1136_v46 = vld [vmem:[#allocation7 + $0x228] sm:$0xff] }
 0x1ff   : > { %v3329_v50 = vcombine.high %v1135_v44, %v1143_v45  ;;  %v3328_v56 = vcombine.low %v1135_v44, %v1143_v45  ;;  %v3330_v57 = vcombine.low %v1136_v46, %v1144_v47  ;;  %v1256_v44 = vld [vmem:[#allocation7 + $0x5e8] sm:$0xff] }
 0x201   : > { %2794 = vmatpush1.bf16.msra.mxu1 %v3452_v51  ;;  %2835 = vmatpush1.bf16.msra.mxu0 %v3454_v52  ;;  %v3331_v51 = vcombine.high %v1136_v46, %v1144_v47  ;;  %v1151_v52 = vld [vmem:[#allocation7 + $0x2a0] sm:$0xff] }
 0x202   : > { %2795 = vmatprep.subr.bf16.mxu1 %v3469_v53  ;;  %2836 = vmatprep.subr.bf16.mxu0 %v3471_v54  ;;  %v1159_v53 = vld [vmem:[#allocation7 + $0x2e0] sm:$0xff]  ;;  %v1152_v54 = vld [vmem:[#allocation7 + $0x2a8] sm:$0xff] }
 0x203   : > { %v3345_v58 = vcombine.high %v1151_v52, %v1159_v53  ;;  %v3344_v3 = vcombine.low %v1151_v52, %v1159_v53  ;;  %v3346_v4 = vcombine.low %v1152_v54, %v1160_v55  ;;  %v1272_v52 = vld [vmem:[#allocation7 + $0x668] sm:$0xff] }
 0x205   : > { %2796 = vmatpush1.bf16.msra.mxu1 %v3468_v59  ;;  %2837 = vmatpush1.bf16.msra.mxu0 %v3470_v62  ;;  %v3347_v59 = vcombine.high %v1152_v54, %v1160_v55  ;;  %v1167_v62 = vld [vmem:[#allocation7 + $0x320] sm:$0xff] }
 0x206   : > { %2797 = vmatprep.subr.bf16.mxu1 %v3485_v0  ;;  %2838 = vmatprep.subr.bf16.mxu0 %v3487_v1  ;;  %v1175_v0 = vld [vmem:[#allocation7 + $0x360] sm:$0xff]  ;;  %v1168_v1 = vld [vmem:[#allocation7 + $0x328] sm:$0xff] }
 0x207   : > { %v3361_v5 = vcombine.high %v1167_v62, %v1175_v0  ;;  %v3360_v11 = vcombine.low %v1167_v62, %v1175_v0  ;;  %v3362_v12 = vcombine.low %v1168_v1, %v1176_v2  ;;  %v1288_v62 = vld [vmem:[#allocation7 + $0x6e8] sm:$0xff] }
 0x209   : > { %2798 = vmatpush1.bf16.msra.mxu1 %v3484_v6  ;;  %2839 = vmatpush1.bf16.msra.mxu0 %v3486_v7  ;;  %v3363_v6 = vcombine.high %v1168_v1, %v1176_v2  ;;  %v1183_v7 = vld [vmem:[#allocation7 + $0x3a0] sm:$0xff] }
 0x20a   : > { %2799 = vmatprep.subr.bf16.mxu1 %v3501_v8  ;;  %2840 = vmatprep.subr.bf16.mxu0 %v3503_v9  ;;  %v1191_v8 = vld [vmem:[#allocation7 + $0x3e0] sm:$0xff]  ;;  %v1184_v9 = vld [vmem:[#allocation7 + $0x3a8] sm:$0xff] }
 0x20b   : > { %v3377_v13 = vcombine.high %v1183_v7, %v1191_v8  ;;  %v3376_v21 = vcombine.low %v1183_v7, %v1191_v8  ;;  %v3378_v22 = vcombine.low %v1184_v9, %v1192_v10  ;;  %v1304_v7 = vld [vmem:[#allocation7 + $0x768] sm:$0xff] }
 0x20d   : > { %2800 = vmatpush1.bf16.msra.mxu1 %v3500_v16  ;;  %2841 = vmatpush1.bf16.msra.mxu0 %v3502_v17  ;;  %v3379_v16 = vcombine.high %v1184_v9, %v1192_v10  ;;  %v1199_v17 = vld [vmem:[#allocation7 + $0x420] sm:$0xff] }
 0x20e   : > { %2851 = vmatprep.subr.bf16.mxu1 %v3265_v18  ;;  %2892 = vmatprep.subr.bf16.mxu0 %v3267_v19  ;;  %v1207_v18 = vld [vmem:[#allocation7 + $0x460] sm:$0xff]  ;;  %v1200_v19 = vld [vmem:[#allocation7 + $0x428] sm:$0xff] }
 0x20f   : > { %v3393_v23 = vcombine.high %v1199_v17, %v1207_v18  ;;  %v3392_v29 = vcombine.low %v1199_v17, %v1207_v18  ;;  %v3394_v30 = vcombine.low %v1200_v19, %v1208_v20  ;;  %v1320_v17 = vld [vmem:[#allocation7 + $0x7e8] sm:$0xff] }
 0x210   : > { %2802 = vmatmul.mubr.bf16.vlgmr.msra.gmra.mrb[8].mxu1 %v4089_v15  ;;  %2843 = vmatmul.mubr.bf16.vlgmr.msra.gmra.mrb[12].mxu0 %v4089_v15 }
 0x211   : > { %2852 = vmatpush1.bf16.msra.mxu1 %v3264_v24  ;;  %2883 = vmatprep.mubr.bf16.mxu1 %v4087_v14  ;;  %v3395_v24 = vcombine.high %v1200_v19, %v1208_v20 }
 0x212   : > { %2893 = vmatpush1.bf16.msra.mxu0 %v3266_v25  ;;  %2924 = vmatprep.mubr.bf16.mxu0 %v4087_v14  ;;  %v1215_v25 = vld [vmem:[#allocation7 + $0x4a0] sm:$0xff] }
 0x213   : > { %2853 = vmatprep.subr.bf16.mxu1 %v3281_v26  ;;  %2894 = vmatprep.subr.bf16.mxu0 %v3283_v27  ;;  %v1223_v26 = vld [vmem:[#allocation7 + $0x4e0] sm:$0xff]  ;;  %v1216_v27 = vld [vmem:[#allocation7 + $0x4a8] sm:$0xff] }
 0x214   : > { %v3409_v31 = vcombine.high %v1215_v25, %v1223_v26  ;;  %v3408_v37 = vcombine.low %v1215_v25, %v1223_v26  ;;  %v3410_v38 = vcombine.low %v1216_v27, %v1224_v28  ;;  %v1082_v25 = vld [vmem:[#allocation7 + $0x78] sm:$0xff] }
 0x215   : > { %2854 = vmatpush1.bf16.msra.mxu1 %v3280_v32  ;;  %v3411_v32 = vcombine.high %v1216_v27, %v1224_v28 }
 0x216   : > { %2895 = vmatpush1.bf16.msra.mxu0 %v3282_v33  ;;  %2855 = vmatprep.subr.bf16.mxu1 %v3297_v34  ;;  %v1231_v33 = vld [vmem:[#allocation7 + $0x520] sm:$0xff] }
 0x217   : > { %2896 = vmatprep.subr.bf16.mxu0 %v3299_v35  ;;  %v1239_v34 = vld [vmem:[#allocation7 + $0x560] sm:$0xff]  ;;  %v1232_v35 = vld [vmem:[#allocation7 + $0x528] sm:$0xff] }
 0x218   : > { %v3425_v39 = vcombine.high %v1231_v33, %v1239_v34  ;;  %v3424_v45 = vcombine.low %v1231_v33, %v1239_v34  ;;  %v3426_v46 = vcombine.low %v1232_v35, %v1240_v36  ;;  %v1090_v33 = vld [vmem:[#allocation7 + $0xb8] sm:$0xff] }
 0x219   : > { %2856 = vmatpush1.bf16.msra.mxu1 %v3296_v40  ;;  %v3427_v40 = vcombine.high %v1232_v35, %v1240_v36  ;;  %v1098_v34 = vld [vmem:[#allocation7 + $0xf8] sm:$0xff] }
 0x21a   : > { %2897 = vmatpush1.bf16.msra.mxu0 %v3298_v41  ;;  %2857 = vmatprep.subr.bf16.mxu1 %v3313_v42  ;;  %v1247_v41 = vld [vmem:[#allocation7 + $0x5a0] sm:$0xff] }
 0x21b   : > { %2898 = vmatprep.subr.bf16.mxu0 %v3315_v43  ;;  %v1255_v42 = vld [vmem:[#allocation7 + $0x5e0] sm:$0xff]  ;;  %v1248_v43 = vld [vmem:[#allocation7 + $0x5a8] sm:$0xff] }
 0x21c   : > { %v3441_v47 = vcombine.high %v1247_v41, %v1255_v42  ;;  %v3440_v53 = vcombine.low %v1247_v41, %v1255_v42  ;;  %v3442_v54 = vcombine.low %v1248_v43, %v1256_v44  ;;  %v1114_v41 = vld [vmem:[#allocation7 + $0x178] sm:$0xff] }
 0x21d   : > { %2858 = vmatpush1.bf16.msra.mxu1 %v3312_v48  ;;  %v3443_v48 = vcombine.high %v1248_v43, %v1256_v44  ;;  %v3286_v43 = vcombine.low %v1090_v33, %v1098_v34 }
 0x21e   : > { %2899 = vmatpush1.bf16.msra.mxu0 %v3314_v49  ;;  %2859 = vmatprep.subr.bf16.mxu1 %v3329_v50  ;;  %v1263_v49 = vld [vmem:[#allocation7 + $0x620] sm:$0xff] }
 0x21f   : > { %2900 = vmatprep.subr.bf16.mxu0 %v3331_v51  ;;  %v1271_v50 = vld [vmem:[#allocation7 + $0x660] sm:$0xff]  ;;  %v1264_v51 = vld [vmem:[#allocation7 + $0x628] sm:$0xff] }
 0x220   : > { %v3457_v55 = vcombine.high %v1263_v49, %v1271_v50  ;;  %v3456_v0 = vcombine.low %v1263_v49, %v1271_v50  ;;  %v3458_v1 = vcombine.low %v1264_v51, %v1272_v52  ;;  %v1130_v49 = vld [vmem:[#allocation7 + $0x1f8] sm:$0xff] }
 0x221   : > { %2860 = vmatpush1.bf16.msra.mxu1 %v3328_v56  ;;  %v3459_v56 = vcombine.high %v1264_v51, %v1272_v52 }
 0x222   : > { %2901 = vmatpush1.bf16.msra.mxu0 %v3330_v57  ;;  %2861 = vmatprep.subr.bf16.mxu1 %v3345_v58  ;;  %v1279_v57 = vld [vmem:[#allocation7 + $0x6a0] sm:$0xff] }
 0x223   : > { %2902 = vmatprep.subr.bf16.mxu0 %v3347_v59  ;;  %v1287_v58 = vld [vmem:[#allocation7 + $0x6e0] sm:$0xff]  ;;  %v1280_v59 = vld [vmem:[#allocation7 + $0x6a8] sm:$0xff] }
 0x224   : > { %v3473_v2 = vcombine.high %v1279_v57, %v1287_v58  ;;  %v3472_v8 = vcombine.low %v1279_v57, %v1287_v58  ;;  %v3474_v9 = vcombine.low %v1280_v59, %v1288_v62  ;;  %v1146_v57 = vld [vmem:[#allocation7 + $0x278] sm:$0xff] }
 0x225   : > { %2862 = vmatpush1.bf16.msra.mxu1 %v3344_v3  ;;  %v3475_v3 = vcombine.high %v1280_v59, %v1288_v62 }
 0x226   : > { %2903 = vmatpush1.bf16.msra.mxu0 %v3346_v4  ;;  %2863 = vmatprep.subr.bf16.mxu1 %v3361_v5  ;;  %v1295_v4 = vld [vmem:[#allocation7 + $0x720] sm:$0xff] }
 0x227   : > { %2904 = vmatprep.subr.bf16.mxu0 %v3363_v6  ;;  %v1303_v5 = vld [vmem:[#allocation7 + $0x760] sm:$0xff]  ;;  %v1296_v6 = vld [vmem:[#allocation7 + $0x728] sm:$0xff] }
 0x228   : > { %v3489_v10 = vcombine.high %v1295_v4, %v1303_v5  ;;  %v3488_v18 = vcombine.low %v1295_v4, %v1303_v5  ;;  %v3490_v19 = vcombine.low %v1296_v6, %v1304_v7 }
 0x229   : > { %2864 = vmatpush1.bf16.msra.mxu1 %v3360_v11  ;;  %v3491_v11 = vcombine.high %v1296_v6, %v1304_v7 }
 0x22a   : > { %2905 = vmatpush1.bf16.msra.mxu0 %v3362_v12  ;;  %2865 = vmatprep.subr.bf16.mxu1 %v3377_v13  ;;  %v1311_v12 = vld [vmem:[#allocation7 + $0x7a0] sm:$0xff] }
 0x22b   : > { %2906 = vmatprep.subr.bf16.mxu0 %v3379_v16  ;;  %v1319_v13 = vld [vmem:[#allocation7 + $0x7e0] sm:$0xff]  ;;  %v1312_v16 = vld [vmem:[#allocation7 + $0x7a8] sm:$0xff] }
 0x22c   : > { %v3505_v20 = vcombine.high %v1311_v12, %v1319_v13  ;;  %v3504_v26 = vcombine.low %v1311_v12, %v1319_v13  ;;  %v3506_v27 = vcombine.low %v1312_v16, %v1320_v17 }
 0x22d   : > { %2866 = vmatpush1.bf16.msra.mxu1 %v3376_v21  ;;  %v3507_v21 = vcombine.high %v1312_v16, %v1320_v17 }
 0x22e   : > { %2907 = vmatpush1.bf16.msra.mxu0 %v3378_v22  ;;  %2867 = vmatprep.subr.bf16.mxu1 %v3393_v23  ;;  %v1073_v22 = vld [vmem:[#allocation7 + $0x30] sm:$0xff] }
 0x22f   : > { %2908 = vmatprep.subr.bf16.mxu0 %v3395_v24  ;;  %v1081_v23 = vld [vmem:[#allocation7 + $0x70] sm:$0xff]  ;;  %v1074_v24 = vld [vmem:[#allocation7 + $0x38] sm:$0xff] }
 0x230   : > { %v3269_v28 = vcombine.high %v1073_v22, %v1081_v23  ;;  %v3270_v35 = vcombine.low %v1074_v24, %v1082_v25 }
 0x231   : > { %2868 = vmatpush1.bf16.msra.mxu1 %v3392_v29  ;;  %v3271_v29 = vcombine.high %v1074_v24, %v1082_v25 }
 0x232   : > { %2909 = vmatpush1.bf16.msra.mxu0 %v3394_v30  ;;  %2869 = vmatprep.subr.bf16.mxu1 %v3409_v31  ;;  %v1089_v30 = vld [vmem:[#allocation7 + $0xb0] sm:$0xff] }
 0x233   : > { %2910 = vmatprep.subr.bf16.mxu0 %v3411_v32  ;;  %v1097_v31 = vld [vmem:[#allocation7 + $0xf0] sm:$0xff]  ;;  %v3268_v32 = vcombine.low %v1073_v22, %v1081_v23 }
 0x234   : > { %v3285_v36 = vcombine.high %v1089_v30, %v1097_v31  ;;  %v3284_v42 = vcombine.low %v1089_v30, %v1097_v31 }
 0x235   : > { %2870 = vmatpush1.bf16.msra.mxu1 %v3408_v37  ;;  %v1105_v37 = vld [vmem:[#allocation7 + $0x130] sm:$0xff] }
 0x236   : > { %2911 = vmatpush1.bf16.msra.mxu0 %v3410_v38  ;;  %2871 = vmatprep.subr.bf16.mxu1 %v3425_v39  ;;  %v1113_v38 = vld [vmem:[#allocation7 + $0x170] sm:$0xff]  ;;  %v3287_v39 = vcombine.high %v1090_v33, %v1098_v34 }
 0x237   : > { %2912 = vmatprep.subr.bf16.mxu0 %v3427_v40  ;;  %v1106_v40 = vld [vmem:[#allocation7 + $0x138] sm:$0xff]  ;;  %v3301_v44 = vcombine.high %v1105_v37, %v1113_v38  ;;  %v3300_v50 = vcombine.low %v1105_v37, %v1113_v38  ;;  %v1217_v34 = vld [vmem:[#allocation7 + $0x4b0] sm:$0xff] }
 0x238   : > { %v3302_v51 = vcombine.low %v1106_v40, %v1114_v41  ;;  %v1226_v37 = vld [vmem:[#allocation7 + $0x4f8] sm:$0xff] }
 0x239   : > { %2872 = vmatpush1.bf16.msra.mxu1 %v3424_v45  ;;  %v3303_v45 = vcombine.high %v1106_v40, %v1114_v41 }
 0x23a   : > { %2913 = vmatpush1.bf16.msra.mxu0 %v3426_v46  ;;  %2873 = vmatprep.subr.bf16.mxu1 %v3441_v47  ;;  %v1121_v46 = vld [vmem:[#allocation7 + $0x1b0] sm:$0xff] }
 0x23b   : > { %2914 = vmatprep.subr.bf16.mxu0 %v3443_v48  ;;  %v1129_v47 = vld [vmem:[#allocation7 + $0x1f0] sm:$0xff]  ;;  %v1122_v48 = vld [vmem:[#allocation7 + $0x1b8] sm:$0xff] }
 0x23c   : > { %v3317_v52 = vcombine.high %v1121_v46, %v1129_v47  ;;  %v3318_v58 = vcombine.low %v1122_v48, %v1130_v49 }
 0x23d   : > { %2874 = vmatpush1.bf16.msra.mxu1 %v3440_v53  ;;  %v3319_v53 = vcombine.high %v1122_v48, %v1130_v49 }
 0x23e   : > { %2915 = vmatpush1.bf16.msra.mxu0 %v3442_v54  ;;  %2875 = vmatprep.subr.bf16.mxu1 %v3457_v55  ;;  %v1137_v54 = vld [vmem:[#allocation7 + $0x230] sm:$0xff] }
 0x23f   : > { %2916 = vmatprep.subr.bf16.mxu0 %v3459_v56  ;;  %v1145_v55 = vld [vmem:[#allocation7 + $0x270] sm:$0xff]  ;;  %v1138_v56 = vld [vmem:[#allocation7 + $0x238] sm:$0xff] }
 0x240   : > { %v3333_v59 = vcombine.high %v1137_v54, %v1145_v55  ;;  %v3335_v62 = vcombine.high %v1138_v56, %v1146_v57  ;;  %v3332_v4 = vcombine.low %v1137_v54, %v1145_v55  ;;  %v3334_v5 = vcombine.low %v1138_v56, %v1146_v57 }
 0x241   : > { %2876 = vmatpush1.bf16.msra.mxu1 %v3456_v0  ;;  %v1153_v0 = vld [vmem:[#allocation7 + $0x2b0] sm:$0xff] }
 0x242   : > { %2917 = vmatpush1.bf16.msra.mxu0 %v3458_v1  ;;  %2877 = vmatprep.subr.bf16.mxu1 %v3473_v2  ;;  %v1161_v1 = vld [vmem:[#allocation7 + $0x2f0] sm:$0xff]  ;;  %v1154_v2 = vld [vmem:[#allocation7 + $0x2b8] sm:$0xff] }
 0x243   : > { %2918 = vmatprep.subr.bf16.mxu0 %v3475_v3  ;;  %v1162_v3 = vld [vmem:[#allocation7 + $0x2f8] sm:$0xff]  ;;  %v3349_v6 = vcombine.high %v1153_v0, %v1161_v1  ;;  %v3348_v12 = vcombine.low %v1153_v0, %v1161_v1 }
 0x244   : > { %v3351_v7 = vcombine.high %v1154_v2, %v1162_v3  ;;  %v3350_v13 = vcombine.low %v1154_v2, %v1162_v3 }
 0x245   : > { %2878 = vmatpush1.bf16.msra.mxu1 %v3472_v8  ;;  %v1169_v8 = vld [vmem:[#allocation7 + $0x330] sm:$0xff] }
 0x246   : > { %2919 = vmatpush1.bf16.msra.mxu0 %v3474_v9  ;;  %2879 = vmatprep.subr.bf16.mxu1 %v3489_v10  ;;  %v1177_v9 = vld [vmem:[#allocation7 + $0x370] sm:$0xff]  ;;  %v1170_v10 = vld [vmem:[#allocation7 + $0x338] sm:$0xff] }
 0x247   : > { %2920 = vmatprep.subr.bf16.mxu0 %v3491_v11  ;;  %v1178_v11 = vld [vmem:[#allocation7 + $0x378] sm:$0xff]  ;;  %v3365_v16 = vcombine.high %v1169_v8, %v1177_v9  ;;  %v3364_v22 = vcombine.low %v1169_v8, %v1177_v9 }
 0x248   : > { %v3367_v17 = vcombine.high %v1170_v10, %v1178_v11  ;;  %v3366_v23 = vcombine.low %v1170_v10, %v1178_v11 }
 0x249   : > { %2880 = vmatpush1.bf16.msra.mxu1 %v3488_v18  ;;  %v1185_v18 = vld [vmem:[#allocation7 + $0x3b0] sm:$0xff] }
 0x24a   : > { %2921 = vmatpush1.bf16.msra.mxu0 %v3490_v19  ;;  %2881 = vmatprep.subr.bf16.mxu1 %v3505_v20  ;;  %v1193_v19 = vld [vmem:[#allocation7 + $0x3f0] sm:$0xff]  ;;  %v1186_v20 = vld [vmem:[#allocation7 + $0x3b8] sm:$0xff] }
 0x24b   : > { %2922 = vmatprep.subr.bf16.mxu0 %v3507_v21  ;;  %v1194_v21 = vld [vmem:[#allocation7 + $0x3f8] sm:$0xff]  ;;  %v3381_v24 = vcombine.high %v1185_v18, %v1193_v19  ;;  %v3380_v30 = vcombine.low %v1185_v18, %v1193_v19 }
 0x24c   : > { %v3383_v25 = vcombine.high %v1186_v20, %v1194_v21  ;;  %v3382_v31 = vcombine.low %v1186_v20, %v1194_v21 }
 0x24d   : > { %2882 = vmatpush1.bf16.msra.mxu1 %v3504_v26  ;;  %v1201_v26 = vld [vmem:[#allocation7 + $0x430] sm:$0xff] }
 0x24e   : > { %2923 = vmatpush1.bf16.msra.mxu0 %v3506_v27  ;;  %2933 = vmatprep.subr.bf16.mxu1 %v3269_v28  ;;  %v1209_v27 = vld [vmem:[#allocation7 + $0x470] sm:$0xff]  ;;  %v1202_v28 = vld [vmem:[#allocation7 + $0x438] sm:$0xff] }
 0x24f   : > { %2974 = vmatprep.subr.bf16.mxu0 %v3271_v29  ;;  %v1210_v29 = vld [vmem:[#allocation7 + $0x478] sm:$0xff]  ;;  %v3396_v38 = vcombine.low %v1201_v26, %v1209_v27 }
 0x250   : > { %2884 = vmatmul.mubr.bf16.vlgmr.msra.gmra.mrb[12].mxu1 %v4089_v15  ;;  %v3399_v33 = vcombine.high %v1202_v28, %v1210_v29 }
 0x251   : > { %2925 = vmatmul.mubr.bf16.vlgmr.msra.gmra.mrb[16].mxu0 %v4089_v15  ;;  %2934 = vmatpush1.bf16.msra.mxu1 %v3268_v32  ;;  %v3397_v32 = vcombine.high %v1201_v26, %v1209_v27 }
 0x252   : > { %2965 = vmatprep.mubr.bf16.mxu1 %v4087_v14  ;;  %2975 = vmatpush1.bf16.msra.mxu0 %v3270_v35  ;;  %v1225_v35 = vld [vmem:[#allocation7 + $0x4f0] sm:$0xff] }
 0x253   : > { %3006 = vmatprep.mubr.bf16.mxu0 %v4087_v14  ;;  %2935 = vmatprep.subr.bf16.mxu1 %v3285_v36  ;;  %v3316_v14 = vcombine.low %v1121_v46, %v1129_v47  ;;  %v1218_v36 = vld [vmem:[#allocation7 + $0x4b8] sm:$0xff]  ;;  %v3413_v40 = vcombine.high %v1217_v34, %v1225_v35  ;;  %v3412_v46 = vcombine.low %v1217_v34, %v1225_v35  ;;  %v1341_v34 = vsub.s32 3, %v4077_v60 }
 0x254   : > { %2976 = vmatprep.subr.bf16.mxu0 %v3287_v39  ;;  %v3398_v39 = vcombine.low %v1202_v28, %v1210_v29  ;;  %v3415_v41 = vcombine.high %v1218_v36, %v1226_v37  ;;  %v3414_v47 = vcombine.low %v1218_v36, %v1226_v37 }
 0x255   : > { %2936 = vmatpush1.bf16.msra.mxu1 %v3284_v42  ;;  %v1233_v42 = vld [vmem:[#allocation7 + $0x530] sm:$0xff] }
 0x256   : > { %2977 = vmatpush1.bf16.msra.mxu0 %v3286_v43  ;;  %2937 = vmatprep.subr.bf16.mxu1 %v3301_v44  ;;  %v1241_v43 = vld [vmem:[#allocation7 + $0x570] sm:$0xff]  ;;  %v1234_v44 = vld [vmem:[#allocation7 + $0x538] sm:$0xff] }
 0x257   : > { %2978 = vmatprep.subr.bf16.mxu0 %v3303_v45  ;;  %v1242_v45 = vld [vmem:[#allocation7 + $0x578] sm:$0xff]  ;;  %v3429_v48 = vcombine.high %v1233_v42, %v1241_v43  ;;  %v3428_v54 = vcombine.low %v1233_v42, %v1241_v43 }
 0x258   : > { %v3431_v49 = vcombine.high %v1234_v44, %v1242_v45  ;;  %v3430_v55 = vcombine.low %v1234_v44, %v1242_v45 }
 0x259   : > { %2938 = vmatpush1.bf16.msra.mxu1 %v3300_v50  ;;  %v1249_v50 = vld [vmem:[#allocation7 + $0x5b0] sm:$0xff] }
 0x25a   : > { %2979 = vmatpush1.bf16.msra.mxu0 %v3302_v51  ;;  %2939 = vmatprep.subr.bf16.mxu1 %v3317_v52  ;;  %v1257_v51 = vld [vmem:[#allocation7 + $0x5f0] sm:$0xff]  ;;  %v1250_v52 = vld [vmem:[#allocation7 + $0x5b8] sm:$0xff] }
 0x25b   : > { %2980 = vmatprep.subr.bf16.mxu0 %v3319_v53  ;;  %v1258_v53 = vld [vmem:[#allocation7 + $0x5f8] sm:$0xff]  ;;  %v3445_v56 = vcombine.high %v1249_v50, %v1257_v51  ;;  %v3444_v0 = vcombine.low %v1249_v50, %v1257_v51  ;;  %v1345_v50 = vsub.s32 4, %v4077_v60  ;;  %v1353_v51 = vsub.s32 6, %v4077_v60 }
 0x25c   : > { %v3447_v57 = vcombine.high %v1250_v52, %v1258_v53  ;;  %v3446_v1 = vcombine.low %v1250_v52, %v1258_v53  ;;  %v1349_v52 = vsub.s32 5, %v4077_v60  ;;  %v1357_v53 = vsub.s32 7, %v4077_v60 }
 0x25d   : > { %2940 = vmatpush1.bf16.msra.mxu1 %v3316_v14  ;;  %v1265_v14 = vld [vmem:[#allocation7 + $0x630] sm:$0xff] }
 0x25e   : > { %2981 = vmatpush1.bf16.msra.mxu0 %v3318_v58  ;;  %2941 = vmatprep.subr.bf16.mxu1 %v3333_v59  ;;  %v1273_v58 = vld [vmem:[#allocation7 + $0x670] sm:$0xff]  ;;  %v1266_v59 = vld [vmem:[#allocation7 + $0x638] sm:$0xff] }
 0x25f   : > { %2982 = vmatprep.subr.bf16.mxu0 %v3335_v62  ;;  %v1274_v62 = vld [vmem:[#allocation7 + $0x678] sm:$0xff]  ;;  %v3461_v2 = vcombine.high %v1265_v14, %v1273_v58  ;;  %v3460_v8 = vcombine.low %v1265_v14, %v1273_v58 }
 0x260   : > { %v3463_v3 = vcombine.high %v1266_v59, %v1274_v62  ;;  %v3462_v9 = vcombine.low %v1266_v59, %v1274_v62 }
 0x261   : > { %2942 = vmatpush1.bf16.msra.mxu1 %v3332_v4  ;;  %v1281_v4 = vld [vmem:[#allocation7 + $0x6b0] sm:$0xff] }
 0x262   : > { %2983 = vmatpush1.bf16.msra.mxu0 %v3334_v5  ;;  %2943 = vmatprep.subr.bf16.mxu1 %v3349_v6  ;;  %v1289_v5 = vld [vmem:[#allocation7 + $0x6f0] sm:$0xff]  ;;  %v1282_v6 = vld [vmem:[#allocation7 + $0x6b8] sm:$0xff] }
 0x263   : > { %2984 = vmatprep.subr.bf16.mxu0 %v3351_v7  ;;  %v1290_v7 = vld [vmem:[#allocation7 + $0x6f8] sm:$0xff]  ;;  %v3477_v10 = vcombine.high %v1281_v4, %v1289_v5  ;;  %v3476_v18 = vcombine.low %v1281_v4, %v1289_v5 }
 0x264   : > { %v3479_v11 = vcombine.high %v1282_v6, %v1290_v7  ;;  %v3478_v19 = vcombine.low %v1282_v6, %v1290_v7  ;;  %v1324_v7 = vld [vmem:[#allocation8 + $0x8] sm:$0xff] }
 0x265   : > { %2944 = vmatpush1.bf16.msra.mxu1 %v3348_v12  ;;  %v1297_v12 = vld [vmem:[#allocation7 + $0x730] sm:$0xff] }
 0x266   : > { %2985 = vmatpush1.bf16.msra.mxu0 %v3350_v13  ;;  %2945 = vmatprep.subr.bf16.mxu1 %v3365_v16  ;;  %v1305_v13 = vld [vmem:[#allocation7 + $0x770] sm:$0xff]  ;;  %v1298_v16 = vld [vmem:[#allocation7 + $0x738] sm:$0xff] }
 0x267   : > { %2986 = vmatprep.subr.bf16.mxu0 %v3367_v17  ;;  %v1306_v17 = vld [vmem:[#allocation7 + $0x778] sm:$0xff]  ;;  %v3493_v20 = vcombine.high %v1297_v12, %v1305_v13  ;;  %v3492_v26 = vcombine.low %v1297_v12, %v1305_v13 }
 0x268   : > { %v3495_v21 = vcombine.high %v1298_v16, %v1306_v17  ;;  %v3494_v27 = vcombine.low %v1298_v16, %v1306_v17 }
 0x269   : > { %2946 = vmatpush1.bf16.msra.mxu1 %v3364_v22  ;;  %v1313_v22 = vld [vmem:[#allocation7 + $0x7b0] sm:$0xff] }
 0x26a   : > { %2987 = vmatpush1.bf16.msra.mxu0 %v3366_v23  ;;  %2947 = vmatprep.subr.bf16.mxu1 %v3381_v24  ;;  %v1321_v23 = vld [vmem:[#allocation7 + $0x7f0] sm:$0xff]  ;;  %v1314_v24 = vld [vmem:[#allocation7 + $0x7b8] sm:$0xff] }
 0x26b   : > { %2988 = vmatprep.subr.bf16.mxu0 %v3383_v25  ;;  %v1322_v25 = vld [vmem:[#allocation7 + $0x7f8] sm:$0xff]  ;;  %v3509_v28 = vcombine.high %v1313_v22, %v1321_v23 }
 0x26c   : > { %v3511_v29 = vcombine.high %v1314_v24, %v1322_v25 }
 0x26d   : > { %2948 = vmatpush1.bf16.msra.mxu1 %v3380_v30  ;;  %v3508_v30 = vcombine.low %v1313_v22, %v1321_v23 }
 0x26e   : > { %2989 = vmatpush1.bf16.msra.mxu0 %v3382_v31  ;;  %2949 = vmatprep.subr.bf16.mxu1 %v3397_v32  ;;  %v3510_v31 = vcombine.low %v1314_v24, %v1322_v25  ;;  %v1337_v32 = vsub.s32 2, %v4077_v60  ;;  %v1386_v25 = vrot.slane %v1324_v7, %v1353_v51 }
 0x26f   : > { %2990 = vmatprep.subr.bf16.mxu0 %v3399_v33  ;;  %v1323_v33 = vld [vmem:[#allocation8] sm:$0xff] }
 0x270   : > { %v1330_v35 = vrot.slane %v1323_v33, %v4080_v61  ;;  %v1338_v36 = vrot.slane %v1323_v33, %v1337_v32  ;;  %v1334_v37 = vrot.slane %v1323_v33, %v4083_v63 }
 0x271   : > { %2950 = vmatpush1.bf16.msra.mxu1 %v3396_v38  ;;  %v1342_v38 = vrot.slane %v1323_v33, %v1341_v34 }
 0x272   : > { %2991 = vmatpush1.bf16.msra.mxu0 %v3398_v39  ;;  %2951 = vmatprep.subr.bf16.mxu1 %v3413_v40 }
 0x273   : > { %2992 = vmatprep.subr.bf16.mxu0 %v3415_v41 }
 0x275   : > { %2952 = vmatpush1.bf16.msra.mxu1 %v3412_v46 }
 0x276   : > { %2993 = vmatpush1.bf16.msra.mxu0 %v3414_v47  ;;  %2953 = vmatprep.subr.bf16.mxu1 %v3429_v48 }
 0x277   : > { %2994 = vmatprep.subr.bf16.mxu0 %v3431_v49 }
 0x279   : > { %2954 = vmatpush1.bf16.msra.mxu1 %v3428_v54  ;;  %v1346_v54 = vrot.slane %v1323_v33, %v1345_v50 }
 0x27a   : > { %2995 = vmatpush1.bf16.msra.mxu0 %v3430_v55  ;;  %2955 = vmatprep.subr.bf16.mxu1 %v3445_v56  ;;  %v1354_v55 = vrot.slane %v1323_v33, %v1353_v51  ;;  %v1350_v56 = vrot.slane %v1323_v33, %v1349_v52 }
 0x27b   : > { %2996 = vmatprep.subr.bf16.mxu0 %v3447_v57  ;;  %v1358_v57 = vrot.slane %v1323_v33, %v1357_v53 }
 0x27d   : > { %2956 = vmatpush1.bf16.msra.mxu1 %v3444_v0 }
 0x27e   : > { %2997 = vmatpush1.bf16.msra.mxu0 %v3446_v1  ;;  %2957 = vmatprep.subr.bf16.mxu1 %v3461_v2 }
 0x27f   : > { %2998 = vmatprep.subr.bf16.mxu0 %v3463_v3 }
 0x281   : > { %2958 = vmatpush1.bf16.msra.mxu1 %v3460_v8  ;;  %v1362_v8 = vrot.slane %v1324_v7, %v4080_v61 }
 0x282   : > { %2999 = vmatpush1.bf16.msra.mxu0 %v3462_v9  ;;  %2959 = vmatprep.subr.bf16.mxu1 %v3477_v10  ;;  %v1370_v9 = vrot.slane %v1324_v7, %v1337_v32  ;;  %v1366_v10 = vrot.slane %v1324_v7, %v4083_v63  ;;  %v1378_v63 = vrot.slane %v1324_v7, %v1345_v50 }
 0x283   : > { %3000 = vmatprep.subr.bf16.mxu0 %v3479_v11  ;;  %v1374_v11 = vrot.slane %v1324_v7, %v1341_v34 }
 0x285   : > { %2960 = vmatpush1.bf16.msra.mxu1 %v3476_v18 }
 0x286   : > { %3001 = vmatpush1.bf16.msra.mxu0 %v3478_v19  ;;  %2961 = vmatprep.subr.bf16.mxu1 %v3493_v20 }
 0x287   : > { %3002 = vmatprep.subr.bf16.mxu0 %v3495_v21 }
 0x289   : > { %2962 = vmatpush1.bf16.msra.mxu1 %v3492_v26  ;;  %v1382_v26 = vrot.slane %v1324_v7, %v1349_v52 }
 0x28a   : > { %3003 = vmatpush1.bf16.msra.mxu0 %v3494_v27  ;;  %2963 = vmatprep.subr.bf16.mxu1 %v3509_v28  ;;  %v1390_v27 = vrot.slane %v1324_v7, %v1357_v53 }
 0x28b   : > { %3004 = vmatprep.subr.bf16.mxu0 %v3511_v29 }
 0x28d   : > { %2964 = vmatpush1.bf16.msra.mxu1 %v3508_v30 }
 0x28e   : > { %3005 = vmatpush1.bf16.msra.mxu0 %v3510_v31 }
 0x290   : > { %2966 = vmatmul.mubr.bf16.vlgmr.msra.gmra.mrb[16].mxu1 %v4089_v15 }
 0x291   : > { %3007 = vmatmul.mubr.bf16.vlgmr.msra.gmra.mrb[20].mxu0 %v4089_v15 }
 0x2a3   : > { %v2721_v15 = vpop.f32.mrb[4].mxu1  ;;  %v2762_v39 = vpop.f32.mrb[8].mxu0 }
 0x2a4   : > { %v2722_v40 = vadd.f32 %v2721_v15, %v1330_v35  ;;  %v2763_v41 = vadd.f32 %v2762_v39, %v1338_v36  ;;  %v2723_v42 = vpop.f32.mrb[5].mxu1  ;;  %v2764_v43 = vpop.f32.mrb[9].mxu0 }
 0x2a5   : > { %v2724_v44 = vadd.f32 %v2723_v42, %v1334_v37  ;;  %v2765_v45 = vadd.f32 %v2764_v43, %v1342_v38  ;;  %v2725_v46 = vpop.f32.mrb[6].mxu1  ;;  %v2766_v47 = vpop.f32.mrb[10].mxu0 }
 0x2a6   : > { %3015 = vst [vmem:[%s4116_s28] sm:$0xff] %v2722_v40  ;;  %3017 = vst [vmem:[%s4116_s28 + $0x10] sm:$0xff] %v2763_v41  ;;  %v2726_v48 = vpop.f32.mrb[7].mxu1  ;;  %v2767_v49 = vpop.f32.mrb[11].mxu0 }
 0x2a7   : > { %3016 = vst [vmem:[%s4116_s28 + $0x8] sm:$0xff] %v2724_v44  ;;  %3018 = vst [vmem:[%s4116_s28 + $0x18] sm:$0xff] %v2765_v45 }
 0x2e3   : > { %v2803_v14 = vpop.f32.mrb[8].mxu1  ;;  %v2844_v58 = vpop.f32.mrb[12].mxu0 }
 0x2e4   : > { %v2804_v59 = vadd.f32 %v2803_v14, %v1346_v54  ;;  %v2845_v62 = vadd.f32 %v2844_v58, %v1354_v55  ;;  %v2805_v0 = vpop.f32.mrb[9].mxu1  ;;  %v2846_v1 = vpop.f32.mrb[13].mxu0 }
 0x2e5   : > { %v2806_v2 = vadd.f32 %v2805_v0, %v1350_v56  ;;  %v2847_v3 = vadd.f32 %v2846_v1, %v1358_v57  ;;  %v2807_v4 = vpop.f32.mrb[10].mxu1  ;;  %v2848_v5 = vpop.f32.mrb[14].mxu0 }
 0x2e6   : > { %3019 = vst [vmem:[%s4116_s28 + $0x20] sm:$0xff] %v2804_v59  ;;  %3021 = vst [vmem:[%s4116_s28 + $0x30] sm:$0xff] %v2845_v62  ;;  %v2808_v60 = vpop.f32.mrb[11].mxu1  ;;  %v2849_v6 = vpop.f32.mrb[15].mxu0 }
 0x2e7   : > { %3020 = vst [vmem:[%s4116_s28 + $0x28] sm:$0xff] %v2806_v2  ;;  %3022 = vst [vmem:[%s4116_s28 + $0x38] sm:$0xff] %v2847_v3 }
 0x323   : > { %v2885_v12 = vpop.f32.mrb[12].mxu1 }
 0x324   : > { %v2886_v13 = vadd.f32 %v2885_v12, %v1362_v8  ;;  %v2926_v16 = vpop.f32.mrb[16].mxu0  ;;  %v2887_v17 = vpop.f32.mrb[13].mxu1 }
 0x325   : > { %v2927_v18 = vadd.f32 %v2926_v16, %v1370_v9  ;;  %v2888_v19 = vadd.f32 %v2887_v17, %v1366_v10  ;;  %v2928_v20 = vpop.f32.mrb[17].mxu0  ;;  %v2889_v21 = vpop.f32.mrb[14].mxu1 }
 0x326   : > { %3023 = vst [vmem:[%s4116_s28 + $0x40] sm:$0xff] %v2886_v13  ;;  %v2929_v22 = vadd.f32 %v2928_v20, %v1374_v11  ;;  %v2930_v23 = vpop.f32.mrb[18].mxu0  ;;  %v2890_v24 = vpop.f32.mrb[15].mxu1 }
 0x327   : > { %3025 = vst [vmem:[%s4116_s28 + $0x50] sm:$0xff] %v2927_v18  ;;  %3024 = vst [vmem:[%s4116_s28 + $0x48] sm:$0xff] %v2888_v19  ;;  %v2931_v61 = vpop.f32.mrb[19].mxu0 }
 0x328   : > { %3026 = vst [vmem:[%s4116_s28 + $0x58] sm:$0xff] %v2929_v22 }
 0x363   : > { %v2967_v28 = vpop.f32.mrb[16].mxu1 }
 0x364   : > { %v2968_v29 = vadd.f32 %v2967_v28, %v1378_v63  ;;  %v3008_v30 = vpop.f32.mrb[20].mxu0  ;;  %v2969_v31 = vpop.f32.mrb[17].mxu1 }
 0x365   : > { %v3009_v32 = vadd.f32 %v3008_v30, %v1386_v25  ;;  %v2970_v33 = vadd.f32 %v2969_v31, %v1382_v26  ;;  %v3010_v34 = vpop.f32.mrb[21].mxu0  ;;  %v2971_v35 = vpop.f32.mrb[18].mxu1 }
 0x366   : > { %3027 = vst [vmem:[%s4116_s28 + $0x60] sm:$0xff] %v2968_v29  ;;  %v3011_v36 = vadd.f32 %v3010_v34, %v1390_v27  ;;  %v3012_v37 = vpop.f32.mrb[22].mxu0  ;;  %v2972_v38 = vpop.f32.mrb[19].mxu1 }
 0x367   : > { %3029 = vst [vmem:[%s4116_s28 + $0x70] sm:$0xff] %v3009_v32  ;;  %3028 = vst [vmem:[%s4116_s28 + $0x68] sm:$0xff] %v2970_v33  ;;  %v3013_v15 = vpop.f32.mrb[23].mxu0 }
 0x368   : > { %3030 = vst [vmem:[%s4116_s28 + $0x78] sm:$0xff] %v3011_v36 }
 0x369 PF: > { %s18_s20 = sadd.s32 1, %s3880_s20   ;;  %s4166_s18 = smov %s3876_s19 }
 0x36a   : > { %p15_p6 = scmp.ge.s32.totalorder %s18_s20, 10   ;;  %s4167_s19 = smov %s4169_s26 }
 0x36c   :  { %17 = sbr.rel (!%p15_p6) target bundleno = 4 (0x4), region = 96 }
 0x373   :  { %3052 = vsyncpa [#allocation4], 1 }
 0x374   :  { %3054 = vsyncpa [#allocation4 + $0x1], 1 }
 0x375   :  { %3055 = vsyncpa [#allocation6], 1 }
 0x376   :  { %3056 = vsyncpa [#allocation9], 1 }

// kernel: forward.7
= control target key start
LH: loop header
LB: loop body
LE: loop exit
PB: predicated region body
PF: predicated region fallthrough
CT: control target
= control target key end

     0   :  { %s4687_s12 = smov 0   ;;  %s6380_s0 = inlined_call_operand.vmem [shape: bf16[8,8,512], index: 0, kind: input, shape index: {}]   ;;  %s6381_s1 = inlined_call_operand.vmem [shape: bf16[512,2048], index: 1, kind: input, shape index: {}]   ;;  %s6382_s2 = inlined_call_operand.vmem [shape: f32[1,2048], index: 2, kind: input, shape index: {}]   ;;  %s6383_s3 = inlined_call_operand.vmem [shape: f32[8,8,2048], index: 3, kind: output, shape index: {}]  }
   0x1 LB: > { %s4070_s13 = sadd.s32 4294967295, %s4665_s12   ;;  %p4074_p0 = scmp.ge.s32.totalorder %s4665_s12, 1  ;;  %s4665_s12 = sphi %s4687_s12, %s13_s12  }
   0x2   : > { %p137_p1 = scmp.lt.s32.totalorder %s4665_s12, 9 }
   0x4   : > { %p138_p2 = pnand %p4074_p0, %p137_p1 }
   0x5   : > { %v173_v0 = vld [vmem:[%s6381_s1] sm:$0xff] (!%p138_p2)  ;;  %v174_v2 = vld [vmem:[%s6381_s1 + $0x8] sm:$0xff] (!%p138_p2)  ;;  %p161_p3 = scmp.lt.s32.totalorder (!%p138_p2), %s4070_s13, 7 }
   0x6   : > { %141 = sbr.rel (%p138_p2) target bundleno = 737 (0x2e1), region = 32  ;;  %v181_v1 = vld [vmem:[%s6381_s1 + $0x40] sm:$0xff] (!%p138_p2)  ;;  %v182_v4 = vld [vmem:[%s6381_s1 + $0x48] sm:$0xff] (!%p138_p2) }
   0x7   : > { %v4084_v3 = vcombine.high (!%p138_p2), %v173_v0, %v181_v1  ;;  %v4083_v5 = vcombine.low (!%p138_p2), %v173_v0, %v181_v1  ;;  %v189_v6 = vld [vmem:[%s6381_s1 + $0x80] sm:$0xff] (!%p138_p2)  ;;  %v4086_v8 = vcombine.high (!%p138_p2), %v174_v2, %v182_v4  ;;  %v4085_v9 = vcombine.low (!%p138_p2), %v174_v2, %v182_v4  ;;  %v190_v11 = vld [vmem:[%s6381_s1 + $0x88] sm:$0xff] (!%p138_p2) }
   0x8   : > { %v197_v7 = vld [vmem:[%s6381_s1 + $0xc0] sm:$0xff] (!%p138_p2)  ;;  %v198_v12 = vld [vmem:[%s6381_s1 + $0xc8] sm:$0xff] (!%p138_p2) }
   0x9   : > { %v4100_v10 = vcombine.high (!%p138_p2), %v189_v6, %v197_v7  ;;  %v205_v13 = vld [vmem:[%s6381_s1 + $0x100] sm:$0xff] (!%p138_p2)  ;;  %3343 = vmatprep.subr.bf16.mxu0 (!%p138_p2), %v4084_v3  ;;  %v4102_v14 = vcombine.high (!%p138_p2), %v190_v11, %v198_v12  ;;  %v206_v16 = vld [vmem:[%s6381_s1 + $0x108] sm:$0xff] (!%p138_p2)  ;;  %3425 = vmatprep.subr.bf16.mxu1 (!%p138_p2), %v4086_v8  ;;  %v4099_v18 = vcombine.low (!%p138_p2), %v189_v6, %v197_v7 }
   0xa   : > { %v213_v15 = vld [vmem:[%s6381_s1 + $0x140] sm:$0xff] (!%p138_p2)  ;;  %v214_v17 = vld [vmem:[%s6381_s1 + $0x148] sm:$0xff] (!%p138_p2)  ;;  %3344 = vmatpush1.bf16.msra.mxu0 (!%p138_p2), %v4083_v5  ;;  %3426 = vmatpush1.bf16.msra.mxu1 (!%p138_p2), %v4085_v9  ;;  %v4101_v19 = vcombine.low (!%p138_p2), %v190_v11, %v198_v12 }
   0xb   : > { %3345 = vmatprep.subr.bf16.mxu0 (!%p138_p2), %v4100_v10  ;;  %v4116_v20 = vcombine.high (!%p138_p2), %v205_v13, %v213_v15  ;;  %3427 = vmatprep.subr.bf16.mxu1 (!%p138_p2), %v4102_v14  ;;  %v4118_v21 = vcombine.high (!%p138_p2), %v206_v16, %v214_v17  ;;  %v221_v22 = vld [vmem:[%s6381_s1 + $0x180] sm:$0xff] (!%p138_p2)  ;;  %v222_v24 = vld [vmem:[%s6381_s1 + $0x188] sm:$0xff] (!%p138_p2)  ;;  %v4115_v26 = vcombine.low (!%p138_p2), %v205_v13, %v213_v15 }
   0xc   : > { %v229_v23 = vld [vmem:[%s6381_s1 + $0x1c0] sm:$0xff] (!%p138_p2)  ;;  %v230_v25 = vld [vmem:[%s6381_s1 + $0x1c8] sm:$0xff] (!%p138_p2)  ;;  %v4117_v27 = vcombine.low (!%p138_p2), %v206_v16, %v214_v17 }
   0xd   : > { %v4132_v28 = vcombine.high %v221_v22, %v229_v23  ;;  %v4134_v29 = vcombine.high %v222_v24, %v230_v25  ;;  %v237_v30 = vld [vmem:[%s6381_s1 + $0x200] sm:$0xff]  ;;  %v238_v32 = vld [vmem:[%s6381_s1 + $0x208] sm:$0xff]  ;;  %s6385_s13 = smov (!%p161_p3, %s4070_s13), 7  ;;  %v4131_v34 = vcombine.low %v221_v22, %v229_v23  ;;  %v4133_v35 = vcombine.low %v222_v24, %v230_v25 }
   0xe   : > { %3346 = vmatpush1.bf16.msra.mxu0 %v4099_v18  ;;  %3428 = vmatpush1.bf16.msra.mxu1 %v4101_v19  ;;  %v245_v31 = vld [vmem:[%s6381_s1 + $0x240] sm:$0xff]  ;;  %v246_v33 = vld [vmem:[%s6381_s1 + $0x248] sm:$0xff]  ;;  %s4597_s10 = sshll.u32 %s6385_s13, 4  ;;  %s4598_s15 = sshll.u32 %s6385_s13, 7 }
   0xf   : > { %3347 = vmatprep.subr.bf16.mxu0 %v4116_v20  ;;  %3429 = vmatprep.subr.bf16.mxu1 %v4118_v21  ;;  %v4148_v36 = vcombine.high %v237_v30, %v245_v31  ;;  %v4150_v37 = vcombine.high %v238_v32, %v246_v33  ;;  %v253_v38 = vld [vmem:[%s6381_s1 + $0x280] sm:$0xff]  ;;  %v254_v40 = vld [vmem:[%s6381_s1 + $0x288] sm:$0xff]  ;;  %v4147_v42 = vcombine.low %v237_v30, %v245_v31  ;;  %s4783_s19 = scalar_lea.vmem %s6380_s0, %s4597_s10  ;;  %s5822_s21 = scalar_lea.vmem %s6383_s3, %s4598_s15 }
  0x10   : > { %v261_v39 = vld [vmem:[%s6381_s1 + $0x2c0] sm:$0xff]  ;;  %v262_v41 = vld [vmem:[%s6381_s1 + $0x2c8] sm:$0xff]  ;;  %v4149_v43 = vcombine.low %v238_v32, %v246_v33 }
  0x11   : > { %v4164_v44 = vcombine.high %v253_v38, %v261_v39  ;;  %v4166_v45 = vcombine.high %v254_v40, %v262_v41  ;;  %v269_v46 = vld [vmem:[%s6381_s1 + $0x300] sm:$0xff]  ;;  %v270_v48 = vld [vmem:[%s6381_s1 + $0x308] sm:$0xff]  ;;  %v4163_v50 = vcombine.low %v253_v38, %v261_v39  ;;  %v4165_v51 = vcombine.low %v254_v40, %v262_v41 }
  0x12   : > { %3348 = vmatpush1.bf16.msra.mxu0 %v4115_v26  ;;  %3430 = vmatpush1.bf16.msra.mxu1 %v4117_v27  ;;  %v277_v47 = vld [vmem:[%s6381_s1 + $0x340] sm:$0xff]  ;;  %v278_v49 = vld [vmem:[%s6381_s1 + $0x348] sm:$0xff] }
  0x13   : > { %3349 = vmatprep.subr.bf16.mxu0 %v4132_v28  ;;  %3431 = vmatprep.subr.bf16.mxu1 %v4134_v29  ;;  %v4180_v52 = vcombine.high %v269_v46, %v277_v47  ;;  %v4792_v53 = vld [vmem:[%s4783_s19] sm:$0xff]  ;;  %v4182_v54 = vcombine.high %v270_v48, %v278_v49  ;;  %v286_v58 = vld [vmem:[%s6381_s1 + $0x388] sm:$0xff]  ;;  %v4179_v60 = vcombine.low %v269_v46, %v277_v47 }
  0x14   : > { %v285_v55 = vld [vmem:[%s6381_s1 + $0x380] sm:$0xff]  ;;  %v4802_v57 = vcombine.high %v4792_v53, %v4792_v53  ;;  %v294_v59 = vld [vmem:[%s6381_s1 + $0x3c8] sm:$0xff]  ;;  %v4181_v61 = vcombine.low %v270_v48, %v278_v49 }
  0x15   : > { %v293_v56 = vld [vmem:[%s6381_s1 + $0x3c0] sm:$0xff]  ;;  %v4198_v63 = vcombine.high %v286_v58, %v294_v59  ;;  %v302_v2 = vld [vmem:[%s6381_s1 + $0x408] sm:$0xff]  ;;  %v4197_v5 = vcombine.low %v286_v58, %v294_v59 }
  0x16   : > { %3350 = vmatpush1.bf16.msra.mxu0 %v4131_v34  ;;  %3432 = vmatpush1.bf16.msra.mxu1 %v4133_v35  ;;  %v4196_v62 = vcombine.high %v285_v55, %v293_v56  ;;  %v301_v0 = vld [vmem:[%s6381_s1 + $0x400] sm:$0xff]  ;;  %v310_v3 = vld [vmem:[%s6381_s1 + $0x448] sm:$0xff]  ;;  %v4195_v4 = vcombine.low %v285_v55, %v293_v56 }
  0x17   : > { %3351 = vmatprep.subr.bf16.mxu0 %v4148_v36  ;;  %3433 = vmatprep.subr.bf16.mxu1 %v4150_v37  ;;  %v309_v1 = vld [vmem:[%s6381_s1 + $0x440] sm:$0xff]  ;;  %v4214_v7 = vcombine.high %v302_v2, %v310_v3  ;;  %v318_v10 = vld [vmem:[%s6381_s1 + $0x488] sm:$0xff]  ;;  %v4213_v13 = vcombine.low %v302_v2, %v310_v3 }
  0x18   : > { %3375 = vmatprep.mubr.bf16.mxu0 %v4802_v57  ;;  %3457 = vmatprep.mubr.bf16.mxu1 %v4802_v57  ;;  %v4212_v6 = vcombine.high %v301_v0, %v309_v1  ;;  %v317_v8 = vld [vmem:[%s6381_s1 + $0x480] sm:$0xff]  ;;  %v326_v11 = vld [vmem:[%s6381_s1 + $0x4c8] sm:$0xff]  ;;  %v4211_v12 = vcombine.low %v301_v0, %v309_v1 }
  0x19   : > { %v325_v9 = vld [vmem:[%s6381_s1 + $0x4c0] sm:$0xff]  ;;  %v4230_v15 = vcombine.high %v318_v10, %v326_v11  ;;  %v334_v18 = vld [vmem:[%s6381_s1 + $0x508] sm:$0xff]  ;;  %v4229_v21 = vcombine.low %v318_v10, %v326_v11 }
  0x1a   : > { %3352 = vmatpush1.bf16.msra.mxu0 %v4147_v42  ;;  %3434 = vmatpush1.bf16.msra.mxu1 %v4149_v43  ;;  %v4228_v14 = vcombine.high %v317_v8, %v325_v9  ;;  %v333_v16 = vld [vmem:[%s6381_s1 + $0x500] sm:$0xff]  ;;  %v342_v19 = vld [vmem:[%s6381_s1 + $0x548] sm:$0xff]  ;;  %v4227_v20 = vcombine.low %v317_v8, %v325_v9 }
  0x1b   : > { %3353 = vmatprep.subr.bf16.mxu0 %v4164_v44  ;;  %3435 = vmatprep.subr.bf16.mxu1 %v4166_v45  ;;  %v341_v17 = vld [vmem:[%s6381_s1 + $0x540] sm:$0xff]  ;;  %v4246_v23 = vcombine.high %v334_v18, %v342_v19  ;;  %v350_v26 = vld [vmem:[%s6381_s1 + $0x588] sm:$0xff]  ;;  %v4245_v29 = vcombine.low %v334_v18, %v342_v19 }
  0x1c   : > { %v4244_v22 = vcombine.high %v333_v16, %v341_v17  ;;  %v349_v24 = vld [vmem:[%s6381_s1 + $0x580] sm:$0xff]  ;;  %v358_v27 = vld [vmem:[%s6381_s1 + $0x5c8] sm:$0xff]  ;;  %v4243_v28 = vcombine.low %v333_v16, %v341_v17 }
  0x1d   : > { %v357_v25 = vld [vmem:[%s6381_s1 + $0x5c0] sm:$0xff]  ;;  %v4262_v31 = vcombine.high %v350_v26, %v358_v27  ;;  %v366_v34 = vld [vmem:[%s6381_s1 + $0x608] sm:$0xff]  ;;  %v4261_v37 = vcombine.low %v350_v26, %v358_v27 }
  0x1e   : > { %3354 = vmatpush1.bf16.msra.mxu0 %v4163_v50  ;;  %3436 = vmatpush1.bf16.msra.mxu1 %v4165_v51  ;;  %v4260_v30 = vcombine.high %v349_v24, %v357_v25  ;;  %v365_v32 = vld [vmem:[%s6381_s1 + $0x600] sm:$0xff]  ;;  %v374_v35 = vld [vmem:[%s6381_s1 + $0x648] sm:$0xff]  ;;  %v4259_v36 = vcombine.low %v349_v24, %v357_v25 }
  0x1f   : > { %3355 = vmatprep.subr.bf16.mxu0 %v4180_v52  ;;  %3437 = vmatprep.subr.bf16.mxu1 %v4182_v54  ;;  %v373_v33 = vld [vmem:[%s6381_s1 + $0x640] sm:$0xff]  ;;  %v4278_v39 = vcombine.high %v366_v34, %v374_v35  ;;  %v382_v42 = vld [vmem:[%s6381_s1 + $0x688] sm:$0xff]  ;;  %v4277_v45 = vcombine.low %v366_v34, %v374_v35 }
  0x20   : > { %v4276_v38 = vcombine.high %v365_v32, %v373_v33  ;;  %v381_v40 = vld [vmem:[%s6381_s1 + $0x680] sm:$0xff]  ;;  %v390_v43 = vld [vmem:[%s6381_s1 + $0x6c8] sm:$0xff]  ;;  %v4275_v44 = vcombine.low %v365_v32, %v373_v33 }
  0x21   : > { %v389_v41 = vld [vmem:[%s6381_s1 + $0x6c0] sm:$0xff]  ;;  %v4294_v47 = vcombine.high %v382_v42, %v390_v43  ;;  %v398_v50 = vld [vmem:[%s6381_s1 + $0x708] sm:$0xff]  ;;  %v4293_v54 = vcombine.low %v382_v42, %v390_v43 }
  0x22   : > { %3356 = vmatpush1.bf16.msra.mxu0 %v4179_v60  ;;  %3438 = vmatpush1.bf16.msra.mxu1 %v4181_v61  ;;  %v4292_v46 = vcombine.high %v381_v40, %v389_v41  ;;  %v397_v48 = vld [vmem:[%s6381_s1 + $0x700] sm:$0xff]  ;;  %v406_v51 = vld [vmem:[%s6381_s1 + $0x748] sm:$0xff]  ;;  %v4291_v52 = vcombine.low %v381_v40, %v389_v41 }
  0x23   : > { %3357 = vmatprep.subr.bf16.mxu0 %v4196_v62  ;;  %3439 = vmatprep.subr.bf16.mxu1 %v4198_v63  ;;  %v405_v49 = vld [vmem:[%s6381_s1 + $0x740] sm:$0xff]  ;;  %v4310_v56 = vcombine.high %v398_v50, %v406_v51  ;;  %v414_v60 = vld [vmem:[%s6381_s1 + $0x788] sm:$0xff]  ;;  %v4309_v63 = vcombine.low %v398_v50, %v406_v51 }
  0x24   : > { %v4308_v55 = vcombine.high %v397_v48, %v405_v49  ;;  %v413_v58 = vld [vmem:[%s6381_s1 + $0x780] sm:$0xff]  ;;  %v422_v61 = vld [vmem:[%s6381_s1 + $0x7c8] sm:$0xff]  ;;  %v4307_v62 = vcombine.low %v397_v48, %v405_v49 }
  0x25   : > { %v421_v59 = vld [vmem:[%s6381_s1 + $0x7c0] sm:$0xff]  ;;  %v4326_v1 = vcombine.high %v414_v60, %v422_v61 }
  0x26   : > { %3358 = vmatpush1.bf16.msra.mxu0 %v4195_v4  ;;  %3440 = vmatpush1.bf16.msra.mxu1 %v4197_v5  ;;  %v4324_v0 = vcombine.high %v413_v58, %v421_v59  ;;  %v429_v2 = vld [vmem:[%s6381_s1 + $0x800] sm:$0xff]  ;;  %v430_v4 = vld [vmem:[%s6381_s1 + $0x808] sm:$0xff] }
  0x27   : > { %3359 = vmatprep.subr.bf16.mxu0 %v4212_v6  ;;  %3441 = vmatprep.subr.bf16.mxu1 %v4214_v7  ;;  %v437_v3 = vld [vmem:[%s6381_s1 + $0x840] sm:$0xff]  ;;  %v438_v5 = vld [vmem:[%s6381_s1 + $0x848] sm:$0xff]  ;;  %v4323_v6 = vcombine.low %v413_v58, %v421_v59  ;;  %v4325_v7 = vcombine.low %v414_v60, %v422_v61 }
  0x28   : > { %v4340_v8 = vcombine.high %v429_v2, %v437_v3  ;;  %v4342_v9 = vcombine.high %v430_v4, %v438_v5  ;;  %v445_v10 = vld [vmem:[%s6381_s1 + $0x880] sm:$0xff]  ;;  %v4339_v16 = vcombine.low %v429_v2, %v437_v3  ;;  %v4341_v17 = vcombine.low %v430_v4, %v438_v5 }
  0x29   : > { %v453_v11 = vld [vmem:[%s6381_s1 + $0x8c0] sm:$0xff] }
  0x2a   : > { %3360 = vmatpush1.bf16.msra.mxu0 %v4211_v12  ;;  %3442 = vmatpush1.bf16.msra.mxu1 %v4213_v13  ;;  %v4928_v12 = vcombine.low %v4792_v53, %v4792_v53  ;;  %v446_v13 = vld [vmem:[%s6381_s1 + $0x888] sm:$0xff]  ;;  %v4356_v18 = vcombine.high %v445_v10, %v453_v11  ;;  %v461_v53 = vld [vmem:[%s6381_s1 + $0x900] sm:$0xff]  ;;  %v4355_v24 = vcombine.low %v445_v10, %v453_v11 }
  0x2b   : > { %3361 = vmatprep.subr.bf16.mxu0 %v4228_v14  ;;  %3443 = vmatprep.subr.bf16.mxu1 %v4230_v15  ;;  %v454_v14 = vld [vmem:[%s6381_s1 + $0x8c8] sm:$0xff] }
  0x2c   : > { %v4937_v15 = vld [vmem:[%s4783_s19 + $0x8] sm:$0xff]  ;;  %v4358_v19 = vcombine.high %v446_v13, %v454_v14  ;;  %v4357_v25 = vcombine.low %v446_v13, %v454_v14 }
  0x2e   : > { %3362 = vmatpush1.bf16.msra.mxu0 %v4227_v20  ;;  %3444 = vmatpush1.bf16.msra.mxu1 %v4229_v21  ;;  %v469_v20 = vld [vmem:[%s6381_s1 + $0x940] sm:$0xff]  ;;  %v4947_v21 = vcombine.high %v4937_v15, %v4937_v15 }
  0x2f   : > { %3363 = vmatprep.subr.bf16.mxu0 %v4244_v22  ;;  %3445 = vmatprep.subr.bf16.mxu1 %v4246_v23  ;;  %v462_v22 = vld [vmem:[%s6381_s1 + $0x908] sm:$0xff]  ;;  %v4372_v26 = vcombine.high %v461_v53, %v469_v20  ;;  %v4371_v32 = vcombine.low %v461_v53, %v469_v20 }
  0x30   : > { %v470_v23 = vld [vmem:[%s6381_s1 + $0x948] sm:$0xff] }
  0x31   : > { %v4374_v27 = vcombine.high %v462_v22, %v470_v23  ;;  %v4373_v33 = vcombine.low %v462_v22, %v470_v23 }
  0x32   : > { %3364 = vmatpush1.bf16.msra.mxu0 %v4243_v28  ;;  %3446 = vmatpush1.bf16.msra.mxu1 %v4245_v29  ;;  %v477_v28 = vld [vmem:[%s6381_s1 + $0x980] sm:$0xff] }
  0x33   : > { %3365 = vmatprep.subr.bf16.mxu0 %v4260_v30  ;;  %3447 = vmatprep.subr.bf16.mxu1 %v4262_v31  ;;  %v485_v29 = vld [vmem:[%s6381_s1 + $0x9c0] sm:$0xff]  ;;  %v478_v30 = vld [vmem:[%s6381_s1 + $0x988] sm:$0xff] }
  0x34   : > { %v486_v31 = vld [vmem:[%s6381_s1 + $0x9c8] sm:$0xff]  ;;  %v4388_v34 = vcombine.high %v477_v28, %v485_v29  ;;  %v4387_v40 = vcombine.low %v477_v28, %v485_v29 }
  0x35   : > { %v4390_v35 = vcombine.high %v478_v30, %v486_v31  ;;  %v4389_v41 = vcombine.low %v478_v30, %v486_v31 }
  0x36   : > { %3366 = vmatpush1.bf16.msra.mxu0 %v4259_v36  ;;  %3448 = vmatpush1.bf16.msra.mxu1 %v4261_v37  ;;  %v493_v36 = vld [vmem:[%s6381_s1 + $0xa00] sm:$0xff] }
  0x37   : > { %3367 = vmatprep.subr.bf16.mxu0 %v4276_v38  ;;  %3449 = vmatprep.subr.bf16.mxu1 %v4278_v39  ;;  %v501_v37 = vld [vmem:[%s6381_s1 + $0xa40] sm:$0xff]  ;;  %v494_v38 = vld [vmem:[%s6381_s1 + $0xa08] sm:$0xff] }
  0x38   : > { %v502_v39 = vld [vmem:[%s6381_s1 + $0xa48] sm:$0xff]  ;;  %v4404_v42 = vcombine.high %v493_v36, %v501_v37  ;;  %v4403_v48 = vcombine.low %v493_v36, %v501_v37 }
  0x39   : > { %v4406_v43 = vcombine.high %v494_v38, %v502_v39  ;;  %v4405_v49 = vcombine.low %v494_v38, %v502_v39 }
  0x3a   : > { %3368 = vmatpush1.bf16.msra.mxu0 %v4275_v44  ;;  %3450 = vmatpush1.bf16.msra.mxu1 %v4277_v45  ;;  %v509_v44 = vld [vmem:[%s6381_s1 + $0xa80] sm:$0xff] }
  0x3b   : > { %3369 = vmatprep.subr.bf16.mxu0 %v4292_v46  ;;  %3451 = vmatprep.subr.bf16.mxu1 %v4294_v47  ;;  %v517_v45 = vld [vmem:[%s6381_s1 + $0xac0] sm:$0xff]  ;;  %v510_v46 = vld [vmem:[%s6381_s1 + $0xa88] sm:$0xff] }
  0x3c   : > { %v518_v47 = vld [vmem:[%s6381_s1 + $0xac8] sm:$0xff]  ;;  %v4420_v50 = vcombine.high %v509_v44, %v517_v45  ;;  %v4419_v58 = vcombine.low %v509_v44, %v517_v45 }
  0x3d   : > { %v4422_v51 = vcombine.high %v510_v46, %v518_v47  ;;  %v4421_v59 = vcombine.low %v510_v46, %v518_v47 }
  0x3e   : > { %3370 = vmatpush1.bf16.msra.mxu0 %v4291_v52  ;;  %3452 = vmatpush1.bf16.msra.mxu1 %v4293_v54  ;;  %v525_v52 = vld [vmem:[%s6381_s1 + $0xb00] sm:$0xff] }
  0x3f   : > { %3371 = vmatprep.subr.bf16.mxu0 %v4308_v55  ;;  %3453 = vmatprep.subr.bf16.mxu1 %v4310_v56  ;;  %v533_v54 = vld [vmem:[%s6381_s1 + $0xb40] sm:$0xff]  ;;  %v526_v55 = vld [vmem:[%s6381_s1 + $0xb08] sm:$0xff] }
  0x40   : > { %v534_v56 = vld [vmem:[%s6381_s1 + $0xb48] sm:$0xff]  ;;  %v4436_v60 = vcombine.high %v525_v52, %v533_v54  ;;  %v4435_v2 = vcombine.low %v525_v52, %v533_v54 }
  0x41   : > { %v4438_v61 = vcombine.high %v526_v55, %v534_v56  ;;  %v4437_v3 = vcombine.low %v526_v55, %v534_v56 }
  0x42   : > { %3372 = vmatpush1.bf16.msra.mxu0 %v4307_v62  ;;  %3454 = vmatpush1.bf16.msra.mxu1 %v4309_v63  ;;  %v541_v62 = vld [vmem:[%s6381_s1 + $0xb80] sm:$0xff] }
  0x43   : > { %3373 = vmatprep.subr.bf16.mxu0 %v4324_v0  ;;  %3455 = vmatprep.subr.bf16.mxu1 %v4326_v1  ;;  %v549_v63 = vld [vmem:[%s6381_s1 + $0xbc0] sm:$0xff]  ;;  %v542_v0 = vld [vmem:[%s6381_s1 + $0xb88] sm:$0xff] }
  0x44   : > { %v550_v1 = vld [vmem:[%s6381_s1 + $0xbc8] sm:$0xff]  ;;  %v4452_v4 = vcombine.high %v541_v62, %v549_v63  ;;  %v4451_v10 = vcombine.low %v541_v62, %v549_v63 }
  0x45   : > { %v4454_v5 = vcombine.high %v542_v0, %v550_v1  ;;  %v4453_v11 = vcombine.low %v542_v0, %v550_v1 }
  0x46   : > { %3374 = vmatpush1.bf16.msra.mxu0 %v4323_v6  ;;  %3456 = vmatpush1.bf16.msra.mxu1 %v4325_v7  ;;  %v557_v6 = vld [vmem:[%s6381_s1 + $0xc00] sm:$0xff] }
  0x47   : > { %3384 = vmatprep.subr.bf16.mxu0 %v4340_v8  ;;  %3466 = vmatprep.subr.bf16.mxu1 %v4342_v9  ;;  %v565_v7 = vld [vmem:[%s6381_s1 + $0xc40] sm:$0xff]  ;;  %v558_v8 = vld [vmem:[%s6381_s1 + $0xc08] sm:$0xff] }
  0x48   : > { %v566_v9 = vld [vmem:[%s6381_s1 + $0xc48] sm:$0xff]  ;;  %v4468_v13 = vcombine.high %v557_v6, %v565_v7  ;;  %v4467_v53 = vcombine.low %v557_v6, %v565_v7 }
  0x49   : > { %3376 = vmatmul.mubr.bf16.vlgmr.msra.gmra.mrb[0].mxu0 %v4928_v12  ;;  %3458 = vmatmul.mubr.bf16.vlgmr.msra.gmra.mrb[0].mxu1 %v4928_v12  ;;  %v4470_v14 = vcombine.high %v558_v8, %v566_v9  ;;  %v4469_v20 = vcombine.low %v558_v8, %v566_v9 }
  0x4a   : > { %3385 = vmatpush1.bf16.msra.mxu0 %v4339_v16  ;;  %3467 = vmatpush1.bf16.msra.mxu1 %v4341_v17  ;;  %v573_v16 = vld [vmem:[%s6381_s1 + $0xc80] sm:$0xff] }
  0x4b   : > { %3386 = vmatprep.subr.bf16.mxu0 %v4356_v18  ;;  %3468 = vmatprep.subr.bf16.mxu1 %v4358_v19  ;;  %v581_v17 = vld [vmem:[%s6381_s1 + $0xcc0] sm:$0xff]  ;;  %v574_v18 = vld [vmem:[%s6381_s1 + $0xc88] sm:$0xff] }
  0x4c   : > { %3416 = vmatprep.mubr.bf16.mxu0 %v4947_v21  ;;  %3498 = vmatprep.mubr.bf16.mxu1 %v4947_v21  ;;  %v582_v19 = vld [vmem:[%s6381_s1 + $0xcc8] sm:$0xff]  ;;  %v4484_v22 = vcombine.high %v573_v16, %v581_v17  ;;  %v4483_v28 = vcombine.low %v573_v16, %v581_v17 }
  0x4d   : > { %v4486_v23 = vcombine.high %v574_v18, %v582_v19  ;;  %v4485_v29 = vcombine.low %v574_v18, %v582_v19 }
  0x4e   : > { %3387 = vmatpush1.bf16.msra.mxu0 %v4355_v24  ;;  %3469 = vmatpush1.bf16.msra.mxu1 %v4357_v25  ;;  %v589_v24 = vld [vmem:[%s6381_s1 + $0xd00] sm:$0xff] }
  0x4f   : > { %3388 = vmatprep.subr.bf16.mxu0 %v4372_v26  ;;  %3470 = vmatprep.subr.bf16.mxu1 %v4374_v27  ;;  %v597_v25 = vld [vmem:[%s6381_s1 + $0xd40] sm:$0xff]  ;;  %v590_v26 = vld [vmem:[%s6381_s1 + $0xd08] sm:$0xff] }
  0x50   : > { %v598_v27 = vld [vmem:[%s6381_s1 + $0xd48] sm:$0xff]  ;;  %v4500_v30 = vcombine.high %v589_v24, %v597_v25  ;;  %v4499_v36 = vcombine.low %v589_v24, %v597_v25  ;;  %v200_v24 = vld [vmem:[%s6381_s1 + $0xd8] sm:$0xff] }
  0x51   : > { %v4502_v31 = vcombine.high %v590_v26, %v598_v27  ;;  %v4501_v37 = vcombine.low %v590_v26, %v598_v27 }
  0x52   : > { %3389 = vmatpush1.bf16.msra.mxu0 %v4371_v32  ;;  %3471 = vmatpush1.bf16.msra.mxu1 %v4373_v33  ;;  %v605_v32 = vld [vmem:[%s6381_s1 + $0xd80] sm:$0xff] }
  0x53   : > { %3390 = vmatprep.subr.bf16.mxu0 %v4388_v34  ;;  %3472 = vmatprep.subr.bf16.mxu1 %v4390_v35  ;;  %v613_v33 = vld [vmem:[%s6381_s1 + $0xdc0] sm:$0xff]  ;;  %v606_v34 = vld [vmem:[%s6381_s1 + $0xd88] sm:$0xff] }
  0x54   : > { %v614_v35 = vld [vmem:[%s6381_s1 + $0xdc8] sm:$0xff]  ;;  %v4516_v38 = vcombine.high %v605_v32, %v613_v33  ;;  %v4515_v44 = vcombine.low %v605_v32, %v613_v33 }
  0x55   : > { %v4518_v39 = vcombine.high %v606_v34, %v614_v35  ;;  %v4517_v45 = vcombine.low %v606_v34, %v614_v35 }
  0x56   : > { %3391 = vmatpush1.bf16.msra.mxu0 %v4387_v40  ;;  %3473 = vmatpush1.bf16.msra.mxu1 %v4389_v41  ;;  %v621_v40 = vld [vmem:[%s6381_s1 + $0xe00] sm:$0xff] }
  0x57   : > { %3392 = vmatprep.subr.bf16.mxu0 %v4404_v42  ;;  %3474 = vmatprep.subr.bf16.mxu1 %v4406_v43  ;;  %v629_v41 = vld [vmem:[%s6381_s1 + $0xe40] sm:$0xff]  ;;  %v622_v42 = vld [vmem:[%s6381_s1 + $0xe08] sm:$0xff] }
  0x58   : > { %v630_v43 = vld [vmem:[%s6381_s1 + $0xe48] sm:$0xff]  ;;  %v4532_v46 = vcombine.high %v621_v40, %v629_v41  ;;  %v4531_v52 = vcombine.low %v621_v40, %v629_v41 }
  0x59   : > { %v4534_v47 = vcombine.high %v622_v42, %v630_v43  ;;  %v4533_v54 = vcombine.low %v622_v42, %v630_v43 }
  0x5a   : > { %3393 = vmatpush1.bf16.msra.mxu0 %v4403_v48  ;;  %3475 = vmatpush1.bf16.msra.mxu1 %v4405_v49  ;;  %v637_v48 = vld [vmem:[%s6381_s1 + $0xe80] sm:$0xff] }
  0x5b   : > { %3394 = vmatprep.subr.bf16.mxu0 %v4420_v50  ;;  %3476 = vmatprep.subr.bf16.mxu1 %v4422_v51  ;;  %v645_v49 = vld [vmem:[%s6381_s1 + $0xec0] sm:$0xff]  ;;  %v638_v50 = vld [vmem:[%s6381_s1 + $0xe88] sm:$0xff] }
  0x5c   : > { %v646_v51 = vld [vmem:[%s6381_s1 + $0xec8] sm:$0xff]  ;;  %v4548_v55 = vcombine.high %v637_v48, %v645_v49  ;;  %v4547_v62 = vcombine.low %v637_v48, %v645_v49 }
  0x5d   : > { %v4550_v56 = vcombine.high %v638_v50, %v646_v51  ;;  %v4549_v63 = vcombine.low %v638_v50, %v646_v51 }
  0x5e   : > { %3395 = vmatpush1.bf16.msra.mxu0 %v4419_v58  ;;  %3477 = vmatpush1.bf16.msra.mxu1 %v4421_v59  ;;  %v653_v58 = vld [vmem:[%s6381_s1 + $0xf00] sm:$0xff] }
  0x5f   : > { %3396 = vmatprep.subr.bf16.mxu0 %v4436_v60  ;;  %3478 = vmatprep.subr.bf16.mxu1 %v4438_v61  ;;  %v661_v59 = vld [vmem:[%s6381_s1 + $0xf40] sm:$0xff]  ;;  %v654_v60 = vld [vmem:[%s6381_s1 + $0xf08] sm:$0xff] }
  0x60   : > { %v662_v61 = vld [vmem:[%s6381_s1 + $0xf48] sm:$0xff]  ;;  %v4564_v0 = vcombine.high %v653_v58, %v661_v59  ;;  %v4563_v6 = vcombine.low %v653_v58, %v661_v59 }
  0x61   : > { %v4566_v1 = vcombine.high %v654_v60, %v662_v61  ;;  %v4565_v7 = vcombine.low %v654_v60, %v662_v61 }
  0x62   : > { %3397 = vmatpush1.bf16.msra.mxu0 %v4435_v2  ;;  %3479 = vmatpush1.bf16.msra.mxu1 %v4437_v3  ;;  %v669_v2 = vld [vmem:[%s6381_s1 + $0xf80] sm:$0xff] }
  0x63   : > { %3398 = vmatprep.subr.bf16.mxu0 %v4452_v4  ;;  %3480 = vmatprep.subr.bf16.mxu1 %v4454_v5  ;;  %v677_v3 = vld [vmem:[%s6381_s1 + $0xfc0] sm:$0xff]  ;;  %v670_v4 = vld [vmem:[%s6381_s1 + $0xf88] sm:$0xff] }
  0x64   : > { %v678_v5 = vld [vmem:[%s6381_s1 + $0xfc8] sm:$0xff]  ;;  %v4580_v8 = vcombine.high %v669_v2, %v677_v3  ;;  %v4579_v16 = vcombine.low %v669_v2, %v677_v3 }
  0x65   : > { %v4582_v9 = vcombine.high %v670_v4, %v678_v5  ;;  %v4581_v17 = vcombine.low %v670_v4, %v678_v5 }
  0x66   : > { %3399 = vmatpush1.bf16.msra.mxu0 %v4451_v10  ;;  %3481 = vmatpush1.bf16.msra.mxu1 %v4453_v11  ;;  %v175_v10 = vld [vmem:[%s6381_s1 + $0x10] sm:$0xff] }
  0x67   : > { %3400 = vmatprep.subr.bf16.mxu0 %v4468_v13  ;;  %3482 = vmatprep.subr.bf16.mxu1 %v4470_v14  ;;  %v183_v11 = vld [vmem:[%s6381_s1 + $0x50] sm:$0xff]  ;;  %v176_v13 = vld [vmem:[%s6381_s1 + $0x18] sm:$0xff] }
  0x68   : > { %v184_v14 = vld [vmem:[%s6381_s1 + $0x58] sm:$0xff]  ;;  %v4088_v18 = vcombine.high %v175_v10, %v183_v11  ;;  %v4087_v25 = vcombine.low %v175_v10, %v183_v11 }
  0x69   : > { %v4090_v19 = vcombine.high %v176_v13, %v184_v14  ;;  %v4089_v26 = vcombine.low %v176_v13, %v184_v14 }
  0x6a   : > { %3401 = vmatpush1.bf16.msra.mxu0 %v4467_v53  ;;  %3483 = vmatpush1.bf16.msra.mxu1 %v4469_v20  ;;  %v191_v53 = vld [vmem:[%s6381_s1 + $0x90] sm:$0xff] }
  0x6b   : > { %3402 = vmatprep.subr.bf16.mxu0 %v4484_v22  ;;  %3484 = vmatprep.subr.bf16.mxu1 %v4486_v23  ;;  %v199_v20 = vld [vmem:[%s6381_s1 + $0xd0] sm:$0xff]  ;;  %v5135_v22 = vcombine.low %v4937_v15, %v4937_v15  ;;  %v192_v23 = vld [vmem:[%s6381_s1 + $0x98] sm:$0xff] }
  0x6c   : > { %v4104_v27 = vcombine.high %v191_v53, %v199_v20  ;;  %v207_v15 = vld [vmem:[%s6381_s1 + $0x110] sm:$0xff]  ;;  %v4103_v32 = vcombine.low %v191_v53, %v199_v20  ;;  %v4105_v33 = vcombine.low %v192_v23, %v200_v24 }
  0x6e   : > { %3403 = vmatpush1.bf16.msra.mxu0 %v4483_v28  ;;  %3485 = vmatpush1.bf16.msra.mxu1 %v4485_v29  ;;  %v4106_v28 = vcombine.high %v192_v23, %v200_v24  ;;  %v215_v29 = vld [vmem:[%s6381_s1 + $0x150] sm:$0xff] }
  0x6f   : > { %3404 = vmatprep.subr.bf16.mxu0 %v4500_v30  ;;  %3486 = vmatprep.subr.bf16.mxu1 %v4502_v31  ;;  %v208_v30 = vld [vmem:[%s6381_s1 + $0x118] sm:$0xff]  ;;  %v4120_v34 = vcombine.high %v207_v15, %v215_v29  ;;  %v4119_v40 = vcombine.low %v207_v15, %v215_v29 }
  0x70   : > { %v216_v31 = vld [vmem:[%s6381_s1 + $0x158] sm:$0xff] }
  0x71   : > { %v4122_v35 = vcombine.high %v208_v30, %v216_v31  ;;  %v4121_v41 = vcombine.low %v208_v30, %v216_v31 }
  0x72   : > { %3405 = vmatpush1.bf16.msra.mxu0 %v4499_v36  ;;  %3487 = vmatpush1.bf16.msra.mxu1 %v4501_v37  ;;  %v223_v36 = vld [vmem:[%s6381_s1 + $0x190] sm:$0xff] }
  0x73   : > { %3406 = vmatprep.subr.bf16.mxu0 %v4516_v38  ;;  %3488 = vmatprep.subr.bf16.mxu1 %v4518_v39  ;;  %v231_v37 = vld [vmem:[%s6381_s1 + $0x1d0] sm:$0xff]  ;;  %v224_v38 = vld [vmem:[%s6381_s1 + $0x198] sm:$0xff] }
  0x74   : > { %v232_v39 = vld [vmem:[%s6381_s1 + $0x1d8] sm:$0xff]  ;;  %v4136_v42 = vcombine.high %v223_v36, %v231_v37  ;;  %v4135_v48 = vcombine.low %v223_v36, %v231_v37 }
  0x75   : > { %v4138_v43 = vcombine.high %v224_v38, %v232_v39  ;;  %v4137_v49 = vcombine.low %v224_v38, %v232_v39 }
  0x76   : > { %3407 = vmatpush1.bf16.msra.mxu0 %v4515_v44  ;;  %3489 = vmatpush1.bf16.msra.mxu1 %v4517_v45  ;;  %v239_v44 = vld [vmem:[%s6381_s1 + $0x210] sm:$0xff] }
  0x77   : > { %3408 = vmatprep.subr.bf16.mxu0 %v4532_v46  ;;  %3490 = vmatprep.subr.bf16.mxu1 %v4534_v47  ;;  %v247_v45 = vld [vmem:[%s6381_s1 + $0x250] sm:$0xff]  ;;  %v240_v46 = vld [vmem:[%s6381_s1 + $0x218] sm:$0xff] }
  0x78   : > { %v248_v47 = vld [vmem:[%s6381_s1 + $0x258] sm:$0xff]  ;;  %v4152_v50 = vcombine.high %v239_v44, %v247_v45  ;;  %v4151_v58 = vcombine.low %v239_v44, %v247_v45 }
  0x79   : > { %v4154_v51 = vcombine.high %v240_v46, %v248_v47  ;;  %v4153_v59 = vcombine.low %v240_v46, %v248_v47 }
  0x7a   : > { %3409 = vmatpush1.bf16.msra.mxu0 %v4531_v52  ;;  %3491 = vmatpush1.bf16.msra.mxu1 %v4533_v54  ;;  %v255_v52 = vld [vmem:[%s6381_s1 + $0x290] sm:$0xff] }
  0x7b   : > { %3410 = vmatprep.subr.bf16.mxu0 %v4548_v55  ;;  %3492 = vmatprep.subr.bf16.mxu1 %v4550_v56  ;;  %v263_v54 = vld [vmem:[%s6381_s1 + $0x2d0] sm:$0xff]  ;;  %v256_v55 = vld [vmem:[%s6381_s1 + $0x298] sm:$0xff] }
  0x7c   : > { %v264_v56 = vld [vmem:[%s6381_s1 + $0x2d8] sm:$0xff]  ;;  %v4168_v60 = vcombine.high %v255_v52, %v263_v54  ;;  %v4167_v2 = vcombine.low %v255_v52, %v263_v54 }
  0x7d   : > { %v4170_v61 = vcombine.high %v256_v55, %v264_v56  ;;  %v4169_v3 = vcombine.low %v256_v55, %v264_v56 }
  0x7e   : > { %3411 = vmatpush1.bf16.msra.mxu0 %v4547_v62  ;;  %3493 = vmatpush1.bf16.msra.mxu1 %v4549_v63  ;;  %v271_v62 = vld [vmem:[%s6381_s1 + $0x310] sm:$0xff] }
  0x7f   : > { %3412 = vmatprep.subr.bf16.mxu0 %v4564_v0  ;;  %3494 = vmatprep.subr.bf16.mxu1 %v4566_v1  ;;  %v279_v63 = vld [vmem:[%s6381_s1 + $0x350] sm:$0xff]  ;;  %v272_v0 = vld [vmem:[%s6381_s1 + $0x318] sm:$0xff] }
  0x80   : > { %v280_v1 = vld [vmem:[%s6381_s1 + $0x358] sm:$0xff]  ;;  %v4184_v4 = vcombine.high %v271_v62, %v279_v63  ;;  %v4183_v10 = vcombine.low %v271_v62, %v279_v63 }
  0x81   : > { %v4186_v5 = vcombine.high %v272_v0, %v280_v1  ;;  %v4185_v11 = vcombine.low %v272_v0, %v280_v1 }
  0x82   : > { %3413 = vmatpush1.bf16.msra.mxu0 %v4563_v6  ;;  %3495 = vmatpush1.bf16.msra.mxu1 %v4565_v7  ;;  %v287_v6 = vld [vmem:[%s6381_s1 + $0x390] sm:$0xff] }
  0x83   : > { %3414 = vmatprep.subr.bf16.mxu0 %v4580_v8  ;;  %3496 = vmatprep.subr.bf16.mxu1 %v4582_v9  ;;  %v295_v7 = vld [vmem:[%s6381_s1 + $0x3d0] sm:$0xff]  ;;  %v288_v8 = vld [vmem:[%s6381_s1 + $0x398] sm:$0xff] }
  0x84   : > { %v296_v9 = vld [vmem:[%s6381_s1 + $0x3d8] sm:$0xff]  ;;  %v4200_v13 = vcombine.high %v287_v6, %v295_v7  ;;  %v4199_v53 = vcombine.low %v287_v6, %v295_v7 }
  0x85   : > { %v4202_v14 = vcombine.high %v288_v8, %v296_v9  ;;  %v4201_v20 = vcombine.low %v288_v8, %v296_v9 }
  0x86   : > { %3415 = vmatpush1.bf16.msra.mxu0 %v4579_v16  ;;  %3497 = vmatpush1.bf16.msra.mxu1 %v4581_v17  ;;  %v303_v16 = vld [vmem:[%s6381_s1 + $0x410] sm:$0xff] }
  0x87   : > { %3507 = vmatprep.subr.bf16.mxu0 %v4088_v18  ;;  %3589 = vmatprep.subr.bf16.mxu1 %v4090_v19  ;;  %v311_v17 = vld [vmem:[%s6381_s1 + $0x450] sm:$0xff]  ;;  %v304_v18 = vld [vmem:[%s6381_s1 + $0x418] sm:$0xff] }
  0x88   : > { %v312_v19 = vld [vmem:[%s6381_s1 + $0x458] sm:$0xff]  ;;  %v4216_v23 = vcombine.high %v303_v16, %v311_v17  ;;  %v4215_v15 = vcombine.low %v303_v16, %v311_v17 }
  0x89   : > { %3417 = vmatmul.mubr.bf16.vlgmr.msra.gmra.mrb[0].mxu0 %v5135_v22  ;;  %3499 = vmatmul.mubr.bf16.vlgmr.msra.gmra.mrb[0].mxu1 %v5135_v22  ;;  %v4218_v24 = vcombine.high %v304_v18, %v312_v19  ;;  %v4217_v29 = vcombine.low %v304_v18, %v312_v19 }
  0x8a   : > { %3508 = vmatpush1.bf16.msra.mxu0 %v4087_v25  ;;  %3590 = vmatpush1.bf16.msra.mxu1 %v4089_v26  ;;  %v319_v25 = vld [vmem:[%s6381_s1 + $0x490] sm:$0xff] }
  0x8b   : > { %3509 = vmatprep.subr.bf16.mxu0 %v4104_v27  ;;  %3591 = vmatprep.subr.bf16.mxu1 %v4106_v28  ;;  %v327_v26 = vld [vmem:[%s6381_s1 + $0x4d0] sm:$0xff]  ;;  %v320_v27 = vld [vmem:[%s6381_s1 + $0x498] sm:$0xff] }
  0x8c   : > { %3539 = vmatprep.mubr.bf16.mxu0 %v4802_v57  ;;  %3621 = vmatprep.mubr.bf16.mxu1 %v4802_v57  ;;  %v328_v28 = vld [vmem:[%s6381_s1 + $0x4d8] sm:$0xff]  ;;  %v4232_v30 = vcombine.high %v319_v25, %v327_v26  ;;  %v4231_v36 = vcombine.low %v319_v25, %v327_v26 }
  0x8d   : > { %v4234_v31 = vcombine.high %v320_v27, %v328_v28  ;;  %v4233_v37 = vcombine.low %v320_v27, %v328_v28 }
  0x8e   : > { %3510 = vmatpush1.bf16.msra.mxu0 %v4103_v32  ;;  %3592 = vmatpush1.bf16.msra.mxu1 %v4105_v33  ;;  %v335_v32 = vld [vmem:[%s6381_s1 + $0x510] sm:$0xff] }
  0x8f   : > { %3511 = vmatprep.subr.bf16.mxu0 %v4120_v34  ;;  %3593 = vmatprep.subr.bf16.mxu1 %v4122_v35  ;;  %v343_v33 = vld [vmem:[%s6381_s1 + $0x550] sm:$0xff]  ;;  %v336_v34 = vld [vmem:[%s6381_s1 + $0x518] sm:$0xff] }
  0x90   : > { %v344_v35 = vld [vmem:[%s6381_s1 + $0x558] sm:$0xff]  ;;  %v4248_v38 = vcombine.high %v335_v32, %v343_v33  ;;  %v4247_v44 = vcombine.low %v335_v32, %v343_v33 }
  0x91   : > { %v4250_v39 = vcombine.high %v336_v34, %v344_v35  ;;  %v4249_v45 = vcombine.low %v336_v34, %v344_v35 }
  0x92   : > { %3512 = vmatpush1.bf16.msra.mxu0 %v4119_v40  ;;  %3594 = vmatpush1.bf16.msra.mxu1 %v4121_v41  ;;  %v351_v40 = vld [vmem:[%s6381_s1 + $0x590] sm:$0xff] }
  0x93   : > { %3513 = vmatprep.subr.bf16.mxu0 %v4136_v42  ;;  %3595 = vmatprep.subr.bf16.mxu1 %v4138_v43  ;;  %v359_v41 = vld [vmem:[%s6381_s1 + $0x5d0] sm:$0xff]  ;;  %v352_v42 = vld [vmem:[%s6381_s1 + $0x598] sm:$0xff] }
  0x94   : > { %v360_v43 = vld [vmem:[%s6381_s1 + $0x5d8] sm:$0xff]  ;;  %v4264_v46 = vcombine.high %v351_v40, %v359_v41  ;;  %v4263_v52 = vcombine.low %v351_v40, %v359_v41 }
  0x95   : > { %v4266_v47 = vcombine.high %v352_v42, %v360_v43  ;;  %v4265_v54 = vcombine.low %v352_v42, %v360_v43 }
  0x96   : > { %3514 = vmatpush1.bf16.msra.mxu0 %v4135_v48  ;;  %3596 = vmatpush1.bf16.msra.mxu1 %v4137_v49  ;;  %v367_v48 = vld [vmem:[%s6381_s1 + $0x610] sm:$0xff] }
  0x97   : > { %3515 = vmatprep.subr.bf16.mxu0 %v4152_v50  ;;  %3597 = vmatprep.subr.bf16.mxu1 %v4154_v51  ;;  %v375_v49 = vld [vmem:[%s6381_s1 + $0x650] sm:$0xff]  ;;  %v368_v50 = vld [vmem:[%s6381_s1 + $0x618] sm:$0xff] }
  0x98   : > { %v376_v51 = vld [vmem:[%s6381_s1 + $0x658] sm:$0xff]  ;;  %v4280_v55 = vcombine.high %v367_v48, %v375_v49  ;;  %v4279_v62 = vcombine.low %v367_v48, %v375_v49 }
  0x99   : > { %v4282_v56 = vcombine.high %v368_v50, %v376_v51  ;;  %v4281_v63 = vcombine.low %v368_v50, %v376_v51 }
  0x9a   : > { %3516 = vmatpush1.bf16.msra.mxu0 %v4151_v58  ;;  %3598 = vmatpush1.bf16.msra.mxu1 %v4153_v59  ;;  %v383_v58 = vld [vmem:[%s6381_s1 + $0x690] sm:$0xff] }
  0x9b   : > { %3517 = vmatprep.subr.bf16.mxu0 %v4168_v60  ;;  %3599 = vmatprep.subr.bf16.mxu1 %v4170_v61  ;;  %v391_v59 = vld [vmem:[%s6381_s1 + $0x6d0] sm:$0xff]  ;;  %v384_v60 = vld [vmem:[%s6381_s1 + $0x698] sm:$0xff] }
  0x9c   : > { %v392_v61 = vld [vmem:[%s6381_s1 + $0x6d8] sm:$0xff]  ;;  %v4296_v0 = vcombine.high %v383_v58, %v391_v59  ;;  %v4295_v6 = vcombine.low %v383_v58, %v391_v59 }
  0x9d   : > { %v4298_v1 = vcombine.high %v384_v60, %v392_v61  ;;  %v4297_v7 = vcombine.low %v384_v60, %v392_v61 }
  0x9e   : > { %3518 = vmatpush1.bf16.msra.mxu0 %v4167_v2  ;;  %3600 = vmatpush1.bf16.msra.mxu1 %v4169_v3  ;;  %v399_v2 = vld [vmem:[%s6381_s1 + $0x710] sm:$0xff] }
  0x9f   : > { %3519 = vmatprep.subr.bf16.mxu0 %v4184_v4  ;;  %3601 = vmatprep.subr.bf16.mxu1 %v4186_v5  ;;  %v407_v3 = vld [vmem:[%s6381_s1 + $0x750] sm:$0xff]  ;;  %v400_v4 = vld [vmem:[%s6381_s1 + $0x718] sm:$0xff] }
  0xa0   : > { %v408_v5 = vld [vmem:[%s6381_s1 + $0x758] sm:$0xff]  ;;  %v4312_v8 = vcombine.high %v399_v2, %v407_v3  ;;  %v4311_v16 = vcombine.low %v399_v2, %v407_v3 }
  0xa1   : > { %v4314_v9 = vcombine.high %v400_v4, %v408_v5  ;;  %v4313_v17 = vcombine.low %v400_v4, %v408_v5 }
  0xa2   : > { %3520 = vmatpush1.bf16.msra.mxu0 %v4183_v10  ;;  %3602 = vmatpush1.bf16.msra.mxu1 %v4185_v11  ;;  %v415_v10 = vld [vmem:[%s6381_s1 + $0x790] sm:$0xff] }
  0xa3   : > { %3521 = vmatprep.subr.bf16.mxu0 %v4200_v13  ;;  %3603 = vmatprep.subr.bf16.mxu1 %v4202_v14  ;;  %v423_v11 = vld [vmem:[%s6381_s1 + $0x7d0] sm:$0xff]  ;;  %v416_v13 = vld [vmem:[%s6381_s1 + $0x798] sm:$0xff] }
  0xa4   : > { %v424_v14 = vld [vmem:[%s6381_s1 + $0x7d8] sm:$0xff]  ;;  %v4328_v18 = vcombine.high %v415_v10, %v423_v11  ;;  %v4327_v25 = vcombine.low %v415_v10, %v423_v11 }
  0xa5   : > { %v4330_v19 = vcombine.high %v416_v13, %v424_v14  ;;  %v4329_v26 = vcombine.low %v416_v13, %v424_v14 }
  0xa6   : > { %3522 = vmatpush1.bf16.msra.mxu0 %v4199_v53  ;;  %3604 = vmatpush1.bf16.msra.mxu1 %v4201_v20  ;;  %v431_v53 = vld [vmem:[%s6381_s1 + $0x810] sm:$0xff] }
  0xa7   : > { %3523 = vmatprep.subr.bf16.mxu0 %v4216_v23  ;;  %3605 = vmatprep.subr.bf16.mxu1 %v4218_v24  ;;  %v439_v20 = vld [vmem:[%s6381_s1 + $0x850] sm:$0xff]  ;;  %v432_v23 = vld [vmem:[%s6381_s1 + $0x818] sm:$0xff] }
  0xa8   : > { %v440_v24 = vld [vmem:[%s6381_s1 + $0x858] sm:$0xff]  ;;  %v4344_v27 = vcombine.high %v431_v53, %v439_v20  ;;  %v4343_v32 = vcombine.low %v431_v53, %v439_v20 }
  0xa9   : > { %v4346_v28 = vcombine.high %v432_v23, %v440_v24  ;;  %v4345_v33 = vcombine.low %v432_v23, %v440_v24 }
  0xaa   : > { %3524 = vmatpush1.bf16.msra.mxu0 %v4215_v15  ;;  %3606 = vmatpush1.bf16.msra.mxu1 %v4217_v29  ;;  %v447_v15 = vld [vmem:[%s6381_s1 + $0x890] sm:$0xff] }
  0xab   : > { %3525 = vmatprep.subr.bf16.mxu0 %v4232_v30  ;;  %3607 = vmatprep.subr.bf16.mxu1 %v4234_v31  ;;  %v455_v29 = vld [vmem:[%s6381_s1 + $0x8d0] sm:$0xff]  ;;  %v448_v30 = vld [vmem:[%s6381_s1 + $0x898] sm:$0xff] }
  0xac   : > { %v456_v31 = vld [vmem:[%s6381_s1 + $0x8d8] sm:$0xff]  ;;  %v4360_v34 = vcombine.high %v447_v15, %v455_v29  ;;  %v4359_v40 = vcombine.low %v447_v15, %v455_v29 }
  0xad   : > { %v4362_v35 = vcombine.high %v448_v30, %v456_v31  ;;  %v4361_v41 = vcombine.low %v448_v30, %v456_v31 }
  0xae   : > { %3526 = vmatpush1.bf16.msra.mxu0 %v4231_v36  ;;  %3608 = vmatpush1.bf16.msra.mxu1 %v4233_v37  ;;  %v463_v36 = vld [vmem:[%s6381_s1 + $0x910] sm:$0xff] }
  0xaf   : > { %3527 = vmatprep.subr.bf16.mxu0 %v4248_v38  ;;  %3609 = vmatprep.subr.bf16.mxu1 %v4250_v39  ;;  %v471_v37 = vld [vmem:[%s6381_s1 + $0x950] sm:$0xff]  ;;  %v464_v38 = vld [vmem:[%s6381_s1 + $0x918] sm:$0xff] }
  0xb0   : > { %v472_v39 = vld [vmem:[%s6381_s1 + $0x958] sm:$0xff]  ;;  %v4376_v42 = vcombine.high %v463_v36, %v471_v37  ;;  %v4375_v48 = vcombine.low %v463_v36, %v471_v37 }
  0xb1   : > { %v4378_v43 = vcombine.high %v464_v38, %v472_v39  ;;  %v4377_v49 = vcombine.low %v464_v38, %v472_v39 }
  0xb2   : > { %3528 = vmatpush1.bf16.msra.mxu0 %v4247_v44  ;;  %3610 = vmatpush1.bf16.msra.mxu1 %v4249_v45  ;;  %v479_v44 = vld [vmem:[%s6381_s1 + $0x990] sm:$0xff] }
  0xb3   : > { %3529 = vmatprep.subr.bf16.mxu0 %v4264_v46  ;;  %3611 = vmatprep.subr.bf16.mxu1 %v4266_v47  ;;  %v487_v45 = vld [vmem:[%s6381_s1 + $0x9d0] sm:$0xff]  ;;  %v480_v46 = vld [vmem:[%s6381_s1 + $0x998] sm:$0xff] }
  0xb4   : > { %v488_v47 = vld [vmem:[%s6381_s1 + $0x9d8] sm:$0xff]  ;;  %v4392_v50 = vcombine.high %v479_v44, %v487_v45  ;;  %v4391_v58 = vcombine.low %v479_v44, %v487_v45 }
  0xb5   : > { %v4394_v51 = vcombine.high %v480_v46, %v488_v47  ;;  %v4393_v59 = vcombine.low %v480_v46, %v488_v47 }
  0xb6   : > { %3530 = vmatpush1.bf16.msra.mxu0 %v4263_v52  ;;  %3612 = vmatpush1.bf16.msra.mxu1 %v4265_v54  ;;  %v495_v52 = vld [vmem:[%s6381_s1 + $0xa10] sm:$0xff] }
  0xb7   : > { %3531 = vmatprep.subr.bf16.mxu0 %v4280_v55  ;;  %3613 = vmatprep.subr.bf16.mxu1 %v4282_v56  ;;  %v503_v54 = vld [vmem:[%s6381_s1 + $0xa50] sm:$0xff]  ;;  %v496_v55 = vld [vmem:[%s6381_s1 + $0xa18] sm:$0xff] }
  0xb8   : > { %v504_v56 = vld [vmem:[%s6381_s1 + $0xa58] sm:$0xff]  ;;  %v4408_v60 = vcombine.high %v495_v52, %v503_v54  ;;  %v4407_v2 = vcombine.low %v495_v52, %v503_v54 }
  0xb9   : > { %v4410_v61 = vcombine.high %v496_v55, %v504_v56  ;;  %v4409_v3 = vcombine.low %v496_v55, %v504_v56 }
  0xba   : > { %3532 = vmatpush1.bf16.msra.mxu0 %v4279_v62  ;;  %3614 = vmatpush1.bf16.msra.mxu1 %v4281_v63  ;;  %v511_v62 = vld [vmem:[%s6381_s1 + $0xa90] sm:$0xff] }
  0xbb   : > { %3533 = vmatprep.subr.bf16.mxu0 %v4296_v0  ;;  %3615 = vmatprep.subr.bf16.mxu1 %v4298_v1  ;;  %v519_v63 = vld [vmem:[%s6381_s1 + $0xad0] sm:$0xff]  ;;  %v512_v0 = vld [vmem:[%s6381_s1 + $0xa98] sm:$0xff] }
  0xbc   : > { %v520_v1 = vld [vmem:[%s6381_s1 + $0xad8] sm:$0xff]  ;;  %v4424_v4 = vcombine.high %v511_v62, %v519_v63  ;;  %v4423_v10 = vcombine.low %v511_v62, %v519_v63 }
  0xbd   : > { %v4426_v5 = vcombine.high %v512_v0, %v520_v1  ;;  %v4425_v11 = vcombine.low %v512_v0, %v520_v1 }
  0xbe   : > { %3534 = vmatpush1.bf16.msra.mxu0 %v4295_v6  ;;  %3616 = vmatpush1.bf16.msra.mxu1 %v4297_v7  ;;  %v527_v6 = vld [vmem:[%s6381_s1 + $0xb10] sm:$0xff] }
  0xbf   : > { %3535 = vmatprep.subr.bf16.mxu0 %v4312_v8  ;;  %3617 = vmatprep.subr.bf16.mxu1 %v4314_v9  ;;  %v535_v7 = vld [vmem:[%s6381_s1 + $0xb50] sm:$0xff]  ;;  %v528_v8 = vld [vmem:[%s6381_s1 + $0xb18] sm:$0xff] }
  0xc0   : > { %v536_v9 = vld [vmem:[%s6381_s1 + $0xb58] sm:$0xff]  ;;  %v4440_v13 = vcombine.high %v527_v6, %v535_v7  ;;  %v4439_v53 = vcombine.low %v527_v6, %v535_v7 }
  0xc1   : > { %v4442_v14 = vcombine.high %v528_v8, %v536_v9  ;;  %v4441_v20 = vcombine.low %v528_v8, %v536_v9 }
  0xc2   : > { %3536 = vmatpush1.bf16.msra.mxu0 %v4311_v16  ;;  %3618 = vmatpush1.bf16.msra.mxu1 %v4313_v17  ;;  %v543_v16 = vld [vmem:[%s6381_s1 + $0xb90] sm:$0xff] }
  0xc3   : > { %3537 = vmatprep.subr.bf16.mxu0 %v4328_v18  ;;  %3619 = vmatprep.subr.bf16.mxu1 %v4330_v19  ;;  %v551_v17 = vld [vmem:[%s6381_s1 + $0xbd0] sm:$0xff]  ;;  %v544_v18 = vld [vmem:[%s6381_s1 + $0xb98] sm:$0xff] }
  0xc4   : > { %v552_v19 = vld [vmem:[%s6381_s1 + $0xbd8] sm:$0xff]  ;;  %v4456_v23 = vcombine.high %v543_v16, %v551_v17  ;;  %v4455_v15 = vcombine.low %v543_v16, %v551_v17 }
  0xc5   : > { %v4458_v24 = vcombine.high %v544_v18, %v552_v19  ;;  %v4457_v29 = vcombine.low %v544_v18, %v552_v19 }
  0xc6   : > { %3538 = vmatpush1.bf16.msra.mxu0 %v4327_v25  ;;  %3620 = vmatpush1.bf16.msra.mxu1 %v4329_v26  ;;  %v559_v25 = vld [vmem:[%s6381_s1 + $0xc10] sm:$0xff] }
  0xc7   : > { %3548 = vmatprep.subr.bf16.mxu0 %v4344_v27  ;;  %3630 = vmatprep.subr.bf16.mxu1 %v4346_v28  ;;  %v567_v26 = vld [vmem:[%s6381_s1 + $0xc50] sm:$0xff]  ;;  %v560_v27 = vld [vmem:[%s6381_s1 + $0xc18] sm:$0xff] }
  0xc8   : > { %v568_v28 = vld [vmem:[%s6381_s1 + $0xc58] sm:$0xff]  ;;  %v4472_v30 = vcombine.high %v559_v25, %v567_v26  ;;  %v4471_v36 = vcombine.low %v559_v25, %v567_v26 }
  0xc9   : > { %3540 = vmatmul.mubr.bf16.vlgmr.msra.gmra.mrb[4].mxu0 %v4928_v12  ;;  %3622 = vmatmul.mubr.bf16.vlgmr.msra.gmra.mrb[4].mxu1 %v4928_v12  ;;  %v4474_v31 = vcombine.high %v560_v27, %v568_v28  ;;  %v4473_v37 = vcombine.low %v560_v27, %v568_v28 }
  0xca   : > { %3549 = vmatpush1.bf16.msra.mxu0 %v4343_v32  ;;  %3631 = vmatpush1.bf16.msra.mxu1 %v4345_v33  ;;  %v575_v32 = vld [vmem:[%s6381_s1 + $0xc90] sm:$0xff] }
  0xcb   : > { %3550 = vmatprep.subr.bf16.mxu0 %v4360_v34  ;;  %3632 = vmatprep.subr.bf16.mxu1 %v4362_v35  ;;  %v583_v33 = vld [vmem:[%s6381_s1 + $0xcd0] sm:$0xff]  ;;  %v576_v34 = vld [vmem:[%s6381_s1 + $0xc98] sm:$0xff] }
  0xcc   : > { %3580 = vmatprep.mubr.bf16.mxu0 %v4947_v21  ;;  %3662 = vmatprep.mubr.bf16.mxu1 %v4947_v21  ;;  %v584_v35 = vld [vmem:[%s6381_s1 + $0xcd8] sm:$0xff]  ;;  %v4488_v38 = vcombine.high %v575_v32, %v583_v33  ;;  %v4487_v44 = vcombine.low %v575_v32, %v583_v33 }
  0xcd   : > { %v4490_v39 = vcombine.high %v576_v34, %v584_v35  ;;  %v4489_v45 = vcombine.low %v576_v34, %v584_v35 }
  0xce   : > { %3551 = vmatpush1.bf16.msra.mxu0 %v4359_v40  ;;  %3633 = vmatpush1.bf16.msra.mxu1 %v4361_v41  ;;  %v591_v40 = vld [vmem:[%s6381_s1 + $0xd10] sm:$0xff] }
  0xcf   : > { %3552 = vmatprep.subr.bf16.mxu0 %v4376_v42  ;;  %3634 = vmatprep.subr.bf16.mxu1 %v4378_v43  ;;  %v599_v41 = vld [vmem:[%s6381_s1 + $0xd50] sm:$0xff]  ;;  %v592_v42 = vld [vmem:[%s6381_s1 + $0xd18] sm:$0xff] }
  0xd0   : > { %v600_v43 = vld [vmem:[%s6381_s1 + $0xd58] sm:$0xff]  ;;  %v4504_v46 = vcombine.high %v591_v40, %v599_v41  ;;  %v4503_v52 = vcombine.low %v591_v40, %v599_v41 }
  0xd1   : > { %v4506_v47 = vcombine.high %v592_v42, %v600_v43  ;;  %v4505_v54 = vcombine.low %v592_v42, %v600_v43 }
  0xd2   : > { %3553 = vmatpush1.bf16.msra.mxu0 %v4375_v48  ;;  %3635 = vmatpush1.bf16.msra.mxu1 %v4377_v49  ;;  %v607_v48 = vld [vmem:[%s6381_s1 + $0xd90] sm:$0xff] }
  0xd3   : > { %3554 = vmatprep.subr.bf16.mxu0 %v4392_v50  ;;  %3636 = vmatprep.subr.bf16.mxu1 %v4394_v51  ;;  %v615_v49 = vld [vmem:[%s6381_s1 + $0xdd0] sm:$0xff]  ;;  %v608_v50 = vld [vmem:[%s6381_s1 + $0xd98] sm:$0xff] }
  0xd4   : > { %v616_v51 = vld [vmem:[%s6381_s1 + $0xdd8] sm:$0xff]  ;;  %v4520_v55 = vcombine.high %v607_v48, %v615_v49  ;;  %v4519_v62 = vcombine.low %v607_v48, %v615_v49 }
  0xd5   : > { %v4522_v56 = vcombine.high %v608_v50, %v616_v51  ;;  %v4521_v63 = vcombine.low %v608_v50, %v616_v51 }
  0xd6   : > { %3555 = vmatpush1.bf16.msra.mxu0 %v4391_v58  ;;  %3637 = vmatpush1.bf16.msra.mxu1 %v4393_v59  ;;  %v623_v58 = vld [vmem:[%s6381_s1 + $0xe10] sm:$0xff] }
  0xd7   : > { %3556 = vmatprep.subr.bf16.mxu0 %v4408_v60  ;;  %3638 = vmatprep.subr.bf16.mxu1 %v4410_v61  ;;  %v631_v59 = vld [vmem:[%s6381_s1 + $0xe50] sm:$0xff]  ;;  %v624_v60 = vld [vmem:[%s6381_s1 + $0xe18] sm:$0xff] }
  0xd8   : > { %v632_v61 = vld [vmem:[%s6381_s1 + $0xe58] sm:$0xff]  ;;  %v4536_v0 = vcombine.high %v623_v58, %v631_v59  ;;  %v4535_v6 = vcombine.low %v623_v58, %v631_v59 }
  0xd9   : > { %v4538_v1 = vcombine.high %v624_v60, %v632_v61  ;;  %v4537_v7 = vcombine.low %v624_v60, %v632_v61 }
  0xda   : > { %3557 = vmatpush1.bf16.msra.mxu0 %v4407_v2  ;;  %3639 = vmatpush1.bf16.msra.mxu1 %v4409_v3  ;;  %v639_v2 = vld [vmem:[%s6381_s1 + $0xe90] sm:$0xff] }
  0xdb   : > { %3558 = vmatprep.subr.bf16.mxu0 %v4424_v4  ;;  %3640 = vmatprep.subr.bf16.mxu1 %v4426_v5  ;;  %v647_v3 = vld [vmem:[%s6381_s1 + $0xed0] sm:$0xff]  ;;  %v640_v4 = vld [vmem:[%s6381_s1 + $0xe98] sm:$0xff] }
  0xdc   : > { %v648_v5 = vld [vmem:[%s6381_s1 + $0xed8] sm:$0xff]  ;;  %v4552_v8 = vcombine.high %v639_v2, %v647_v3  ;;  %v4551_v16 = vcombine.low %v639_v2, %v647_v3 }
  0xdd   : > { %v4554_v9 = vcombine.high %v640_v4, %v648_v5  ;;  %v4553_v17 = vcombine.low %v640_v4, %v648_v5 }
  0xde   : > { %3559 = vmatpush1.bf16.msra.mxu0 %v4423_v10  ;;  %3641 = vmatpush1.bf16.msra.mxu1 %v4425_v11  ;;  %v655_v10 = vld [vmem:[%s6381_s1 + $0xf10] sm:$0xff] }
  0xdf   : > { %3560 = vmatprep.subr.bf16.mxu0 %v4440_v13  ;;  %3642 = vmatprep.subr.bf16.mxu1 %v4442_v14  ;;  %v663_v11 = vld [vmem:[%s6381_s1 + $0xf50] sm:$0xff]  ;;  %v656_v13 = vld [vmem:[%s6381_s1 + $0xf18] sm:$0xff] }
  0xe0   : > { %v664_v14 = vld [vmem:[%s6381_s1 + $0xf58] sm:$0xff]  ;;  %v4568_v18 = vcombine.high %v655_v10, %v663_v11  ;;  %v4567_v25 = vcombine.low %v655_v10, %v663_v11 }
  0xe1   : > { %v4570_v19 = vcombine.high %v656_v13, %v664_v14  ;;  %v4569_v26 = vcombine.low %v656_v13, %v664_v14 }
  0xe2   : > { %3561 = vmatpush1.bf16.msra.mxu0 %v4439_v53  ;;  %3643 = vmatpush1.bf16.msra.mxu1 %v4441_v20  ;;  %v671_v53 = vld [vmem:[%s6381_s1 + $0xf90] sm:$0xff] }
  0xe3   : > { %3562 = vmatprep.subr.bf16.mxu0 %v4456_v23  ;;  %3644 = vmatprep.subr.bf16.mxu1 %v4458_v24  ;;  %v679_v20 = vld [vmem:[%s6381_s1 + $0xfd0] sm:$0xff]  ;;  %v672_v23 = vld [vmem:[%s6381_s1 + $0xf98] sm:$0xff] }
  0xe4   : > { %v680_v24 = vld [vmem:[%s6381_s1 + $0xfd8] sm:$0xff]  ;;  %v4584_v27 = vcombine.high %v671_v53, %v679_v20  ;;  %v4583_v32 = vcombine.low %v671_v53, %v679_v20 }
  0xe5   : > { %v4586_v28 = vcombine.high %v672_v23, %v680_v24  ;;  %v4585_v33 = vcombine.low %v672_v23, %v680_v24 }
  0xe6   : > { %3563 = vmatpush1.bf16.msra.mxu0 %v4455_v15  ;;  %3645 = vmatpush1.bf16.msra.mxu1 %v4457_v29  ;;  %v177_v15 = vld [vmem:[%s6381_s1 + $0x20] sm:$0xff] }
  0xe7   : > { %3564 = vmatprep.subr.bf16.mxu0 %v4472_v30  ;;  %3646 = vmatprep.subr.bf16.mxu1 %v4474_v31  ;;  %v185_v29 = vld [vmem:[%s6381_s1 + $0x60] sm:$0xff]  ;;  %v178_v30 = vld [vmem:[%s6381_s1 + $0x28] sm:$0xff] }
  0xe8   : > { %v186_v31 = vld [vmem:[%s6381_s1 + $0x68] sm:$0xff]  ;;  %v4092_v34 = vcombine.high %v177_v15, %v185_v29  ;;  %v4091_v40 = vcombine.low %v177_v15, %v185_v29 }
  0xe9   : > { %v4094_v35 = vcombine.high %v178_v30, %v186_v31  ;;  %v4093_v41 = vcombine.low %v178_v30, %v186_v31 }
  0xea   : > { %3565 = vmatpush1.bf16.msra.mxu0 %v4471_v36  ;;  %3647 = vmatpush1.bf16.msra.mxu1 %v4473_v37  ;;  %v193_v36 = vld [vmem:[%s6381_s1 + $0xa0] sm:$0xff] }
  0xeb   : > { %3566 = vmatprep.subr.bf16.mxu0 %v4488_v38  ;;  %3648 = vmatprep.subr.bf16.mxu1 %v4490_v39  ;;  %v201_v37 = vld [vmem:[%s6381_s1 + $0xe0] sm:$0xff]  ;;  %v194_v38 = vld [vmem:[%s6381_s1 + $0xa8] sm:$0xff] }
  0xec   : > { %v202_v39 = vld [vmem:[%s6381_s1 + $0xe8] sm:$0xff]  ;;  %v4108_v42 = vcombine.high %v193_v36, %v201_v37  ;;  %v4107_v48 = vcombine.low %v193_v36, %v201_v37 }
  0xed   : > { %v4110_v43 = vcombine.high %v194_v38, %v202_v39  ;;  %v4109_v49 = vcombine.low %v194_v38, %v202_v39 }
  0xee   : > { %3567 = vmatpush1.bf16.msra.mxu0 %v4487_v44  ;;  %3649 = vmatpush1.bf16.msra.mxu1 %v4489_v45  ;;  %v209_v44 = vld [vmem:[%s6381_s1 + $0x120] sm:$0xff] }
  0xef   : > { %3568 = vmatprep.subr.bf16.mxu0 %v4504_v46  ;;  %3650 = vmatprep.subr.bf16.mxu1 %v4506_v47  ;;  %v217_v45 = vld [vmem:[%s6381_s1 + $0x160] sm:$0xff]  ;;  %v210_v46 = vld [vmem:[%s6381_s1 + $0x128] sm:$0xff] }
  0xf0   : > { %v218_v47 = vld [vmem:[%s6381_s1 + $0x168] sm:$0xff]  ;;  %v4124_v50 = vcombine.high %v209_v44, %v217_v45  ;;  %v4123_v58 = vcombine.low %v209_v44, %v217_v45 }
  0xf1   : > { %v4126_v51 = vcombine.high %v210_v46, %v218_v47  ;;  %v4125_v59 = vcombine.low %v210_v46, %v218_v47 }
  0xf2   : > { %3569 = vmatpush1.bf16.msra.mxu0 %v4503_v52  ;;  %3651 = vmatpush1.bf16.msra.mxu1 %v4505_v54  ;;  %v225_v52 = vld [vmem:[%s6381_s1 + $0x1a0] sm:$0xff] }
  0xf3   : > { %3570 = vmatprep.subr.bf16.mxu0 %v4520_v55  ;;  %3652 = vmatprep.subr.bf16.mxu1 %v4522_v56  ;;  %v233_v54 = vld [vmem:[%s6381_s1 + $0x1e0] sm:$0xff]  ;;  %v226_v55 = vld [vmem:[%s6381_s1 + $0x1a8] sm:$0xff] }
  0xf4   : > { %v234_v56 = vld [vmem:[%s6381_s1 + $0x1e8] sm:$0xff]  ;;  %v4140_v60 = vcombine.high %v225_v52, %v233_v54  ;;  %v4139_v2 = vcombine.low %v225_v52, %v233_v54 }
  0xf5   : > { %v4142_v61 = vcombine.high %v226_v55, %v234_v56  ;;  %v4141_v3 = vcombine.low %v226_v55, %v234_v56 }
  0xf6   : > { %3571 = vmatpush1.bf16.msra.mxu0 %v4519_v62  ;;  %3653 = vmatpush1.bf16.msra.mxu1 %v4521_v63  ;;  %v241_v62 = vld [vmem:[%s6381_s1 + $0x220] sm:$0xff] }
  0xf7   : > { %3572 = vmatprep.subr.bf16.mxu0 %v4536_v0  ;;  %3654 = vmatprep.subr.bf16.mxu1 %v4538_v1  ;;  %v249_v63 = vld [vmem:[%s6381_s1 + $0x260] sm:$0xff]  ;;  %v242_v0 = vld [vmem:[%s6381_s1 + $0x228] sm:$0xff] }
  0xf8   : > { %v250_v1 = vld [vmem:[%s6381_s1 + $0x268] sm:$0xff]  ;;  %v4156_v4 = vcombine.high %v241_v62, %v249_v63  ;;  %v4155_v10 = vcombine.low %v241_v62, %v249_v63 }
  0xf9   : > { %v4158_v5 = vcombine.high %v242_v0, %v250_v1  ;;  %v4157_v11 = vcombine.low %v242_v0, %v250_v1 }
  0xfa   : > { %3573 = vmatpush1.bf16.msra.mxu0 %v4535_v6  ;;  %3655 = vmatpush1.bf16.msra.mxu1 %v4537_v7  ;;  %v257_v6 = vld [vmem:[%s6381_s1 + $0x2a0] sm:$0xff] }
  0xfb   : > { %3574 = vmatprep.subr.bf16.mxu0 %v4552_v8  ;;  %3656 = vmatprep.subr.bf16.mxu1 %v4554_v9  ;;  %v265_v7 = vld [vmem:[%s6381_s1 + $0x2e0] sm:$0xff]  ;;  %v258_v8 = vld [vmem:[%s6381_s1 + $0x2a8] sm:$0xff] }
  0xfc   : > { %v266_v9 = vld [vmem:[%s6381_s1 + $0x2e8] sm:$0xff]  ;;  %v4172_v13 = vcombine.high %v257_v6, %v265_v7  ;;  %v4171_v53 = vcombine.low %v257_v6, %v265_v7 }
  0xfd   : > { %v4174_v14 = vcombine.high %v258_v8, %v266_v9  ;;  %v4173_v20 = vcombine.low %v258_v8, %v266_v9 }
  0xfe   : > { %3575 = vmatpush1.bf16.msra.mxu0 %v4551_v16  ;;  %3657 = vmatpush1.bf16.msra.mxu1 %v4553_v17  ;;  %v273_v16 = vld [vmem:[%s6381_s1 + $0x320] sm:$0xff] }
  0xff   : > { %3576 = vmatprep.subr.bf16.mxu0 %v4568_v18  ;;  %3658 = vmatprep.subr.bf16.mxu1 %v4570_v19  ;;  %v281_v17 = vld [vmem:[%s6381_s1 + $0x360] sm:$0xff]  ;;  %v274_v18 = vld [vmem:[%s6381_s1 + $0x328] sm:$0xff] }
 0x100   : > { %v282_v19 = vld [vmem:[%s6381_s1 + $0x368] sm:$0xff]  ;;  %v4188_v23 = vcombine.high %v273_v16, %v281_v17  ;;  %v4187_v15 = vcombine.low %v273_v16, %v281_v17 }
 0x101   : > { %v4190_v24 = vcombine.high %v274_v18, %v282_v19  ;;  %v4189_v29 = vcombine.low %v274_v18, %v282_v19 }
 0x102   : > { %3577 = vmatpush1.bf16.msra.mxu0 %v4567_v25  ;;  %3659 = vmatpush1.bf16.msra.mxu1 %v4569_v26  ;;  %v289_v25 = vld [vmem:[%s6381_s1 + $0x3a0] sm:$0xff] }
 0x103   : > { %3578 = vmatprep.subr.bf16.mxu0 %v4584_v27  ;;  %3660 = vmatprep.subr.bf16.mxu1 %v4586_v28  ;;  %v297_v26 = vld [vmem:[%s6381_s1 + $0x3e0] sm:$0xff]  ;;  %v290_v27 = vld [vmem:[%s6381_s1 + $0x3a8] sm:$0xff] }
 0x104   : > { %v298_v28 = vld [vmem:[%s6381_s1 + $0x3e8] sm:$0xff]  ;;  %v4204_v30 = vcombine.high %v289_v25, %v297_v26  ;;  %v4203_v36 = vcombine.low %v289_v25, %v297_v26 }
 0x105   : > { %v4206_v31 = vcombine.high %v290_v27, %v298_v28  ;;  %v4205_v37 = vcombine.low %v290_v27, %v298_v28 }
 0x106   : > { %3579 = vmatpush1.bf16.msra.mxu0 %v4583_v32  ;;  %3661 = vmatpush1.bf16.msra.mxu1 %v4585_v33  ;;  %v305_v32 = vld [vmem:[%s6381_s1 + $0x420] sm:$0xff] }
 0x107   : > { %3671 = vmatprep.subr.bf16.mxu0 %v4092_v34  ;;  %3753 = vmatprep.subr.bf16.mxu1 %v4094_v35  ;;  %v313_v33 = vld [vmem:[%s6381_s1 + $0x460] sm:$0xff]  ;;  %v306_v34 = vld [vmem:[%s6381_s1 + $0x428] sm:$0xff] }
 0x108   : > { %v314_v35 = vld [vmem:[%s6381_s1 + $0x468] sm:$0xff]  ;;  %v4220_v38 = vcombine.high %v305_v32, %v313_v33  ;;  %v4219_v44 = vcombine.low %v305_v32, %v313_v33 }
 0x109   : > { %3581 = vmatmul.mubr.bf16.vlgmr.msra.gmra.mrb[4].mxu0 %v5135_v22  ;;  %3663 = vmatmul.mubr.bf16.vlgmr.msra.gmra.mrb[4].mxu1 %v5135_v22  ;;  %v4222_v39 = vcombine.high %v306_v34, %v314_v35  ;;  %v4221_v45 = vcombine.low %v306_v34, %v314_v35 }
 0x10a   : > { %3672 = vmatpush1.bf16.msra.mxu0 %v4091_v40  ;;  %3754 = vmatpush1.bf16.msra.mxu1 %v4093_v41  ;;  %v321_v40 = vld [vmem:[%s6381_s1 + $0x4a0] sm:$0xff] }
 0x10b   : > { %3673 = vmatprep.subr.bf16.mxu0 %v4108_v42  ;;  %3755 = vmatprep.subr.bf16.mxu1 %v4110_v43  ;;  %v329_v41 = vld [vmem:[%s6381_s1 + $0x4e0] sm:$0xff]  ;;  %v322_v42 = vld [vmem:[%s6381_s1 + $0x4a8] sm:$0xff] }
 0x10c   : > { %3703 = vmatprep.mubr.bf16.mxu0 %v4802_v57  ;;  %3785 = vmatprep.mubr.bf16.mxu1 %v4802_v57  ;;  %v330_v43 = vld [vmem:[%s6381_s1 + $0x4e8] sm:$0xff]  ;;  %v4236_v46 = vcombine.high %v321_v40, %v329_v41  ;;  %v4235_v52 = vcombine.low %v321_v40, %v329_v41 }
 0x10d   : > { %v4238_v47 = vcombine.high %v322_v42, %v330_v43  ;;  %v4237_v54 = vcombine.low %v322_v42, %v330_v43 }
 0x10e   : > { %3674 = vmatpush1.bf16.msra.mxu0 %v4107_v48  ;;  %3756 = vmatpush1.bf16.msra.mxu1 %v4109_v49  ;;  %v337_v48 = vld [vmem:[%s6381_s1 + $0x520] sm:$0xff] }
 0x10f   : > { %3675 = vmatprep.subr.bf16.mxu0 %v4124_v50  ;;  %3757 = vmatprep.subr.bf16.mxu1 %v4126_v51  ;;  %v345_v49 = vld [vmem:[%s6381_s1 + $0x560] sm:$0xff]  ;;  %v338_v50 = vld [vmem:[%s6381_s1 + $0x528] sm:$0xff] }
 0x110   : > { %v346_v51 = vld [vmem:[%s6381_s1 + $0x568] sm:$0xff]  ;;  %v4252_v55 = vcombine.high %v337_v48, %v345_v49  ;;  %v4251_v62 = vcombine.low %v337_v48, %v345_v49 }
 0x111   : > { %v4254_v56 = vcombine.high %v338_v50, %v346_v51  ;;  %v4253_v63 = vcombine.low %v338_v50, %v346_v51 }
 0x112   : > { %3676 = vmatpush1.bf16.msra.mxu0 %v4123_v58  ;;  %3758 = vmatpush1.bf16.msra.mxu1 %v4125_v59  ;;  %v353_v58 = vld [vmem:[%s6381_s1 + $0x5a0] sm:$0xff] }
 0x113   : > { %3677 = vmatprep.subr.bf16.mxu0 %v4140_v60  ;;  %3759 = vmatprep.subr.bf16.mxu1 %v4142_v61  ;;  %v361_v59 = vld [vmem:[%s6381_s1 + $0x5e0] sm:$0xff]  ;;  %v354_v60 = vld [vmem:[%s6381_s1 + $0x5a8] sm:$0xff] }
 0x114   : > { %v362_v61 = vld [vmem:[%s6381_s1 + $0x5e8] sm:$0xff]  ;;  %v4268_v0 = vcombine.high %v353_v58, %v361_v59  ;;  %v4267_v6 = vcombine.low %v353_v58, %v361_v59 }
 0x115   : > { %v4270_v1 = vcombine.high %v354_v60, %v362_v61  ;;  %v4269_v7 = vcombine.low %v354_v60, %v362_v61 }
 0x116   : > { %3678 = vmatpush1.bf16.msra.mxu0 %v4139_v2  ;;  %3760 = vmatpush1.bf16.msra.mxu1 %v4141_v3  ;;  %v369_v2 = vld [vmem:[%s6381_s1 + $0x620] sm:$0xff] }
 0x117   : > { %3679 = vmatprep.subr.bf16.mxu0 %v4156_v4  ;;  %3761 = vmatprep.subr.bf16.mxu1 %v4158_v5  ;;  %v377_v3 = vld [vmem:[%s6381_s1 + $0x660] sm:$0xff]  ;;  %v370_v4 = vld [vmem:[%s6381_s1 + $0x628] sm:$0xff] }
 0x118   : > { %v378_v5 = vld [vmem:[%s6381_s1 + $0x668] sm:$0xff]  ;;  %v4284_v8 = vcombine.high %v369_v2, %v377_v3  ;;  %v4283_v16 = vcombine.low %v369_v2, %v377_v3  ;;  %v689_v2 = vlaneseq }
 0x119   : > { %v4286_v9 = vcombine.high %v370_v4, %v378_v5  ;;  %v4285_v17 = vcombine.low %v370_v4, %v378_v5 }
 0x11a   : > { %3680 = vmatpush1.bf16.msra.mxu0 %v4155_v10  ;;  %3762 = vmatpush1.bf16.msra.mxu1 %v4157_v11  ;;  %v385_v10 = vld [vmem:[%s6381_s1 + $0x6a0] sm:$0xff] }
 0x11b   : > { %3681 = vmatprep.subr.bf16.mxu0 %v4172_v13  ;;  %3763 = vmatprep.subr.bf16.mxu1 %v4174_v14  ;;  %v393_v11 = vld [vmem:[%s6381_s1 + $0x6e0] sm:$0xff]  ;;  %v386_v13 = vld [vmem:[%s6381_s1 + $0x6a8] sm:$0xff] }
 0x11c   : > { %v394_v14 = vld [vmem:[%s6381_s1 + $0x6e8] sm:$0xff]  ;;  %v4300_v18 = vcombine.high %v385_v10, %v393_v11  ;;  %v4299_v25 = vcombine.low %v385_v10, %v393_v11  ;;  %v5771_v11 = vshrl.u32 %v689_v2, 7  ;;  %v569_v2 = vld [vmem:[%s6381_s1 + $0xc60] sm:$0xff] }
 0x11d   : > { %v4302_v19 = vcombine.high %v386_v13, %v394_v14  ;;  %v4301_v26 = vcombine.low %v386_v13, %v394_v14  ;;  %v506_v10 = vld [vmem:[%s6381_s1 + $0xa68] sm:$0xff] }
 0x11e   : > { %3682 = vmatpush1.bf16.msra.mxu0 %v4171_v53  ;;  %3764 = vmatpush1.bf16.msra.mxu1 %v4173_v20  ;;  %v401_v53 = vld [vmem:[%s6381_s1 + $0x720] sm:$0xff] }
 0x11f   : > { %3683 = vmatprep.subr.bf16.mxu0 %v4188_v23  ;;  %3765 = vmatprep.subr.bf16.mxu1 %v4190_v24  ;;  %v409_v20 = vld [vmem:[%s6381_s1 + $0x760] sm:$0xff]  ;;  %v402_v23 = vld [vmem:[%s6381_s1 + $0x728] sm:$0xff] }
 0x120   : > { %v410_v24 = vld [vmem:[%s6381_s1 + $0x768] sm:$0xff]  ;;  %v4316_v27 = vcombine.high %v401_v53, %v409_v20  ;;  %v4315_v32 = vcombine.low %v401_v53, %v409_v20  ;;  %v691_v53 = vsub.s32 0, %v5771_v11 }
 0x121   : > { %v4318_v28 = vcombine.high %v402_v23, %v410_v24  ;;  %v4317_v33 = vcombine.low %v402_v23, %v410_v24  ;;  %v514_v20 = vld [vmem:[%s6381_s1 + $0xaa8] sm:$0xff] }
 0x122   : > { %3684 = vmatpush1.bf16.msra.mxu0 %v4187_v15  ;;  %3766 = vmatpush1.bf16.msra.mxu1 %v4189_v29  ;;  %v417_v15 = vld [vmem:[%s6381_s1 + $0x7a0] sm:$0xff]  ;;  %v522_v23 = vld [vmem:[%s6381_s1 + $0xae8] sm:$0xff] }
 0x123   : > { %3685 = vmatprep.subr.bf16.mxu0 %v4204_v30  ;;  %3767 = vmatprep.subr.bf16.mxu1 %v4206_v31  ;;  %v425_v29 = vld [vmem:[%s6381_s1 + $0x7e0] sm:$0xff]  ;;  %v418_v30 = vld [vmem:[%s6381_s1 + $0x7a8] sm:$0xff] }
 0x124   : > { %v426_v31 = vld [vmem:[%s6381_s1 + $0x7e8] sm:$0xff]  ;;  %v4332_v34 = vcombine.high %v417_v15, %v425_v29  ;;  %v4331_v40 = vcombine.low %v417_v15, %v425_v29  ;;  %v703_v15 = vsub.s32 3, %v5771_v11 }
 0x125   : > { %v4334_v35 = vcombine.high %v418_v30, %v426_v31  ;;  %v4333_v41 = vcombine.low %v418_v30, %v426_v31  ;;  %v4430_v30 = vcombine.high %v514_v20, %v522_v23  ;;  %v529_v31 = vld [vmem:[%s6381_s1 + $0xb20] sm:$0xff] }
 0x126   : > { %3686 = vmatpush1.bf16.msra.mxu0 %v4203_v36  ;;  %3768 = vmatpush1.bf16.msra.mxu1 %v4205_v37  ;;  %v433_v36 = vld [vmem:[%s6381_s1 + $0x820] sm:$0xff] }
 0x127   : > { %3687 = vmatprep.subr.bf16.mxu0 %v4220_v38  ;;  %3769 = vmatprep.subr.bf16.mxu1 %v4222_v39  ;;  %v441_v37 = vld [vmem:[%s6381_s1 + $0x860] sm:$0xff]  ;;  %v434_v38 = vld [vmem:[%s6381_s1 + $0x828] sm:$0xff] }
 0x128   : > { %v442_v39 = vld [vmem:[%s6381_s1 + $0x868] sm:$0xff]  ;;  %v4348_v42 = vcombine.high %v433_v36, %v441_v37  ;;  %v4347_v48 = vcombine.low %v433_v36, %v441_v37 }
 0x129   : > { %v4350_v43 = vcombine.high %v434_v38, %v442_v39  ;;  %v4349_v49 = vcombine.low %v434_v38, %v442_v39 }
 0x12a   : > { %3688 = vmatpush1.bf16.msra.mxu0 %v4219_v44  ;;  %3770 = vmatpush1.bf16.msra.mxu1 %v4221_v45  ;;  %v449_v44 = vld [vmem:[%s6381_s1 + $0x8a0] sm:$0xff] }
 0x12b   : > { %3689 = vmatprep.subr.bf16.mxu0 %v4236_v46  ;;  %3771 = vmatprep.subr.bf16.mxu1 %v4238_v47  ;;  %v457_v45 = vld [vmem:[%s6381_s1 + $0x8e0] sm:$0xff]  ;;  %v450_v46 = vld [vmem:[%s6381_s1 + $0x8a8] sm:$0xff] }
 0x12c   : > { %v458_v47 = vld [vmem:[%s6381_s1 + $0x8e8] sm:$0xff]  ;;  %v4364_v50 = vcombine.high %v449_v44, %v457_v45  ;;  %v4363_v58 = vcombine.low %v449_v44, %v457_v45  ;;  %v545_v44 = vld [vmem:[%s6381_s1 + $0xba0] sm:$0xff] }
 0x12d   : > { %v4366_v51 = vcombine.high %v450_v46, %v458_v47  ;;  %v4365_v59 = vcombine.low %v450_v46, %v458_v47  ;;  %v553_v45 = vld [vmem:[%s6381_s1 + $0xbe0] sm:$0xff] }
 0x12e   : > { %3690 = vmatpush1.bf16.msra.mxu0 %v4235_v52  ;;  %3772 = vmatpush1.bf16.msra.mxu1 %v4237_v54  ;;  %v465_v52 = vld [vmem:[%s6381_s1 + $0x920] sm:$0xff] }
 0x12f   : > { %3691 = vmatprep.subr.bf16.mxu0 %v4252_v55  ;;  %3773 = vmatprep.subr.bf16.mxu1 %v4254_v56  ;;  %v473_v54 = vld [vmem:[%s6381_s1 + $0x960] sm:$0xff]  ;;  %v466_v55 = vld [vmem:[%s6381_s1 + $0x928] sm:$0xff] }
 0x130   : > { %v474_v56 = vld [vmem:[%s6381_s1 + $0x968] sm:$0xff]  ;;  %v4380_v60 = vcombine.high %v465_v52, %v473_v54  ;;  %v4379_v3 = vcombine.low %v465_v52, %v473_v54 }
 0x131   : > { %v4382_v61 = vcombine.high %v466_v55, %v474_v56  ;;  %v4381_v4 = vcombine.low %v466_v55, %v474_v56 }
 0x132   : > { %3692 = vmatpush1.bf16.msra.mxu0 %v4251_v62  ;;  %3774 = vmatpush1.bf16.msra.mxu1 %v4253_v63  ;;  %v481_v62 = vld [vmem:[%s6381_s1 + $0x9a0] sm:$0xff] }
 0x133   : > { %3693 = vmatprep.subr.bf16.mxu0 %v4268_v0  ;;  %3775 = vmatprep.subr.bf16.mxu1 %v4270_v1  ;;  %v489_v63 = vld [vmem:[%s6381_s1 + $0x9e0] sm:$0xff]  ;;  %v482_v0 = vld [vmem:[%s6381_s1 + $0x9a8] sm:$0xff] }
 0x134   : > { %v490_v1 = vld [vmem:[%s6381_s1 + $0x9e8] sm:$0xff]  ;;  %v4396_v5 = vcombine.high %v481_v62, %v489_v63  ;;  %v4395_v13 = vcombine.low %v481_v62, %v489_v63  ;;  %v4460_v62 = vcombine.high %v545_v44, %v553_v45 }
 0x135   : > { %v4397_v14 = vcombine.low %v482_v0, %v490_v1 }
 0x136   : > { %3694 = vmatpush1.bf16.msra.mxu0 %v4267_v6  ;;  %3776 = vmatpush1.bf16.msra.mxu1 %v4269_v7  ;;  %v4398_v6 = vcombine.high %v482_v0, %v490_v1  ;;  %v497_v7 = vld [vmem:[%s6381_s1 + $0xa20] sm:$0xff] }
 0x137   : > { %3695 = vmatprep.subr.bf16.mxu0 %v4284_v8  ;;  %3777 = vmatprep.subr.bf16.mxu1 %v4286_v9  ;;  %v505_v8 = vld [vmem:[%s6381_s1 + $0xa60] sm:$0xff]  ;;  %v498_v9 = vld [vmem:[%s6381_s1 + $0xa28] sm:$0xff] }
 0x138   : > { %v4411_v24 = vcombine.low %v497_v7, %v505_v8  ;;  %v561_v1 = vld [vmem:[%s6381_s1 + $0xc20] sm:$0xff] }
 0x13a   : > { %3696 = vmatpush1.bf16.msra.mxu0 %v4283_v16  ;;  %3778 = vmatpush1.bf16.msra.mxu1 %v4285_v17  ;;  %v4412_v16 = vcombine.high %v497_v7, %v505_v8  ;;  %v4414_v17 = vcombine.high %v498_v9, %v506_v10  ;;  %v4476_v7 = vcombine.high %v561_v1, %v569_v2 }
 0x13b   : > { %3697 = vmatprep.subr.bf16.mxu0 %v4300_v18  ;;  %3779 = vmatprep.subr.bf16.mxu1 %v4302_v19  ;;  %v513_v18 = vld [vmem:[%s6381_s1 + $0xaa0] sm:$0xff] }
 0x13c   : > { %v521_v19 = vld [vmem:[%s6381_s1 + $0xae0] sm:$0xff] }
 0x13d   : > { %v4428_v29 = vcombine.high %v513_v18, %v521_v19  ;;  %v4427_v38 = vcombine.low %v513_v18, %v521_v19 }
 0x13e   : > { %3698 = vmatpush1.bf16.msra.mxu0 %v4299_v25  ;;  %3780 = vmatpush1.bf16.msra.mxu1 %v4301_v26  ;;  %v5789_v25 = vld [vmem:[%s6382_s2] sm:$0xff]  ;;  %v699_v26 = vsub.s32 2, %v5771_v11 }
 0x13f   : > { %3699 = vmatprep.subr.bf16.mxu0 %v4316_v27  ;;  %3781 = vmatprep.subr.bf16.mxu1 %v4318_v28  ;;  %v695_v27 = vsub.s32 1, %v5771_v11  ;;  %v4413_v28 = vcombine.low %v498_v9, %v506_v10  ;;  %v704_v39 = vrot.slane %v5789_v25, %v703_v15  ;;  %v577_v9 = vld [vmem:[%s6381_s1 + $0xca0] sm:$0xff] }
 0x140   : > { %v700_v36 = vrot.slane %v5789_v25, %v699_v26  ;;  %v585_v10 = vld [vmem:[%s6381_s1 + $0xce0] sm:$0xff] }
 0x141   : > { %v696_v37 = vrot.slane %v5789_v25, %v695_v27  ;;  %v4492_v18 = vcombine.high %v577_v9, %v585_v10 }
 0x142   : > { %3700 = vmatpush1.bf16.msra.mxu0 %v4315_v32  ;;  %3782 = vmatpush1.bf16.msra.mxu1 %v4317_v33  ;;  %v537_v32 = vld [vmem:[%s6381_s1 + $0xb60] sm:$0xff]  ;;  %v692_v33 = vrot.slane %v5789_v25, %v691_v53 }
 0x143   : > { %3701 = vmatprep.subr.bf16.mxu0 %v4332_v34  ;;  %3783 = vmatprep.subr.bf16.mxu1 %v4334_v35  ;;  %v530_v34 = vld [vmem:[%s6381_s1 + $0xb28] sm:$0xff]  ;;  %v4443_v56 = vcombine.low %v529_v31, %v537_v32 }
 0x144   : > { %v538_v35 = vld [vmem:[%s6381_s1 + $0xb68] sm:$0xff] }
 0x146   : > { %3702 = vmatpush1.bf16.msra.mxu0 %v4331_v40  ;;  %3784 = vmatpush1.bf16.msra.mxu1 %v4333_v41  ;;  %v4429_v40 = vcombine.low %v514_v20, %v522_v23  ;;  %v4444_v41 = vcombine.high %v529_v31, %v537_v32  ;;  %v593_v20 = vld [vmem:[%s6381_s1 + $0xd20] sm:$0xff] }
 0x147   : > { %3712 = vmatprep.subr.bf16.mxu0 %v4348_v42  ;;  %3794 = vmatprep.subr.bf16.mxu1 %v4350_v43  ;;  %v4446_v43 = vcombine.high %v530_v34, %v538_v35  ;;  %v601_v23 = vld [vmem:[%s6381_s1 + $0xd60] sm:$0xff] }
 0x148   : > { %v4508_v31 = vcombine.high %v593_v20, %v601_v23 }
 0x149   : > { %3704 = vmatmul.mubr.bf16.vlgmr.msra.gmra.mrb[8].mxu0 %v4928_v12  ;;  %3786 = vmatmul.mubr.bf16.vlgmr.msra.gmra.mrb[8].mxu1 %v4928_v12 }
 0x14a   : > { %3713 = vmatpush1.bf16.msra.mxu0 %v4347_v48  ;;  %3795 = vmatpush1.bf16.msra.mxu1 %v4349_v49  ;;  %v546_v49 = vld [vmem:[%s6381_s1 + $0xba8] sm:$0xff] }
 0x14b   : > { %3714 = vmatprep.subr.bf16.mxu0 %v4364_v50  ;;  %3796 = vmatprep.subr.bf16.mxu1 %v4366_v51  ;;  %v554_v50 = vld [vmem:[%s6381_s1 + $0xbe8] sm:$0xff] }
 0x14c   : > { %3744 = vmatprep.mubr.bf16.mxu0 %v4947_v21  ;;  %3826 = vmatprep.mubr.bf16.mxu1 %v4947_v21  ;;  %v4462_v0 = vcombine.high %v546_v49, %v554_v50 }
 0x14e   : > { %3715 = vmatpush1.bf16.msra.mxu0 %v4363_v58  ;;  %3797 = vmatpush1.bf16.msra.mxu1 %v4365_v59 }
 0x14f   : > { %3716 = vmatprep.subr.bf16.mxu0 %v4380_v60  ;;  %3798 = vmatprep.subr.bf16.mxu1 %v4382_v61  ;;  %v4445_v61 = vcombine.low %v530_v34, %v538_v35  ;;  %v617_v34 = vld [vmem:[%s6381_s1 + $0xde0] sm:$0xff]  ;;  %v610_v35 = vld [vmem:[%s6381_s1 + $0xda8] sm:$0xff] }
 0x152   : > { %3717 = vmatpush1.bf16.msra.mxu0 %v4379_v3  ;;  %3799 = vmatpush1.bf16.msra.mxu1 %v4381_v4  ;;  %v562_v3 = vld [vmem:[%s6381_s1 + $0xc28] sm:$0xff] }
 0x153   : > { %3718 = vmatprep.subr.bf16.mxu0 %v4396_v5  ;;  %3800 = vmatprep.subr.bf16.mxu1 %v4398_v6  ;;  %v570_v4 = vld [vmem:[%s6381_s1 + $0xc68] sm:$0xff]  ;;  %v4459_v5 = vcombine.low %v545_v44, %v553_v45  ;;  %v4461_v6 = vcombine.low %v546_v49, %v554_v50  ;;  %v641_v49 = vld [vmem:[%s6381_s1 + $0xea0] sm:$0xff] }
 0x154   : > { %v4478_v8 = vcombine.high %v562_v3, %v570_v4  ;;  %v634_v44 = vld [vmem:[%s6381_s1 + $0xe68] sm:$0xff]  ;;  %v649_v50 = vld [vmem:[%s6381_s1 + $0xee0] sm:$0xff] }
 0x156   : > { %3719 = vmatpush1.bf16.msra.mxu0 %v4395_v13  ;;  %3801 = vmatpush1.bf16.msra.mxu1 %v4397_v14  ;;  %v578_v13 = vld [vmem:[%s6381_s1 + $0xca8] sm:$0xff] }
 0x157   : > { %3720 = vmatprep.subr.bf16.mxu0 %v4412_v16  ;;  %3802 = vmatprep.subr.bf16.mxu1 %v4414_v17  ;;  %v586_v14 = vld [vmem:[%s6381_s1 + $0xce8] sm:$0xff]  ;;  %v4475_v16 = vcombine.low %v561_v1, %v569_v2  ;;  %v4477_v17 = vcombine.low %v562_v3, %v570_v4  ;;  %v673_v3 = vld [vmem:[%s6381_s1 + $0xfa0] sm:$0xff] }
 0x158   : > { %v4494_v19 = vcombine.high %v578_v13, %v586_v14  ;;  %v681_v4 = vld [vmem:[%s6381_s1 + $0xfe0] sm:$0xff] }
 0x15a   : > { %3721 = vmatpush1.bf16.msra.mxu0 %v4411_v24  ;;  %3803 = vmatpush1.bf16.msra.mxu1 %v4413_v28  ;;  %v594_v24 = vld [vmem:[%s6381_s1 + $0xd28] sm:$0xff] }
 0x15b   : > { %3722 = vmatprep.subr.bf16.mxu0 %v4428_v29  ;;  %3804 = vmatprep.subr.bf16.mxu1 %v4430_v30  ;;  %v602_v28 = vld [vmem:[%s6381_s1 + $0xd68] sm:$0xff]  ;;  %v4491_v29 = vcombine.low %v577_v9, %v585_v10  ;;  %v4493_v30 = vcombine.low %v578_v13, %v586_v14  ;;  %v4588_v9 = vcombine.high %v673_v3, %v681_v4  ;;  %v179_v13 = vld [vmem:[%s6381_s1 + $0x30] sm:$0xff] }
 0x15c   : > { %v3418_v42 = vpop.f32.mrb[0].mxu0  ;;  %v3500_v47 = vpop.f32.mrb[0].mxu1  ;;  %v4510_v32 = vcombine.high %v594_v24, %v602_v28  ;;  %v187_v14 = vld [vmem:[%s6381_s1 + $0x70] sm:$0xff] }
 0x15d   : > { %v4599_v46 = vadd.f32 %v3418_v42, %v692_v33  ;;  %v3420_v48 = vpop.f32.mrb[1].mxu0  ;;  %v4601_v51 = vadd.f32 %v3500_v47, %v700_v36  ;;  %v3502_v54 = vpop.f32.mrb[1].mxu1  ;;  %v609_v33 = vld [vmem:[%s6381_s1 + $0xda0] sm:$0xff]  ;;  %v618_v36 = vld [vmem:[%s6381_s1 + $0xde8] sm:$0xff] }
 0x15e   : > { %v4600_v52 = vadd.f32 %v3420_v48, %v696_v37  ;;  %v3422_v55 = vpop.f32.mrb[2].mxu0  ;;  %3723 = vmatpush1.bf16.msra.mxu0 %v4427_v38  ;;  %v4602_v58 = vadd.f32 %v3502_v54, %v704_v39  ;;  %v3504_v59 = vpop.f32.mrb[2].mxu1  ;;  %3805 = vmatpush1.bf16.msra.mxu1 %v4429_v40  ;;  %v4507_v37 = vcombine.low %v593_v20, %v601_v23  ;;  %v633_v42 = vld [vmem:[%s6381_s1 + $0xe60] sm:$0xff] }
 0x15f   : > { %3999 = vst [vmem:[%s5822_s21] sm:$0xff] %v4599_v46  ;;  %v3423_v60 = vpop.f32.mrb[3].mxu0  ;;  %3724 = vmatprep.subr.bf16.mxu0 %v4444_v41  ;;  %4001 = vst [vmem:[%s5822_s21 + $0x10] sm:$0xff] %v4601_v51  ;;  %v3505_v63 = vpop.f32.mrb[3].mxu1  ;;  %3806 = vmatprep.subr.bf16.mxu1 %v4446_v43  ;;  %v4509_v38 = vcombine.low %v594_v24, %v602_v28  ;;  %v4524_v39 = vcombine.high %v609_v33, %v617_v34  ;;  %v625_v41 = vld [vmem:[%s6381_s1 + $0xe20] sm:$0xff]  ;;  %v626_v43 = vld [vmem:[%s6381_s1 + $0xe28] sm:$0xff] }
 0x160   : > { %4000 = vst [vmem:[%s5822_s21 + $0x8] sm:$0xff] %v4600_v52  ;;  %4002 = vst [vmem:[%s5822_s21 + $0x18] sm:$0xff] %v4602_v58  ;;  %v4526_v40 = vcombine.high %v610_v35, %v618_v36  ;;  %v4523_v45 = vcombine.low %v609_v33, %v617_v34  ;;  %v4525_v46 = vcombine.low %v610_v35, %v618_v36  ;;  %v642_v51 = vld [vmem:[%s6381_s1 + $0xea8] sm:$0xff]  ;;  %v657_v59 = vld [vmem:[%s6381_s1 + $0xf20] sm:$0xff] }
 0x161   : > { %v4540_v47 = vcombine.high %v625_v41, %v633_v42  ;;  %v4542_v48 = vcombine.high %v626_v43, %v634_v44  ;;  %v650_v52 = vld [vmem:[%s6381_s1 + $0xee8] sm:$0xff]  ;;  %v4539_v54 = vcombine.low %v625_v41, %v633_v42  ;;  %v4541_v55 = vcombine.low %v626_v43, %v634_v44  ;;  %v665_v60 = vld [vmem:[%s6381_s1 + $0xf60] sm:$0xff]  ;;  %v195_v24 = vld [vmem:[%s6381_s1 + $0xb0] sm:$0xff] }
 0x162   : > { %3725 = vmatpush1.bf16.msra.mxu0 %v4443_v56  ;;  %3807 = vmatpush1.bf16.msra.mxu1 %v4445_v61  ;;  %v4556_v56 = vcombine.high %v641_v49, %v649_v50  ;;  %v4558_v58 = vcombine.high %v642_v51, %v650_v52  ;;  %v658_v61 = vld [vmem:[%s6381_s1 + $0xf28] sm:$0xff]  ;;  %v4555_v63 = vcombine.low %v641_v49, %v649_v50  ;;  %v203_v28 = vld [vmem:[%s6381_s1 + $0xf0] sm:$0xff] }
 0x163   : > { %3726 = vmatprep.subr.bf16.mxu0 %v4460_v62  ;;  %3808 = vmatprep.subr.bf16.mxu1 %v4462_v0  ;;  %v666_v62 = vld [vmem:[%s6381_s1 + $0xf68] sm:$0xff]  ;;  %v4557_v0 = vcombine.low %v642_v51, %v650_v52  ;;  %v4572_v1 = vcombine.high %v657_v59, %v665_v60  ;;  %v4096_v20 = vcombine.high %v179_v13, %v187_v14  ;;  %v211_v35 = vld [vmem:[%s6381_s1 + $0x130] sm:$0xff] }
 0x164   : > { %v4574_v2 = vcombine.high %v658_v61, %v666_v62  ;;  %v4112_v33 = vcombine.high %v195_v24, %v203_v28  ;;  %v219_v36 = vld [vmem:[%s6381_s1 + $0x170] sm:$0xff] }
 0x165   : > { %v4128_v41 = vcombine.high %v211_v35, %v219_v36  ;;  %v227_v43 = vld [vmem:[%s6381_s1 + $0x1b0] sm:$0xff] }
 0x166   : > { %3727 = vmatpush1.bf16.msra.mxu0 %v4459_v5  ;;  %3809 = vmatpush1.bf16.msra.mxu1 %v4461_v6  ;;  %v674_v5 = vld [vmem:[%s6381_s1 + $0xfa8] sm:$0xff]  ;;  %v235_v44 = vld [vmem:[%s6381_s1 + $0x1f0] sm:$0xff] }
 0x167   : > { %3728 = vmatprep.subr.bf16.mxu0 %v4476_v7  ;;  %3810 = vmatprep.subr.bf16.mxu1 %v4478_v8  ;;  %v682_v6 = vld [vmem:[%s6381_s1 + $0xfe8] sm:$0xff]  ;;  %v4571_v7 = vcombine.low %v657_v59, %v665_v60  ;;  %v4573_v8 = vcombine.low %v658_v61, %v666_v62  ;;  %v4144_v49 = vcombine.high %v227_v43, %v235_v44  ;;  %v243_v51 = vld [vmem:[%s6381_s1 + $0x230] sm:$0xff]  ;;  %v260_v62 = vld [vmem:[%s6381_s1 + $0x2b8] sm:$0xff] }
 0x168   : > { %v4590_v10 = vcombine.high %v674_v5, %v682_v6  ;;  %v251_v52 = vld [vmem:[%s6381_s1 + $0x270] sm:$0xff] }
 0x169   : > { %v259_v60 = vld [vmem:[%s6381_s1 + $0x2b0] sm:$0xff] }
 0x16a   : > { %3729 = vmatpush1.bf16.msra.mxu0 %v4475_v16  ;;  %3811 = vmatpush1.bf16.msra.mxu1 %v4477_v17  ;;  %v180_v16 = vld [vmem:[%s6381_s1 + $0x38] sm:$0xff]  ;;  %v267_v61 = vld [vmem:[%s6381_s1 + $0x2f0] sm:$0xff] }
 0x16b   : > { %3730 = vmatprep.subr.bf16.mxu0 %v4492_v18  ;;  %3812 = vmatprep.subr.bf16.mxu1 %v4494_v19  ;;  %v188_v17 = vld [vmem:[%s6381_s1 + $0x78] sm:$0xff]  ;;  %v4587_v18 = vcombine.low %v673_v3, %v681_v4  ;;  %v4589_v19 = vcombine.low %v674_v5, %v682_v6  ;;  %v275_v4 = vld [vmem:[%s6381_s1 + $0x330] sm:$0xff] }
 0x16c   : > { %v4098_v23 = vcombine.high %v180_v16, %v188_v17  ;;  %v283_v5 = vld [vmem:[%s6381_s1 + $0x370] sm:$0xff]  ;;  %v276_v6 = vld [vmem:[%s6381_s1 + $0x338] sm:$0xff] }
 0x16e   : > { %3731 = vmatpush1.bf16.msra.mxu0 %v4491_v29  ;;  %3813 = vmatpush1.bf16.msra.mxu1 %v4493_v30  ;;  %v196_v29 = vld [vmem:[%s6381_s1 + $0xb8] sm:$0xff] }
 0x16f   : > { %3732 = vmatprep.subr.bf16.mxu0 %v4508_v31  ;;  %3814 = vmatprep.subr.bf16.mxu1 %v4510_v32  ;;  %v204_v30 = vld [vmem:[%s6381_s1 + $0xf8] sm:$0xff]  ;;  %v4095_v31 = vcombine.low %v179_v13, %v187_v14  ;;  %v4097_v32 = vcombine.low %v180_v16, %v188_v17  ;;  %v291_v14 = vld [vmem:[%s6381_s1 + $0x3b0] sm:$0xff] }
 0x170   : > { %v4114_v34 = vcombine.high %v196_v29, %v204_v30  ;;  %v299_v16 = vld [vmem:[%s6381_s1 + $0x3f0] sm:$0xff]  ;;  %v292_v17 = vld [vmem:[%s6381_s1 + $0x3b8] sm:$0xff] }
 0x172   : > { %3733 = vmatpush1.bf16.msra.mxu0 %v4507_v37  ;;  %3815 = vmatpush1.bf16.msra.mxu1 %v4509_v38  ;;  %v212_v37 = vld [vmem:[%s6381_s1 + $0x138] sm:$0xff] }
 0x173   : > { %3734 = vmatprep.subr.bf16.mxu0 %v4524_v39  ;;  %3816 = vmatprep.subr.bf16.mxu1 %v4526_v40  ;;  %v220_v38 = vld [vmem:[%s6381_s1 + $0x178] sm:$0xff]  ;;  %v4111_v39 = vcombine.low %v195_v24, %v203_v28  ;;  %v4113_v40 = vcombine.low %v196_v29, %v204_v30  ;;  %v307_v28 = vld [vmem:[%s6381_s1 + $0x430] sm:$0xff] }
 0x174   : > { %v4130_v42 = vcombine.high %v212_v37, %v220_v38  ;;  %v315_v29 = vld [vmem:[%s6381_s1 + $0x470] sm:$0xff]  ;;  %v308_v30 = vld [vmem:[%s6381_s1 + $0x438] sm:$0xff] }
 0x176   : > { %3735 = vmatpush1.bf16.msra.mxu0 %v4523_v45  ;;  %3817 = vmatpush1.bf16.msra.mxu1 %v4525_v46  ;;  %v228_v45 = vld [vmem:[%s6381_s1 + $0x1b8] sm:$0xff] }
 0x177   : > { %3736 = vmatprep.subr.bf16.mxu0 %v4540_v47  ;;  %3818 = vmatprep.subr.bf16.mxu1 %v4542_v48  ;;  %v236_v46 = vld [vmem:[%s6381_s1 + $0x1f8] sm:$0xff]  ;;  %v4127_v47 = vcombine.low %v211_v35, %v219_v36  ;;  %v4129_v48 = vcombine.low %v212_v37, %v220_v38  ;;  %v323_v36 = vld [vmem:[%s6381_s1 + $0x4b0] sm:$0xff] }
 0x178   : > { %v4146_v50 = vcombine.high %v228_v45, %v236_v46  ;;  %v331_v37 = vld [vmem:[%s6381_s1 + $0x4f0] sm:$0xff]  ;;  %v324_v38 = vld [vmem:[%s6381_s1 + $0x4b8] sm:$0xff] }
 0x17a   : > { %3737 = vmatpush1.bf16.msra.mxu0 %v4539_v54  ;;  %3819 = vmatpush1.bf16.msra.mxu1 %v4541_v55  ;;  %v252_v54 = vld [vmem:[%s6381_s1 + $0x278] sm:$0xff]  ;;  %v4143_v55 = vcombine.low %v227_v43, %v235_v44  ;;  %v339_v44 = vld [vmem:[%s6381_s1 + $0x530] sm:$0xff] }
 0x17b   : > { %3738 = vmatprep.subr.bf16.mxu0 %v4556_v56  ;;  %3820 = vmatprep.subr.bf16.mxu1 %v4558_v58  ;;  %v4145_v56 = vcombine.low %v228_v45, %v236_v46  ;;  %v4160_v58 = vcombine.high %v243_v51, %v251_v52  ;;  %v347_v45 = vld [vmem:[%s6381_s1 + $0x570] sm:$0xff]  ;;  %v340_v46 = vld [vmem:[%s6381_s1 + $0x538] sm:$0xff] }
 0x17e   : > { %3739 = vmatpush1.bf16.msra.mxu0 %v4555_v63  ;;  %3821 = vmatpush1.bf16.msra.mxu1 %v4557_v0  ;;  %v268_v63 = vld [vmem:[%s6381_s1 + $0x2f8] sm:$0xff]  ;;  %v4159_v0 = vcombine.low %v243_v51, %v251_v52  ;;  %v355_v52 = vld [vmem:[%s6381_s1 + $0x5b0] sm:$0xff] }
 0x17f   : > { %3740 = vmatprep.subr.bf16.mxu0 %v4572_v1  ;;  %3822 = vmatprep.subr.bf16.mxu1 %v4574_v2  ;;  %v4176_v2 = vcombine.high %v259_v60, %v267_v61  ;;  %v4178_v3 = vcombine.high %v260_v62, %v268_v63 }
 0x182   : > { %3741 = vmatpush1.bf16.msra.mxu0 %v4571_v7  ;;  %3823 = vmatpush1.bf16.msra.mxu1 %v4573_v8  ;;  %v284_v7 = vld [vmem:[%s6381_s1 + $0x378] sm:$0xff]  ;;  %v4175_v8 = vcombine.low %v259_v60, %v267_v61  ;;  %v371_v61 = vld [vmem:[%s6381_s1 + $0x630] sm:$0xff] }
 0x183   : > { %3742 = vmatprep.subr.bf16.mxu0 %v4588_v9  ;;  %3824 = vmatprep.subr.bf16.mxu1 %v4590_v10  ;;  %v4177_v9 = vcombine.low %v260_v62, %v268_v63  ;;  %v4192_v10 = vcombine.high %v275_v4, %v283_v5  ;;  %v4194_v13 = vcombine.high %v276_v6, %v284_v7  ;;  %v379_v62 = vld [vmem:[%s6381_s1 + $0x670] sm:$0xff]  ;;  %v372_v63 = vld [vmem:[%s6381_s1 + $0x638] sm:$0xff] }
 0x186   : > { %3743 = vmatpush1.bf16.msra.mxu0 %v4587_v18  ;;  %3825 = vmatpush1.bf16.msra.mxu1 %v4589_v19  ;;  %v300_v18 = vld [vmem:[%s6381_s1 + $0x3f8] sm:$0xff]  ;;  %v4191_v19 = vcombine.low %v275_v4, %v283_v5  ;;  %v387_v5 = vld [vmem:[%s6381_s1 + $0x6b0] sm:$0xff] }
 0x187   : > { %3835 = vmatprep.subr.bf16.mxu0 %v4096_v20  ;;  %3917 = vmatprep.subr.bf16.mxu1 %v4098_v23  ;;  %v4193_v20 = vcombine.low %v276_v6, %v284_v7  ;;  %v4208_v23 = vcombine.high %v291_v14, %v299_v16  ;;  %v4210_v24 = vcombine.high %v292_v17, %v300_v18  ;;  %v395_v6 = vld [vmem:[%s6381_s1 + $0x6f0] sm:$0xff]  ;;  %v388_v7 = vld [vmem:[%s6381_s1 + $0x6b8] sm:$0xff] }
 0x189   : > { %3745 = vmatmul.mubr.bf16.vlgmr.msra.gmra.mrb[8].mxu0 %v5135_v22  ;;  %3827 = vmatmul.mubr.bf16.vlgmr.msra.gmra.mrb[8].mxu1 %v5135_v22 }
 0x18a   : > { %3836 = vmatpush1.bf16.msra.mxu0 %v4095_v31  ;;  %3918 = vmatpush1.bf16.msra.mxu1 %v4097_v32  ;;  %v316_v31 = vld [vmem:[%s6381_s1 + $0x478] sm:$0xff]  ;;  %v4207_v32 = vcombine.low %v291_v14, %v299_v16  ;;  %v403_v16 = vld [vmem:[%s6381_s1 + $0x730] sm:$0xff] }
 0x18b   : > { %3837 = vmatprep.subr.bf16.mxu0 %v4112_v33  ;;  %3919 = vmatprep.subr.bf16.mxu1 %v4114_v34  ;;  %v4209_v33 = vcombine.low %v292_v17, %v300_v18  ;;  %v4224_v34 = vcombine.high %v307_v28, %v315_v29  ;;  %v4226_v35 = vcombine.high %v308_v30, %v316_v31  ;;  %v411_v17 = vld [vmem:[%s6381_s1 + $0x770] sm:$0xff]  ;;  %v404_v18 = vld [vmem:[%s6381_s1 + $0x738] sm:$0xff] }
 0x18c   : > { %3867 = vmatprep.mubr.bf16.mxu0 %v4802_v57  ;;  %3949 = vmatprep.mubr.bf16.mxu1 %v4802_v57  ;;  %v244_v57 = vld [vmem:[%s6381_s1 + $0x238] sm:$0xff] }
 0x18d   : > { %v4162_v59 = vcombine.high %v244_v57, %v252_v54  ;;  %v4161_v1 = vcombine.low %v244_v57, %v252_v54  ;;  %v363_v57 = vld [vmem:[%s6381_s1 + $0x5f0] sm:$0xff]  ;;  %v356_v54 = vld [vmem:[%s6381_s1 + $0x5b8] sm:$0xff] }
 0x18e   : > { %3838 = vmatpush1.bf16.msra.mxu0 %v4111_v39  ;;  %3920 = vmatpush1.bf16.msra.mxu1 %v4113_v40  ;;  %v332_v39 = vld [vmem:[%s6381_s1 + $0x4f8] sm:$0xff]  ;;  %v4223_v40 = vcombine.low %v307_v28, %v315_v29  ;;  %v419_v29 = vld [vmem:[%s6381_s1 + $0x7b0] sm:$0xff] }
 0x18f   : > { %3839 = vmatprep.subr.bf16.mxu0 %v4128_v41  ;;  %3921 = vmatprep.subr.bf16.mxu1 %v4130_v42  ;;  %v4225_v41 = vcombine.low %v308_v30, %v316_v31  ;;  %v4240_v42 = vcombine.high %v323_v36, %v331_v37  ;;  %v4242_v43 = vcombine.high %v324_v38, %v332_v39  ;;  %v427_v30 = vld [vmem:[%s6381_s1 + $0x7f0] sm:$0xff]  ;;  %v420_v31 = vld [vmem:[%s6381_s1 + $0x7b8] sm:$0xff] }
 0x192   : > { %3840 = vmatpush1.bf16.msra.mxu0 %v4127_v47  ;;  %3922 = vmatpush1.bf16.msra.mxu1 %v4129_v48  ;;  %v348_v47 = vld [vmem:[%s6381_s1 + $0x578] sm:$0xff]  ;;  %v4239_v48 = vcombine.low %v323_v36, %v331_v37  ;;  %v435_v37 = vld [vmem:[%s6381_s1 + $0x830] sm:$0xff] }
 0x193   : > { %3841 = vmatprep.subr.bf16.mxu0 %v4144_v49  ;;  %3923 = vmatprep.subr.bf16.mxu1 %v4146_v50  ;;  %v4241_v49 = vcombine.low %v324_v38, %v332_v39  ;;  %v4256_v50 = vcombine.high %v339_v44, %v347_v45  ;;  %v4258_v51 = vcombine.high %v340_v46, %v348_v47  ;;  %v443_v38 = vld [vmem:[%s6381_s1 + $0x870] sm:$0xff]  ;;  %v436_v39 = vld [vmem:[%s6381_s1 + $0x838] sm:$0xff] }
 0x196   : > { %3842 = vmatpush1.bf16.msra.mxu0 %v4143_v55  ;;  %3924 = vmatpush1.bf16.msra.mxu1 %v4145_v56  ;;  %v364_v55 = vld [vmem:[%s6381_s1 + $0x5f8] sm:$0xff]  ;;  %v4255_v56 = vcombine.low %v339_v44, %v347_v45  ;;  %v451_v45 = vld [vmem:[%s6381_s1 + $0x8b0] sm:$0xff] }
 0x197   : > { %3843 = vmatprep.subr.bf16.mxu0 %v4160_v58  ;;  %3925 = vmatprep.subr.bf16.mxu1 %v4162_v59  ;;  %v4257_v58 = vcombine.low %v340_v46, %v348_v47  ;;  %v4272_v59 = vcombine.high %v355_v52, %v363_v57  ;;  %v4274_v60 = vcombine.high %v356_v54, %v364_v55  ;;  %v459_v46 = vld [vmem:[%s6381_s1 + $0x8f0] sm:$0xff]  ;;  %v452_v47 = vld [vmem:[%s6381_s1 + $0x8b8] sm:$0xff] }
 0x19a   : > { %3844 = vmatpush1.bf16.msra.mxu0 %v4159_v0  ;;  %3926 = vmatpush1.bf16.msra.mxu1 %v4161_v1  ;;  %v380_v0 = vld [vmem:[%s6381_s1 + $0x678] sm:$0xff]  ;;  %v4271_v1 = vcombine.low %v355_v52, %v363_v57  ;;  %v467_v57 = vld [vmem:[%s6381_s1 + $0x930] sm:$0xff] }
 0x19b   : > { %3845 = vmatprep.subr.bf16.mxu0 %v4176_v2  ;;  %3927 = vmatprep.subr.bf16.mxu1 %v4178_v3  ;;  %v4273_v2 = vcombine.low %v356_v54, %v364_v55  ;;  %v4288_v3 = vcombine.high %v371_v61, %v379_v62  ;;  %v4290_v4 = vcombine.high %v372_v63, %v380_v0  ;;  %v475_v54 = vld [vmem:[%s6381_s1 + $0x970] sm:$0xff]  ;;  %v468_v55 = vld [vmem:[%s6381_s1 + $0x938] sm:$0xff] }
 0x19e   : > { %3846 = vmatpush1.bf16.msra.mxu0 %v4175_v8  ;;  %3928 = vmatpush1.bf16.msra.mxu1 %v4177_v9  ;;  %v396_v8 = vld [vmem:[%s6381_s1 + $0x6f8] sm:$0xff]  ;;  %v4287_v9 = vcombine.low %v371_v61, %v379_v62  ;;  %v483_v62 = vld [vmem:[%s6381_s1 + $0x9b0] sm:$0xff] }
 0x19f   : > { %3847 = vmatprep.subr.bf16.mxu0 %v4192_v10  ;;  %3929 = vmatprep.subr.bf16.mxu1 %v4194_v13  ;;  %v4289_v10 = vcombine.low %v372_v63, %v380_v0  ;;  %v4304_v13 = vcombine.high %v387_v5, %v395_v6  ;;  %v4306_v14 = vcombine.high %v388_v7, %v396_v8  ;;  %v491_v63 = vld [vmem:[%s6381_s1 + $0x9f0] sm:$0xff]  ;;  %v492_v0 = vld [vmem:[%s6381_s1 + $0x9f8] sm:$0xff] }
 0x1a2   : > { %3848 = vmatpush1.bf16.msra.mxu0 %v4191_v19  ;;  %3930 = vmatpush1.bf16.msra.mxu1 %v4193_v20  ;;  %v412_v19 = vld [vmem:[%s6381_s1 + $0x778] sm:$0xff]  ;;  %v4303_v20 = vcombine.low %v387_v5, %v395_v6  ;;  %v499_v5 = vld [vmem:[%s6381_s1 + $0xa30] sm:$0xff] }
 0x1a3   : > { %3849 = vmatprep.subr.bf16.mxu0 %v4208_v23  ;;  %3931 = vmatprep.subr.bf16.mxu1 %v4210_v24  ;;  %v4305_v23 = vcombine.low %v388_v7, %v396_v8  ;;  %v4320_v24 = vcombine.high %v403_v16, %v411_v17  ;;  %v4322_v28 = vcombine.high %v404_v18, %v412_v19  ;;  %v507_v6 = vld [vmem:[%s6381_s1 + $0xa70] sm:$0xff]  ;;  %v508_v7 = vld [vmem:[%s6381_s1 + $0xa78] sm:$0xff] }
 0x1a4   : > { %v4399_v8 = vcombine.low %v483_v62, %v491_v63 }
 0x1a6   : > { %3850 = vmatpush1.bf16.msra.mxu0 %v4207_v32  ;;  %3932 = vmatpush1.bf16.msra.mxu1 %v4209_v33  ;;  %v428_v32 = vld [vmem:[%s6381_s1 + $0x7f8] sm:$0xff]  ;;  %v4319_v33 = vcombine.low %v403_v16, %v411_v17  ;;  %v523_v16 = vld [vmem:[%s6381_s1 + $0xaf0] sm:$0xff]  ;;  %v707_v17 = vsub.s32 4, %v5771_v11 }
 0x1a7   : > { %3851 = vmatprep.subr.bf16.mxu0 %v4224_v34  ;;  %3933 = vmatprep.subr.bf16.mxu1 %v4226_v35  ;;  %v4321_v34 = vcombine.low %v404_v18, %v412_v19  ;;  %v4336_v35 = vcombine.high %v419_v29, %v427_v30  ;;  %v4338_v36 = vcombine.high %v420_v31, %v428_v32  ;;  %v516_v18 = vld [vmem:[%s6381_s1 + $0xab8] sm:$0xff] }
 0x1a8   : > { %v524_v19 = vld [vmem:[%s6381_s1 + $0xaf8] sm:$0xff] }
 0x1aa   : > { %3852 = vmatpush1.bf16.msra.mxu0 %v4223_v40  ;;  %3934 = vmatpush1.bf16.msra.mxu1 %v4225_v41  ;;  %v444_v40 = vld [vmem:[%s6381_s1 + $0x878] sm:$0xff]  ;;  %v4335_v41 = vcombine.low %v419_v29, %v427_v30  ;;  %v719_v29 = vsub.s32 7, %v5771_v11 }
 0x1ab   : > { %3853 = vmatprep.subr.bf16.mxu0 %v4240_v42  ;;  %3935 = vmatprep.subr.bf16.mxu1 %v4242_v43  ;;  %v4337_v42 = vcombine.low %v420_v31, %v428_v32  ;;  %v4352_v43 = vcombine.high %v435_v37, %v443_v38  ;;  %v4354_v44 = vcombine.high %v436_v39, %v444_v40  ;;  %v531_v32 = vld [vmem:[%s6381_s1 + $0xb30] sm:$0xff] }
 0x1ac   : > { %v4434_v31 = vcombine.high %v516_v18, %v524_v19 }
 0x1ae   : > { %3854 = vmatpush1.bf16.msra.mxu0 %v4239_v48  ;;  %3936 = vmatpush1.bf16.msra.mxu1 %v4241_v49  ;;  %v460_v48 = vld [vmem:[%s6381_s1 + $0x8f8] sm:$0xff]  ;;  %v4351_v49 = vcombine.low %v435_v37, %v443_v38 }
 0x1af   : > { %3855 = vmatprep.subr.bf16.mxu0 %v4256_v50  ;;  %3937 = vmatprep.subr.bf16.mxu1 %v4258_v51  ;;  %v4353_v50 = vcombine.low %v436_v39, %v444_v40  ;;  %v4368_v51 = vcombine.high %v451_v45, %v459_v46  ;;  %v4370_v52 = vcombine.high %v452_v47, %v460_v48 }
 0x1b0   : > { %v720_v40 = vrot.slane %v5789_v25, %v719_v29 }
 0x1b2   : > { %3856 = vmatpush1.bf16.msra.mxu0 %v4255_v56  ;;  %3938 = vmatpush1.bf16.msra.mxu1 %v4257_v58  ;;  %v476_v56 = vld [vmem:[%s6381_s1 + $0x978] sm:$0xff]  ;;  %v4367_v58 = vcombine.low %v451_v45, %v459_v46  ;;  %v547_v45 = vld [vmem:[%s6381_s1 + $0xbb0] sm:$0xff] }
 0x1b3   : > { %3857 = vmatprep.subr.bf16.mxu0 %v4272_v59  ;;  %3939 = vmatprep.subr.bf16.mxu1 %v4274_v60  ;;  %v4369_v59 = vcombine.low %v452_v47, %v460_v48  ;;  %v4384_v60 = vcombine.high %v467_v57, %v475_v54  ;;  %v4386_v61 = vcombine.high %v468_v55, %v476_v56  ;;  %v555_v46 = vld [vmem:[%s6381_s1 + $0xbf0] sm:$0xff] }
 0x1b6   : > { %3858 = vmatpush1.bf16.msra.mxu0 %v4271_v1  ;;  %3940 = vmatpush1.bf16.msra.mxu1 %v4273_v2  ;;  %v4383_v1 = vcombine.low %v467_v57, %v475_v54  ;;  %v4385_v2 = vcombine.low %v468_v55, %v476_v56 }
 0x1b7   : > { %3859 = vmatprep.subr.bf16.mxu0 %v4288_v3  ;;  %3941 = vmatprep.subr.bf16.mxu1 %v4290_v4  ;;  %v4400_v3 = vcombine.high %v483_v62, %v491_v63 }
 0x1ba   : > { %3860 = vmatpush1.bf16.msra.mxu0 %v4287_v9  ;;  %3942 = vmatpush1.bf16.msra.mxu1 %v4289_v10  ;;  %v4416_v10 = vcombine.high %v499_v5, %v507_v6 }
 0x1bb   : > { %3861 = vmatprep.subr.bf16.mxu0 %v4304_v13  ;;  %3943 = vmatprep.subr.bf16.mxu1 %v4306_v14  ;;  %v515_v14 = vld [vmem:[%s6381_s1 + $0xab0] sm:$0xff] }
 0x1bc   : > { %v4432_v30 = vcombine.high %v515_v14, %v523_v16  ;;  %v4431_v39 = vcombine.low %v515_v14, %v523_v16 }
 0x1be   : > { %3862 = vmatpush1.bf16.msra.mxu0 %v4303_v20  ;;  %3944 = vmatpush1.bf16.msra.mxu1 %v4305_v23  ;;  %v4415_v20 = vcombine.low %v499_v5, %v507_v6  ;;  %v715_v23 = vsub.s32 6, %v5771_v11 }
 0x1bf   : > { %3863 = vmatprep.subr.bf16.mxu0 %v4320_v24  ;;  %3945 = vmatprep.subr.bf16.mxu1 %v4322_v28  ;;  %v711_v24 = vsub.s32 5, %v5771_v11 }
 0x1c0   : > { %v716_v37 = vrot.slane %v5789_v25, %v715_v23 }
 0x1c1   : > { %v712_v38 = vrot.slane %v5789_v25, %v711_v24 }
 0x1c2   : > { %3864 = vmatpush1.bf16.msra.mxu0 %v4319_v33  ;;  %3946 = vmatpush1.bf16.msra.mxu1 %v4321_v34  ;;  %v539_v33 = vld [vmem:[%s6381_s1 + $0xb70] sm:$0xff]  ;;  %v708_v34 = vrot.slane %v5789_v25, %v707_v17  ;;  %v548_v25 = vld [vmem:[%s6381_s1 + $0xbb8] sm:$0xff] }
 0x1c3   : > { %3865 = vmatprep.subr.bf16.mxu0 %v4336_v35  ;;  %3947 = vmatprep.subr.bf16.mxu1 %v4338_v36  ;;  %v532_v35 = vld [vmem:[%s6381_s1 + $0xb38] sm:$0xff]  ;;  %v4447_v55 = vcombine.low %v531_v32, %v539_v33 }
 0x1c4   : > { %v540_v36 = vld [vmem:[%s6381_s1 + $0xb78] sm:$0xff] }
 0x1c6   : > { %3866 = vmatpush1.bf16.msra.mxu0 %v4335_v41  ;;  %3948 = vmatpush1.bf16.msra.mxu1 %v4337_v42  ;;  %v4433_v41 = vcombine.low %v516_v18, %v524_v19  ;;  %v4448_v42 = vcombine.high %v531_v32, %v539_v33  ;;  %v595_v18 = vld [vmem:[%s6381_s1 + $0xd30] sm:$0xff] }
 0x1c7   : > { %3876 = vmatprep.subr.bf16.mxu0 %v4352_v43  ;;  %3958 = vmatprep.subr.bf16.mxu1 %v4354_v44  ;;  %v4450_v44 = vcombine.high %v532_v35, %v540_v36  ;;  %v603_v19 = vld [vmem:[%s6381_s1 + $0xd70] sm:$0xff] }
 0x1c8   : > { %v4512_v32 = vcombine.high %v595_v18, %v603_v19 }
 0x1c9   : > { %3868 = vmatmul.mubr.bf16.vlgmr.msra.gmra.mrb[12].mxu0 %v4928_v12  ;;  %3950 = vmatmul.mubr.bf16.vlgmr.msra.gmra.mrb[12].mxu1 %v4928_v12  ;;  %v484_v12 = vld [vmem:[%s6381_s1 + $0x9b8] sm:$0xff] }
 0x1ca   : > { %3877 = vmatpush1.bf16.msra.mxu0 %v4351_v49  ;;  %3959 = vmatpush1.bf16.msra.mxu1 %v4353_v50  ;;  %v4402_v4 = vcombine.high %v484_v12, %v492_v0  ;;  %v4401_v9 = vcombine.low %v484_v12, %v492_v0  ;;  %v556_v50 = vld [vmem:[%s6381_s1 + $0xbf8] sm:$0xff]  ;;  %v563_v12 = vld [vmem:[%s6381_s1 + $0xc30] sm:$0xff] }
 0x1cb   : > { %3878 = vmatprep.subr.bf16.mxu0 %v4368_v51  ;;  %3960 = vmatprep.subr.bf16.mxu1 %v4370_v52  ;;  %v4466_v63 = vcombine.high %v548_v25, %v556_v50  ;;  %v571_v0 = vld [vmem:[%s6381_s1 + $0xc70] sm:$0xff] }
 0x1cc   : > { %3908 = vmatprep.mubr.bf16.mxu0 %v4947_v21  ;;  %3990 = vmatprep.mubr.bf16.mxu1 %v4947_v21  ;;  %v500_v21 = vld [vmem:[%s6381_s1 + $0xa38] sm:$0xff]  ;;  %v4480_v5 = vcombine.high %v563_v12, %v571_v0 }
 0x1cd   : > { %v4418_v13 = vcombine.high %v500_v21, %v508_v7  ;;  %v4417_v28 = vcombine.low %v500_v21, %v508_v7  ;;  %v579_v21 = vld [vmem:[%s6381_s1 + $0xcb0] sm:$0xff] }
 0x1ce   : > { %3879 = vmatpush1.bf16.msra.mxu0 %v4367_v58  ;;  %3961 = vmatpush1.bf16.msra.mxu1 %v4369_v59  ;;  %v587_v7 = vld [vmem:[%s6381_s1 + $0xcf0] sm:$0xff] }
 0x1cf   : > { %3880 = vmatprep.subr.bf16.mxu0 %v4384_v60  ;;  %3962 = vmatprep.subr.bf16.mxu1 %v4386_v61  ;;  %v4449_v60 = vcombine.low %v532_v35, %v540_v36  ;;  %v4464_v61 = vcombine.high %v547_v45, %v555_v46  ;;  %v4496_v14 = vcombine.high %v579_v21, %v587_v7  ;;  %v619_v35 = vld [vmem:[%s6381_s1 + $0xdf0] sm:$0xff]  ;;  %v612_v36 = vld [vmem:[%s6381_s1 + $0xdb8] sm:$0xff] }
 0x1d2   : > { %3881 = vmatpush1.bf16.msra.mxu0 %v4383_v1  ;;  %3963 = vmatpush1.bf16.msra.mxu1 %v4385_v2  ;;  %v564_v1 = vld [vmem:[%s6381_s1 + $0xc38] sm:$0xff] }
 0x1d3   : > { %3882 = vmatprep.subr.bf16.mxu0 %v4400_v3  ;;  %3964 = vmatprep.subr.bf16.mxu1 %v4402_v4  ;;  %v572_v2 = vld [vmem:[%s6381_s1 + $0xc78] sm:$0xff]  ;;  %v4463_v3 = vcombine.low %v547_v45, %v555_v46  ;;  %v4465_v4 = vcombine.low %v548_v25, %v556_v50  ;;  %v643_v25 = vld [vmem:[%s6381_s1 + $0xeb0] sm:$0xff] }
 0x1d4   : > { %v4482_v6 = vcombine.high %v564_v1, %v572_v2  ;;  %v636_v45 = vld [vmem:[%s6381_s1 + $0xe78] sm:$0xff]  ;;  %v651_v50 = vld [vmem:[%s6381_s1 + $0xef0] sm:$0xff] }
 0x1d6   : > { %3883 = vmatpush1.bf16.msra.mxu0 %v4399_v8  ;;  %3965 = vmatpush1.bf16.msra.mxu1 %v4401_v9  ;;  %v580_v8 = vld [vmem:[%s6381_s1 + $0xcb8] sm:$0xff] }
 0x1d7   : > { %3884 = vmatprep.subr.bf16.mxu0 %v4416_v10  ;;  %3966 = vmatprep.subr.bf16.mxu1 %v4418_v13  ;;  %v588_v9 = vld [vmem:[%s6381_s1 + $0xcf8] sm:$0xff]  ;;  %v4479_v10 = vcombine.low %v563_v12, %v571_v0  ;;  %v4481_v13 = vcombine.low %v564_v1, %v572_v2  ;;  %v675_v1 = vld [vmem:[%s6381_s1 + $0xfb0] sm:$0xff] }
 0x1d8   : > { %v4498_v16 = vcombine.high %v580_v8, %v588_v9  ;;  %v683_v2 = vld [vmem:[%s6381_s1 + $0xff0] sm:$0xff] }
 0x1da   : > { %3885 = vmatpush1.bf16.msra.mxu0 %v4415_v20  ;;  %3967 = vmatpush1.bf16.msra.mxu1 %v4417_v28  ;;  %v596_v20 = vld [vmem:[%s6381_s1 + $0xd38] sm:$0xff] }
 0x1db   : > { %3886 = vmatprep.subr.bf16.mxu0 %v4432_v30  ;;  %3968 = vmatprep.subr.bf16.mxu1 %v4434_v31  ;;  %v604_v28 = vld [vmem:[%s6381_s1 + $0xd78] sm:$0xff]  ;;  %v4495_v30 = vcombine.low %v579_v21, %v587_v7  ;;  %v4497_v31 = vcombine.low %v580_v8, %v588_v9  ;;  %v4592_v21 = vcombine.high %v675_v1, %v683_v2 }
 0x1dc   : > { %v3582_v43 = vpop.f32.mrb[4].mxu0  ;;  %v3664_v48 = vpop.f32.mrb[4].mxu1  ;;  %v4514_v33 = vcombine.high %v596_v20, %v604_v28  ;;  %v4591_v8 = vcombine.low %v675_v1, %v683_v2 }
 0x1dd   : > { %v4603_v47 = vadd.f32 %v3582_v43, %v708_v34  ;;  %v3584_v49 = vpop.f32.mrb[5].mxu0  ;;  %v4605_v51 = vadd.f32 %v3664_v48, %v716_v37  ;;  %v3666_v57 = vpop.f32.mrb[5].mxu1  ;;  %v611_v34 = vld [vmem:[%s6381_s1 + $0xdb0] sm:$0xff]  ;;  %v620_v37 = vld [vmem:[%s6381_s1 + $0xdf8] sm:$0xff] }
 0x1de   : > { %v4604_v52 = vadd.f32 %v3584_v49, %v712_v38  ;;  %v3586_v54 = vpop.f32.mrb[6].mxu0  ;;  %3887 = vmatpush1.bf16.msra.mxu0 %v4431_v39  ;;  %v4606_v56 = vadd.f32 %v3666_v57, %v720_v40  ;;  %v3668_v58 = vpop.f32.mrb[6].mxu1  ;;  %3969 = vmatpush1.bf16.msra.mxu1 %v4433_v41  ;;  %v4511_v38 = vcombine.low %v595_v18, %v603_v19  ;;  %v635_v43 = vld [vmem:[%s6381_s1 + $0xe70] sm:$0xff] }
 0x1df   : > { %4003 = vst [vmem:[%s5822_s21 + $0x20] sm:$0xff] %v4603_v47  ;;  %v3587_v59 = vpop.f32.mrb[7].mxu0  ;;  %3888 = vmatprep.subr.bf16.mxu0 %v4448_v42  ;;  %4005 = vst [vmem:[%s5822_s21 + $0x30] sm:$0xff] %v4605_v51  ;;  %v3669_v62 = vpop.f32.mrb[7].mxu1  ;;  %3970 = vmatprep.subr.bf16.mxu1 %v4450_v44  ;;  %v4513_v39 = vcombine.low %v596_v20, %v604_v28  ;;  %v4528_v40 = vcombine.high %v611_v34, %v619_v35  ;;  %v627_v42 = vld [vmem:[%s6381_s1 + $0xe30] sm:$0xff]  ;;  %v628_v44 = vld [vmem:[%s6381_s1 + $0xe38] sm:$0xff] }
 0x1e0   : > { %4004 = vst [vmem:[%s5822_s21 + $0x28] sm:$0xff] %v4604_v52  ;;  %4006 = vst [vmem:[%s5822_s21 + $0x38] sm:$0xff] %v4606_v56  ;;  %v4530_v41 = vcombine.high %v612_v36, %v620_v37  ;;  %v4527_v46 = vcombine.low %v611_v34, %v619_v35  ;;  %v4529_v47 = vcombine.low %v612_v36, %v620_v37  ;;  %v644_v51 = vld [vmem:[%s6381_s1 + $0xeb8] sm:$0xff]  ;;  %v659_v58 = vld [vmem:[%s6381_s1 + $0xf30] sm:$0xff] }
 0x1e1   : > { %v4544_v48 = vcombine.high %v627_v42, %v635_v43  ;;  %v4546_v49 = vcombine.high %v628_v44, %v636_v45  ;;  %v652_v52 = vld [vmem:[%s6381_s1 + $0xef8] sm:$0xff]  ;;  %v4543_v57 = vcombine.low %v627_v42, %v635_v43  ;;  %v4545_v54 = vcombine.low %v628_v44, %v636_v45  ;;  %v667_v59 = vld [vmem:[%s6381_s1 + $0xf70] sm:$0xff] }
 0x1e2   : > { %3889 = vmatpush1.bf16.msra.mxu0 %v4447_v55  ;;  %3971 = vmatpush1.bf16.msra.mxu1 %v4449_v60  ;;  %v4560_v55 = vcombine.high %v643_v25, %v651_v50  ;;  %v4562_v56 = vcombine.high %v644_v51, %v652_v52  ;;  %v660_v60 = vld [vmem:[%s6381_s1 + $0xf38] sm:$0xff]  ;;  %v4559_v62 = vcombine.low %v643_v25, %v651_v50 }
 0x1e3   : > { %3890 = vmatprep.subr.bf16.mxu0 %v4464_v61  ;;  %3972 = vmatprep.subr.bf16.mxu1 %v4466_v63  ;;  %v668_v61 = vld [vmem:[%s6381_s1 + $0xf78] sm:$0xff]  ;;  %v4561_v63 = vcombine.low %v644_v51, %v652_v52  ;;  %v4576_v12 = vcombine.high %v659_v58, %v667_v59 }
 0x1e4   : > { %v4578_v0 = vcombine.high %v660_v60, %v668_v61 }
 0x1e6   : > { %3891 = vmatpush1.bf16.msra.mxu0 %v4463_v3  ;;  %3973 = vmatpush1.bf16.msra.mxu1 %v4465_v4  ;;  %v676_v3 = vld [vmem:[%s6381_s1 + $0xfb8] sm:$0xff] }
 0x1e7   : > { %3892 = vmatprep.subr.bf16.mxu0 %v4480_v5  ;;  %3974 = vmatprep.subr.bf16.mxu1 %v4482_v6  ;;  %v684_v4 = vld [vmem:[%s6381_s1 + $0xff8] sm:$0xff]  ;;  %v4575_v5 = vcombine.low %v659_v58, %v667_v59  ;;  %v4577_v6 = vcombine.low %v660_v60, %v668_v61 }
 0x1e8   : > { %v4594_v7 = vcombine.high %v676_v3, %v684_v4  ;;  %v4593_v9 = vcombine.low %v676_v3, %v684_v4 }
 0x1ea   : > { %3893 = vmatpush1.bf16.msra.mxu0 %v4479_v10  ;;  %3975 = vmatpush1.bf16.msra.mxu1 %v4481_v13  ;;  %v686_v10 = vld [vmem:[%s6382_s2 + $0x8] sm:$0xff] }
 0x1eb   : > { %3894 = vmatprep.subr.bf16.mxu0 %v4496_v14  ;;  %3976 = vmatprep.subr.bf16.mxu1 %v4498_v16  ;;  %v724_v13 = vrot.slane %v686_v10, %v691_v53  ;;  %v732_v14 = vrot.slane %v686_v10, %v699_v26  ;;  %v728_v16 = vrot.slane %v686_v10, %v695_v27 }
 0x1ec   : > { %v736_v18 = vrot.slane %v686_v10, %v703_v15  ;;  %v740_v15 = vrot.slane %v686_v10, %v707_v17  ;;  %v748_v35 = vrot.slane %v686_v10, %v715_v23  ;;  %v744_v36 = vrot.slane %v686_v10, %v711_v24 }
 0x1ed   : > { %v752_v37 = vrot.slane %v686_v10, %v719_v29 }
 0x1ee   : > { %3895 = vmatpush1.bf16.msra.mxu0 %v4495_v30  ;;  %3977 = vmatpush1.bf16.msra.mxu1 %v4497_v31 }
 0x1ef   : > { %3896 = vmatprep.subr.bf16.mxu0 %v4512_v32  ;;  %3978 = vmatprep.subr.bf16.mxu1 %v4514_v33 }
 0x1f2   : > { %3897 = vmatpush1.bf16.msra.mxu0 %v4511_v38  ;;  %3979 = vmatpush1.bf16.msra.mxu1 %v4513_v39 }
 0x1f3   : > { %3898 = vmatprep.subr.bf16.mxu0 %v4528_v40  ;;  %3980 = vmatprep.subr.bf16.mxu1 %v4530_v41 }
 0x1f6   : > { %3899 = vmatpush1.bf16.msra.mxu0 %v4527_v46  ;;  %3981 = vmatpush1.bf16.msra.mxu1 %v4529_v47 }
 0x1f7   : > { %3900 = vmatprep.subr.bf16.mxu0 %v4544_v48  ;;  %3982 = vmatprep.subr.bf16.mxu1 %v4546_v49 }
 0x1fa   : > { %3901 = vmatpush1.bf16.msra.mxu0 %v4543_v57  ;;  %3983 = vmatpush1.bf16.msra.mxu1 %v4545_v54 }
 0x1fb   : > { %3902 = vmatprep.subr.bf16.mxu0 %v4560_v55  ;;  %3984 = vmatprep.subr.bf16.mxu1 %v4562_v56 }
 0x1fe   : > { %3903 = vmatpush1.bf16.msra.mxu0 %v4559_v62  ;;  %3985 = vmatpush1.bf16.msra.mxu1 %v4561_v63 }
 0x1ff   : > { %3904 = vmatprep.subr.bf16.mxu0 %v4576_v12  ;;  %3986 = vmatprep.subr.bf16.mxu1 %v4578_v0 }
 0x202   : > { %3905 = vmatpush1.bf16.msra.mxu0 %v4575_v5  ;;  %3987 = vmatpush1.bf16.msra.mxu1 %v4577_v6 }
 0x203   : > { %3906 = vmatprep.subr.bf16.mxu0 %v4592_v21  ;;  %3988 = vmatprep.subr.bf16.mxu1 %v4594_v7 }
 0x206   : > { %3907 = vmatpush1.bf16.msra.mxu0 %v4591_v8  ;;  %3989 = vmatpush1.bf16.msra.mxu1 %v4593_v9 }
 0x209   : > { %3909 = vmatmul.mubr.bf16.vlgmr.msra.gmra.mrb[12].mxu0 %v5135_v22  ;;  %3991 = vmatmul.mubr.bf16.vlgmr.msra.gmra.mrb[12].mxu1 %v5135_v22 }
 0x25c   : > { %v3746_v22 = vpop.f32.mrb[8].mxu0  ;;  %v3828_v20 = vpop.f32.mrb[8].mxu1 }
 0x25d   : > { %v4607_v19 = vadd.f32 %v3746_v22, %v724_v13  ;;  %v3748_v28 = vpop.f32.mrb[9].mxu0  ;;  %v4609_v30 = vadd.f32 %v3828_v20, %v732_v14  ;;  %v3830_v32 = vpop.f32.mrb[9].mxu1 }
 0x25e   : > { %v4608_v31 = vadd.f32 %v3748_v28, %v728_v16  ;;  %v3750_v53 = vpop.f32.mrb[10].mxu0  ;;  %v4610_v33 = vadd.f32 %v3830_v32, %v736_v18  ;;  %v3832_v34 = vpop.f32.mrb[10].mxu1 }
 0x25f   : > { %4007 = vst [vmem:[%s5822_s21 + $0x40] sm:$0xff] %v4607_v19  ;;  %v3751_v26 = vpop.f32.mrb[11].mxu0  ;;  %4009 = vst [vmem:[%s5822_s21 + $0x50] sm:$0xff] %v4609_v30  ;;  %v3833_v27 = vpop.f32.mrb[11].mxu1 }
 0x260   : > { %4008 = vst [vmem:[%s5822_s21 + $0x48] sm:$0xff] %v4608_v31  ;;  %4010 = vst [vmem:[%s5822_s21 + $0x58] sm:$0xff] %v4610_v33 }
 0x2dc   : > { %v3910_v38 = vpop.f32.mrb[12].mxu0  ;;  %v3992_v40 = vpop.f32.mrb[12].mxu1 }
 0x2dd   : > { %v4611_v39 = vadd.f32 %v3910_v38, %v740_v15  ;;  %v3912_v41 = vpop.f32.mrb[13].mxu0  ;;  %v4613_v42 = vadd.f32 %v3992_v40, %v748_v35  ;;  %v3994_v44 = vpop.f32.mrb[13].mxu1 }
 0x2de   : > { %v4612_v43 = vadd.f32 %v3912_v41, %v744_v36  ;;  %v3914_v17 = vpop.f32.mrb[14].mxu0  ;;  %v4614_v45 = vadd.f32 %v3994_v44, %v752_v37  ;;  %v3996_v46 = vpop.f32.mrb[14].mxu1 }
 0x2df   : > { %4011 = vst [vmem:[%s5822_s21 + $0x60] sm:$0xff] %v4611_v39  ;;  %v3915_v23 = vpop.f32.mrb[15].mxu0  ;;  %4013 = vst [vmem:[%s5822_s21 + $0x70] sm:$0xff] %v4613_v42  ;;  %v3997_v47 = vpop.f32.mrb[15].mxu1 }
 0x2e0   : > { %4012 = vst [vmem:[%s5822_s21 + $0x68] sm:$0xff] %v4612_v43  ;;  %4014 = vst [vmem:[%s5822_s21 + $0x78] sm:$0xff] %v4614_v45 }
 0x2e1 PF: > { %s13_s12 = sadd.s32 1, %s4665_s12  }
 0x2e2   : > { %p10_p4 = scmp.ge.s32.totalorder %s13_s12, 10  }
 0x2e4   :  { %12 = sbr.rel (!%p10_p4) target bundleno = 1 (0x1), region = 62 }

// kernel: forward.6
= control target key start
LH: loop header
LB: loop body
LE: loop exit
PB: predicated region body
PF: predicated region fallthrough
CT: control target
= control target key end

     0   :  { %s10107_s9 = smov 0   ;;  %s10109_s10 = smov 0   ;;  %s13036_s0 = inlined_call_operand.vmem [shape: f32[8,8,2048], index: 0, kind: input, shape index: {}]   ;;  %s13037_s1 = inlined_call_operand.vmem [shape: bf16[2,256,1024], index: 1, kind: input, shape index: {}]   ;;  %s13038_s2 = inlined_call_operand.vmem [shape: bf16[8,8,512], index: 2, kind: output, shape index: {}]  }
   0x1   :  { %s10111_s11 = smov 0  }
   0x2 LB: > { %s10123_s12 = sadd.s32 4294967295, %s10089_s11   ;;  %s10126_s13 = sadd.s32 1, %s10089_s11   ;;  %s10089_s11 = sphi %s10111_s11, %s13936_s11   ;;  %s10085_s10 = sphi %s10109_s10, %s13935_s10   ;;  %s10081_s9 = sphi %s10107_s9, %s13934_s9  }
   0x3   : > { %s16_s14 = ssub.s32 %s10089_s11, %s10126_s13  ;;  %s19_s15 = sadd.s32 1, %s10085_s10 }
   0x4   : > { %p17_p0 = scmp.eq.s32.totalorder %s16_s14, 0  ;;  %p26_p1 = scmp.ne.s32.totalorder %s10085_s10, %s10081_s9 }
   0x5   : > { %p27_p2 = scmp.eq.s32.totalorder %s10089_s11, 0  ;;  %p82_p3 = scmp.eq.s32.totalorder %s10123_s12, 1 }
   0x6   : > { %s10136_s16 = scalar_select %p17_p0, %s10085_s10, %s19_s15  }
   0x7   : > { %p28_p4 = por %p27_p2, %p26_p1  ;;  %p10138_p5 = por %p82_p3, %p26_p1 }
   0x8   : > { %p8603_p6 = scmp.ge.s32.totalorder %s10089_s11, 2 }
   0xa   : > { %104 = sbr.rel (%p8603_p6) target bundleno = 53 (0x35), region = 16 }
  0x11   : > { %107 = sbr.rel (!%p28_p4) target bundleno = 53 (0x35), region = 20  ;;  %s109_s18 = sand.u32 (%p28_p4), 1, %s10085_s10  }
  0x12   : > { %s9771_s19 = sshll.u32 (%p28_p4), %s10089_s11, 6  ;;  %s8604_s20 = sshll.u32 (%p28_p4), %s109_s18, 9 }
  0x13   : > { %s10148_s23 = scalar_lea.vmem (%p28_p4), %s13036_s0, %s9771_s19  ;;  %s10153_s24 = scalar_lea.vmem (%p28_p4), [#allocation2], %s8604_s20 }
  0x14   : > { %v127_v0 = vld [vmem:[%s10148_s23] sm:$0xff] (%p28_p4)  ;;  %v129_v1 = vld [vmem:[%s10148_s23 + $0x8] sm:$0xff] (%p28_p4)  ;;  %v131_v2 = vld [vmem:[%s10148_s23 + $0x10] sm:$0xff] (%p28_p4) }
  0x15   : > { %128 = vst [vmem:[%s10153_s24] sm:$0xff] (%p28_p4), %v127_v0  ;;  %130 = vst [vmem:[%s10153_s24 + $0x8] sm:$0xff] (%p28_p4), %v129_v1  ;;  %v133_v3 = vld [vmem:[%s10148_s23 + $0x18] sm:$0xff] (%p28_p4)  ;;  %v135_v4 = vld [vmem:[%s10148_s23 + $0x20] sm:$0xff] (%p28_p4) }
  0x16   : > { %132 = vst [vmem:[%s10153_s24 + $0x10] sm:$0xff] (%p28_p4), %v131_v2  ;;  %v137_v5 = vld [vmem:[%s10148_s23 + $0x28] sm:$0xff] (%p28_p4)  ;;  %134 = vst [vmem:[%s10153_s24 + $0x18] sm:$0xff] (%p28_p4), %v133_v3  ;;  %v139_v6 = vld [vmem:[%s10148_s23 + $0x30] sm:$0xff] (%p28_p4) }
  0x17   : > { %136 = vst [vmem:[%s10153_s24 + $0x20] sm:$0xff] (%p28_p4), %v135_v4  ;;  %138 = vst [vmem:[%s10153_s24 + $0x28] sm:$0xff] (%p28_p4), %v137_v5  ;;  %v141_v7 = vld [vmem:[%s10148_s23 + $0x38] sm:$0xff] (%p28_p4)  ;;  %v143_v8 = vld [vmem:[%s10148_s23 + $0x80] sm:$0xff] (%p28_p4) }
  0x18   : > { %140 = vst [vmem:[%s10153_s24 + $0x30] sm:$0xff] %v139_v6  ;;  %142 = vst [vmem:[%s10153_s24 + $0x38] sm:$0xff] %v141_v7  ;;  %v145_v9 = vld [vmem:[%s10148_s23 + $0x88] sm:$0xff]  ;;  %v147_v10 = vld [vmem:[%s10148_s23 + $0x90] sm:$0xff] }
  0x19   : > { %144 = vst [vmem:[%s10153_s24 + $0x40] sm:$0xff] %v143_v8  ;;  %v149_v11 = vld [vmem:[%s10148_s23 + $0x98] sm:$0xff]  ;;  %146 = vst [vmem:[%s10153_s24 + $0x48] sm:$0xff] %v145_v9  ;;  %v151_v12 = vld [vmem:[%s10148_s23 + $0xa0] sm:$0xff] }
  0x1a   : > { %148 = vst [vmem:[%s10153_s24 + $0x50] sm:$0xff] %v147_v10  ;;  %150 = vst [vmem:[%s10153_s24 + $0x58] sm:$0xff] %v149_v11  ;;  %v153_v13 = vld [vmem:[%s10148_s23 + $0xa8] sm:$0xff]  ;;  %v155_v14 = vld [vmem:[%s10148_s23 + $0xb0] sm:$0xff] }
  0x1b   : > { %152 = vst [vmem:[%s10153_s24 + $0x60] sm:$0xff] %v151_v12  ;;  %154 = vst [vmem:[%s10153_s24 + $0x68] sm:$0xff] %v153_v13  ;;  %v157_v15 = vld [vmem:[%s10148_s23 + $0xb8] sm:$0xff]  ;;  %v159_v16 = vld [vmem:[%s10148_s23 + $0x100] sm:$0xff] }
  0x1c   : > { %156 = vst [vmem:[%s10153_s24 + $0x70] sm:$0xff] %v155_v14  ;;  %v161_v17 = vld [vmem:[%s10148_s23 + $0x108] sm:$0xff]  ;;  %158 = vst [vmem:[%s10153_s24 + $0x78] sm:$0xff] %v157_v15  ;;  %v163_v18 = vld [vmem:[%s10148_s23 + $0x110] sm:$0xff] }
  0x1d   : > { %160 = vst [vmem:[%s10153_s24 + $0x80] sm:$0xff] %v159_v16  ;;  %162 = vst [vmem:[%s10153_s24 + $0x88] sm:$0xff] %v161_v17  ;;  %v165_v19 = vld [vmem:[%s10148_s23 + $0x118] sm:$0xff]  ;;  %v167_v20 = vld [vmem:[%s10148_s23 + $0x120] sm:$0xff] }
  0x1e   : > { %164 = vst [vmem:[%s10153_s24 + $0x90] sm:$0xff] %v163_v18  ;;  %166 = vst [vmem:[%s10153_s24 + $0x98] sm:$0xff] %v165_v19  ;;  %v169_v21 = vld [vmem:[%s10148_s23 + $0x128] sm:$0xff]  ;;  %v171_v22 = vld [vmem:[%s10148_s23 + $0x130] sm:$0xff] }
  0x1f   : > { %168 = vst [vmem:[%s10153_s24 + $0xa0] sm:$0xff] %v167_v20  ;;  %v173_v23 = vld [vmem:[%s10148_s23 + $0x138] sm:$0xff]  ;;  %170 = vst [vmem:[%s10153_s24 + $0xa8] sm:$0xff] %v169_v21  ;;  %v175_v24 = vld [vmem:[%s10148_s23 + $0x180] sm:$0xff] }
  0x20   : > { %172 = vst [vmem:[%s10153_s24 + $0xb0] sm:$0xff] %v171_v22  ;;  %174 = vst [vmem:[%s10153_s24 + $0xb8] sm:$0xff] %v173_v23  ;;  %v177_v25 = vld [vmem:[%s10148_s23 + $0x188] sm:$0xff]  ;;  %v179_v26 = vld [vmem:[%s10148_s23 + $0x190] sm:$0xff] }
  0x21   : > { %176 = vst [vmem:[%s10153_s24 + $0xc0] sm:$0xff] %v175_v24  ;;  %178 = vst [vmem:[%s10153_s24 + $0xc8] sm:$0xff] %v177_v25  ;;  %v181_v27 = vld [vmem:[%s10148_s23 + $0x198] sm:$0xff]  ;;  %v183_v28 = vld [vmem:[%s10148_s23 + $0x1a0] sm:$0xff] }
  0x22   : > { %180 = vst [vmem:[%s10153_s24 + $0xd0] sm:$0xff] %v179_v26  ;;  %v185_v29 = vld [vmem:[%s10148_s23 + $0x1a8] sm:$0xff]  ;;  %182 = vst [vmem:[%s10153_s24 + $0xd8] sm:$0xff] %v181_v27  ;;  %v187_v30 = vld [vmem:[%s10148_s23 + $0x1b0] sm:$0xff] }
  0x23   : > { %184 = vst [vmem:[%s10153_s24 + $0xe0] sm:$0xff] %v183_v28  ;;  %186 = vst [vmem:[%s10153_s24 + $0xe8] sm:$0xff] %v185_v29  ;;  %v189_v31 = vld [vmem:[%s10148_s23 + $0x1b8] sm:$0xff]  ;;  %v191_v32 = vld [vmem:[%s10148_s23 + $0x200] sm:$0xff] }
  0x24   : > { %188 = vst [vmem:[%s10153_s24 + $0xf0] sm:$0xff] %v187_v30  ;;  %190 = vst [vmem:[%s10153_s24 + $0xf8] sm:$0xff] %v189_v31  ;;  %v193_v33 = vld [vmem:[%s10148_s23 + $0x208] sm:$0xff]  ;;  %v195_v34 = vld [vmem:[%s10148_s23 + $0x210] sm:$0xff] }
  0x25   : > { %192 = vst [vmem:[%s10153_s24 + $0x100] sm:$0xff] %v191_v32  ;;  %v197_v35 = vld [vmem:[%s10148_s23 + $0x218] sm:$0xff]  ;;  %194 = vst [vmem:[%s10153_s24 + $0x108] sm:$0xff] %v193_v33  ;;  %v199_v36 = vld [vmem:[%s10148_s23 + $0x220] sm:$0xff] }
  0x26   : > { %196 = vst [vmem:[%s10153_s24 + $0x110] sm:$0xff] %v195_v34  ;;  %198 = vst [vmem:[%s10153_s24 + $0x118] sm:$0xff] %v197_v35  ;;  %v201_v37 = vld [vmem:[%s10148_s23 + $0x228] sm:$0xff]  ;;  %v203_v38 = vld [vmem:[%s10148_s23 + $0x230] sm:$0xff] }
  0x27   : > { %200 = vst [vmem:[%s10153_s24 + $0x120] sm:$0xff] %v199_v36  ;;  %202 = vst [vmem:[%s10153_s24 + $0x128] sm:$0xff] %v201_v37  ;;  %v205_v39 = vld [vmem:[%s10148_s23 + $0x238] sm:$0xff]  ;;  %v207_v40 = vld [vmem:[%s10148_s23 + $0x280] sm:$0xff] }
  0x28   : > { %204 = vst [vmem:[%s10153_s24 + $0x130] sm:$0xff] %v203_v38  ;;  %v209_v41 = vld [vmem:[%s10148_s23 + $0x288] sm:$0xff]  ;;  %206 = vst [vmem:[%s10153_s24 + $0x138] sm:$0xff] %v205_v39  ;;  %v211_v42 = vld [vmem:[%s10148_s23 + $0x290] sm:$0xff] }
  0x29   : > { %208 = vst [vmem:[%s10153_s24 + $0x140] sm:$0xff] %v207_v40  ;;  %210 = vst [vmem:[%s10153_s24 + $0x148] sm:$0xff] %v209_v41  ;;  %v213_v43 = vld [vmem:[%s10148_s23 + $0x298] sm:$0xff]  ;;  %v215_v44 = vld [vmem:[%s10148_s23 + $0x2a0] sm:$0xff] }
  0x2a   : > { %212 = vst [vmem:[%s10153_s24 + $0x150] sm:$0xff] %v211_v42  ;;  %214 = vst [vmem:[%s10153_s24 + $0x158] sm:$0xff] %v213_v43  ;;  %v217_v45 = vld [vmem:[%s10148_s23 + $0x2a8] sm:$0xff]  ;;  %v219_v46 = vld [vmem:[%s10148_s23 + $0x2b0] sm:$0xff] }
  0x2b   : > { %216 = vst [vmem:[%s10153_s24 + $0x160] sm:$0xff] %v215_v44  ;;  %v221_v47 = vld [vmem:[%s10148_s23 + $0x2b8] sm:$0xff]  ;;  %218 = vst [vmem:[%s10153_s24 + $0x168] sm:$0xff] %v217_v45  ;;  %v223_v48 = vld [vmem:[%s10148_s23 + $0x300] sm:$0xff] }
  0x2c   : > { %220 = vst [vmem:[%s10153_s24 + $0x170] sm:$0xff] %v219_v46  ;;  %222 = vst [vmem:[%s10153_s24 + $0x178] sm:$0xff] %v221_v47  ;;  %v225_v49 = vld [vmem:[%s10148_s23 + $0x308] sm:$0xff]  ;;  %v227_v50 = vld [vmem:[%s10148_s23 + $0x310] sm:$0xff] }
  0x2d   : > { %224 = vst [vmem:[%s10153_s24 + $0x180] sm:$0xff] %v223_v48  ;;  %226 = vst [vmem:[%s10153_s24 + $0x188] sm:$0xff] %v225_v49  ;;  %v229_v51 = vld [vmem:[%s10148_s23 + $0x318] sm:$0xff]  ;;  %v231_v52 = vld [vmem:[%s10148_s23 + $0x320] sm:$0xff] }
  0x2e   : > { %228 = vst [vmem:[%s10153_s24 + $0x190] sm:$0xff] %v227_v50  ;;  %v233_v53 = vld [vmem:[%s10148_s23 + $0x328] sm:$0xff]  ;;  %230 = vst [vmem:[%s10153_s24 + $0x198] sm:$0xff] %v229_v51  ;;  %v235_v54 = vld [vmem:[%s10148_s23 + $0x330] sm:$0xff] }
  0x2f   : > { %232 = vst [vmem:[%s10153_s24 + $0x1a0] sm:$0xff] %v231_v52  ;;  %234 = vst [vmem:[%s10153_s24 + $0x1a8] sm:$0xff] %v233_v53  ;;  %v237_v55 = vld [vmem:[%s10148_s23 + $0x338] sm:$0xff]  ;;  %v239_v56 = vld [vmem:[%s10148_s23 + $0x380] sm:$0xff] }
  0x30   : > { %236 = vst [vmem:[%s10153_s24 + $0x1b0] sm:$0xff] %v235_v54  ;;  %238 = vst [vmem:[%s10153_s24 + $0x1b8] sm:$0xff] %v237_v55  ;;  %v241_v57 = vld [vmem:[%s10148_s23 + $0x388] sm:$0xff]  ;;  %v243_v58 = vld [vmem:[%s10148_s23 + $0x390] sm:$0xff] }
  0x31   : > { %240 = vst [vmem:[%s10153_s24 + $0x1c0] sm:$0xff] %v239_v56  ;;  %v245_v59 = vld [vmem:[%s10148_s23 + $0x398] sm:$0xff]  ;;  %242 = vst [vmem:[%s10153_s24 + $0x1c8] sm:$0xff] %v241_v57  ;;  %v247_v60 = vld [vmem:[%s10148_s23 + $0x3a0] sm:$0xff] }
  0x32   : > { %244 = vst [vmem:[%s10153_s24 + $0x1d0] sm:$0xff] %v243_v58  ;;  %246 = vst [vmem:[%s10153_s24 + $0x1d8] sm:$0xff] %v245_v59  ;;  %v249_v61 = vld [vmem:[%s10148_s23 + $0x3a8] sm:$0xff]  ;;  %v251_v62 = vld [vmem:[%s10148_s23 + $0x3b0] sm:$0xff] }
  0x33   : > { %248 = vst [vmem:[%s10153_s24 + $0x1e0] sm:$0xff] %v247_v60  ;;  %250 = vst [vmem:[%s10153_s24 + $0x1e8] sm:$0xff] %v249_v61  ;;  %v253_v63 = vld [vmem:[%s10148_s23 + $0x3b8] sm:$0xff] }
  0x34   : > { %252 = vst [vmem:[%s10153_s24 + $0x1f0] sm:$0xff] %v251_v62  ;;  %254 = vst [vmem:[%s10153_s24 + $0x1f8] sm:$0xff] %v253_v63 }
  0x35 PF: > { %p8607_p7 = scmp.ge.s32.totalorder %s10089_s11, 1  ;;  %p267_p8 = scmp.lt.s32.totalorder %s10089_s11, 3 }
  0x37   : > { %p268_p9 = pnand %p8607_p7, %p267_p8 }
  0x39   : > { %271 = sbr.rel (%p268_p9) target bundleno = 2645 (0xa55), region = 47 }
  0x40   : > { %p300_p10 = scmp.lt.s32.totalorder %s10123_s12, 1  ;;  %v13039_v0 = vmov 0   ;;  %s274_s30 = sand.u32 1, %s10081_s9  }
  0x41   : > { %1119 = vmatprep.mubr.bf16.mxu0 %v13039_v0  ;;  %1160 = vmatprep.mubr.bf16.mxu1 %v13039_v0  ;;  %s8608_s3 = sshll.u32 %s274_s30, 9  ;;  %s9773_s4 = smul.u32 448, %s10123_s12 }
  0x42   : > { %s301_s25 = scalar_select %p300_p10, %s10123_s12, 1 }
  0x43   : > { %s10879_s5 = scalar_lea.vmem [#allocation2], %s8608_s3  ;;  %s8609_s7 = sshll.u32 %s274_s30, 6 }
  0x44   : > { %s9772_s26 = sshll.u32 %s301_s25, 10  ;;  %s10882_s6 = scalar_lea.vmem %s10879_s5, %s9773_s4 [#allocation2] }
  0x45   : > { %s10289_s29 = scalar_lea.vmem %s13037_s1, %s9772_s26  ;;  %s9775_s8 = smul.u32 56, %s10123_s12 }
  0x46   : > { %v319_v1 = vld [vmem:[%s10289_s29] sm:$0xff]  ;;  %v320_v3 = vld [vmem:[%s10289_s29 + $0x8] sm:$0xff]  ;;  %s10901_s11 = scalar_lea.vmem [#allocation3], %s8609_s7  ;;  %s8751_s9 = smul.u32 320, %s10123_s12 }
  0x47   : > { %v323_v2 = vld [vmem:[%s10289_s29 + $0x20] sm:$0xff]  ;;  %v324_v5 = vld [vmem:[%s10289_s29 + $0x28] sm:$0xff]  ;;  %s1317_s14 = scalar_lea.vmem %s10901_s11, %s9775_s8 [#allocation3]  ;;  %s8895_s18 = smul.u32 40, %s10123_s12 }
  0x48   : > { %v10294_v4 = vcombine.high %v319_v1, %v323_v2  ;;  %v10297_v6 = vcombine.low %v319_v1, %v323_v2  ;;  %v327_v7 = vld [vmem:[%s10289_s29 + $0x40] sm:$0xff]  ;;  %v10301_v9 = vcombine.high %v320_v3, %v324_v5  ;;  %v10303_v10 = vcombine.low %v320_v3, %v324_v5  ;;  %v328_v12 = vld [vmem:[%s10289_s29 + $0x48] sm:$0xff]  ;;  %s8512_s15 = scalar_lea.vmem %s10879_s5, %s8751_s9 [#allocation2]  ;;  %s8897_s20 = smul.u32 192, %s10123_s12 }
  0x49   : > { %v331_v8 = vld [vmem:[%s10289_s29 + $0x60] sm:$0xff]  ;;  %v332_v13 = vld [vmem:[%s10289_s29 + $0x68] sm:$0xff]  ;;  %s8516_s19 = scalar_lea.vmem %s10901_s11, %s8895_s18 [#allocation3]  ;;  %s9041_s22 = smul.u32 24, %s10123_s12 }
  0x4a   : > { %v10305_v11 = vcombine.high %v327_v7, %v331_v8  ;;  %v335_v14 = vld [vmem:[%s10289_s29 + $0x80] sm:$0xff]  ;;  %1087 = vmatprep.subr.bf16.mxu0 %v10294_v4  ;;  %v10311_v15 = vcombine.high %v328_v12, %v332_v13  ;;  %v336_v17 = vld [vmem:[%s10289_s29 + $0x88] sm:$0xff]  ;;  %1128 = vmatprep.subr.bf16.mxu1 %v10301_v9  ;;  %v10318_v19 = vcombine.low %v327_v7, %v331_v8  ;;  %s8520_s21 = scalar_lea.vmem %s10879_s5, %s8897_s20 [#allocation2]  ;;  %s9043_s24 = sshll.u32 %s10123_s12, 6 }
  0x4b   : > { %v339_v16 = vld [vmem:[%s10289_s29 + $0xa0] sm:$0xff]  ;;  %v340_v18 = vld [vmem:[%s10289_s29 + $0xa8] sm:$0xff]  ;;  %1088 = vmatpush1.bf16.msra.mxu0 %v10297_v6  ;;  %1129 = vmatpush1.bf16.msra.mxu1 %v10303_v10  ;;  %v10322_v20 = vcombine.low %v328_v12, %v332_v13  ;;  %s8524_s23 = scalar_lea.vmem %s10901_s11, %s9041_s22 [#allocation3]  ;;  %s8527_s25 = scalar_lea.vmem %s10879_s5, %s9043_s24 [#allocation2] }
  0x4c   : > { %1089 = vmatprep.subr.bf16.mxu0 %v10305_v11  ;;  %v10324_v21 = vcombine.high %v335_v14, %v339_v16  ;;  %1130 = vmatprep.subr.bf16.mxu1 %v10311_v15  ;;  %v10327_v22 = vcombine.high %v336_v17, %v340_v18  ;;  %v343_v23 = vld [vmem:[%s10289_s29 + $0xc0] sm:$0xff]  ;;  %v344_v25 = vld [vmem:[%s10289_s29 + $0xc8] sm:$0xff]  ;;  %v10334_v27 = vcombine.low %v335_v14, %v339_v16  ;;  %s9187_s26 = sshll.u32 %s10123_s12, 3  ;;  %s4357_s28 = ssub.s32 4, %s10123_s12 }
  0x4d   : > { %v347_v24 = vld [vmem:[%s10289_s29 + $0xe0] sm:$0xff]  ;;  %v348_v26 = vld [vmem:[%s10289_s29 + $0xe8] sm:$0xff]  ;;  %v10338_v28 = vcombine.low %v336_v17, %v340_v18  ;;  %s8530_s27 = scalar_lea.vmem %s10901_s11, %s9187_s26 [#allocation3]  ;;  %s9779_s30 = sshll.u32 %s4357_s28, 6 }
  0x4e   : > { %v10340_v29 = vcombine.high %v343_v23, %v347_v24  ;;  %v10343_v30 = vcombine.high %v344_v25, %v348_v26  ;;  %v351_v31 = vld [vmem:[%s10289_s29 + $0x100] sm:$0xff]  ;;  %v352_v33 = vld [vmem:[%s10289_s29 + $0x108] sm:$0xff]  ;;  %v10350_v35 = vcombine.low %v343_v23, %v347_v24  ;;  %v10354_v36 = vcombine.low %v344_v25, %v348_v26  ;;  %s4360_s3 = scalar_lea.vmem %s10879_s5, %s9779_s30 [#allocation2]  ;;  %s9781_s4 = sshll.u32 %s4357_s28, 3 }
  0x4f   : > { %1090 = vmatpush1.bf16.msra.mxu0 %v10318_v19  ;;  %1131 = vmatpush1.bf16.msra.mxu1 %v10322_v20  ;;  %v355_v32 = vld [vmem:[%s10289_s29 + $0x120] sm:$0xff]  ;;  %v356_v34 = vld [vmem:[%s10289_s29 + $0x128] sm:$0xff]  ;;  %s9328_s7 = smul.u32 4294967104, %s10123_s12 }
  0x50   : > { %1091 = vmatprep.subr.bf16.mxu0 %v10324_v21  ;;  %1132 = vmatprep.subr.bf16.mxu1 %v10327_v22  ;;  %v10356_v37 = vcombine.high %v351_v31, %v355_v32  ;;  %v10359_v38 = vcombine.high %v352_v33, %v356_v34  ;;  %v359_v39 = vld [vmem:[%s10289_s29 + $0x140] sm:$0xff]  ;;  %v360_v41 = vld [vmem:[%s10289_s29 + $0x148] sm:$0xff]  ;;  %v10366_v43 = vcombine.low %v351_v31, %v355_v32  ;;  %s9618_s18 = smul.u32 4294967256, %s10123_s12 }
  0x51   : > { %v363_v40 = vld [vmem:[%s10289_s29 + $0x160] sm:$0xff]  ;;  %v364_v42 = vld [vmem:[%s10289_s29 + $0x168] sm:$0xff]  ;;  %v10370_v44 = vcombine.low %v352_v33, %v356_v34  ;;  %s8538_s8 = scalar_lea.vmem %s10879_s5, %s9328_s7 [#allocation2]  ;;  %s9620_s20 = smul.u32 4294966848, %s10123_s12 }
  0x52   : > { %v10372_v45 = vcombine.high %v359_v39, %v363_v40  ;;  %v10375_v46 = vcombine.high %v360_v41, %v364_v42  ;;  %v367_v47 = vld [vmem:[%s10289_s29 + $0x180] sm:$0xff]  ;;  %v368_v49 = vld [vmem:[%s10289_s29 + $0x188] sm:$0xff]  ;;  %v10382_v51 = vcombine.low %v359_v39, %v363_v40  ;;  %v10386_v52 = vcombine.low %v360_v41, %v364_v42 }
  0x53   : > { %1092 = vmatpush1.bf16.msra.mxu0 %v10334_v27  ;;  %1133 = vmatpush1.bf16.msra.mxu1 %v10338_v28  ;;  %v371_v48 = vld [vmem:[%s10289_s29 + $0x1a0] sm:$0xff]  ;;  %v372_v50 = vld [vmem:[%s10289_s29 + $0x1a8] sm:$0xff] }
  0x54   : > { %1093 = vmatprep.subr.bf16.mxu0 %v10340_v29  ;;  %1134 = vmatprep.subr.bf16.mxu1 %v10343_v30  ;;  %v10388_v53 = vcombine.high %v367_v47, %v371_v48  ;;  %v10391_v54 = vcombine.high %v368_v49, %v372_v50  ;;  %v375_v55 = vld [vmem:[%s10289_s29 + $0x1c0] sm:$0xff]  ;;  %v376_v57 = vld [vmem:[%s10289_s29 + $0x1c8] sm:$0xff]  ;;  %v10398_v59 = vcombine.low %v367_v47, %v371_v48 }
  0x55   : > { %v379_v56 = vld [vmem:[%s10289_s29 + $0x1e0] sm:$0xff]  ;;  %v380_v58 = vld [vmem:[%s10289_s29 + $0x1e8] sm:$0xff]  ;;  %v10402_v60 = vcombine.low %v368_v49, %v372_v50 }
  0x56   : > { %v10404_v61 = vcombine.high %v375_v55, %v379_v56  ;;  %v10407_v62 = vcombine.high %v376_v57, %v380_v58  ;;  %v383_v63 = vld [vmem:[%s10289_s29 + $0x200] sm:$0xff]  ;;  %v384_v2 = vld [vmem:[%s10289_s29 + $0x208] sm:$0xff]  ;;  %v10414_v5 = vcombine.low %v375_v55, %v379_v56  ;;  %v10418_v7 = vcombine.low %v376_v57, %v380_v58 }
  0x57   : > { %1094 = vmatpush1.bf16.msra.mxu0 %v10350_v35  ;;  %1135 = vmatpush1.bf16.msra.mxu1 %v10354_v36  ;;  %v387_v1 = vld [vmem:[%s10289_s29 + $0x220] sm:$0xff]  ;;  %v388_v3 = vld [vmem:[%s10289_s29 + $0x228] sm:$0xff] }
  0x58   : > { %1095 = vmatprep.subr.bf16.mxu0 %v10356_v37  ;;  %1136 = vmatprep.subr.bf16.mxu1 %v10359_v38  ;;  %v10420_v8 = vcombine.high %v383_v63, %v387_v1  ;;  %v10423_v12 = vcombine.high %v384_v2, %v388_v3  ;;  %v391_v13 = vld [vmem:[%s10289_s29 + $0x240] sm:$0xff]  ;;  %v392_v16 = vld [vmem:[%s10289_s29 + $0x248] sm:$0xff]  ;;  %v10430_v18 = vcombine.low %v383_v63, %v387_v1 }
  0x59   : > { %v395_v14 = vld [vmem:[%s10289_s29 + $0x260] sm:$0xff]  ;;  %v396_v17 = vld [vmem:[%s10289_s29 + $0x268] sm:$0xff]  ;;  %v10434_v23 = vcombine.low %v384_v2, %v388_v3 }
  0x5a   : > { %v10436_v24 = vcombine.high %v391_v13, %v395_v14  ;;  %v10439_v25 = vcombine.high %v392_v16, %v396_v17  ;;  %v399_v26 = vld [vmem:[%s10289_s29 + $0x280] sm:$0xff]  ;;  %v400_v32 = vld [vmem:[%s10289_s29 + $0x288] sm:$0xff]  ;;  %v10446_v34 = vcombine.low %v391_v13, %v395_v14  ;;  %v10450_v39 = vcombine.low %v392_v16, %v396_v17 }
  0x5b   : > { %1096 = vmatpush1.bf16.msra.mxu0 %v10366_v43  ;;  %1137 = vmatpush1.bf16.msra.mxu1 %v10370_v44  ;;  %v403_v31 = vld [vmem:[%s10289_s29 + $0x2a0] sm:$0xff]  ;;  %v404_v33 = vld [vmem:[%s10289_s29 + $0x2a8] sm:$0xff] }
  0x5c   : > { %1097 = vmatprep.subr.bf16.mxu0 %v10372_v45  ;;  %1138 = vmatprep.subr.bf16.mxu1 %v10375_v46  ;;  %v10452_v40 = vcombine.high %v399_v26, %v403_v31  ;;  %v10455_v41 = vcombine.high %v400_v32, %v404_v33  ;;  %v407_v42 = vld [vmem:[%s10289_s29 + $0x2c0] sm:$0xff]  ;;  %v408_v48 = vld [vmem:[%s10289_s29 + $0x2c8] sm:$0xff]  ;;  %v10462_v50 = vcombine.low %v399_v26, %v403_v31 }
  0x5d   : > { %v411_v47 = vld [vmem:[%s10289_s29 + $0x2e0] sm:$0xff]  ;;  %v412_v49 = vld [vmem:[%s10289_s29 + $0x2e8] sm:$0xff]  ;;  %v10466_v55 = vcombine.low %v400_v32, %v404_v33 }
  0x5e   : > { %v10468_v56 = vcombine.high %v407_v42, %v411_v47  ;;  %v10471_v57 = vcombine.high %v408_v48, %v412_v49  ;;  %v415_v58 = vld [vmem:[%s10289_s29 + $0x300] sm:$0xff]  ;;  %v416_v1 = vld [vmem:[%s10289_s29 + $0x308] sm:$0xff]  ;;  %v10478_v3 = vcombine.low %v407_v42, %v411_v47  ;;  %v10482_v13 = vcombine.low %v408_v48, %v412_v49 }
  0x5f   : > { %1098 = vmatpush1.bf16.msra.mxu0 %v10382_v51  ;;  %1139 = vmatpush1.bf16.msra.mxu1 %v10386_v52  ;;  %13339 = vst [vmem:[#allocation4_spill] sm:$0xff] %v10466_v55  ;;  %v419_v63 = vld [vmem:[%s10289_s29 + $0x320] sm:$0xff]  ;;  %v420_v2 = vld [vmem:[%s10289_s29 + $0x328] sm:$0xff] }
  0x60   : > { %1099 = vmatprep.subr.bf16.mxu0 %v10388_v53  ;;  %1140 = vmatprep.subr.bf16.mxu1 %v10391_v54  ;;  %13340 = vst [vmem:[#allocation5_spill] sm:$0xff] %v10468_v56  ;;  %13341 = vst [vmem:[#allocation6_spill] sm:$0xff] %v10471_v57  ;;  %v10484_v14 = vcombine.high %v415_v58, %v419_v63  ;;  %v10487_v16 = vcombine.high %v416_v1, %v420_v2  ;;  %v423_v17 = vld [vmem:[%s10289_s29 + $0x340] sm:$0xff]  ;;  %v424_v31 = vld [vmem:[%s10289_s29 + $0x348] sm:$0xff] }
  0x61   : > { %13342 = vst [vmem:[#allocation7_spill] sm:$0xff] %v10478_v3  ;;  %13343 = vst [vmem:[#allocation8_spill] sm:$0xff] %v10482_v13  ;;  %v427_v26 = vld [vmem:[%s10289_s29 + $0x360] sm:$0xff]  ;;  %v428_v32 = vld [vmem:[%s10289_s29 + $0x368] sm:$0xff]  ;;  %v10494_v33 = vcombine.low %v415_v58, %v419_v63  ;;  %v10498_v42 = vcombine.low %v416_v1, %v420_v2 }
  0x62   : > { %13344 = vst [vmem:[#allocation9_spill] sm:$0xff] %v10484_v14  ;;  %13345 = vst [vmem:[#allocation10_spill] sm:$0xff] %v10487_v16  ;;  %v10500_v47 = vcombine.high %v423_v17, %v427_v26  ;;  %v10503_v48 = vcombine.high %v424_v31, %v428_v32  ;;  %v431_v49 = vld [vmem:[%s10289_s29 + $0x380] sm:$0xff]  ;;  %v432_v58 = vld [vmem:[%s10289_s29 + $0x388] sm:$0xff]  ;;  %v10514_v1 = vcombine.low %v424_v31, %v428_v32 }
  0x63   : > { %1100 = vmatpush1.bf16.msra.mxu0 %v10398_v59  ;;  %1141 = vmatpush1.bf16.msra.mxu1 %v10402_v60  ;;  %13346 = vst [vmem:[#allocation11_spill] sm:$0xff] %v10494_v33  ;;  %13347 = vst [vmem:[#allocation12_spill] sm:$0xff] %v10498_v42  ;;  %v435_v0 = vld [vmem:[%s10289_s29 + $0x3a0] sm:$0xff]  ;;  %v436_v63 = vld [vmem:[%s10289_s29 + $0x3a8] sm:$0xff] }
  0x64   : > { %1101 = vmatprep.subr.bf16.mxu0 %v10404_v61  ;;  %1142 = vmatprep.subr.bf16.mxu1 %v10407_v62  ;;  %13348 = vst [vmem:[#allocation13_spill] sm:$0xff] %v10500_v47  ;;  %13349 = vst [vmem:[#allocation14_spill] sm:$0xff] %v10503_v48  ;;  %v10516_v2 = vcombine.high %v431_v49, %v435_v0  ;;  %v10530_v31 = vcombine.low %v432_v58, %v436_v63 }
  0x65   : > { %13351 = vst [vmem:[#allocation16_spill] sm:$0xff] %v10514_v1 }
  0x66   : > { %13352 = vst [vmem:[#allocation17_spill] sm:$0xff] %v10516_v2  ;;  %13355 = vst [vmem:[#allocation20_spill] sm:$0xff] %v10530_v31 }
  0x67   : > { %1102 = vmatpush1.bf16.msra.mxu0 %v10414_v5  ;;  %1143 = vmatpush1.bf16.msra.mxu1 %v10418_v7 }
  0x68   : > { %1103 = vmatprep.subr.bf16.mxu0 %v10420_v8  ;;  %1144 = vmatprep.subr.bf16.mxu1 %v10423_v12 }
  0x6b   : > { %1104 = vmatpush1.bf16.msra.mxu0 %v10430_v18  ;;  %1145 = vmatpush1.bf16.msra.mxu1 %v10434_v23 }
  0x6c   : > { %1105 = vmatprep.subr.bf16.mxu0 %v10436_v24  ;;  %1146 = vmatprep.subr.bf16.mxu1 %v10439_v25 }
  0x6f   : > { %1106 = vmatpush1.bf16.msra.mxu0 %v10446_v34  ;;  %1147 = vmatpush1.bf16.msra.mxu1 %v10450_v39 }
  0x70   : > { %1107 = vmatprep.subr.bf16.mxu0 %v10452_v40  ;;  %1148 = vmatprep.subr.bf16.mxu1 %v10455_v41 }
  0x73   : > { %1108 = vmatpush1.bf16.msra.mxu0 %v10462_v50  ;;  %1149 = vmatpush1.bf16.msra.mxu1 %v10466_v55  ;;  %v446_v55 = vld [vmem:[%s10289_s29 + $0x3f8] sm:$0xff] }
  0x74   : > { %1109 = vmatprep.subr.bf16.mxu0 %v10468_v56  ;;  %1150 = vmatprep.subr.bf16.mxu1 %v10471_v57  ;;  %v13366_v57 = vmov 0   ;;  %v442_v56 = vld [vmem:[%s10289_s29 + $0x3d8] sm:$0xff] }
  0x77   : > { %1110 = vmatpush1.bf16.msra.mxu0 %v10478_v3  ;;  %1151 = vmatpush1.bf16.msra.mxu1 %v10482_v13  ;;  %v10510_v13 = vcombine.low %v423_v17, %v427_v26  ;;  %v440_v17 = vld [vmem:[%s10289_s29 + $0x3c8] sm:$0xff]  ;;  %v341_v3 = vld [vmem:[%s10289_s29 + $0xb0] sm:$0xff] }
  0x78   : > { %1111 = vmatprep.subr.bf16.mxu0 %v10484_v14  ;;  %1152 = vmatprep.subr.bf16.mxu1 %v10487_v16  ;;  %v10519_v16 = vcombine.high %v432_v58, %v436_v63  ;;  %v439_v14 = vld [vmem:[%s10289_s29 + $0x3c0] sm:$0xff]  ;;  %v444_v26 = vld [vmem:[%s10289_s29 + $0x3e8] sm:$0xff] }
  0x79   : > { %13350 = vst [vmem:[#allocation15_spill] sm:$0xff] %v10510_v13  ;;  %v10546_v58 = vcombine.low %v440_v17, %v444_v26 }
  0x7a   : > { %13353 = vst [vmem:[#allocation18_spill] sm:$0xff] %v10519_v16 }
  0x7b   : > { %1112 = vmatpush1.bf16.msra.mxu0 %v10494_v33  ;;  %1153 = vmatpush1.bf16.msra.mxu1 %v10498_v42  ;;  %v443_v33 = vld [vmem:[%s10289_s29 + $0x3e0] sm:$0xff]  ;;  %v10526_v42 = vcombine.low %v431_v49, %v435_v0  ;;  %v322_v0 = vld [vmem:[%s10289_s29 + $0x18] sm:$0xff]  ;;  %13359 = vst [vmem:[#allocation24_spill] sm:$0xff] %v10546_v58 }
  0x7c   : > { %1113 = vmatprep.subr.bf16.mxu0 %v10500_v47  ;;  %1154 = vmatprep.subr.bf16.mxu1 %v10503_v48  ;;  %v10532_v32 = vcombine.high %v439_v14, %v443_v33  ;;  %v10535_v48 = vcombine.high %v440_v17, %v444_v26  ;;  %v321_v47 = vld [vmem:[%s10289_s29 + $0x10] sm:$0xff]  ;;  %v326_v49 = vld [vmem:[%s10289_s29 + $0x38] sm:$0xff] }
  0x7d   : > { %13354 = vst [vmem:[#allocation19_spill] sm:$0xff] %v10526_v42  ;;  %v10562_v17 = vcombine.low %v322_v0, %v326_v49 }
  0x7e   : > { %13356 = vst [vmem:[#allocation21_spill] sm:$0xff] %v10532_v32  ;;  %13357 = vst [vmem:[#allocation22_spill] sm:$0xff] %v10535_v48 }
  0x7f   : > { %1114 = vmatpush1.bf16.msra.mxu0 %v10510_v13  ;;  %1155 = vmatpush1.bf16.msra.mxu1 %v10514_v1  ;;  %v325_v13 = vld [vmem:[%s10289_s29 + $0x30] sm:$0xff]  ;;  %v10542_v1 = vcombine.low %v439_v14, %v443_v33  ;;  %v330_v14 = vld [vmem:[%s10289_s29 + $0x58] sm:$0xff]  ;;  %13363 = vst [vmem:[#allocation28_spill] sm:$0xff] %v10562_v17 }
  0x80   : > { %1115 = vmatprep.subr.bf16.mxu0 %v10516_v2  ;;  %1156 = vmatprep.subr.bf16.mxu1 %v10519_v16  ;;  %v10548_v63 = vcombine.high %v321_v47, %v325_v13  ;;  %v10551_v16 = vcombine.high %v322_v0, %v326_v49  ;;  %v329_v2 = vld [vmem:[%s10289_s29 + $0x50] sm:$0xff]  ;;  %v334_v33 = vld [vmem:[%s10289_s29 + $0x78] sm:$0xff] }
  0x81   : > { %13358 = vst [vmem:[#allocation23_spill] sm:$0xff] %v10542_v1  ;;  %v10580_v49 = vcombine.low %v330_v14, %v334_v33 }
  0x82   : > { %13360 = vst [vmem:[#allocation25_spill] sm:$0xff] %v10548_v63  ;;  %13361 = vst [vmem:[#allocation26_spill] sm:$0xff] %v10551_v16 }
  0x83   : > { %1116 = vmatpush1.bf16.msra.mxu0 %v10526_v42  ;;  %1157 = vmatpush1.bf16.msra.mxu1 %v10530_v31  ;;  %v333_v42 = vld [vmem:[%s10289_s29 + $0x70] sm:$0xff]  ;;  %v10558_v31 = vcombine.low %v321_v47, %v325_v13  ;;  %v338_v13 = vld [vmem:[%s10289_s29 + $0x98] sm:$0xff]  ;;  %13368 = vst [vmem:[#allocation32_spill] sm:$0xff] %v10580_v49 }
  0x84   : > { %1117 = vmatprep.subr.bf16.mxu0 %v10532_v32  ;;  %1158 = vmatprep.subr.bf16.mxu1 %v10535_v48  ;;  %v10564_v26 = vcombine.high %v329_v2, %v333_v42  ;;  %v10567_v48 = vcombine.high %v330_v14, %v334_v33  ;;  %v337_v32 = vld [vmem:[%s10289_s29 + $0x90] sm:$0xff]  ;;  %v342_v47 = vld [vmem:[%s10289_s29 + $0xb8] sm:$0xff]  ;;  %v10576_v0 = vcombine.low %v329_v2, %v333_v42 }
  0x85   : > { %13362 = vst [vmem:[#allocation27_spill] sm:$0xff] %v10558_v31  ;;  %v346_v42 = vld [vmem:[%s10289_s29 + $0xd8] sm:$0xff]  ;;  %v10594_v14 = vcombine.low %v337_v32, %v341_v3  ;;  %v10598_v33 = vcombine.low %v338_v13, %v342_v47 }
  0x86   : > { %13364 = vst [vmem:[#allocation29_spill] sm:$0xff] %v10564_v26  ;;  %13365 = vst [vmem:[#allocation30_spill] sm:$0xff] %v10567_v48  ;;  %v350_v2 = vld [vmem:[%s10289_s29 + $0xf8] sm:$0xff] }
  0x87   : > { %1118 = vmatpush1.bf16.msra.mxu0 %v10542_v1  ;;  %1159 = vmatpush1.bf16.msra.mxu1 %v10546_v58  ;;  %13367 = vst [vmem:[#allocation31_spill] sm:$0xff] %v10576_v0  ;;  %v345_v58 = vld [vmem:[%s10289_s29 + $0xd0] sm:$0xff]  ;;  %13371 = vst [vmem:[#allocation35_spill] sm:$0xff] %v10594_v14 }
  0x88   : > { %1169 = vmatprep.subr.bf16.mxu0 %v10548_v63  ;;  %1210 = vmatprep.subr.bf16.mxu1 %v10551_v16  ;;  %v10582_v16 = vcombine.high %v337_v32, %v341_v3  ;;  %v10585_v63 = vcombine.high %v338_v13, %v342_v47  ;;  %v349_v1 = vld [vmem:[%s10289_s29 + $0xf0] sm:$0xff]  ;;  %13372 = vst [vmem:[#allocation36_spill] sm:$0xff] %v10598_v33  ;;  %v354_v3 = vld [vmem:[%s10289_s29 + $0x118] sm:$0xff] }
  0x89   : > { %v358_v32 = vld [vmem:[%s10289_s29 + $0x138] sm:$0xff]  ;;  %v10614_v13 = vcombine.low %v346_v42, %v350_v2 }
  0x8a   : > { %1120 = vmatmul.mubr.bf16.vlgmr.msra.gmra.mrb[0].mxu0 %v13366_v57  ;;  %1161 = vmatmul.mubr.bf16.vlgmr.msra.gmra.mrb[0].mxu1 %v13366_v57  ;;  %13369 = vst [vmem:[#allocation33_spill] sm:$0xff] %v10582_v16  ;;  %13370 = vst [vmem:[#allocation34_spill] sm:$0xff] %v10585_v63 }
  0x8b   : > { %1170 = vmatpush1.bf16.msra.mxu0 %v10558_v31  ;;  %1211 = vmatpush1.bf16.msra.mxu1 %v10562_v17  ;;  %v353_v17 = vld [vmem:[%s10289_s29 + $0x110] sm:$0xff]  ;;  %13376 = vst [vmem:[#allocation40_spill] sm:$0xff] %v10614_v13 }
  0x8c   : > { %1171 = vmatprep.subr.bf16.mxu0 %v10564_v26  ;;  %1212 = vmatprep.subr.bf16.mxu1 %v10567_v48  ;;  %v10600_v48 = vcombine.high %v345_v58, %v349_v1  ;;  %v10603_v26 = vcombine.high %v346_v42, %v350_v2  ;;  %v10630_v42 = vcombine.low %v354_v3, %v358_v32  ;;  %v445_v31 = vld [vmem:[%s10289_s29 + $0x3f0] sm:$0xff] }
  0x8d   : > { %1201 = vmatprep.mubr.bf16.mxu0 %v13366_v57  ;;  %1242 = vmatprep.mubr.bf16.mxu1 %v13366_v57 }
  0x8e   : > { %13373 = vst [vmem:[#allocation37_spill] sm:$0xff] %v10600_v48  ;;  %13374 = vst [vmem:[#allocation38_spill] sm:$0xff] %v10603_v26 }
  0x8f   : > { %1172 = vmatpush1.bf16.msra.mxu0 %v10576_v0  ;;  %1213 = vmatpush1.bf16.msra.mxu1 %v10580_v49  ;;  %v357_v0 = vld [vmem:[%s10289_s29 + $0x130] sm:$0xff]  ;;  %v10610_v49 = vcombine.low %v345_v58, %v349_v1  ;;  %v362_v1 = vld [vmem:[%s10289_s29 + $0x158] sm:$0xff]  ;;  %13380 = vst [vmem:[#allocation44_spill] sm:$0xff] %v10630_v42 }
  0x90   : > { %1173 = vmatprep.subr.bf16.mxu0 %v10582_v16  ;;  %1214 = vmatprep.subr.bf16.mxu1 %v10585_v63  ;;  %v10616_v47 = vcombine.high %v353_v17, %v357_v0  ;;  %v10619_v63 = vcombine.high %v354_v3, %v358_v32  ;;  %v361_v16 = vld [vmem:[%s10289_s29 + $0x150] sm:$0xff]  ;;  %v366_v58 = vld [vmem:[%s10289_s29 + $0x178] sm:$0xff] }
  0x91   : > { %13375 = vst [vmem:[#allocation39_spill] sm:$0xff] %v10610_v49  ;;  %v10646_v3 = vcombine.low %v362_v1, %v366_v58 }
  0x92   : > { %13377 = vst [vmem:[#allocation41_spill] sm:$0xff] %v10616_v47  ;;  %13378 = vst [vmem:[#allocation42_spill] sm:$0xff] %v10619_v63 }
  0x93   : > { %1174 = vmatpush1.bf16.msra.mxu0 %v10594_v14  ;;  %1215 = vmatpush1.bf16.msra.mxu1 %v10598_v33  ;;  %v365_v14 = vld [vmem:[%s10289_s29 + $0x170] sm:$0xff]  ;;  %v10626_v33 = vcombine.low %v353_v17, %v357_v0  ;;  %v370_v17 = vld [vmem:[%s10289_s29 + $0x198] sm:$0xff]  ;;  %13384 = vst [vmem:[#allocation48_spill] sm:$0xff] %v10646_v3 }
  0x94   : > { %1175 = vmatprep.subr.bf16.mxu0 %v10600_v48  ;;  %1216 = vmatprep.subr.bf16.mxu1 %v10603_v26  ;;  %v10632_v2 = vcombine.high %v361_v16, %v365_v14  ;;  %v10635_v26 = vcombine.high %v362_v1, %v366_v58  ;;  %v369_v48 = vld [vmem:[%s10289_s29 + $0x190] sm:$0xff]  ;;  %v374_v0 = vld [vmem:[%s10289_s29 + $0x1b8] sm:$0xff] }
  0x95   : > { %13379 = vst [vmem:[#allocation43_spill] sm:$0xff] %v10626_v33  ;;  %v10662_v1 = vcombine.low %v370_v17, %v374_v0 }
  0x96   : > { %13381 = vst [vmem:[#allocation45_spill] sm:$0xff] %v10632_v2  ;;  %13382 = vst [vmem:[#allocation46_spill] sm:$0xff] %v10635_v26 }
  0x97   : > { %1176 = vmatpush1.bf16.msra.mxu0 %v10610_v49  ;;  %1217 = vmatpush1.bf16.msra.mxu1 %v10614_v13  ;;  %v373_v49 = vld [vmem:[%s10289_s29 + $0x1b0] sm:$0xff]  ;;  %v10642_v13 = vcombine.low %v361_v16, %v365_v14  ;;  %v378_v16 = vld [vmem:[%s10289_s29 + $0x1d8] sm:$0xff]  ;;  %13388 = vst [vmem:[#allocation52_spill] sm:$0xff] %v10662_v1 }
  0x98   : > { %1177 = vmatprep.subr.bf16.mxu0 %v10616_v47  ;;  %1218 = vmatprep.subr.bf16.mxu1 %v10619_v63  ;;  %v10648_v32 = vcombine.high %v369_v48, %v373_v49  ;;  %v10651_v63 = vcombine.high %v370_v17, %v374_v0  ;;  %v377_v47 = vld [vmem:[%s10289_s29 + $0x1d0] sm:$0xff]  ;;  %v382_v14 = vld [vmem:[%s10289_s29 + $0x1f8] sm:$0xff] }
  0x99   : > { %13383 = vst [vmem:[#allocation47_spill] sm:$0xff] %v10642_v13  ;;  %v10678_v17 = vcombine.low %v378_v16, %v382_v14 }
  0x9a   : > { %13385 = vst [vmem:[#allocation49_spill] sm:$0xff] %v10648_v32  ;;  %13386 = vst [vmem:[#allocation50_spill] sm:$0xff] %v10651_v63 }
  0x9b   : > { %1178 = vmatpush1.bf16.msra.mxu0 %v10626_v33  ;;  %1219 = vmatpush1.bf16.msra.mxu1 %v10630_v42  ;;  %v381_v33 = vld [vmem:[%s10289_s29 + $0x1f0] sm:$0xff]  ;;  %v10658_v42 = vcombine.low %v369_v48, %v373_v49  ;;  %v386_v48 = vld [vmem:[%s10289_s29 + $0x218] sm:$0xff]  ;;  %13392 = vst [vmem:[#allocation56_spill] sm:$0xff] %v10678_v17 }
  0x9c   : > { %1179 = vmatprep.subr.bf16.mxu0 %v10632_v2  ;;  %1220 = vmatprep.subr.bf16.mxu1 %v10635_v26  ;;  %v10664_v58 = vcombine.high %v377_v47, %v381_v33  ;;  %v10667_v26 = vcombine.high %v378_v16, %v382_v14  ;;  %v385_v2 = vld [vmem:[%s10289_s29 + $0x210] sm:$0xff]  ;;  %v390_v49 = vld [vmem:[%s10289_s29 + $0x238] sm:$0xff] }
  0x9d   : > { %13387 = vst [vmem:[#allocation51_spill] sm:$0xff] %v10658_v42  ;;  %v10694_v16 = vcombine.low %v386_v48, %v390_v49 }
  0x9e   : > { %13389 = vst [vmem:[#allocation53_spill] sm:$0xff] %v10664_v58  ;;  %13390 = vst [vmem:[#allocation54_spill] sm:$0xff] %v10667_v26 }
  0x9f   : > { %1180 = vmatpush1.bf16.msra.mxu0 %v10642_v13  ;;  %1221 = vmatpush1.bf16.msra.mxu1 %v10646_v3  ;;  %v389_v13 = vld [vmem:[%s10289_s29 + $0x230] sm:$0xff]  ;;  %v10674_v3 = vcombine.low %v377_v47, %v381_v33  ;;  %v394_v33 = vld [vmem:[%s10289_s29 + $0x258] sm:$0xff]  ;;  %13396 = vst [vmem:[#allocation60_spill] sm:$0xff] %v10694_v16 }
  0xa0   : > { %1181 = vmatprep.subr.bf16.mxu0 %v10648_v32  ;;  %1222 = vmatprep.subr.bf16.mxu1 %v10651_v63  ;;  %v10680_v0 = vcombine.high %v385_v2, %v389_v13  ;;  %v10683_v63 = vcombine.high %v386_v48, %v390_v49  ;;  %v393_v32 = vld [vmem:[%s10289_s29 + $0x250] sm:$0xff]  ;;  %v398_v47 = vld [vmem:[%s10289_s29 + $0x278] sm:$0xff] }
  0xa1   : > { %13391 = vst [vmem:[#allocation55_spill] sm:$0xff] %v10674_v3  ;;  %v10710_v48 = vcombine.low %v394_v33, %v398_v47 }
  0xa2   : > { %13393 = vst [vmem:[#allocation57_spill] sm:$0xff] %v10680_v0  ;;  %13394 = vst [vmem:[#allocation58_spill] sm:$0xff] %v10683_v63 }
  0xa3   : > { %1182 = vmatpush1.bf16.msra.mxu0 %v10658_v42  ;;  %1223 = vmatpush1.bf16.msra.mxu1 %v10662_v1  ;;  %v397_v42 = vld [vmem:[%s10289_s29 + $0x270] sm:$0xff]  ;;  %v10690_v1 = vcombine.low %v385_v2, %v389_v13  ;;  %v402_v13 = vld [vmem:[%s10289_s29 + $0x298] sm:$0xff]  ;;  %13400 = vst [vmem:[#allocation64_spill] sm:$0xff] %v10710_v48 }
  0xa4   : > { %1183 = vmatprep.subr.bf16.mxu0 %v10664_v58  ;;  %1224 = vmatprep.subr.bf16.mxu1 %v10667_v26  ;;  %v10696_v14 = vcombine.high %v393_v32, %v397_v42  ;;  %v10699_v26 = vcombine.high %v394_v33, %v398_v47  ;;  %v401_v58 = vld [vmem:[%s10289_s29 + $0x290] sm:$0xff]  ;;  %v406_v2 = vld [vmem:[%s10289_s29 + $0x2b8] sm:$0xff] }
  0xa5   : > { %13395 = vst [vmem:[#allocation59_spill] sm:$0xff] %v10690_v1  ;;  %v10726_v33 = vcombine.low %v402_v13, %v406_v2 }
  0xa6   : > { %13397 = vst [vmem:[#allocation61_spill] sm:$0xff] %v10696_v14  ;;  %13398 = vst [vmem:[#allocation62_spill] sm:$0xff] %v10699_v26 }
  0xa7   : > { %1184 = vmatpush1.bf16.msra.mxu0 %v10674_v3  ;;  %1225 = vmatpush1.bf16.msra.mxu1 %v10678_v17  ;;  %v405_v3 = vld [vmem:[%s10289_s29 + $0x2b0] sm:$0xff]  ;;  %v10706_v17 = vcombine.low %v393_v32, %v397_v42  ;;  %v410_v42 = vld [vmem:[%s10289_s29 + $0x2d8] sm:$0xff]  ;;  %13404 = vst [vmem:[#allocation68_spill] sm:$0xff] %v10726_v33 }
  0xa8   : > { %1185 = vmatprep.subr.bf16.mxu0 %v10680_v0  ;;  %1226 = vmatprep.subr.bf16.mxu1 %v10683_v63  ;;  %v10712_v49 = vcombine.high %v401_v58, %v405_v3  ;;  %v10715_v63 = vcombine.high %v402_v13, %v406_v2  ;;  %v409_v0 = vld [vmem:[%s10289_s29 + $0x2d0] sm:$0xff]  ;;  %v414_v32 = vld [vmem:[%s10289_s29 + $0x2f8] sm:$0xff] }
  0xa9   : > { %13399 = vst [vmem:[#allocation63_spill] sm:$0xff] %v10706_v17  ;;  %v10742_v13 = vcombine.low %v410_v42, %v414_v32 }
  0xaa   : > { %13401 = vst [vmem:[#allocation65_spill] sm:$0xff] %v10712_v49  ;;  %13402 = vst [vmem:[#allocation66_spill] sm:$0xff] %v10715_v63 }
  0xab   : > { %1186 = vmatpush1.bf16.msra.mxu0 %v10690_v1  ;;  %1227 = vmatpush1.bf16.msra.mxu1 %v10694_v16  ;;  %v413_v1 = vld [vmem:[%s10289_s29 + $0x2f0] sm:$0xff]  ;;  %v10722_v16 = vcombine.low %v401_v58, %v405_v3  ;;  %v418_v3 = vld [vmem:[%s10289_s29 + $0x318] sm:$0xff]  ;;  %13408 = vst [vmem:[#allocation72_spill] sm:$0xff] %v10742_v13 }
  0xac   : > { %1187 = vmatprep.subr.bf16.mxu0 %v10696_v14  ;;  %1228 = vmatprep.subr.bf16.mxu1 %v10699_v26  ;;  %v10728_v47 = vcombine.high %v409_v0, %v413_v1  ;;  %v10731_v26 = vcombine.high %v410_v42, %v414_v32  ;;  %v417_v14 = vld [vmem:[%s10289_s29 + $0x310] sm:$0xff]  ;;  %v422_v58 = vld [vmem:[%s10289_s29 + $0x338] sm:$0xff] }
  0xad   : > { %13403 = vst [vmem:[#allocation67_spill] sm:$0xff] %v10722_v16  ;;  %v10758_v42 = vcombine.low %v418_v3, %v422_v58 }
  0xae   : > { %13405 = vst [vmem:[#allocation69_spill] sm:$0xff] %v10728_v47  ;;  %13406 = vst [vmem:[#allocation70_spill] sm:$0xff] %v10731_v26 }
  0xaf   : > { %1188 = vmatpush1.bf16.msra.mxu0 %v10706_v17  ;;  %1229 = vmatpush1.bf16.msra.mxu1 %v10710_v48  ;;  %v421_v17 = vld [vmem:[%s10289_s29 + $0x330] sm:$0xff]  ;;  %v10738_v48 = vcombine.low %v409_v0, %v413_v1  ;;  %v426_v1 = vld [vmem:[%s10289_s29 + $0x358] sm:$0xff] }
  0xb0   : > { %1189 = vmatprep.subr.bf16.mxu0 %v10712_v49  ;;  %1230 = vmatprep.subr.bf16.mxu1 %v10715_v63  ;;  %v10744_v2 = vcombine.high %v417_v14, %v421_v17  ;;  %v10747_v63 = vcombine.high %v418_v3, %v422_v58  ;;  %v425_v49 = vld [vmem:[%s10289_s29 + $0x350] sm:$0xff]  ;;  %v430_v0 = vld [vmem:[%s10289_s29 + $0x378] sm:$0xff] }
  0xb1   : > { %13407 = vst [vmem:[#allocation71_spill] sm:$0xff] %v10738_v48  ;;  %v10774_v3 = vcombine.low %v426_v1, %v430_v0 }
  0xb2   : > { %13409 = vst [vmem:[#allocation73_spill] sm:$0xff] %v10744_v2  ;;  %13410 = vst [vmem:[#allocation74_spill] sm:$0xff] %v10747_v63 }
  0xb3   : > { %1190 = vmatpush1.bf16.msra.mxu0 %v10722_v16  ;;  %1231 = vmatpush1.bf16.msra.mxu1 %v10726_v33  ;;  %v429_v16 = vld [vmem:[%s10289_s29 + $0x370] sm:$0xff]  ;;  %v10754_v33 = vcombine.low %v417_v14, %v421_v17  ;;  %v434_v17 = vld [vmem:[%s10289_s29 + $0x398] sm:$0xff] }
  0xb4   : > { %1191 = vmatprep.subr.bf16.mxu0 %v10728_v47  ;;  %1232 = vmatprep.subr.bf16.mxu1 %v10731_v26  ;;  %v10760_v32 = vcombine.high %v425_v49, %v429_v16  ;;  %v10763_v26 = vcombine.high %v426_v1, %v430_v0  ;;  %v433_v47 = vld [vmem:[%s10289_s29 + $0x390] sm:$0xff]  ;;  %v438_v14 = vld [vmem:[%s10289_s29 + $0x3b8] sm:$0xff]  ;;  %v10795_v0 = vcombine.high %v442_v56, %v446_v55 }
  0xb6   : > { %13411 = vst [vmem:[#allocation75_spill] sm:$0xff] %v10763_v26 }
  0xb7   : > { %1192 = vmatpush1.bf16.msra.mxu0 %v10738_v48  ;;  %1233 = vmatpush1.bf16.msra.mxu1 %v10742_v13  ;;  %v437_v48 = vld [vmem:[%s10289_s29 + $0x3b0] sm:$0xff]  ;;  %v10770_v13 = vcombine.low %v425_v49, %v429_v16  ;;  %v10790_v49 = vcombine.low %v434_v17, %v438_v14 }
  0xb8   : > { %1193 = vmatprep.subr.bf16.mxu0 %v10744_v2  ;;  %1234 = vmatprep.subr.bf16.mxu1 %v10747_v63  ;;  %v10776_v58 = vcombine.high %v433_v47, %v437_v48  ;;  %v10779_v63 = vcombine.high %v434_v17, %v438_v14  ;;  %v441_v2 = vld [vmem:[%s10289_s29 + $0x3d0] sm:$0xff]  ;;  %v10786_v16 = vcombine.low %v433_v47, %v437_v48 }
  0xb9   : > { %v10792_v1 = vcombine.high %v441_v2, %v445_v31  ;;  %v10802_v48 = vcombine.low %v442_v56, %v446_v55 }
  0xbb   : > { %1194 = vmatpush1.bf16.msra.mxu0 %v10754_v33  ;;  %1235 = vmatpush1.bf16.msra.mxu1 %v10758_v42 }
  0xbc   : > { %1195 = vmatprep.subr.bf16.mxu0 %v10760_v32  ;;  %1236 = vmatprep.subr.bf16.mxu1 %v10763_v26  ;;  %v10798_v26 = vcombine.low %v441_v2, %v445_v31 }
  0xbf   : > { %1196 = vmatpush1.bf16.msra.mxu0 %v10770_v13  ;;  %1237 = vmatpush1.bf16.msra.mxu1 %v10774_v3 }
  0xc0   : > { %1197 = vmatprep.subr.bf16.mxu0 %v10776_v58  ;;  %1238 = vmatprep.subr.bf16.mxu1 %v10779_v63 }
  0xc3   : > { %1198 = vmatpush1.bf16.msra.mxu0 %v10786_v16  ;;  %1239 = vmatpush1.bf16.msra.mxu1 %v10790_v49 }
  0xc4   : > { %1199 = vmatprep.subr.bf16.mxu0 %v10792_v1  ;;  %1240 = vmatprep.subr.bf16.mxu1 %v10795_v0 }
  0xc7   : > { %1200 = vmatpush1.bf16.msra.mxu0 %v10798_v26  ;;  %1241 = vmatpush1.bf16.msra.mxu1 %v10802_v48 }
  0xc8   : > { %2100 = vmatprep.subr.bf16.mxu0 %v10294_v4  ;;  %2141 = vmatprep.subr.bf16.mxu1 %v10301_v9  ;;  %v13412_v4 = vld [vmem:[#allocation4_spill] sm:$0xff]  ;;  %v13414_v9 = vld [vmem:[#allocation6_spill] sm:$0xff] }
  0xca   : > { %1202 = vmatmul.mubr.bf16.vlgmr.msra.gmra.mrb[4].mxu0 %v13366_v57  ;;  %1243 = vmatmul.mubr.bf16.vlgmr.msra.gmra.mrb[4].mxu1 %v13366_v57 }
  0xcb   : > { %2101 = vmatpush1.bf16.msra.mxu0 %v10297_v6  ;;  %2142 = vmatpush1.bf16.msra.mxu1 %v10303_v10  ;;  %v13413_v6 = vld [vmem:[#allocation5_spill] sm:$0xff]  ;;  %v13415_v10 = vld [vmem:[#allocation7_spill] sm:$0xff] }
  0xcc   : > { %2102 = vmatprep.subr.bf16.mxu0 %v10305_v11  ;;  %2143 = vmatprep.subr.bf16.mxu1 %v10311_v15  ;;  %v13416_v11 = vld [vmem:[#allocation8_spill] sm:$0xff]  ;;  %v13417_v15 = vld [vmem:[#allocation9_spill] sm:$0xff] }
  0xcf   : > { %2103 = vmatpush1.bf16.msra.mxu0 %v10318_v19  ;;  %2144 = vmatpush1.bf16.msra.mxu1 %v10322_v20  ;;  %v13418_v19 = vld [vmem:[#allocation10_spill] sm:$0xff]  ;;  %v13419_v20 = vld [vmem:[#allocation11_spill] sm:$0xff] }
  0xd0   : > { %2104 = vmatprep.subr.bf16.mxu0 %v10324_v21  ;;  %2145 = vmatprep.subr.bf16.mxu1 %v10327_v22  ;;  %v13420_v21 = vld [vmem:[#allocation12_spill] sm:$0xff]  ;;  %v13421_v22 = vld [vmem:[#allocation13_spill] sm:$0xff] }
  0xd3   : > { %2105 = vmatpush1.bf16.msra.mxu0 %v10334_v27  ;;  %2146 = vmatpush1.bf16.msra.mxu1 %v10338_v28  ;;  %v13422_v27 = vld [vmem:[#allocation14_spill] sm:$0xff]  ;;  %v13423_v28 = vld [vmem:[#allocation15_spill] sm:$0xff] }
  0xd4   : > { %2106 = vmatprep.subr.bf16.mxu0 %v10340_v29  ;;  %2147 = vmatprep.subr.bf16.mxu1 %v10343_v30  ;;  %v13424_v29 = vld [vmem:[#allocation16_spill] sm:$0xff]  ;;  %v13425_v30 = vld [vmem:[#allocation17_spill] sm:$0xff] }
  0xd7   : > { %2107 = vmatpush1.bf16.msra.mxu0 %v10350_v35  ;;  %2148 = vmatpush1.bf16.msra.mxu1 %v10354_v36  ;;  %v13426_v35 = vld [vmem:[#allocation18_spill] sm:$0xff]  ;;  %v13427_v36 = vld [vmem:[#allocation19_spill] sm:$0xff] }
  0xd8   : > { %2108 = vmatprep.subr.bf16.mxu0 %v10356_v37  ;;  %2149 = vmatprep.subr.bf16.mxu1 %v10359_v38  ;;  %v13428_v37 = vld [vmem:[#allocation20_spill] sm:$0xff]  ;;  %v13429_v38 = vld [vmem:[#allocation21_spill] sm:$0xff] }
  0xdb   : > { %2109 = vmatpush1.bf16.msra.mxu0 %v10366_v43  ;;  %2150 = vmatpush1.bf16.msra.mxu1 %v10370_v44  ;;  %v13430_v43 = vld [vmem:[#allocation22_spill] sm:$0xff]  ;;  %v13431_v44 = vld [vmem:[#allocation23_spill] sm:$0xff] }
  0xdc   : > { %2110 = vmatprep.subr.bf16.mxu0 %v10372_v45  ;;  %2151 = vmatprep.subr.bf16.mxu1 %v10375_v46  ;;  %v13432_v45 = vld [vmem:[#allocation24_spill] sm:$0xff]  ;;  %v13433_v46 = vld [vmem:[#allocation25_spill] sm:$0xff] }
  0xdf   : > { %2111 = vmatpush1.bf16.msra.mxu0 %v10382_v51  ;;  %2152 = vmatpush1.bf16.msra.mxu1 %v10386_v52  ;;  %v13434_v51 = vld [vmem:[#allocation26_spill] sm:$0xff] }
  0xe0   : > { %2112 = vmatprep.subr.bf16.mxu0 %v10388_v53  ;;  %2153 = vmatprep.subr.bf16.mxu1 %v10391_v54 }
  0xe3   : > { %2113 = vmatpush1.bf16.msra.mxu0 %v10398_v59  ;;  %2154 = vmatpush1.bf16.msra.mxu1 %v10402_v60 }
  0xe4   : > { %2114 = vmatprep.subr.bf16.mxu0 %v10404_v61  ;;  %2155 = vmatprep.subr.bf16.mxu1 %v10407_v62 }
  0xe7   : > { %2115 = vmatpush1.bf16.msra.mxu0 %v10414_v5  ;;  %2156 = vmatpush1.bf16.msra.mxu1 %v10418_v7  ;;  %v311_v7 = vld [vmem:[%s10882_s6] sm:$0xff] }
  0xe8   : > { %2116 = vmatprep.subr.bf16.mxu0 %v10420_v8  ;;  %2157 = vmatprep.subr.bf16.mxu1 %v10423_v12  ;;  %v313_v8 = vld [vmem:[%s10882_s6 + $0x10] sm:$0xff]  ;;  %v312_v12 = vld [vmem:[%s10882_s6 + $0x8] sm:$0xff] }
  0xeb   : > { %2117 = vmatpush1.bf16.msra.mxu0 %v10430_v18  ;;  %2158 = vmatpush1.bf16.msra.mxu1 %v10434_v23  ;;  %v314_v23 = vld [vmem:[%s10882_s6 + $0x18] sm:$0xff] }
  0xec   : > { %2118 = vmatprep.subr.bf16.mxu0 %v10436_v24  ;;  %2159 = vmatprep.subr.bf16.mxu1 %v10439_v25 }
  0xef   : > { %2119 = vmatpush1.bf16.msra.mxu0 %v10446_v34  ;;  %2160 = vmatpush1.bf16.msra.mxu1 %v10450_v39 }
  0xf0   : > { %2120 = vmatprep.subr.bf16.mxu0 %v10452_v40  ;;  %2161 = vmatprep.subr.bf16.mxu1 %v10455_v41 }
  0xf3   : > { %2121 = vmatpush1.bf16.msra.mxu0 %v10462_v50  ;;  %2162 = vmatpush1.bf16.msra.mxu1 %v13412_v4  ;;  %v315_v4 = vld [vmem:[%s10882_s6 + $0x20] sm:$0xff] }
  0xf4   : > { %2122 = vmatprep.subr.bf16.mxu0 %v13413_v6  ;;  %2163 = vmatprep.subr.bf16.mxu1 %v13414_v9  ;;  %v317_v6 = vld [vmem:[%s10882_s6 + $0x30] sm:$0xff]  ;;  %v316_v9 = vld [vmem:[%s10882_s6 + $0x28] sm:$0xff] }
  0xf7   : > { %2123 = vmatpush1.bf16.msra.mxu0 %v13415_v10  ;;  %2164 = vmatpush1.bf16.msra.mxu1 %v13416_v11  ;;  %v318_v11 = vld [vmem:[%s10882_s6 + $0x38] sm:$0xff]  ;;  %s5367_s6 = scalar_lea.vmem %s10901_s11, %s9781_s4 [#allocation3] }
  0xf8   : > { %2124 = vmatprep.subr.bf16.mxu0 %v13417_v15  ;;  %2165 = vmatprep.subr.bf16.mxu1 %v13418_v19 }
  0xfb   : > { %2125 = vmatpush1.bf16.msra.mxu0 %v13419_v20  ;;  %2166 = vmatpush1.bf16.msra.mxu1 %v13420_v21 }
  0xfc   : > { %2126 = vmatprep.subr.bf16.mxu0 %v13421_v22  ;;  %2167 = vmatprep.subr.bf16.mxu1 %v13422_v27 }
  0xff   : > { %2127 = vmatpush1.bf16.msra.mxu0 %v13423_v28  ;;  %2168 = vmatpush1.bf16.msra.mxu1 %v13424_v29 }
 0x100   : > { %2128 = vmatprep.subr.bf16.mxu0 %v13425_v30  ;;  %2169 = vmatprep.subr.bf16.mxu1 %v13426_v35 }
 0x103   : > { %2129 = vmatpush1.bf16.msra.mxu0 %v13427_v36  ;;  %2170 = vmatpush1.bf16.msra.mxu1 %v13428_v37 }
 0x104   : > { %2130 = vmatprep.subr.bf16.mxu0 %v13429_v38  ;;  %2171 = vmatprep.subr.bf16.mxu1 %v13430_v43 }
 0x107   : > { %2131 = vmatpush1.bf16.msra.mxu0 %v13431_v44  ;;  %2172 = vmatpush1.bf16.msra.mxu1 %v13432_v45 }
 0x108   : > { %2182 = vmatprep.subr.bf16.mxu0 %v13433_v46  ;;  %2223 = vmatprep.subr.bf16.mxu1 %v13434_v51 }
 0x15d   : > { %v1121_v52 = vpop.f32.mrb[0].mxu0  ;;  %v1162_v53 = vpop.f32.mrb[0].mxu1 }
 0x15e   : > { %v1123_v54 = vpop.f32.mrb[1].mxu0  ;;  %v1164_v59 = vpop.f32.mrb[1].mxu1  ;;  %v1251_v18 = vadd.f32 %v1121_v52, %v311_v7  ;;  %v1253_v24 = vadd.f32 %v1162_v53, %v313_v8 }
 0x15f   : > { %v1125_v60 = vpop.f32.mrb[2].mxu0  ;;  %v1166_v61 = vpop.f32.mrb[2].mxu1  ;;  %v1252_v25 = vadd.f32 %v1123_v54, %v312_v12  ;;  %v1254_v34 = vadd.f32 %v1164_v59, %v314_v23 }
 0x160   : > { %v1126_v62 = vpop.f32.mrb[3].mxu0  ;;  %v1167_v5 = vpop.f32.mrb[3].mxu1  ;;  %v8742_v39 = vmul.f32 -1.442695, %v1251_v18  ;;  %v8744_v40 = vmul.f32 -1.442695, %v1253_v24 }
 0x161   : > { %v8743_v41 = vmul.f32 -1.442695, %v1252_v25  ;;  %v8745_v50 = vmul.f32 -1.442695, %v1254_v34 }
 0x162   : > { %9811 = vpow2.f32 %v8742_v39 }
 0x163   : > { %9813 = vpow2.f32 %v8744_v40 }
 0x164   : > { %9815 = vpow2.f32 %v8743_v41 }
 0x165   : > { %9817 = vpow2.f32 %v8745_v50 }
 0x16c   : > { %v9812_v55 = vpop.eup %9811 }
 0x16d   : > { %v9814_v56 = vpop.eup %9813  ;;  %v1265_v47 = vadd.f32 1.0, %v9812_v55  ;;  %v13435_v55 = vld [vmem:[#allocation27_spill] sm:$0xff] }
 0x16e   : > { %v9816_v57 = vpop.eup %9815  ;;  %v1277_v2 = vadd.f32 1.0, %v9814_v56  ;;  %v13436_v56 = vld [vmem:[#allocation28_spill] sm:$0xff] }
 0x16f   : > { %v9818_v31 = vpop.eup %9817  ;;  %v1266_v17 = vadd.f32 1.0, %v9816_v57  ;;  %9819 = vrcp.f32 %v1265_v47  ;;  %v13437_v57 = vld [vmem:[#allocation29_spill] sm:$0xff]  ;;  %v13439_v47 = vld [vmem:[#allocation31_spill] sm:$0xff] }
 0x170   : > { %v1278_v14 = vadd.f32 1.0, %v9818_v31  ;;  %9821 = vrcp.f32 %v1277_v2  ;;  %v13438_v31 = vld [vmem:[#allocation30_spill] sm:$0xff]  ;;  %v13440_v2 = vld [vmem:[#allocation32_spill] sm:$0xff] }
 0x171   : > { %9823 = vrcp.f32 %v1266_v17  ;;  %v13441_v17 = vld [vmem:[#allocation33_spill] sm:$0xff] }
 0x172   : > { %9825 = vrcp.f32 %v1278_v14  ;;  %v13442_v14 = vld [vmem:[#allocation34_spill] sm:$0xff] }
 0x179   : > { %v9820_v43 = vpop.eup %9819 }
 0x17a   : > { %v9822_v44 = vpop.eup %9821 }
 0x17b   : > { %v9824_v45 = vpop.eup %9823  ;;  %v1297_v53 = vmul.f32 0.0, %v9822_v44  ;;  %v13462_v44 = vld [vmem:[#allocation54_spill] sm:$0xff] }
 0x17c   : > { %v9826_v46 = vpop.eup %9825 }
 0x17d   : > { %v1298_v59 = vmul.f32 0.0, %v9826_v46  ;;  %v13464_v46 = vld [vmem:[#allocation56_spill] sm:$0xff] }
 0x19d   : > { %v1203_v10 = vpop.f32.mrb[4].mxu0  ;;  %v1244_v19 = vpop.f32.mrb[4].mxu1 }
 0x19e   : > { %v1255_v15 = vadd.f32 %v1203_v10, %v315_v4  ;;  %v1205_v20 = vpop.f32.mrb[5].mxu0  ;;  %v1257_v21 = vadd.f32 %v1244_v19, %v317_v6  ;;  %v1246_v27 = vpop.f32.mrb[5].mxu1  ;;  %v13443_v4 = vld [vmem:[#allocation35_spill] sm:$0xff]  ;;  %v13444_v6 = vld [vmem:[#allocation36_spill] sm:$0xff]  ;;  %v13446_v10 = vld [vmem:[#allocation38_spill] sm:$0xff] }
 0x19f   : > { %v1256_v22 = vadd.f32 %v1205_v20, %v316_v9  ;;  %v1207_v28 = vpop.f32.mrb[6].mxu0  ;;  %v1258_v29 = vadd.f32 %v1246_v27, %v318_v11  ;;  %v1248_v30 = vpop.f32.mrb[6].mxu1  ;;  %v13445_v9 = vld [vmem:[#allocation37_spill] sm:$0xff]  ;;  %v13447_v11 = vld [vmem:[#allocation39_spill] sm:$0xff]  ;;  %v13450_v20 = vld [vmem:[#allocation42_spill] sm:$0xff] }
 0x1a0   : > { %9827 = vtanh.f32 %v1255_v15  ;;  %v1208_v35 = vpop.f32.mrb[7].mxu0  ;;  %v8746_v36 = vmul.f32 -1.442695, %v1257_v21  ;;  %v1249_v37 = vpop.f32.mrb[7].mxu1  ;;  %v13448_v15 = vld [vmem:[#allocation40_spill] sm:$0xff]  ;;  %v13449_v19 = vld [vmem:[#allocation41_spill] sm:$0xff] }
 0x1a1   : > { %9829 = vtanh.f32 %v1256_v22  ;;  %v8747_v38 = vmul.f32 -1.442695, %v1258_v29  ;;  %v13451_v21 = vld [vmem:[#allocation43_spill] sm:$0xff]  ;;  %v13452_v22 = vld [vmem:[#allocation44_spill] sm:$0xff]  ;;  %v13453_v27 = vld [vmem:[#allocation45_spill] sm:$0xff] }
 0x1a2   : > { %9831 = vpow2.f32 %v8746_v36  ;;  %v13454_v28 = vld [vmem:[#allocation46_spill] sm:$0xff]  ;;  %v13455_v29 = vld [vmem:[#allocation47_spill] sm:$0xff]  ;;  %v13456_v30 = vld [vmem:[#allocation48_spill] sm:$0xff] }
 0x1a3   : > { %9833 = vpow2.f32 %v8747_v38  ;;  %v13457_v35 = vld [vmem:[#allocation49_spill] sm:$0xff]  ;;  %v13458_v36 = vld [vmem:[#allocation50_spill] sm:$0xff]  ;;  %v13459_v37 = vld [vmem:[#allocation51_spill] sm:$0xff] }
 0x1a4   : > { %v13460_v38 = vld [vmem:[#allocation52_spill] sm:$0xff] }
 0x1aa   : > { %v9828_v51 = vpop.eup %9827 }
 0x1ab   : > { %v9830_v52 = vpop.eup %9829  ;;  %v1299_v54 = vmul.f32 %v9828_v51, %v9820_v43  ;;  %v13461_v43 = vld [vmem:[#allocation53_spill] sm:$0xff] }
 0x1ac   : > { %v1300_v60 = vmul.f32 %v9830_v52, %v9824_v45  ;;  %v9832_v61 = vpop.eup %9831  ;;  %v13463_v45 = vld [vmem:[#allocation55_spill] sm:$0xff]  ;;  %v13465_v51 = vld [vmem:[#allocation57_spill] sm:$0xff]  ;;  %v13466_v52 = vld [vmem:[#allocation58_spill] sm:$0xff] }
 0x1ad   : > { %v10892_v62 = vadd.f32 %v1299_v54, %v1297_v53  ;;  %v9834_v5 = vpop.eup %9833  ;;  %v1291_v7 = vadd.f32 1.0, %v9832_v61  ;;  %v13467_v53 = vld [vmem:[#allocation59_spill] sm:$0xff]  ;;  %v13468_v54 = vld [vmem:[#allocation60_spill] sm:$0xff] }
 0x1ae   : > { %v10894_v8 = vadd.f32 %v1300_v60, %v1298_v59  ;;  %v1292_v12 = vadd.f32 1.0, %v9834_v5  ;;  %v13469_v59 = vld [vmem:[#allocation61_spill] sm:$0xff]  ;;  %v13470_v60 = vld [vmem:[#allocation62_spill] sm:$0xff]  ;;  %v13471_v61 = vld [vmem:[#allocation63_spill] sm:$0xff] }
 0x1af   : > { %9835 = vtanh.f32 %v10892_v62  ;;  %v13472_v5 = vld [vmem:[#allocation64_spill] sm:$0xff] }
 0x1b0   : > { %9837 = vrcp.f32 %v1291_v7  ;;  %v13473_v7 = vld [vmem:[#allocation65_spill] sm:$0xff] }
 0x1b1   : > { %9839 = vtanh.f32 %v10894_v8 }
 0x1b2   : > { %9841 = vrcp.f32 %v1292_v12  ;;  %v13474_v12 = vld [vmem:[#allocation66_spill] sm:$0xff] }
 0x1b9   : > { %v9836_v18 = vpop.eup %9835 }
 0x1ba   : > { %v9838_v23 = vpop.eup %9837 }
 0x1bb   : > { %v9840_v24 = vpop.eup %9839  ;;  %v1305_v25 = vmul.f32 %v9838_v23, %v9836_v18  ;;  %v13475_v18 = vld [vmem:[#allocation67_spill] sm:$0xff]  ;;  %v13476_v23 = vld [vmem:[#allocation68_spill] sm:$0xff] }
 0x1bc   : > { %v9842_v34 = vpop.eup %9841 }
 0x1bd   : > { %v1306_v39 = vmul.f32 %v9842_v34, %v9840_v24  ;;  %v10904_v50 = vpack.c.bf16 %v1305_v25, %v1305_v25  ;;  %v13477_v24 = vld [vmem:[#allocation69_spill] sm:$0xff]  ;;  %v13479_v34 = vld [vmem:[#allocation71_spill] sm:$0xff] }
 0x1bf   : > { %v1308_v40 = vpack.c.bf16 %v1306_v39, %v1306_v39  ;;  %v9774_v41 = vpack.c.bf16 %v1306_v39, %v1305_v25  ;;  %v13478_v25 = vld [vmem:[#allocation70_spill] sm:$0xff]  ;;  %v13480_v39 = vld [vmem:[#allocation72_spill] sm:$0xff] }
 0x1c1   : > { %2132 = vmatprep.mubr.bf16.mxu0 %v1308_v40  ;;  %2173 = vmatprep.mubr.bf16.mxu1 %v1308_v40  ;;  %1318 = vst [vmem:[%s1317_s14] sm:$0xff] %v9774_v41  ;;  %v13482_v41 = vld [vmem:[#allocation74_spill] sm:$0xff]  ;;  %s9472_s14 = smul.u32 4294967272, %s10123_s12 }
 0x1c2   : > { %2133 = vmatmul.mubr.bf16.vlgmr.msra.gmra.mrb[8].mxu0 %v10904_v50  ;;  %2174 = vmatmul.mubr.bf16.vlgmr.msra.gmra.mrb[8].mxu1 %v10904_v50 }
 0x1c3   : > { %2183 = vmatpush1.bf16.msra.mxu0 %v13435_v55  ;;  %2224 = vmatpush1.bf16.msra.mxu1 %v13436_v56  ;;  %v13483_v55 = vld [vmem:[#allocation75_spill] sm:$0xff]  ;;  %s8542_s9 = scalar_lea.vmem %s10901_s11, %s9472_s14 [#allocation3] }
 0x1c4   : > { %2214 = vmatprep.mubr.bf16.mxu0 %v1308_v40  ;;  %2255 = vmatprep.mubr.bf16.mxu1 %v1308_v40  ;;  %v13481_v40 = vld [vmem:[#allocation73_spill] sm:$0xff] }
 0x1c5   : > { %2184 = vmatprep.subr.bf16.mxu0 %v13437_v57  ;;  %2225 = vmatprep.subr.bf16.mxu1 %v13438_v31  ;;  %v2365_v57 = vld [vmem:[%s10289_s29 + $0xa0] sm:$0xff]  ;;  %v2362_v31 = vld [vmem:[%s10289_s29 + $0x88] sm:$0xff] }
 0x1c7   : > { %2185 = vmatpush1.bf16.msra.mxu0 %v13439_v47  ;;  %2226 = vmatpush1.bf16.msra.mxu1 %v13440_v2  ;;  %v2366_v47 = vld [vmem:[%s10289_s29 + $0xa8] sm:$0xff] }
 0x1c8   : > { %2186 = vmatprep.subr.bf16.mxu0 %v13441_v17  ;;  %2227 = vmatprep.subr.bf16.mxu1 %v13442_v14 }
 0x1cb   : > { %2187 = vmatpush1.bf16.msra.mxu0 %v13443_v4  ;;  %2228 = vmatpush1.bf16.msra.mxu1 %v13444_v6  ;;  %v11008_v4 = vcombine.high %v2362_v31, %v2366_v47  ;;  %v2369_v6 = vld [vmem:[%s10289_s29 + $0xc0] sm:$0xff] }
 0x1cc   : > { %2188 = vmatprep.subr.bf16.mxu0 %v13445_v9  ;;  %2229 = vmatprep.subr.bf16.mxu1 %v13446_v10  ;;  %v2373_v9 = vld [vmem:[%s10289_s29 + $0xe0] sm:$0xff]  ;;  %v2370_v10 = vld [vmem:[%s10289_s29 + $0xc8] sm:$0xff] }
 0x1cf   : > { %2189 = vmatpush1.bf16.msra.mxu0 %v13447_v11  ;;  %2230 = vmatpush1.bf16.msra.mxu1 %v13448_v15  ;;  %v2374_v11 = vld [vmem:[%s10289_s29 + $0xe8] sm:$0xff] }
 0x1d0   : > { %2190 = vmatprep.subr.bf16.mxu0 %v13449_v19  ;;  %2231 = vmatprep.subr.bf16.mxu1 %v13450_v20  ;;  %v11019_v19 = vcombine.low %v2362_v31, %v2366_v47  ;;  %v11021_v20 = vcombine.high %v2369_v6, %v2373_v9  ;;  %v2417_v31 = vld [vmem:[%s10289_s29 + $0x240] sm:$0xff] }
 0x1d1   : > { %v2421_v47 = vld [vmem:[%s10289_s29 + $0x260] sm:$0xff] }
 0x1d3   : > { %2191 = vmatpush1.bf16.msra.mxu0 %v13451_v21  ;;  %2232 = vmatpush1.bf16.msra.mxu1 %v13452_v22  ;;  %v11024_v21 = vcombine.high %v2370_v10, %v2374_v11  ;;  %v2377_v22 = vld [vmem:[%s10289_s29 + $0x100] sm:$0xff] }
 0x1d4   : > { %2192 = vmatprep.subr.bf16.mxu0 %v13453_v27  ;;  %2233 = vmatprep.subr.bf16.mxu1 %v13454_v28  ;;  %v2381_v27 = vld [vmem:[%s10289_s29 + $0x120] sm:$0xff]  ;;  %v2378_v28 = vld [vmem:[%s10289_s29 + $0x108] sm:$0xff] }
 0x1d7   : > { %2193 = vmatpush1.bf16.msra.mxu0 %v13455_v29  ;;  %2234 = vmatpush1.bf16.msra.mxu1 %v13456_v30  ;;  %v2382_v29 = vld [vmem:[%s10289_s29 + $0x128] sm:$0xff]  ;;  %v11031_v30 = vcombine.low %v2369_v6, %v2373_v9  ;;  %v11118_v9 = vcombine.high %v2417_v31, %v2421_v47 }
 0x1d8   : > { %2194 = vmatprep.subr.bf16.mxu0 %v13457_v35  ;;  %2235 = vmatprep.subr.bf16.mxu1 %v13458_v36  ;;  %v11035_v35 = vcombine.low %v2370_v10, %v2374_v11  ;;  %v11037_v36 = vcombine.high %v2377_v22, %v2381_v27  ;;  %v2418_v6 = vld [vmem:[%s10289_s29 + $0x248] sm:$0xff]  ;;  %v11122_v11 = vcombine.low %v2417_v31, %v2421_v47 }
 0x1d9   : > { %v2422_v10 = vld [vmem:[%s10289_s29 + $0x268] sm:$0xff] }
 0x1da   : > { %13484 = vst [vmem:[#allocation4_spill] sm:$0xff] %v11122_v11  ;;  %v2442_v31 = vld [vmem:[%s10289_s29 + $0x308] sm:$0xff] }
 0x1db   : > { %2195 = vmatpush1.bf16.msra.mxu0 %v13459_v37  ;;  %2236 = vmatpush1.bf16.msra.mxu1 %v13460_v38  ;;  %v11040_v37 = vcombine.high %v2378_v28, %v2382_v29  ;;  %v2385_v38 = vld [vmem:[%s10289_s29 + $0x140] sm:$0xff] }
 0x1dc   : > { %2196 = vmatprep.subr.bf16.mxu0 %v13461_v43  ;;  %2237 = vmatprep.subr.bf16.mxu1 %v13462_v44  ;;  %v2389_v43 = vld [vmem:[%s10289_s29 + $0x160] sm:$0xff]  ;;  %v2386_v44 = vld [vmem:[%s10289_s29 + $0x148] sm:$0xff] }
 0x1df   : > { %2197 = vmatpush1.bf16.msra.mxu0 %v13463_v45  ;;  %2238 = vmatpush1.bf16.msra.mxu1 %v13464_v46  ;;  %v2390_v45 = vld [vmem:[%s10289_s29 + $0x168] sm:$0xff]  ;;  %v11047_v46 = vcombine.low %v2377_v22, %v2381_v27  ;;  %v11124_v22 = vcombine.low %v2418_v6, %v2422_v10  ;;  %v11126_v27 = vcombine.high %v2418_v6, %v2422_v10 }
 0x1e0   : > { %2198 = vmatprep.subr.bf16.mxu0 %v13465_v51  ;;  %2239 = vmatprep.subr.bf16.mxu1 %v13466_v52  ;;  %v11051_v51 = vcombine.low %v2378_v28, %v2382_v29  ;;  %v11053_v52 = vcombine.high %v2385_v38, %v2389_v43  ;;  %v2425_v28 = vld [vmem:[%s10289_s29 + $0x280] sm:$0xff]  ;;  %v2446_v6 = vld [vmem:[%s10289_s29 + $0x328] sm:$0xff] }
 0x1e1   : > { %13485 = vst [vmem:[#allocation5_spill] sm:$0xff] %v11124_v22  ;;  %13486 = vst [vmem:[#allocation6_spill] sm:$0xff] %v11126_v27  ;;  %v2429_v29 = vld [vmem:[%s10289_s29 + $0x2a0] sm:$0xff] }
 0x1e3   : > { %2199 = vmatpush1.bf16.msra.mxu0 %v13467_v53  ;;  %2240 = vmatpush1.bf16.msra.mxu1 %v13468_v54  ;;  %v11056_v53 = vcombine.high %v2386_v44, %v2390_v45  ;;  %v2393_v54 = vld [vmem:[%s10289_s29 + $0x180] sm:$0xff] }
 0x1e4   : > { %2200 = vmatprep.subr.bf16.mxu0 %v13469_v59  ;;  %2241 = vmatprep.subr.bf16.mxu1 %v13470_v60  ;;  %v2397_v59 = vld [vmem:[%s10289_s29 + $0x1a0] sm:$0xff]  ;;  %v2394_v60 = vld [vmem:[%s10289_s29 + $0x188] sm:$0xff] }
 0x1e7   : > { %2201 = vmatpush1.bf16.msra.mxu0 %v13471_v61  ;;  %2242 = vmatpush1.bf16.msra.mxu1 %v13472_v5  ;;  %v2398_v61 = vld [vmem:[%s10289_s29 + $0x1a8] sm:$0xff]  ;;  %v11063_v5 = vcombine.low %v2385_v38, %v2389_v43  ;;  %v11134_v43 = vcombine.high %v2425_v28, %v2429_v29 }
 0x1e8   : > { %2202 = vmatprep.subr.bf16.mxu0 %v13473_v7  ;;  %2243 = vmatprep.subr.bf16.mxu1 %v13474_v12  ;;  %v11067_v7 = vcombine.low %v2386_v44, %v2390_v45  ;;  %v11069_v12 = vcombine.high %v2393_v54, %v2397_v59  ;;  %v2426_v38 = vld [vmem:[%s10289_s29 + $0x288] sm:$0xff]  ;;  %v11138_v45 = vcombine.low %v2425_v28, %v2429_v29 }
 0x1e9   : > { %13487 = vst [vmem:[#allocation7_spill] sm:$0xff] %v11134_v43  ;;  %v2430_v44 = vld [vmem:[%s10289_s29 + $0x2a8] sm:$0xff]  ;;  %v11172_v28 = vcombine.low %v2442_v31, %v2446_v6  ;;  %v11174_v29 = vcombine.high %v2442_v31, %v2446_v6 }
 0x1ea   : > { %13488 = vst [vmem:[#allocation8_spill] sm:$0xff] %v11138_v45 }
 0x1eb   : > { %2203 = vmatpush1.bf16.msra.mxu0 %v13475_v18  ;;  %2244 = vmatpush1.bf16.msra.mxu1 %v13476_v23  ;;  %v11072_v18 = vcombine.high %v2394_v60, %v2398_v61  ;;  %v2401_v23 = vld [vmem:[%s10289_s29 + $0x1c0] sm:$0xff]  ;;  %13497 = vst [vmem:[#allocation17_spill] sm:$0xff] %v11172_v28  ;;  %13498 = vst [vmem:[#allocation18_spill] sm:$0xff] %v11174_v29 }
 0x1ec   : > { %2204 = vmatprep.subr.bf16.mxu0 %v13477_v24  ;;  %2245 = vmatprep.subr.bf16.mxu1 %v13478_v25  ;;  %v2405_v24 = vld [vmem:[%s10289_s29 + $0x1e0] sm:$0xff]  ;;  %v2402_v25 = vld [vmem:[%s10289_s29 + $0x1c8] sm:$0xff] }
 0x1ef   : > { %2205 = vmatpush1.bf16.msra.mxu0 %v13479_v34  ;;  %2246 = vmatpush1.bf16.msra.mxu1 %v13480_v39  ;;  %v2406_v34 = vld [vmem:[%s10289_s29 + $0x1e8] sm:$0xff]  ;;  %v11079_v39 = vcombine.low %v2393_v54, %v2397_v59  ;;  %v11140_v54 = vcombine.low %v2426_v38, %v2430_v44  ;;  %v11142_v59 = vcombine.high %v2426_v38, %v2430_v44  ;;  %v2449_v38 = vld [vmem:[%s10289_s29 + $0x340] sm:$0xff] }
 0x1f0   : > { %2206 = vmatprep.subr.bf16.mxu0 %v13481_v40  ;;  %2247 = vmatprep.subr.bf16.mxu1 %v13482_v41  ;;  %v11083_v40 = vcombine.low %v2394_v60, %v2398_v61  ;;  %v11085_v41 = vcombine.high %v2401_v23, %v2405_v24  ;;  %v2433_v60 = vld [vmem:[%s10289_s29 + $0x2c0] sm:$0xff] }
 0x1f1   : > { %13489 = vst [vmem:[#allocation9_spill] sm:$0xff] %v11140_v54  ;;  %13490 = vst [vmem:[#allocation10_spill] sm:$0xff] %v11142_v59  ;;  %v2437_v61 = vld [vmem:[%s10289_s29 + $0x2e0] sm:$0xff] }
 0x1f2   : > { %v2453_v44 = vld [vmem:[%s10289_s29 + $0x360] sm:$0xff] }
 0x1f3   : > { %2207 = vmatpush1.bf16.msra.mxu0 %v10754_v33  ;;  %2248 = vmatpush1.bf16.msra.mxu1 %v10758_v42  ;;  %v2349_v33 = vld [vmem:[%s10289_s29 + $0x20] sm:$0xff] }
 0x1f4   : > { %2208 = vmatprep.subr.bf16.mxu0 %v10760_v32  ;;  %2249 = vmatprep.subr.bf16.mxu1 %v13483_v55  ;;  %v11088_v55 = vcombine.high %v2402_v25, %v2406_v34 }
 0x1f7   : > { %2209 = vmatpush1.bf16.msra.mxu0 %v10770_v13  ;;  %2250 = vmatpush1.bf16.msra.mxu1 %v10774_v3  ;;  %v2346_v13 = vld [vmem:[%s10289_s29 + $0x8] sm:$0xff] }
 0x1f8   : > { %2210 = vmatprep.subr.bf16.mxu0 %v10776_v58  ;;  %2251 = vmatprep.subr.bf16.mxu1 %v10779_v63  ;;  %v2345_v63 = vld [vmem:[%s10289_s29] sm:$0xff]  ;;  %v2350_v3 = vld [vmem:[%s10289_s29 + $0x28] sm:$0xff] }
 0x1f9   : > { %v10975_v42 = vcombine.low %v2345_v63, %v2349_v33  ;;  %v10977_v32 = vcombine.high %v2345_v63, %v2349_v33  ;;  %v2357_v58 = vld [vmem:[%s10289_s29 + $0x60] sm:$0xff]  ;;  %v11091_v63 = vcombine.low %v2401_v23, %v2405_v24  ;;  %v11095_v33 = vcombine.low %v2402_v25, %v2406_v34  ;;  %v2434_v23 = vld [vmem:[%s10289_s29 + $0x2c8] sm:$0xff] }
 0x1fa   : > { %v11150_v24 = vcombine.high %v2433_v60, %v2437_v61  ;;  %v2438_v25 = vld [vmem:[%s10289_s29 + $0x2e8] sm:$0xff]  ;;  %v11154_v34 = vcombine.low %v2433_v60, %v2437_v61  ;;  %v11182_v61 = vcombine.low %v2449_v38, %v2453_v44 }
 0x1fb   : > { %2211 = vmatpush1.bf16.msra.mxu0 %v10786_v16  ;;  %2252 = vmatpush1.bf16.msra.mxu1 %v10790_v49  ;;  %v10982_v16 = vcombine.low %v2346_v13, %v2350_v3  ;;  %v10984_v49 = vcombine.high %v2346_v13, %v2350_v3  ;;  %v2409_v13 = vld [vmem:[%s10289_s29 + $0x200] sm:$0xff]  ;;  %v2450_v60 = vld [vmem:[%s10289_s29 + $0x348] sm:$0xff] }
 0x1fc   : > { %2212 = vmatprep.subr.bf16.mxu0 %v10792_v1  ;;  %2253 = vmatprep.subr.bf16.mxu1 %v10795_v0  ;;  %v2354_v0 = vld [vmem:[%s10289_s29 + $0x48] sm:$0xff]  ;;  %v2413_v3 = vld [vmem:[%s10289_s29 + $0x220] sm:$0xff]  ;;  %13491 = vst [vmem:[#allocation11_spill] sm:$0xff] %v11150_v24  ;;  %13492 = vst [vmem:[#allocation12_spill] sm:$0xff] %v11154_v34 }
 0x1fd   : > { %13499 = vst [vmem:[#allocation19_spill] sm:$0xff] %v11182_v61 }
 0x1ff   : > { %2213 = vmatpush1.bf16.msra.mxu0 %v10798_v26  ;;  %2254 = vmatpush1.bf16.msra.mxu1 %v10802_v48  ;;  %v2353_v26 = vld [vmem:[%s10289_s29 + $0x40] sm:$0xff]  ;;  %v2358_v48 = vld [vmem:[%s10289_s29 + $0x68] sm:$0xff] }
 0x200   : > { %v10986_v1 = vcombine.high %v2353_v26, %v2357_v58  ;;  %3113 = vmatprep.subr.bf16.mxu0 %v10977_v32  ;;  %v10992_v56 = vcombine.high %v2354_v0, %v2358_v48  ;;  %3154 = vmatprep.subr.bf16.mxu1 %v10984_v49  ;;  %v10999_v2 = vcombine.low %v2353_v26, %v2357_v58  ;;  %v2410_v58 = vld [vmem:[%s10289_s29 + $0x208] sm:$0xff] }
 0x201   : > { %v11003_v17 = vcombine.low %v2354_v0, %v2358_v48  ;;  %v11102_v26 = vcombine.high %v2409_v13, %v2413_v3  ;;  %v11105_v0 = vcombine.low %v2409_v13, %v2413_v3  ;;  %v2414_v48 = vld [vmem:[%s10289_s29 + $0x228] sm:$0xff]  ;;  %v11156_v13 = vcombine.low %v2434_v23, %v2438_v25 }
 0x202   : > { %2215 = vmatmul.mubr.bf16.vlgmr.msra.gmra.mrb[12].mxu0 %v10904_v50  ;;  %2256 = vmatmul.mubr.bf16.vlgmr.msra.gmra.mrb[12].mxu1 %v10904_v50  ;;  %v2361_v50 = vld [vmem:[%s10289_s29 + $0x80] sm:$0xff]  ;;  %v11158_v3 = vcombine.high %v2434_v23, %v2438_v25  ;;  %v11184_v23 = vcombine.high %v2449_v38, %v2453_v44  ;;  %v2454_v25 = vld [vmem:[%s10289_s29 + $0x368] sm:$0xff] }
 0x203   : > { %3114 = vmatpush1.bf16.msra.mxu0 %v10975_v42  ;;  %3155 = vmatpush1.bf16.msra.mxu1 %v10982_v16  ;;  %v11005_v14 = vcombine.high %v2361_v50, %v2365_v57  ;;  %v11015_v15 = vcombine.low %v2361_v50, %v2365_v57  ;;  %v11109_v50 = vcombine.low %v2410_v58, %v2414_v48  ;;  %v2469_v44 = vld [vmem:[%s10289_s29 + $0x3e0] sm:$0xff] }
 0x204   : > { %3115 = vmatprep.subr.bf16.mxu0 %v10986_v1  ;;  %3156 = vmatprep.subr.bf16.mxu1 %v10992_v56  ;;  %v11111_v57 = vcombine.high %v2410_v58, %v2414_v48  ;;  %13493 = vst [vmem:[#allocation13_spill] sm:$0xff] %v11156_v13  ;;  %13494 = vst [vmem:[#allocation14_spill] sm:$0xff] %v11158_v3  ;;  %v2441_v58 = vld [vmem:[%s10289_s29 + $0x300] sm:$0xff]  ;;  %v11190_v31 = vcombine.low %v2450_v60, %v2454_v25 }
 0x205   : > { %v2445_v48 = vld [vmem:[%s10289_s29 + $0x320] sm:$0xff]  ;;  %13500 = vst [vmem:[#allocation20_spill] sm:$0xff] %v11184_v23  ;;  %v11192_v6 = vcombine.high %v2450_v60, %v2454_v25  ;;  %v2470_v60 = vld [vmem:[%s10289_s29 + $0x3e8] sm:$0xff] }
 0x206   : > { %v11166_v47 = vcombine.high %v2441_v58, %v2445_v48  ;;  %v11170_v10 = vcombine.low %v2441_v58, %v2445_v48  ;;  %v2457_v58 = vld [vmem:[%s10289_s29 + $0x380] sm:$0xff]  ;;  %13501 = vst [vmem:[#allocation21_spill] sm:$0xff] %v11190_v31 }
 0x207   : > { %3116 = vmatpush1.bf16.msra.mxu0 %v10999_v2  ;;  %3157 = vmatpush1.bf16.msra.mxu1 %v11003_v17  ;;  %v2461_v48 = vld [vmem:[%s10289_s29 + $0x3a0] sm:$0xff]  ;;  %13502 = vst [vmem:[#allocation22_spill] sm:$0xff] %v11192_v6 }
 0x208   : > { %3117 = vmatprep.subr.bf16.mxu0 %v11005_v14  ;;  %3158 = vmatprep.subr.bf16.mxu1 %v11008_v4  ;;  %13495 = vst [vmem:[#allocation15_spill] sm:$0xff] %v11166_v47  ;;  %13496 = vst [vmem:[#allocation16_spill] sm:$0xff] %v11170_v10 }
 0x20b   : > { %3118 = vmatpush1.bf16.msra.mxu0 %v11015_v15  ;;  %3159 = vmatpush1.bf16.msra.mxu1 %v11019_v19 }
 0x20c   : > { %3119 = vmatprep.subr.bf16.mxu0 %v11021_v20  ;;  %3160 = vmatprep.subr.bf16.mxu1 %v11024_v21 }
 0x20f   : > { %3120 = vmatpush1.bf16.msra.mxu0 %v11031_v30  ;;  %3161 = vmatpush1.bf16.msra.mxu1 %v11035_v35 }
 0x210   : > { %3121 = vmatprep.subr.bf16.mxu0 %v11037_v36  ;;  %3162 = vmatprep.subr.bf16.mxu1 %v11040_v37 }
 0x213   : > { %3122 = vmatpush1.bf16.msra.mxu0 %v11047_v46  ;;  %3163 = vmatpush1.bf16.msra.mxu1 %v11051_v51 }
 0x214   : > { %3123 = vmatprep.subr.bf16.mxu0 %v11053_v52  ;;  %3164 = vmatprep.subr.bf16.mxu1 %v11056_v53 }
 0x217   : > { %3124 = vmatpush1.bf16.msra.mxu0 %v11063_v5  ;;  %3165 = vmatpush1.bf16.msra.mxu1 %v11067_v7 }
 0x218   : > { %3125 = vmatprep.subr.bf16.mxu0 %v11069_v12  ;;  %3166 = vmatprep.subr.bf16.mxu1 %v11072_v18 }
 0x21b   : > { %3126 = vmatpush1.bf16.msra.mxu0 %v11079_v39  ;;  %3167 = vmatpush1.bf16.msra.mxu1 %v11083_v40 }
 0x21c   : > { %3127 = vmatprep.subr.bf16.mxu0 %v11085_v41  ;;  %3168 = vmatprep.subr.bf16.mxu1 %v11088_v55 }
 0x21f   : > { %3128 = vmatpush1.bf16.msra.mxu0 %v11091_v63  ;;  %3169 = vmatpush1.bf16.msra.mxu1 %v11095_v33 }
 0x220   : > { %3129 = vmatprep.subr.bf16.mxu0 %v11102_v26  ;;  %3170 = vmatprep.subr.bf16.mxu1 %v11111_v57 }
 0x223   : > { %3130 = vmatpush1.bf16.msra.mxu0 %v11105_v0  ;;  %3171 = vmatpush1.bf16.msra.mxu1 %v11109_v50 }
 0x224   : > { %3131 = vmatprep.subr.bf16.mxu0 %v11118_v9  ;;  %3172 = vmatprep.subr.bf16.mxu1 %v11126_v27 }
 0x227   : > { %3132 = vmatpush1.bf16.msra.mxu0 %v11122_v11  ;;  %3173 = vmatpush1.bf16.msra.mxu1 %v11124_v22 }
 0x228   : > { %3133 = vmatprep.subr.bf16.mxu0 %v11134_v43  ;;  %3174 = vmatprep.subr.bf16.mxu1 %v11142_v59 }
 0x22b   : > { %3134 = vmatpush1.bf16.msra.mxu0 %v11138_v45  ;;  %3175 = vmatpush1.bf16.msra.mxu1 %v11140_v54 }
 0x22c   : > { %3135 = vmatprep.subr.bf16.mxu0 %v11150_v24  ;;  %3176 = vmatprep.subr.bf16.mxu1 %v11158_v3 }
 0x22f   : > { %3136 = vmatpush1.bf16.msra.mxu0 %v11154_v34  ;;  %3177 = vmatpush1.bf16.msra.mxu1 %v11156_v13  ;;  %v2465_v13 = vld [vmem:[%s10289_s29 + $0x3c0] sm:$0xff]  ;;  %v11205_v34 = vcombine.low %v2457_v58, %v2461_v48 }
 0x230   : > { %3137 = vmatprep.subr.bf16.mxu0 %v11166_v47  ;;  %3178 = vmatprep.subr.bf16.mxu1 %v11174_v29  ;;  %v2458_v29 = vld [vmem:[%s10289_s29 + $0x388] sm:$0xff]  ;;  %v11210_v25 = vcombine.high %v2465_v13, %v2469_v44 }
 0x231   : > { %v2462_v47 = vld [vmem:[%s10289_s29 + $0x3a8] sm:$0xff]  ;;  %13505 = vst [vmem:[#allocation25_spill] sm:$0xff] %v11205_v34 }
 0x232   : > { %v11200_v38 = vcombine.high %v2458_v29, %v2462_v47  ;;  %13506 = vst [vmem:[#allocation26_spill] sm:$0xff] %v11210_v25 }
 0x233   : > { %3138 = vmatpush1.bf16.msra.mxu0 %v11170_v10  ;;  %3179 = vmatpush1.bf16.msra.mxu1 %v11172_v28  ;;  %v11194_v10 = vcombine.high %v2457_v58, %v2461_v48  ;;  %v2466_v28 = vld [vmem:[%s10289_s29 + $0x3c8] sm:$0xff]  ;;  %v11219_v58 = vcombine.low %v2465_v13, %v2469_v44 }
 0x234   : > { %3139 = vmatprep.subr.bf16.mxu0 %v11184_v23  ;;  %13504 = vst [vmem:[#allocation24_spill] sm:$0xff] %v11200_v38  ;;  %3180 = vmatprep.subr.bf16.mxu1 %v11192_v6  ;;  %v11213_v23 = vcombine.low %v2458_v29, %v2462_v47  ;;  %v11216_v6 = vcombine.high %v2466_v28, %v2470_v60  ;;  %v2347_v47 = vld [vmem:[%s10289_s29 + $0x10] sm:$0xff] }
 0x235   : > { %13503 = vst [vmem:[#allocation23_spill] sm:$0xff] %v11194_v10  ;;  %13509 = vst [vmem:[#allocation29_spill] sm:$0xff] %v11219_v58  ;;  %v11223_v48 = vcombine.low %v2466_v28, %v2470_v60  ;;  %v2351_v29 = vld [vmem:[%s10289_s29 + $0x30] sm:$0xff] }
 0x236   : > { %13507 = vst [vmem:[#allocation27_spill] sm:$0xff] %v11213_v23  ;;  %13508 = vst [vmem:[#allocation28_spill] sm:$0xff] %v11216_v6  ;;  %v11234_v13 = vcombine.low %v2347_v47, %v2351_v29 }
 0x237   : > { %3140 = vmatpush1.bf16.msra.mxu0 %v11182_v61  ;;  %3181 = vmatpush1.bf16.msra.mxu1 %v11190_v31  ;;  %13510 = vst [vmem:[#allocation30_spill] sm:$0xff] %v11223_v48  ;;  %v2352_v31 = vld [vmem:[%s10289_s29 + $0x38] sm:$0xff] }
 0x238   : > { %3141 = vmatprep.subr.bf16.mxu0 %v11194_v10  ;;  %3182 = vmatprep.subr.bf16.mxu1 %v11200_v38  ;;  %v2348_v10 = vld [vmem:[%s10289_s29 + $0x18] sm:$0xff]  ;;  %v11230_v38 = vcombine.high %v2347_v47, %v2351_v29  ;;  %v8752_v47 = vld [vmem:[%s8512_s15 + $0x40] sm:$0xff]  ;;  %v8754_v29 = vld [vmem:[%s8512_s15 + $0x50] sm:$0xff] }
 0x239   : > { %v11236_v44 = vcombine.low %v2348_v10, %v2352_v31  ;;  %v11238_v28 = vcombine.high %v2348_v10, %v2352_v31  ;;  %v8755_v10 = vld [vmem:[%s8512_s15 + $0x58] sm:$0xff] }
 0x23a   : > { %13511 = vst [vmem:[#allocation31_spill] sm:$0xff] %v11230_v38 }
 0x23b   : > { %3142 = vmatpush1.bf16.msra.mxu0 %v11205_v34  ;;  %3183 = vmatpush1.bf16.msra.mxu1 %v11213_v23  ;;  %13512 = vst [vmem:[#allocation32_spill] sm:$0xff] %v11238_v28 }
 0x23c   : > { %3143 = vmatprep.subr.bf16.mxu0 %v11210_v25  ;;  %3184 = vmatprep.subr.bf16.mxu1 %v11216_v6 }
 0x23f   : > { %3144 = vmatpush1.bf16.msra.mxu0 %v11219_v58  ;;  %3185 = vmatpush1.bf16.msra.mxu1 %v11223_v48  ;;  %v8753_v48 = vld [vmem:[%s8512_s15 + $0x48] sm:$0xff] }
 0x240   : > { %3195 = vmatprep.subr.bf16.mxu0 %v11230_v38  ;;  %3236 = vmatprep.subr.bf16.mxu1 %v11238_v28 }
 0x295   : > { %v2134_v60 = vpop.f32.mrb[8].mxu0  ;;  %v2175_v58 = vpop.f32.mrb[8].mxu1 }
 0x296   : > { %v2136_v6 = vpop.f32.mrb[9].mxu0  ;;  %v2177_v25 = vpop.f32.mrb[9].mxu1  ;;  %v2264_v24 = vadd.f32 %v8752_v47, %v2134_v60  ;;  %v2266_v31 = vadd.f32 %v8754_v29, %v2175_v58  ;;  %v8756_v47 = vld [vmem:[%s8512_s15 + $0x60] sm:$0xff]  ;;  %v8758_v58 = vld [vmem:[%s8512_s15 + $0x70] sm:$0xff] }
 0x297   : > { %v2138_v23 = vpop.f32.mrb[10].mxu0  ;;  %v2179_v34 = vpop.f32.mrb[10].mxu1  ;;  %v2265_v54 = vadd.f32 %v8753_v48, %v2136_v6  ;;  %v2267_v38 = vadd.f32 %v8755_v10, %v2177_v25  ;;  %v8757_v6 = vld [vmem:[%s8512_s15 + $0x68] sm:$0xff] }
 0x298   : > { %v2139_v61 = vpop.f32.mrb[11].mxu0  ;;  %v2180_v3 = vpop.f32.mrb[11].mxu1  ;;  %v8888_v45 = vmul.f32 -1.442695, %v2264_v24  ;;  %v8890_v28 = vmul.f32 -1.442695, %v2266_v31 }
 0x299   : > { %v8889_v59 = vmul.f32 -1.442695, %v2265_v54  ;;  %v8891_v43 = vmul.f32 -1.442695, %v2267_v38  ;;  %v8759_v24 = vld [vmem:[%s8512_s15 + $0x78] sm:$0xff] }
 0x29a   : > { %9843 = vpow2.f32 %v8888_v45 }
 0x29b   : > { %9845 = vpow2.f32 %v8890_v28 }
 0x29c   : > { %9847 = vpow2.f32 %v8889_v59 }
 0x29d   : > { %9849 = vpow2.f32 %v8891_v43 }
 0x2a4   : > { %v9844_v34 = vpop.eup %9843 }
 0x2a5   : > { %v9846_v3 = vpop.eup %9845  ;;  %v2278_v22 = vadd.f32 1.0, %v9844_v34 }
 0x2a6   : > { %v9848_v61 = vpop.eup %9847  ;;  %v2290_v11 = vadd.f32 1.0, %v9846_v3 }
 0x2a7   : > { %v9850_v23 = vpop.eup %9849  ;;  %v2279_v27 = vadd.f32 1.0, %v9848_v61  ;;  %9851 = vrcp.f32 %v2278_v22 }
 0x2a8   : > { %v2291_v60 = vadd.f32 1.0, %v9850_v23  ;;  %9853 = vrcp.f32 %v2290_v11 }
 0x2a9   : > { %9855 = vrcp.f32 %v2279_v27 }
 0x2aa   : > { %9857 = vrcp.f32 %v2291_v60 }
 0x2b1   : > { %v9852_v11 = vpop.eup %9851 }
 0x2b2   : > { %v9854_v61 = vpop.eup %9853 }
 0x2b3   : > { %v9856_v27 = vpop.eup %9855  ;;  %v2310_v60 = vmul.f32 %v9854_v61, %v10892_v62 }
 0x2b4   : > { %v9858_v23 = vpop.eup %9857 }
 0x2d5   : > { %v2216_v54 = vpop.f32.mrb[12].mxu0  ;;  %v2257_v38 = vpop.f32.mrb[12].mxu1 }
 0x2d6   : > { %v2268_v45 = vadd.f32 %v8756_v47, %v2216_v54  ;;  %v2270_v59 = vadd.f32 %v8758_v58, %v2257_v38  ;;  %v2218_v43 = vpop.f32.mrb[13].mxu0  ;;  %v2259_v25 = vpop.f32.mrb[13].mxu1  ;;  %v2311_v54 = vmul.f32 %v9858_v23, %v10894_v8 }
 0x2d7   : > { %v2269_v48 = vadd.f32 %v8757_v6, %v2218_v43  ;;  %v2271_v28 = vadd.f32 %v8759_v24, %v2259_v25  ;;  %v2220_v29 = vpop.f32.mrb[14].mxu0  ;;  %v2261_v10 = vpop.f32.mrb[14].mxu1 }
 0x2d8   : > { %9859 = vtanh.f32 %v2268_v45  ;;  %v8892_v31 = vmul.f32 -1.442695, %v2270_v59  ;;  %v2221_v34 = vpop.f32.mrb[15].mxu0  ;;  %v2262_v3 = vpop.f32.mrb[15].mxu1 }
 0x2d9   : > { %9861 = vtanh.f32 %v2269_v48  ;;  %v8893_v22 = vmul.f32 -1.442695, %v2271_v28  ;;  %v2355_v34 = vld [vmem:[%s10289_s29 + $0x50] sm:$0xff] }
 0x2da   : > { %9863 = vpow2.f32 %v8892_v31  ;;  %v2359_v3 = vld [vmem:[%s10289_s29 + $0x70] sm:$0xff] }
 0x2db   : > { %9865 = vpow2.f32 %v8893_v22  ;;  %v2356_v22 = vld [vmem:[%s10289_s29 + $0x58] sm:$0xff] }
 0x2e2   : > { %v9860_v47 = vpop.eup %9859 }
 0x2e3   : > { %v9862_v58 = vpop.eup %9861  ;;  %v2312_v6 = vmul.f32 %v9860_v47, %v9852_v11  ;;  %v2360_v11 = vld [vmem:[%s10289_s29 + $0x78] sm:$0xff]  ;;  %v2363_v47 = vld [vmem:[%s10289_s29 + $0x90] sm:$0xff] }
 0x2e4   : > { %v9864_v24 = vpop.eup %9863  ;;  %v2313_v38 = vmul.f32 %v9862_v58, %v9856_v27  ;;  %v11261_v58 = vcombine.high %v2355_v34, %v2359_v3 }
 0x2e5   : > { %v9866_v45 = vpop.eup %9865  ;;  %v11246_v59 = vadd.f32 %v2312_v6, %v2310_v60  ;;  %v2304_v43 = vadd.f32 1.0, %v9864_v24  ;;  %v11263_v60 = vcombine.high %v2356_v22, %v2360_v11  ;;  %v2367_v6 = vld [vmem:[%s10289_s29 + $0xb0] sm:$0xff]  ;;  %v2364_v24 = vld [vmem:[%s10289_s29 + $0x98] sm:$0xff] }
 0x2e6   : > { %v11248_v25 = vadd.f32 %v2313_v38, %v2311_v54  ;;  %v2305_v48 = vadd.f32 1.0, %v9866_v45  ;;  %v2368_v54 = vld [vmem:[%s10289_s29 + $0xb8] sm:$0xff]  ;;  %v11272_v38 = vcombine.low %v2355_v34, %v2359_v3  ;;  %v11274_v45 = vcombine.low %v2356_v22, %v2360_v11  ;;  %v2379_v22 = vld [vmem:[%s10289_s29 + $0x110] sm:$0xff] }
 0x2e7   : > { %9867 = vtanh.f32 %v11246_v59  ;;  %v2383_v11 = vld [vmem:[%s10289_s29 + $0x130] sm:$0xff] }
 0x2e8   : > { %9869 = vrcp.f32 %v2304_v43  ;;  %13513 = vst [vmem:[#allocation33_spill] sm:$0xff] %v11272_v38  ;;  %13514 = vst [vmem:[#allocation34_spill] sm:$0xff] %v11274_v45  ;;  %v11276_v43 = vcombine.high %v2363_v47, %v2367_v6 }
 0x2e9   : > { %9871 = vtanh.f32 %v11248_v25 }
 0x2ea   : > { %9873 = vrcp.f32 %v2305_v48  ;;  %13515 = vst [vmem:[#allocation35_spill] sm:$0xff] %v11276_v43  ;;  %v11278_v48 = vcombine.high %v2364_v24, %v2368_v54 }
 0x2ec   : > { %13516 = vst [vmem:[#allocation36_spill] sm:$0xff] %v11278_v48 }
 0x2f1   : > { %v9868_v62 = vpop.eup %9867 }
 0x2f2   : > { %v9870_v8 = vpop.eup %9869 }
 0x2f3   : > { %v9872_v28 = vpop.eup %9871  ;;  %v2318_v29 = vmul.f32 %v9870_v8, %v9868_v62  ;;  %v2371_v62 = vld [vmem:[%s10289_s29 + $0xd0] sm:$0xff] }
 0x2f4   : > { %v9874_v10 = vpop.eup %9873  ;;  %v2375_v8 = vld [vmem:[%s10289_s29 + $0xf0] sm:$0xff] }
 0x2f5   : > { %v2319_v31 = vmul.f32 %v9874_v10, %v9872_v28  ;;  %v11258_v23 = vpack.c.bf16 %v2318_v29, %v2318_v29  ;;  %v2372_v28 = vld [vmem:[%s10289_s29 + $0xd8] sm:$0xff]  ;;  %v11288_v10 = vcombine.low %v2363_v47, %v2367_v6  ;;  %v11294_v34 = vcombine.high %v2371_v62, %v2375_v8 }
 0x2f6   : > { %v11304_v47 = vcombine.low %v2371_v62, %v2375_v8  ;;  %v11320_v62 = vcombine.low %v2379_v22, %v2383_v11 }
 0x2f7   : > { %v2321_v61 = vpack.c.bf16 %v2319_v31, %v2319_v31  ;;  %v9776_v27 = vpack.c.bf16 %v2319_v31, %v2318_v29  ;;  %v2376_v29 = vld [vmem:[%s10289_s29 + $0xf8] sm:$0xff]  ;;  %13517 = vst [vmem:[#allocation37_spill] sm:$0xff] %v11288_v10  ;;  %v11290_v31 = vcombine.low %v2364_v24, %v2368_v54  ;;  %13519 = vst [vmem:[#allocation39_spill] sm:$0xff] %v11294_v34 }
 0x2f8   : > { %v11296_v3 = vcombine.high %v2372_v28, %v2376_v29  ;;  %13521 = vst [vmem:[#allocation41_spill] sm:$0xff] %v11304_v47  ;;  %v11306_v6 = vcombine.low %v2372_v28, %v2376_v29  ;;  %v11310_v24 = vcombine.high %v2379_v22, %v2383_v11  ;;  %13525 = vst [vmem:[#allocation45_spill] sm:$0xff] %v11320_v62 }
 0x2f9   : > { %3145 = vmatprep.mubr.bf16.mxu0 %v2321_v61  ;;  %3186 = vmatprep.mubr.bf16.mxu1 %v2321_v61  ;;  %8896 = vst [vmem:[%s8516_s19 + $0x8] sm:$0xff] %v9776_v27  ;;  %13518 = vst [vmem:[#allocation38_spill] sm:$0xff] %v11290_v31  ;;  %v2384_v27 = vld [vmem:[%s10289_s29 + $0x138] sm:$0xff]  ;;  %s8550_s19 = scalar_lea.vmem %s10901_s11, %s9618_s18 [#allocation3] }
 0x2fa   : > { %3146 = vmatmul.mubr.bf16.vlgmr.msra.gmra.mrb[16].mxu0 %v11258_v23  ;;  %3187 = vmatmul.mubr.bf16.vlgmr.msra.gmra.mrb[16].mxu1 %v11258_v23  ;;  %13520 = vst [vmem:[#allocation40_spill] sm:$0xff] %v11296_v3  ;;  %13522 = vst [vmem:[#allocation42_spill] sm:$0xff] %v11306_v6 }
 0x2fb   : > { %3196 = vmatpush1.bf16.msra.mxu0 %v11234_v13  ;;  %3237 = vmatpush1.bf16.msra.mxu1 %v11236_v44  ;;  %13523 = vst [vmem:[#allocation43_spill] sm:$0xff] %v11310_v24 }
 0x2fc   : > { %3227 = vmatprep.mubr.bf16.mxu0 %v2321_v61  ;;  %3268 = vmatprep.mubr.bf16.mxu1 %v2321_v61  ;;  %v2380_v61 = vld [vmem:[%s10289_s29 + $0x118] sm:$0xff] }
 0x2fd   : > { %3197 = vmatprep.subr.bf16.mxu0 %v11261_v58  ;;  %3238 = vmatprep.subr.bf16.mxu1 %v11263_v60  ;;  %v11312_v54 = vcombine.high %v2380_v61, %v2384_v27  ;;  %v11322_v8 = vcombine.low %v2380_v61, %v2384_v27 }
 0x2ff   : > { %3198 = vmatpush1.bf16.msra.mxu0 %v11272_v38  ;;  %3239 = vmatpush1.bf16.msra.mxu1 %v11274_v45  ;;  %13524 = vst [vmem:[#allocation44_spill] sm:$0xff] %v11312_v54  ;;  %13526 = vst [vmem:[#allocation46_spill] sm:$0xff] %v11322_v8  ;;  %v2468_v45 = vld [vmem:[%s10289_s29 + $0x3d8] sm:$0xff] }
 0x300   : > { %3199 = vmatprep.subr.bf16.mxu0 %v11276_v43  ;;  %3240 = vmatprep.subr.bf16.mxu1 %v11278_v48  ;;  %v2387_v48 = vld [vmem:[%s10289_s29 + $0x150] sm:$0xff]  ;;  %v2388_v43 = vld [vmem:[%s10289_s29 + $0x158] sm:$0xff] }
 0x301   : > { %v2472_v38 = vld [vmem:[%s10289_s29 + $0x3f8] sm:$0xff] }
 0x303   : > { %3200 = vmatpush1.bf16.msra.mxu0 %v11288_v10  ;;  %3241 = vmatpush1.bf16.msra.mxu1 %v11290_v31  ;;  %v2391_v10 = vld [vmem:[%s10289_s29 + $0x170] sm:$0xff]  ;;  %v2392_v31 = vld [vmem:[%s10289_s29 + $0x178] sm:$0xff] }
 0x304   : > { %3201 = vmatprep.subr.bf16.mxu0 %v11294_v34  ;;  %3242 = vmatprep.subr.bf16.mxu1 %v11296_v3  ;;  %v11326_v28 = vcombine.high %v2387_v48, %v2391_v10  ;;  %v11328_v29 = vcombine.high %v2388_v43, %v2392_v31  ;;  %v2395_v3 = vld [vmem:[%s10289_s29 + $0x190] sm:$0xff]  ;;  %v2396_v34 = vld [vmem:[%s10289_s29 + $0x198] sm:$0xff]  ;;  %v11336_v22 = vcombine.low %v2387_v48, %v2391_v10 }
 0x305   : > { %v11338_v11 = vcombine.low %v2388_v43, %v2392_v31 }
 0x306   : > { %13527 = vst [vmem:[#allocation47_spill] sm:$0xff] %v11326_v28  ;;  %13528 = vst [vmem:[#allocation48_spill] sm:$0xff] %v11328_v29 }
 0x307   : > { %3202 = vmatpush1.bf16.msra.mxu0 %v11304_v47  ;;  %3243 = vmatpush1.bf16.msra.mxu1 %v11306_v6  ;;  %v2399_v47 = vld [vmem:[%s10289_s29 + $0x1b0] sm:$0xff]  ;;  %v2400_v6 = vld [vmem:[%s10289_s29 + $0x1b8] sm:$0xff]  ;;  %13529 = vst [vmem:[#allocation49_spill] sm:$0xff] %v11336_v22  ;;  %13530 = vst [vmem:[#allocation50_spill] sm:$0xff] %v11338_v11 }
 0x308   : > { %3203 = vmatprep.subr.bf16.mxu0 %v11310_v24  ;;  %3244 = vmatprep.subr.bf16.mxu1 %v11312_v54  ;;  %v11342_v61 = vcombine.high %v2395_v3, %v2399_v47  ;;  %v11344_v27 = vcombine.high %v2396_v34, %v2400_v6  ;;  %v2403_v54 = vld [vmem:[%s10289_s29 + $0x1d0] sm:$0xff]  ;;  %v2404_v24 = vld [vmem:[%s10289_s29 + $0x1d8] sm:$0xff]  ;;  %v11352_v43 = vcombine.low %v2395_v3, %v2399_v47 }
 0x309   : > { %v11354_v48 = vcombine.low %v2396_v34, %v2400_v6 }
 0x30a   : > { %13531 = vst [vmem:[#allocation51_spill] sm:$0xff] %v11342_v61  ;;  %13532 = vst [vmem:[#allocation52_spill] sm:$0xff] %v11344_v27 }
 0x30b   : > { %3204 = vmatpush1.bf16.msra.mxu0 %v11320_v62  ;;  %3245 = vmatpush1.bf16.msra.mxu1 %v11322_v8  ;;  %v2407_v62 = vld [vmem:[%s10289_s29 + $0x1f0] sm:$0xff]  ;;  %v2408_v8 = vld [vmem:[%s10289_s29 + $0x1f8] sm:$0xff]  ;;  %13533 = vst [vmem:[#allocation53_spill] sm:$0xff] %v11352_v43  ;;  %13534 = vst [vmem:[#allocation54_spill] sm:$0xff] %v11354_v48 }
 0x30c   : > { %3205 = vmatprep.subr.bf16.mxu0 %v11326_v28  ;;  %3246 = vmatprep.subr.bf16.mxu1 %v11328_v29  ;;  %v11358_v10 = vcombine.high %v2403_v54, %v2407_v62  ;;  %v11360_v31 = vcombine.high %v2404_v24, %v2408_v8  ;;  %v2411_v29 = vld [vmem:[%s10289_s29 + $0x210] sm:$0xff]  ;;  %v2412_v28 = vld [vmem:[%s10289_s29 + $0x218] sm:$0xff]  ;;  %v11368_v34 = vcombine.low %v2403_v54, %v2407_v62 }
 0x30d   : > { %v11370_v3 = vcombine.low %v2404_v24, %v2408_v8 }
 0x30e   : > { %13535 = vst [vmem:[#allocation55_spill] sm:$0xff] %v11358_v10  ;;  %13536 = vst [vmem:[#allocation56_spill] sm:$0xff] %v11360_v31 }
 0x30f   : > { %3206 = vmatpush1.bf16.msra.mxu0 %v11336_v22  ;;  %3247 = vmatpush1.bf16.msra.mxu1 %v11338_v11  ;;  %v2415_v22 = vld [vmem:[%s10289_s29 + $0x230] sm:$0xff]  ;;  %v2416_v11 = vld [vmem:[%s10289_s29 + $0x238] sm:$0xff]  ;;  %13537 = vst [vmem:[#allocation57_spill] sm:$0xff] %v11368_v34  ;;  %13538 = vst [vmem:[#allocation58_spill] sm:$0xff] %v11370_v3 }
 0x310   : > { %3207 = vmatprep.subr.bf16.mxu0 %v11342_v61  ;;  %3248 = vmatprep.subr.bf16.mxu1 %v11344_v27  ;;  %v11374_v47 = vcombine.high %v2411_v29, %v2415_v22  ;;  %v11376_v6 = vcombine.high %v2412_v28, %v2416_v11  ;;  %v2419_v27 = vld [vmem:[%s10289_s29 + $0x250] sm:$0xff]  ;;  %v2420_v61 = vld [vmem:[%s10289_s29 + $0x258] sm:$0xff]  ;;  %v11384_v24 = vcombine.low %v2411_v29, %v2415_v22 }
 0x311   : > { %v11386_v54 = vcombine.low %v2412_v28, %v2416_v11 }
 0x312   : > { %13539 = vst [vmem:[#allocation59_spill] sm:$0xff] %v11374_v47  ;;  %13540 = vst [vmem:[#allocation60_spill] sm:$0xff] %v11376_v6 }
 0x313   : > { %3208 = vmatpush1.bf16.msra.mxu0 %v11352_v43  ;;  %3249 = vmatpush1.bf16.msra.mxu1 %v11354_v48  ;;  %v2423_v43 = vld [vmem:[%s10289_s29 + $0x270] sm:$0xff]  ;;  %v2424_v48 = vld [vmem:[%s10289_s29 + $0x278] sm:$0xff]  ;;  %13541 = vst [vmem:[#allocation61_spill] sm:$0xff] %v11384_v24  ;;  %13542 = vst [vmem:[#allocation62_spill] sm:$0xff] %v11386_v54 }
 0x314   : > { %3209 = vmatprep.subr.bf16.mxu0 %v11358_v10  ;;  %3250 = vmatprep.subr.bf16.mxu1 %v11360_v31  ;;  %v11390_v62 = vcombine.high %v2419_v27, %v2423_v43  ;;  %v11392_v8 = vcombine.high %v2420_v61, %v2424_v48  ;;  %v2427_v31 = vld [vmem:[%s10289_s29 + $0x290] sm:$0xff]  ;;  %v2428_v10 = vld [vmem:[%s10289_s29 + $0x298] sm:$0xff]  ;;  %v11400_v28 = vcombine.low %v2419_v27, %v2423_v43 }
 0x315   : > { %v11402_v29 = vcombine.low %v2420_v61, %v2424_v48 }
 0x316   : > { %13543 = vst [vmem:[#allocation63_spill] sm:$0xff] %v11390_v62  ;;  %13544 = vst [vmem:[#allocation64_spill] sm:$0xff] %v11392_v8 }
 0x317   : > { %3210 = vmatpush1.bf16.msra.mxu0 %v11368_v34  ;;  %3251 = vmatpush1.bf16.msra.mxu1 %v11370_v3  ;;  %v2431_v34 = vld [vmem:[%s10289_s29 + $0x2b0] sm:$0xff]  ;;  %v2432_v3 = vld [vmem:[%s10289_s29 + $0x2b8] sm:$0xff]  ;;  %13545 = vst [vmem:[#allocation65_spill] sm:$0xff] %v11400_v28  ;;  %13546 = vst [vmem:[#allocation66_spill] sm:$0xff] %v11402_v29 }
 0x318   : > { %3211 = vmatprep.subr.bf16.mxu0 %v11374_v47  ;;  %3252 = vmatprep.subr.bf16.mxu1 %v11376_v6  ;;  %v11406_v22 = vcombine.high %v2427_v31, %v2431_v34  ;;  %v11408_v11 = vcombine.high %v2428_v10, %v2432_v3  ;;  %v2435_v6 = vld [vmem:[%s10289_s29 + $0x2d0] sm:$0xff]  ;;  %v2436_v47 = vld [vmem:[%s10289_s29 + $0x2d8] sm:$0xff]  ;;  %v11416_v61 = vcombine.low %v2427_v31, %v2431_v34 }
 0x319   : > { %v11418_v27 = vcombine.low %v2428_v10, %v2432_v3 }
 0x31a   : > { %13547 = vst [vmem:[#allocation67_spill] sm:$0xff] %v11406_v22  ;;  %13548 = vst [vmem:[#allocation68_spill] sm:$0xff] %v11408_v11 }
 0x31b   : > { %3212 = vmatpush1.bf16.msra.mxu0 %v11384_v24  ;;  %3253 = vmatpush1.bf16.msra.mxu1 %v11386_v54  ;;  %v2439_v24 = vld [vmem:[%s10289_s29 + $0x2f0] sm:$0xff]  ;;  %v2440_v54 = vld [vmem:[%s10289_s29 + $0x2f8] sm:$0xff]  ;;  %13549 = vst [vmem:[#allocation69_spill] sm:$0xff] %v11416_v61  ;;  %13550 = vst [vmem:[#allocation70_spill] sm:$0xff] %v11418_v27 }
 0x31c   : > { %3213 = vmatprep.subr.bf16.mxu0 %v11390_v62  ;;  %3254 = vmatprep.subr.bf16.mxu1 %v11392_v8  ;;  %v11422_v43 = vcombine.high %v2435_v6, %v2439_v24  ;;  %v11424_v48 = vcombine.high %v2436_v47, %v2440_v54  ;;  %v2443_v8 = vld [vmem:[%s10289_s29 + $0x310] sm:$0xff]  ;;  %v2444_v62 = vld [vmem:[%s10289_s29 + $0x318] sm:$0xff]  ;;  %v11432_v10 = vcombine.low %v2435_v6, %v2439_v24 }
 0x31d   : > { %v11434_v31 = vcombine.low %v2436_v47, %v2440_v54 }
 0x31e   : > { %13551 = vst [vmem:[#allocation71_spill] sm:$0xff] %v11422_v43  ;;  %13552 = vst [vmem:[#allocation72_spill] sm:$0xff] %v11424_v48 }
 0x31f   : > { %3214 = vmatpush1.bf16.msra.mxu0 %v11400_v28  ;;  %3255 = vmatpush1.bf16.msra.mxu1 %v11402_v29  ;;  %v2447_v28 = vld [vmem:[%s10289_s29 + $0x330] sm:$0xff]  ;;  %v2448_v29 = vld [vmem:[%s10289_s29 + $0x338] sm:$0xff]  ;;  %13553 = vst [vmem:[#allocation73_spill] sm:$0xff] %v11432_v10  ;;  %13554 = vst [vmem:[#allocation74_spill] sm:$0xff] %v11434_v31 }
 0x320   : > { %3215 = vmatprep.subr.bf16.mxu0 %v11406_v22  ;;  %3256 = vmatprep.subr.bf16.mxu1 %v11408_v11  ;;  %v11438_v34 = vcombine.high %v2443_v8, %v2447_v28  ;;  %v11440_v3 = vcombine.high %v2444_v62, %v2448_v29  ;;  %v2451_v11 = vld [vmem:[%s10289_s29 + $0x350] sm:$0xff]  ;;  %v2452_v22 = vld [vmem:[%s10289_s29 + $0x358] sm:$0xff]  ;;  %v11448_v47 = vcombine.low %v2443_v8, %v2447_v28 }
 0x321   : > { %v11450_v6 = vcombine.low %v2444_v62, %v2448_v29 }
 0x322   : > { %13555 = vst [vmem:[#allocation75_spill] sm:$0xff] %v11438_v34  ;;  %13556 = vst [vmem:[#allocation76_spill] sm:$0xff] %v11440_v3 }
 0x323   : > { %3216 = vmatpush1.bf16.msra.mxu0 %v11416_v61  ;;  %3257 = vmatpush1.bf16.msra.mxu1 %v11418_v27  ;;  %v2455_v61 = vld [vmem:[%s10289_s29 + $0x370] sm:$0xff]  ;;  %v2456_v27 = vld [vmem:[%s10289_s29 + $0x378] sm:$0xff] }
 0x324   : > { %3217 = vmatprep.subr.bf16.mxu0 %v11422_v43  ;;  %3258 = vmatprep.subr.bf16.mxu1 %v11424_v48  ;;  %v11454_v24 = vcombine.high %v2451_v11, %v2455_v61  ;;  %v11456_v54 = vcombine.high %v2452_v22, %v2456_v27  ;;  %v2459_v48 = vld [vmem:[%s10289_s29 + $0x390] sm:$0xff]  ;;  %v2460_v43 = vld [vmem:[%s10289_s29 + $0x398] sm:$0xff]  ;;  %v11464_v62 = vcombine.low %v2451_v11, %v2455_v61 }
 0x325   : > { %v11466_v8 = vcombine.low %v2452_v22, %v2456_v27  ;;  %v11488_v27 = vcombine.high %v2468_v45, %v2472_v38 }
 0x326   : > { %13557 = vst [vmem:[#allocation77_spill] sm:$0xff] %v11456_v54  ;;  %13558 = vst [vmem:[#allocation78_spill] sm:$0xff] %v11464_v62 }
 0x327   : > { %3218 = vmatpush1.bf16.msra.mxu0 %v11432_v10  ;;  %3259 = vmatpush1.bf16.msra.mxu1 %v11434_v31  ;;  %v2463_v10 = vld [vmem:[%s10289_s29 + $0x3b0] sm:$0xff]  ;;  %v2464_v31 = vld [vmem:[%s10289_s29 + $0x3b8] sm:$0xff] }
 0x328   : > { %3219 = vmatprep.subr.bf16.mxu0 %v11438_v34  ;;  %3260 = vmatprep.subr.bf16.mxu1 %v11440_v3  ;;  %v11470_v28 = vcombine.high %v2459_v48, %v2463_v10  ;;  %v11472_v29 = vcombine.high %v2460_v43, %v2464_v31  ;;  %v2467_v3 = vld [vmem:[%s10289_s29 + $0x3d0] sm:$0xff]  ;;  %v11480_v11 = vcombine.low %v2459_v48, %v2463_v10  ;;  %v8901_v48 = vld [vmem:[%s8520_s21 + $0x98] sm:$0xff] }
 0x329   : > { %v2471_v34 = vld [vmem:[%s10289_s29 + $0x3f0] sm:$0xff]  ;;  %v11482_v22 = vcombine.low %v2460_v43, %v2464_v31 }
 0x32a   : > { %v11486_v61 = vcombine.high %v2467_v3, %v2471_v34 }
 0x32b   : > { %3220 = vmatpush1.bf16.msra.mxu0 %v11448_v47  ;;  %3261 = vmatpush1.bf16.msra.mxu1 %v11450_v6 }
 0x32c   : > { %3221 = vmatprep.subr.bf16.mxu0 %v11454_v24  ;;  %3262 = vmatprep.subr.bf16.mxu1 %v11456_v54  ;;  %v11492_v54 = vcombine.low %v2467_v3, %v2471_v34 }
 0x32f   : > { %3222 = vmatpush1.bf16.msra.mxu0 %v11464_v62  ;;  %3263 = vmatpush1.bf16.msra.mxu1 %v11466_v8  ;;  %v11494_v62 = vcombine.low %v2468_v45, %v2472_v38  ;;  %v8900_v38 = vld [vmem:[%s8520_s21 + $0x90] sm:$0xff]  ;;  %v8899_v45 = vld [vmem:[%s8520_s21 + $0x88] sm:$0xff] }
 0x330   : > { %3223 = vmatprep.subr.bf16.mxu0 %v11470_v28  ;;  %3264 = vmatprep.subr.bf16.mxu1 %v11472_v29 }
 0x333   : > { %3224 = vmatpush1.bf16.msra.mxu0 %v11480_v11  ;;  %3265 = vmatpush1.bf16.msra.mxu1 %v11482_v22 }
 0x334   : > { %3225 = vmatprep.subr.bf16.mxu0 %v11486_v61  ;;  %3266 = vmatprep.subr.bf16.mxu1 %v11488_v27 }
 0x337   : > { %3226 = vmatpush1.bf16.msra.mxu0 %v11492_v54  ;;  %3267 = vmatpush1.bf16.msra.mxu1 %v11494_v62 }
 0x338   : > { %4125 = vmatprep.subr.bf16.mxu0 %v10977_v32  ;;  %4166 = vmatprep.subr.bf16.mxu1 %v10984_v49  ;;  %v13560_v32 = vld [vmem:[#allocation4_spill] sm:$0xff]  ;;  %v13562_v49 = vld [vmem:[#allocation7_spill] sm:$0xff] }
 0x33a   : > { %3228 = vmatmul.mubr.bf16.vlgmr.msra.gmra.mrb[20].mxu0 %v11258_v23  ;;  %3269 = vmatmul.mubr.bf16.vlgmr.msra.gmra.mrb[20].mxu1 %v11258_v23  ;;  %v8898_v23 = vld [vmem:[%s8520_s21 + $0x80] sm:$0xff] }
 0x33b   : > { %4126 = vmatpush1.bf16.msra.mxu0 %v10975_v42  ;;  %4167 = vmatpush1.bf16.msra.mxu1 %v10982_v16  ;;  %v13559_v42 = vld [vmem:[#allocation6_spill] sm:$0xff]  ;;  %v13561_v16 = vld [vmem:[#allocation5_spill] sm:$0xff] }
 0x33c   : > { %4127 = vmatprep.subr.bf16.mxu0 %v10986_v1  ;;  %4168 = vmatprep.subr.bf16.mxu1 %v10992_v56  ;;  %v13563_v1 = vld [vmem:[#allocation10_spill] sm:$0xff]  ;;  %v13564_v56 = vld [vmem:[#allocation8_spill] sm:$0xff] }
 0x33f   : > { %4128 = vmatpush1.bf16.msra.mxu0 %v10999_v2  ;;  %4169 = vmatpush1.bf16.msra.mxu1 %v11003_v17  ;;  %v13565_v2 = vld [vmem:[#allocation9_spill] sm:$0xff]  ;;  %v13566_v17 = vld [vmem:[#allocation11_spill] sm:$0xff] }
 0x340   : > { %4129 = vmatprep.subr.bf16.mxu0 %v11005_v14  ;;  %4170 = vmatprep.subr.bf16.mxu1 %v11008_v4  ;;  %v13567_v14 = vld [vmem:[#allocation14_spill] sm:$0xff]  ;;  %v13568_v4 = vld [vmem:[#allocation12_spill] sm:$0xff] }
 0x343   : > { %4130 = vmatpush1.bf16.msra.mxu0 %v11015_v15  ;;  %4171 = vmatpush1.bf16.msra.mxu1 %v11019_v19  ;;  %v13569_v15 = vld [vmem:[#allocation13_spill] sm:$0xff]  ;;  %v13570_v19 = vld [vmem:[#allocation15_spill] sm:$0xff] }
 0x344   : > { %4131 = vmatprep.subr.bf16.mxu0 %v11021_v20  ;;  %4172 = vmatprep.subr.bf16.mxu1 %v11024_v21  ;;  %v13571_v20 = vld [vmem:[#allocation18_spill] sm:$0xff]  ;;  %v13572_v21 = vld [vmem:[#allocation16_spill] sm:$0xff] }
 0x347   : > { %4132 = vmatpush1.bf16.msra.mxu0 %v11031_v30  ;;  %4173 = vmatpush1.bf16.msra.mxu1 %v11035_v35  ;;  %v13573_v30 = vld [vmem:[#allocation17_spill] sm:$0xff]  ;;  %v13574_v35 = vld [vmem:[#allocation20_spill] sm:$0xff] }
 0x348   : > { %4133 = vmatprep.subr.bf16.mxu0 %v11037_v36  ;;  %4174 = vmatprep.subr.bf16.mxu1 %v11040_v37  ;;  %v13575_v36 = vld [vmem:[#allocation22_spill] sm:$0xff]  ;;  %v13576_v37 = vld [vmem:[#allocation19_spill] sm:$0xff] }
 0x34b   : > { %4134 = vmatpush1.bf16.msra.mxu0 %v11047_v46  ;;  %4175 = vmatpush1.bf16.msra.mxu1 %v11051_v51  ;;  %v13577_v46 = vld [vmem:[#allocation21_spill] sm:$0xff]  ;;  %v13578_v51 = vld [vmem:[#allocation23_spill] sm:$0xff] }
 0x34c   : > { %4135 = vmatprep.subr.bf16.mxu0 %v11053_v52  ;;  %4176 = vmatprep.subr.bf16.mxu1 %v11056_v53  ;;  %v13579_v52 = vld [vmem:[#allocation24_spill] sm:$0xff]  ;;  %v13580_v53 = vld [vmem:[#allocation25_spill] sm:$0xff] }
 0x34f   : > { %4136 = vmatpush1.bf16.msra.mxu0 %v11063_v5  ;;  %4177 = vmatpush1.bf16.msra.mxu1 %v11067_v7  ;;  %v13581_v5 = vld [vmem:[#allocation27_spill] sm:$0xff]  ;;  %v13582_v7 = vld [vmem:[#allocation26_spill] sm:$0xff] }
 0x350   : > { %4137 = vmatprep.subr.bf16.mxu0 %v11069_v12  ;;  %4178 = vmatprep.subr.bf16.mxu1 %v11072_v18  ;;  %v13583_v12 = vld [vmem:[#allocation28_spill] sm:$0xff]  ;;  %v13584_v18 = vld [vmem:[#allocation29_spill] sm:$0xff] }
 0x353   : > { %4138 = vmatpush1.bf16.msra.mxu0 %v11079_v39  ;;  %4179 = vmatpush1.bf16.msra.mxu1 %v11083_v40  ;;  %v13585_v39 = vld [vmem:[#allocation30_spill] sm:$0xff]  ;;  %v13586_v40 = vld [vmem:[#allocation31_spill] sm:$0xff] }
 0x354   : > { %4139 = vmatprep.subr.bf16.mxu0 %v11085_v41  ;;  %4180 = vmatprep.subr.bf16.mxu1 %v11088_v55  ;;  %v13587_v41 = vld [vmem:[#allocation32_spill] sm:$0xff] }
 0x357   : > { %4140 = vmatpush1.bf16.msra.mxu0 %v11091_v63  ;;  %4181 = vmatpush1.bf16.msra.mxu1 %v11095_v33 }
 0x358   : > { %4141 = vmatprep.subr.bf16.mxu0 %v11102_v26  ;;  %4182 = vmatprep.subr.bf16.mxu1 %v11111_v57 }
 0x35b   : > { %4142 = vmatpush1.bf16.msra.mxu0 %v11105_v0  ;;  %4183 = vmatpush1.bf16.msra.mxu1 %v11109_v50 }
 0x35c   : > { %4143 = vmatprep.subr.bf16.mxu0 %v11118_v9  ;;  %4184 = vmatprep.subr.bf16.mxu1 %v13559_v42 }
 0x35f   : > { %4144 = vmatpush1.bf16.msra.mxu0 %v13560_v32  ;;  %4185 = vmatpush1.bf16.msra.mxu1 %v13561_v16 }
 0x360   : > { %4145 = vmatprep.subr.bf16.mxu0 %v13562_v49  ;;  %4186 = vmatprep.subr.bf16.mxu1 %v13563_v1 }
 0x363   : > { %4146 = vmatpush1.bf16.msra.mxu0 %v13564_v56  ;;  %4187 = vmatpush1.bf16.msra.mxu1 %v13565_v2 }
 0x364   : > { %4147 = vmatprep.subr.bf16.mxu0 %v13566_v17  ;;  %4188 = vmatprep.subr.bf16.mxu1 %v13567_v14 }
 0x367   : > { %4148 = vmatpush1.bf16.msra.mxu0 %v13568_v4  ;;  %4189 = vmatpush1.bf16.msra.mxu1 %v13569_v15 }
 0x368   : > { %4149 = vmatprep.subr.bf16.mxu0 %v13570_v19  ;;  %4190 = vmatprep.subr.bf16.mxu1 %v13571_v20  ;;  %v8902_v19 = vld [vmem:[%s8520_s21 + $0xa0] sm:$0xff]  ;;  %v8904_v20 = vld [vmem:[%s8520_s21 + $0xb0] sm:$0xff] }
 0x36b   : > { %4150 = vmatpush1.bf16.msra.mxu0 %v13572_v21  ;;  %4191 = vmatpush1.bf16.msra.mxu1 %v13573_v30  ;;  %v8903_v21 = vld [vmem:[%s8520_s21 + $0xa8] sm:$0xff]  ;;  %v8905_v30 = vld [vmem:[%s8520_s21 + $0xb8] sm:$0xff]  ;;  %s8554_s21 = scalar_lea.vmem %s10879_s5, %s9620_s20 [#allocation2] }
 0x36c   : > { %4151 = vmatprep.subr.bf16.mxu0 %v13574_v35  ;;  %4192 = vmatprep.subr.bf16.mxu1 %v13575_v36 }
 0x36f   : > { %4152 = vmatpush1.bf16.msra.mxu0 %v13576_v37  ;;  %4193 = vmatpush1.bf16.msra.mxu1 %v13577_v46 }
 0x370   : > { %4153 = vmatprep.subr.bf16.mxu0 %v13578_v51  ;;  %4194 = vmatprep.subr.bf16.mxu1 %v13579_v52 }
 0x373   : > { %4154 = vmatpush1.bf16.msra.mxu0 %v13580_v53  ;;  %4195 = vmatpush1.bf16.msra.mxu1 %v13581_v5 }
 0x374   : > { %4155 = vmatprep.subr.bf16.mxu0 %v13582_v7  ;;  %4196 = vmatprep.subr.bf16.mxu1 %v13583_v12 }
 0x377   : > { %4156 = vmatpush1.bf16.msra.mxu0 %v13584_v18  ;;  %4197 = vmatpush1.bf16.msra.mxu1 %v13585_v39 }
 0x378   : > { %4207 = vmatprep.subr.bf16.mxu0 %v13586_v40  ;;  %4248 = vmatprep.subr.bf16.mxu1 %v13587_v41 }
 0x3cd   : > { %v3147_v55 = vpop.f32.mrb[16].mxu0  ;;  %v3188_v63 = vpop.f32.mrb[16].mxu1 }
 0x3ce   : > { %v3149_v33 = vpop.f32.mrb[17].mxu0  ;;  %v3190_v26 = vpop.f32.mrb[17].mxu1  ;;  %v3277_v43 = vadd.f32 %v8898_v23, %v3147_v55  ;;  %v3279_v10 = vadd.f32 %v8900_v38, %v3188_v63 }
 0x3cf   : > { %v3151_v0 = vpop.f32.mrb[18].mxu0  ;;  %v3192_v50 = vpop.f32.mrb[18].mxu1  ;;  %v3278_v31 = vadd.f32 %v8899_v45, %v3149_v33  ;;  %v3280_v34 = vadd.f32 %v8901_v48, %v3190_v26 }
 0x3d0   : > { %v3152_v57 = vpop.f32.mrb[19].mxu0  ;;  %v3193_v9 = vpop.f32.mrb[19].mxu1  ;;  %v9034_v3 = vmul.f32 -1.442695, %v3277_v43  ;;  %v9036_v42 = vmul.f32 -1.442695, %v3279_v10 }
 0x3d1   : > { %v9035_v32 = vmul.f32 -1.442695, %v3278_v31  ;;  %v9037_v16 = vmul.f32 -1.442695, %v3280_v34 }
 0x3d2   : > { %9875 = vpow2.f32 %v9034_v3 }
 0x3d3   : > { %9877 = vpow2.f32 %v9036_v42 }
 0x3d4   : > { %9879 = vpow2.f32 %v9035_v32 }
 0x3d5   : > { %9881 = vpow2.f32 %v9037_v16 }
 0x3dc   : > { %v9876_v49 = vpop.eup %9875 }
 0x3dd   : > { %v9878_v1 = vpop.eup %9877  ;;  %v3291_v17 = vadd.f32 1.0, %v9876_v49 }
 0x3de   : > { %v9880_v56 = vpop.eup %9879  ;;  %v3303_v14 = vadd.f32 1.0, %v9878_v1 }
 0x3df   : > { %v9882_v2 = vpop.eup %9881  ;;  %v3292_v4 = vadd.f32 1.0, %v9880_v56  ;;  %9883 = vrcp.f32 %v3291_v17  ;;  %v13589_v17 = vld [vmem:[#allocation34_spill] sm:$0xff] }
 0x3e0   : > { %v3304_v15 = vadd.f32 1.0, %v9882_v2  ;;  %9885 = vrcp.f32 %v3303_v14  ;;  %v13588_v2 = vld [vmem:[#allocation33_spill] sm:$0xff]  ;;  %v13590_v14 = vld [vmem:[#allocation35_spill] sm:$0xff] }
 0x3e1   : > { %9887 = vrcp.f32 %v3292_v4  ;;  %v13591_v4 = vld [vmem:[#allocation36_spill] sm:$0xff] }
 0x3e2   : > { %9889 = vrcp.f32 %v3304_v15  ;;  %v13592_v15 = vld [vmem:[#allocation37_spill] sm:$0xff] }
 0x3e9   : > { %v9884_v55 = vpop.eup %9883 }
 0x3ea   : > { %v9886_v63 = vpop.eup %9885 }
 0x3eb   : > { %v9888_v33 = vpop.eup %9887  ;;  %v3323_v57 = vmul.f32 %v9886_v63, %v11246_v59  ;;  %v13616_v63 = vld [vmem:[#allocation61_spill] sm:$0xff] }
 0x3ec   : > { %v9890_v26 = vpop.eup %9889 }
 0x3ed   : > { %v3324_v38 = vmul.f32 %v9890_v26, %v11248_v25  ;;  %v13618_v26 = vld [vmem:[#allocation63_spill] sm:$0xff] }
 0x40d   : > { %v3229_v35 = vpop.f32.mrb[20].mxu0  ;;  %v3270_v36 = vpop.f32.mrb[20].mxu1 }
 0x40e   : > { %v3281_v37 = vadd.f32 %v8902_v19, %v3229_v35  ;;  %v3283_v46 = vadd.f32 %v8904_v20, %v3270_v36  ;;  %v3231_v51 = vpop.f32.mrb[21].mxu0  ;;  %v3272_v52 = vpop.f32.mrb[21].mxu1  ;;  %v13593_v19 = vld [vmem:[#allocation38_spill] sm:$0xff]  ;;  %v13596_v20 = vld [vmem:[#allocation41_spill] sm:$0xff]  ;;  %v13602_v36 = vld [vmem:[#allocation47_spill] sm:$0xff] }
 0x40f   : > { %v3282_v53 = vadd.f32 %v8903_v21, %v3231_v51  ;;  %v3284_v5 = vadd.f32 %v8905_v30, %v3272_v52  ;;  %v3233_v7 = vpop.f32.mrb[22].mxu0  ;;  %v3274_v12 = vpop.f32.mrb[22].mxu1  ;;  %v13599_v21 = vld [vmem:[#allocation44_spill] sm:$0xff]  ;;  %v13600_v30 = vld [vmem:[#allocation45_spill] sm:$0xff]  ;;  %v13601_v35 = vld [vmem:[#allocation46_spill] sm:$0xff] }
 0x410   : > { %9891 = vtanh.f32 %v3281_v37  ;;  %v9038_v18 = vmul.f32 -1.442695, %v3283_v46  ;;  %v3234_v39 = vpop.f32.mrb[23].mxu0  ;;  %v3275_v40 = vpop.f32.mrb[23].mxu1  ;;  %v13603_v37 = vld [vmem:[#allocation48_spill] sm:$0xff]  ;;  %v13604_v46 = vld [vmem:[#allocation49_spill] sm:$0xff] }
 0x411   : > { %9893 = vtanh.f32 %v3282_v53  ;;  %v9039_v41 = vmul.f32 -1.442695, %v3284_v5  ;;  %v13605_v51 = vld [vmem:[#allocation50_spill] sm:$0xff]  ;;  %v13606_v52 = vld [vmem:[#allocation51_spill] sm:$0xff]  ;;  %v13607_v53 = vld [vmem:[#allocation52_spill] sm:$0xff] }
 0x412   : > { %9895 = vpow2.f32 %v9038_v18  ;;  %v13608_v5 = vld [vmem:[#allocation53_spill] sm:$0xff]  ;;  %v13609_v7 = vld [vmem:[#allocation54_spill] sm:$0xff]  ;;  %v13610_v12 = vld [vmem:[#allocation55_spill] sm:$0xff] }
 0x413   : > { %9897 = vpow2.f32 %v9039_v41  ;;  %v13611_v18 = vld [vmem:[#allocation56_spill] sm:$0xff]  ;;  %v13612_v39 = vld [vmem:[#allocation57_spill] sm:$0xff]  ;;  %v13613_v40 = vld [vmem:[#allocation58_spill] sm:$0xff] }
 0x414   : > { %v13614_v41 = vld [vmem:[#allocation59_spill] sm:$0xff] }
 0x41a   : > { %v9892_v0 = vpop.eup %9891 }
 0x41b   : > { %v9894_v50 = vpop.eup %9893  ;;  %v3325_v9 = vmul.f32 %v9892_v0, %v9884_v55  ;;  %v13615_v55 = vld [vmem:[#allocation60_spill] sm:$0xff] }
 0x41c   : > { %v9896_v23 = vpop.eup %9895  ;;  %v3326_v45 = vmul.f32 %v9894_v50, %v9888_v33  ;;  %v13617_v33 = vld [vmem:[#allocation62_spill] sm:$0xff]  ;;  %v13619_v0 = vld [vmem:[#allocation64_spill] sm:$0xff]  ;;  %v13620_v50 = vld [vmem:[#allocation65_spill] sm:$0xff] }
 0x41d   : > { %v9898_v43 = vpop.eup %9897  ;;  %v11572_v48 = vadd.f32 %v3325_v9, %v3323_v57  ;;  %v3317_v10 = vadd.f32 1.0, %v9896_v23  ;;  %v13621_v57 = vld [vmem:[#allocation66_spill] sm:$0xff]  ;;  %v13622_v9 = vld [vmem:[#allocation67_spill] sm:$0xff]  ;;  %v13623_v23 = vld [vmem:[#allocation68_spill] sm:$0xff] }
 0x41e   : > { %v11574_v31 = vadd.f32 %v3326_v45, %v3324_v38  ;;  %v3318_v34 = vadd.f32 1.0, %v9898_v43  ;;  %v13624_v38 = vld [vmem:[#allocation69_spill] sm:$0xff]  ;;  %v13625_v45 = vld [vmem:[#allocation70_spill] sm:$0xff]  ;;  %v13626_v43 = vld [vmem:[#allocation71_spill] sm:$0xff] }
 0x41f   : > { %9899 = vtanh.f32 %v11572_v48 }
 0x420   : > { %9901 = vrcp.f32 %v3317_v10  ;;  %v13627_v10 = vld [vmem:[#allocation72_spill] sm:$0xff] }
 0x421   : > { %9903 = vtanh.f32 %v11574_v31 }
 0x422   : > { %9905 = vrcp.f32 %v3318_v34  ;;  %v13628_v34 = vld [vmem:[#allocation73_spill] sm:$0xff] }
 0x429   : > { %v9900_v59 = vpop.eup %9899 }
 0x42a   : > { %v9902_v3 = vpop.eup %9901 }
 0x42b   : > { %v9904_v42 = vpop.eup %9903  ;;  %v3331_v25 = vmul.f32 %v9902_v3, %v9900_v59  ;;  %v13629_v59 = vld [vmem:[#allocation74_spill] sm:$0xff]  ;;  %v13630_v3 = vld [vmem:[#allocation75_spill] sm:$0xff] }
 0x42c   : > { %v9906_v32 = vpop.eup %9905 }
 0x42d   : > { %v3332_v16 = vmul.f32 %v9906_v32, %v9904_v42  ;;  %v11580_v56 = vpack.c.bf16 %v3331_v25, %v3331_v25  ;;  %v13631_v42 = vld [vmem:[#allocation76_spill] sm:$0xff]  ;;  %v13633_v32 = vld [vmem:[#allocation78_spill] sm:$0xff] }
 0x42f   : > { %v3334_v49 = vpack.c.bf16 %v3332_v16, %v3332_v16  ;;  %v9777_v1 = vpack.c.bf16 %v3332_v16, %v3331_v25  ;;  %v13632_v25 = vld [vmem:[#allocation77_spill] sm:$0xff] }
 0x430   : > { %v4382_v16 = vld [vmem:[%s10289_s29 + $0x68] sm:$0xff] }
 0x431   : > { %4157 = vmatprep.mubr.bf16.mxu0 %v3334_v49  ;;  %4198 = vmatprep.mubr.bf16.mxu1 %v3334_v49  ;;  %9042 = vst [vmem:[%s8524_s23 + $0x10] sm:$0xff] %v9777_v1 }
 0x432   : > { %4158 = vmatmul.mubr.bf16.vlgmr.msra.gmra.mrb[24].mxu0 %v11580_v56  ;;  %4199 = vmatmul.mubr.bf16.vlgmr.msra.gmra.mrb[24].mxu1 %v11580_v56 }
 0x433   : > { %4208 = vmatpush1.bf16.msra.mxu0 %v11234_v13  ;;  %4249 = vmatpush1.bf16.msra.mxu1 %v11236_v44  ;;  %v13594_v13 = vld [vmem:[#allocation39_spill] sm:$0xff]  ;;  %v13595_v44 = vld [vmem:[#allocation40_spill] sm:$0xff] }
 0x434   : > { %4239 = vmatprep.mubr.bf16.mxu0 %v3334_v49  ;;  %4280 = vmatprep.mubr.bf16.mxu1 %v3334_v49  ;;  %v4385_v49 = vld [vmem:[%s10289_s29 + $0x80] sm:$0xff] }
 0x435   : > { %4209 = vmatprep.subr.bf16.mxu0 %v11261_v58  ;;  %4250 = vmatprep.subr.bf16.mxu1 %v11263_v60  ;;  %v13597_v58 = vld [vmem:[#allocation42_spill] sm:$0xff]  ;;  %v13598_v60 = vld [vmem:[#allocation43_spill] sm:$0xff] }
 0x437   : > { %4210 = vmatpush1.bf16.msra.mxu0 %v13588_v2  ;;  %4251 = vmatpush1.bf16.msra.mxu1 %v13589_v17  ;;  %v4386_v2 = vld [vmem:[%s10289_s29 + $0x88] sm:$0xff] }
 0x438   : > { %4211 = vmatprep.subr.bf16.mxu0 %v13590_v14  ;;  %4252 = vmatprep.subr.bf16.mxu1 %v13591_v4  ;;  %v4390_v17 = vld [vmem:[%s10289_s29 + $0xa8] sm:$0xff] }
 0x43b   : > { %4212 = vmatpush1.bf16.msra.mxu0 %v13592_v15  ;;  %4253 = vmatpush1.bf16.msra.mxu1 %v13593_v19  ;;  %v11684_v19 = vcombine.high %v4386_v2, %v4390_v17 }
 0x43c   : > { %4213 = vmatprep.subr.bf16.mxu0 %v13594_v13  ;;  %4254 = vmatprep.subr.bf16.mxu1 %v13595_v44  ;;  %v4393_v13 = vld [vmem:[%s10289_s29 + $0xc0] sm:$0xff] }
 0x43d   : > { %v4397_v44 = vld [vmem:[%s10289_s29 + $0xe0] sm:$0xff] }
 0x43f   : > { %4214 = vmatpush1.bf16.msra.mxu0 %v13596_v20  ;;  %4255 = vmatpush1.bf16.msra.mxu1 %v13597_v58  ;;  %v4394_v20 = vld [vmem:[%s10289_s29 + $0xc8] sm:$0xff] }
 0x440   : > { %4215 = vmatprep.subr.bf16.mxu0 %v13598_v60  ;;  %4256 = vmatprep.subr.bf16.mxu1 %v13599_v21  ;;  %v4398_v58 = vld [vmem:[%s10289_s29 + $0xe8] sm:$0xff]  ;;  %v11695_v21 = vcombine.low %v4386_v2, %v4390_v17  ;;  %v4441_v2 = vld [vmem:[%s10289_s29 + $0x240] sm:$0xff] }
 0x441   : > { %v4445_v17 = vld [vmem:[%s10289_s29 + $0x260] sm:$0xff] }
 0x443   : > { %4216 = vmatpush1.bf16.msra.mxu0 %v13600_v30  ;;  %4257 = vmatpush1.bf16.msra.mxu1 %v13601_v35  ;;  %v11697_v30 = vcombine.high %v4393_v13, %v4397_v44  ;;  %v11700_v35 = vcombine.high %v4394_v20, %v4398_v58 }
 0x444   : > { %4217 = vmatprep.subr.bf16.mxu0 %v13602_v36  ;;  %4258 = vmatprep.subr.bf16.mxu1 %v13603_v37  ;;  %v4401_v36 = vld [vmem:[%s10289_s29 + $0x100] sm:$0xff] }
 0x445   : > { %v4405_v37 = vld [vmem:[%s10289_s29 + $0x120] sm:$0xff] }
 0x447   : > { %4218 = vmatpush1.bf16.msra.mxu0 %v13604_v46  ;;  %4259 = vmatpush1.bf16.msra.mxu1 %v13605_v51  ;;  %v4402_v46 = vld [vmem:[%s10289_s29 + $0x108] sm:$0xff] }
 0x448   : > { %4219 = vmatprep.subr.bf16.mxu0 %v13606_v52  ;;  %4260 = vmatprep.subr.bf16.mxu1 %v13607_v53  ;;  %v4406_v51 = vld [vmem:[%s10289_s29 + $0x128] sm:$0xff]  ;;  %v11707_v52 = vcombine.low %v4393_v13, %v4397_v44  ;;  %v11711_v53 = vcombine.low %v4394_v20, %v4398_v58  ;;  %v11794_v44 = vcombine.high %v4441_v2, %v4445_v17 }
 0x449   : > { %v4442_v13 = vld [vmem:[%s10289_s29 + $0x248] sm:$0xff]  ;;  %v11798_v58 = vcombine.low %v4441_v2, %v4445_v17 }
 0x44a   : > { %v4446_v20 = vld [vmem:[%s10289_s29 + $0x268] sm:$0xff] }
 0x44b   : > { %4220 = vmatpush1.bf16.msra.mxu0 %v13608_v5  ;;  %4261 = vmatpush1.bf16.msra.mxu1 %v13609_v7  ;;  %v11713_v5 = vcombine.high %v4401_v36, %v4405_v37  ;;  %v11716_v7 = vcombine.high %v4402_v46, %v4406_v51  ;;  %13634 = vst [vmem:[#allocation6_spill] sm:$0xff] %v11798_v58  ;;  %v4466_v2 = vld [vmem:[%s10289_s29 + $0x308] sm:$0xff] }
 0x44c   : > { %4221 = vmatprep.subr.bf16.mxu0 %v13610_v12  ;;  %4262 = vmatprep.subr.bf16.mxu1 %v13611_v18  ;;  %v4409_v12 = vld [vmem:[%s10289_s29 + $0x140] sm:$0xff] }
 0x44d   : > { %v4413_v18 = vld [vmem:[%s10289_s29 + $0x160] sm:$0xff] }
 0x44f   : > { %4222 = vmatpush1.bf16.msra.mxu0 %v13612_v39  ;;  %4263 = vmatpush1.bf16.msra.mxu1 %v13613_v40  ;;  %v4410_v39 = vld [vmem:[%s10289_s29 + $0x148] sm:$0xff] }
 0x450   : > { %4223 = vmatprep.subr.bf16.mxu0 %v13614_v41  ;;  %4264 = vmatprep.subr.bf16.mxu1 %v13615_v55  ;;  %v4414_v40 = vld [vmem:[%s10289_s29 + $0x168] sm:$0xff]  ;;  %v11723_v41 = vcombine.low %v4401_v36, %v4405_v37  ;;  %v11727_v55 = vcombine.low %v4402_v46, %v4406_v51  ;;  %v11800_v36 = vcombine.low %v4442_v13, %v4446_v20  ;;  %v4449_v46 = vld [vmem:[%s10289_s29 + $0x280] sm:$0xff] }
 0x451   : > { %v11802_v37 = vcombine.high %v4442_v13, %v4446_v20  ;;  %v4453_v51 = vld [vmem:[%s10289_s29 + $0x2a0] sm:$0xff]  ;;  %v4470_v13 = vld [vmem:[%s10289_s29 + $0x328] sm:$0xff] }
 0x452   : > { %13635 = vst [vmem:[#allocation4_spill] sm:$0xff] %v11800_v36 }
 0x453   : > { %4224 = vmatpush1.bf16.msra.mxu0 %v13616_v63  ;;  %4265 = vmatpush1.bf16.msra.mxu1 %v13617_v33  ;;  %v11729_v63 = vcombine.high %v4409_v12, %v4413_v18  ;;  %v11732_v33 = vcombine.high %v4410_v39, %v4414_v40  ;;  %13636 = vst [vmem:[#allocation5_spill] sm:$0xff] %v11802_v37 }
 0x454   : > { %4225 = vmatprep.subr.bf16.mxu0 %v13618_v26  ;;  %4266 = vmatprep.subr.bf16.mxu1 %v13619_v0  ;;  %v4417_v26 = vld [vmem:[%s10289_s29 + $0x180] sm:$0xff] }
 0x455   : > { %v4421_v0 = vld [vmem:[%s10289_s29 + $0x1a0] sm:$0xff] }
 0x457   : > { %4226 = vmatpush1.bf16.msra.mxu0 %v13620_v50  ;;  %4267 = vmatpush1.bf16.msra.mxu1 %v13621_v57  ;;  %v4418_v50 = vld [vmem:[%s10289_s29 + $0x188] sm:$0xff] }
 0x458   : > { %4227 = vmatprep.subr.bf16.mxu0 %v13622_v9  ;;  %4268 = vmatprep.subr.bf16.mxu1 %v13623_v23  ;;  %v4422_v57 = vld [vmem:[%s10289_s29 + $0x1a8] sm:$0xff]  ;;  %v11739_v9 = vcombine.low %v4409_v12, %v4413_v18  ;;  %v11743_v23 = vcombine.low %v4410_v39, %v4414_v40  ;;  %v11810_v18 = vcombine.high %v4449_v46, %v4453_v51 }
 0x459   : > { %v4450_v12 = vld [vmem:[%s10289_s29 + $0x288] sm:$0xff]  ;;  %v11814_v40 = vcombine.low %v4449_v46, %v4453_v51  ;;  %v11848_v46 = vcombine.low %v4466_v2, %v4470_v13  ;;  %v11850_v51 = vcombine.high %v4466_v2, %v4470_v13 }
 0x45a   : > { %13637 = vst [vmem:[#allocation7_spill] sm:$0xff] %v11810_v18  ;;  %v4454_v39 = vld [vmem:[%s10289_s29 + $0x2a8] sm:$0xff] }
 0x45b   : > { %4228 = vmatpush1.bf16.msra.mxu0 %v13624_v38  ;;  %4269 = vmatpush1.bf16.msra.mxu1 %v13625_v45  ;;  %v11745_v38 = vcombine.high %v4417_v26, %v4421_v0  ;;  %v11748_v45 = vcombine.high %v4418_v50, %v4422_v57  ;;  %13638 = vst [vmem:[#allocation10_spill] sm:$0xff] %v11814_v40  ;;  %13647 = vst [vmem:[#allocation16_spill] sm:$0xff] %v11848_v46 }
 0x45c   : > { %4229 = vmatprep.subr.bf16.mxu0 %v13626_v43  ;;  %4270 = vmatprep.subr.bf16.mxu1 %v13627_v10  ;;  %v4425_v43 = vld [vmem:[%s10289_s29 + $0x1c0] sm:$0xff]  ;;  %13648 = vst [vmem:[#allocation17_spill] sm:$0xff] %v11850_v51 }
 0x45d   : > { %v4429_v10 = vld [vmem:[%s10289_s29 + $0x1e0] sm:$0xff] }
 0x45f   : > { %4230 = vmatpush1.bf16.msra.mxu0 %v13628_v34  ;;  %4271 = vmatpush1.bf16.msra.mxu1 %v13629_v59  ;;  %v4426_v34 = vld [vmem:[%s10289_s29 + $0x1c8] sm:$0xff] }
 0x460   : > { %4231 = vmatprep.subr.bf16.mxu0 %v13630_v3  ;;  %4272 = vmatprep.subr.bf16.mxu1 %v13631_v42  ;;  %v4430_v59 = vld [vmem:[%s10289_s29 + $0x1e8] sm:$0xff]  ;;  %v11755_v3 = vcombine.low %v4417_v26, %v4421_v0  ;;  %v11759_v42 = vcombine.low %v4418_v50, %v4422_v57  ;;  %v11816_v26 = vcombine.low %v4450_v12, %v4454_v39  ;;  %v4457_v50 = vld [vmem:[%s10289_s29 + $0x2c0] sm:$0xff] }
 0x461   : > { %v11818_v0 = vcombine.high %v4450_v12, %v4454_v39  ;;  %v4461_v57 = vld [vmem:[%s10289_s29 + $0x2e0] sm:$0xff] }
 0x462   : > { %13639 = vst [vmem:[#allocation8_spill] sm:$0xff] %v11816_v26  ;;  %v4473_v12 = vld [vmem:[%s10289_s29 + $0x340] sm:$0xff] }
 0x463   : > { %4232 = vmatpush1.bf16.msra.mxu0 %v11448_v47  ;;  %4273 = vmatpush1.bf16.msra.mxu1 %v11450_v6  ;;  %v4369_v47 = vld [vmem:[%s10289_s29] sm:$0xff]  ;;  %13640 = vst [vmem:[#allocation9_spill] sm:$0xff] %v11818_v0 }
 0x464   : > { %4233 = vmatprep.subr.bf16.mxu0 %v11454_v24  ;;  %4274 = vmatprep.subr.bf16.mxu1 %v13632_v25  ;;  %v4373_v6 = vld [vmem:[%s10289_s29 + $0x20] sm:$0xff]  ;;  %v4370_v24 = vld [vmem:[%s10289_s29 + $0x8] sm:$0xff]  ;;  %v11761_v25 = vcombine.high %v4425_v43, %v4429_v10 }
 0x465   : > { %v4477_v39 = vld [vmem:[%s10289_s29 + $0x360] sm:$0xff] }
 0x467   : > { %4234 = vmatpush1.bf16.msra.mxu0 %v13633_v32  ;;  %4275 = vmatpush1.bf16.msra.mxu1 %v11466_v8  ;;  %v11651_v8 = vcombine.low %v4369_v47, %v4373_v6  ;;  %v11764_v32 = vcombine.high %v4426_v34, %v4430_v59 }
 0x468   : > { %4235 = vmatprep.subr.bf16.mxu0 %v11470_v28  ;;  %4276 = vmatprep.subr.bf16.mxu1 %v11472_v29  ;;  %v11653_v28 = vcombine.high %v4369_v47, %v4373_v6  ;;  %v4374_v29 = vld [vmem:[%s10289_s29 + $0x28] sm:$0xff]  ;;  %v11767_v47 = vcombine.low %v4425_v43, %v4429_v10  ;;  %v11771_v6 = vcombine.low %v4426_v34, %v4430_v59 }
 0x469   : > { %v4458_v43 = vld [vmem:[%s10289_s29 + $0x2c8] sm:$0xff]  ;;  %v11826_v10 = vcombine.high %v4457_v50, %v4461_v57  ;;  %v11830_v59 = vcombine.low %v4457_v50, %v4461_v57  ;;  %v11858_v57 = vcombine.low %v4473_v12, %v4477_v39 }
 0x46a   : > { %v4462_v34 = vld [vmem:[%s10289_s29 + $0x2e8] sm:$0xff] }
 0x46b   : > { %4236 = vmatpush1.bf16.msra.mxu0 %v11480_v11  ;;  %4277 = vmatpush1.bf16.msra.mxu1 %v11482_v22  ;;  %v4381_v11 = vld [vmem:[%s10289_s29 + $0x60] sm:$0xff]  ;;  %v11658_v22 = vcombine.low %v4370_v24, %v4374_v29  ;;  %13641 = vst [vmem:[#allocation11_spill] sm:$0xff] %v11826_v10  ;;  %13642 = vst [vmem:[#allocation14_spill] sm:$0xff] %v11830_v59  ;;  %v4474_v50 = vld [vmem:[%s10289_s29 + $0x348] sm:$0xff] }
 0x46c   : > { %4237 = vmatprep.subr.bf16.mxu0 %v11486_v61  ;;  %4278 = vmatprep.subr.bf16.mxu1 %v11488_v27  ;;  %v4378_v27 = vld [vmem:[%s10289_s29 + $0x48] sm:$0xff]  ;;  %13649 = vst [vmem:[#allocation20_spill] sm:$0xff] %v11858_v57 }
 0x46d   : > { %v11668_v1 = vcombine.high %v4378_v27, %v4382_v16  ;;  %v11679_v4 = vcombine.low %v4378_v27, %v4382_v16  ;;  %v4438_v16 = vld [vmem:[%s10289_s29 + $0x228] sm:$0xff] }
 0x46f   : > { %4238 = vmatpush1.bf16.msra.mxu0 %v11492_v54  ;;  %4279 = vmatpush1.bf16.msra.mxu1 %v11494_v62  ;;  %v4377_v54 = vld [vmem:[%s10289_s29 + $0x40] sm:$0xff]  ;;  %v11660_v62 = vcombine.high %v4370_v24, %v4374_v29 }
 0x470   : > { %v11662_v61 = vcombine.high %v4377_v54, %v4381_v11  ;;  %5137 = vmatprep.subr.bf16.mxu0 %v11653_v28  ;;  %v11675_v14 = vcombine.low %v4377_v54, %v4381_v11  ;;  %v4433_v24 = vld [vmem:[%s10289_s29 + $0x200] sm:$0xff]  ;;  %v4434_v11 = vld [vmem:[%s10289_s29 + $0x208] sm:$0xff] }
 0x471   : > { %5178 = vmatprep.subr.bf16.mxu1 %v11660_v62  ;;  %v4437_v29 = vld [vmem:[%s10289_s29 + $0x220] sm:$0xff] }
 0x472   : > { %4240 = vmatmul.mubr.bf16.vlgmr.msra.gmra.mrb[28].mxu0 %v11580_v56  ;;  %4281 = vmatmul.mubr.bf16.vlgmr.msra.gmra.mrb[28].mxu1 %v11580_v56  ;;  %v4389_v56 = vld [vmem:[%s10289_s29 + $0xa0] sm:$0xff]  ;;  %v11778_v54 = vcombine.high %v4433_v24, %v4437_v29  ;;  %v11781_v27 = vcombine.low %v4433_v24, %v4437_v29  ;;  %v11832_v24 = vcombine.low %v4458_v43, %v4462_v34 }
 0x473   : > { %5138 = vmatpush1.bf16.msra.mxu0 %v11651_v8  ;;  %5179 = vmatpush1.bf16.msra.mxu1 %v11658_v22  ;;  %v11681_v15 = vcombine.high %v4385_v49, %v4389_v56  ;;  %v11691_v60 = vcombine.low %v4385_v49, %v4389_v56  ;;  %v11785_v49 = vcombine.low %v4434_v11, %v4438_v16 }
 0x474   : > { %5139 = vmatprep.subr.bf16.mxu0 %v11662_v61  ;;  %5180 = vmatprep.subr.bf16.mxu1 %v11668_v1  ;;  %v11787_v56 = vcombine.high %v4434_v11, %v4438_v16  ;;  %13643 = vst [vmem:[#allocation12_spill] sm:$0xff] %v11832_v24  ;;  %v11834_v29 = vcombine.high %v4458_v43, %v4462_v34  ;;  %v4465_v11 = vld [vmem:[%s10289_s29 + $0x300] sm:$0xff]  ;;  %v4478_v34 = vld [vmem:[%s10289_s29 + $0x368] sm:$0xff] }
 0x475   : > { %v4469_v16 = vld [vmem:[%s10289_s29 + $0x320] sm:$0xff]  ;;  %v11860_v43 = vcombine.high %v4473_v12, %v4477_v39  ;;  %v11866_v2 = vcombine.low %v4474_v50, %v4478_v34  ;;  %v11868_v13 = vcombine.high %v4474_v50, %v4478_v34  ;;  %v4494_v50 = vld [vmem:[%s10289_s29 + $0x3e8] sm:$0xff] }
 0x476   : > { %13644 = vst [vmem:[#allocation13_spill] sm:$0xff] %v11834_v29  ;;  %v11842_v17 = vcombine.high %v4465_v11, %v4469_v16  ;;  %v11846_v20 = vcombine.low %v4465_v11, %v4469_v16  ;;  %v4481_v11 = vld [vmem:[%s10289_s29 + $0x380] sm:$0xff] }
 0x477   : > { %5140 = vmatpush1.bf16.msra.mxu0 %v11675_v14  ;;  %5181 = vmatpush1.bf16.msra.mxu1 %v11679_v4  ;;  %13650 = vst [vmem:[#allocation22_spill] sm:$0xff] %v11860_v43  ;;  %v4485_v16 = vld [vmem:[%s10289_s29 + $0x3a0] sm:$0xff]  ;;  %13651 = vst [vmem:[#allocation19_spill] sm:$0xff] %v11866_v2 }
 0x478   : > { %5141 = vmatprep.subr.bf16.mxu0 %v11681_v15  ;;  %5182 = vmatprep.subr.bf16.mxu1 %v11684_v19  ;;  %13645 = vst [vmem:[#allocation15_spill] sm:$0xff] %v11842_v17  ;;  %13646 = vst [vmem:[#allocation18_spill] sm:$0xff] %v11846_v20  ;;  %v4493_v39 = vld [vmem:[%s10289_s29 + $0x3e0] sm:$0xff] }
 0x479   : > { %13652 = vst [vmem:[#allocation21_spill] sm:$0xff] %v11868_v13 }
 0x47b   : > { %5142 = vmatpush1.bf16.msra.mxu0 %v11691_v60  ;;  %5183 = vmatpush1.bf16.msra.mxu1 %v11695_v21 }
 0x47c   : > { %5143 = vmatprep.subr.bf16.mxu0 %v11697_v30  ;;  %5184 = vmatprep.subr.bf16.mxu1 %v11700_v35 }
 0x47f   : > { %5144 = vmatpush1.bf16.msra.mxu0 %v11707_v52  ;;  %5185 = vmatpush1.bf16.msra.mxu1 %v11711_v53 }
 0x480   : > { %5145 = vmatprep.subr.bf16.mxu0 %v11713_v5  ;;  %5186 = vmatprep.subr.bf16.mxu1 %v11716_v7 }
 0x483   : > { %5146 = vmatpush1.bf16.msra.mxu0 %v11723_v41  ;;  %5187 = vmatpush1.bf16.msra.mxu1 %v11727_v55 }
 0x484   : > { %5147 = vmatprep.subr.bf16.mxu0 %v11729_v63  ;;  %5188 = vmatprep.subr.bf16.mxu1 %v11732_v33 }
 0x487   : > { %5148 = vmatpush1.bf16.msra.mxu0 %v11739_v9  ;;  %5189 = vmatpush1.bf16.msra.mxu1 %v11743_v23 }
 0x488   : > { %5149 = vmatprep.subr.bf16.mxu0 %v11745_v38  ;;  %5190 = vmatprep.subr.bf16.mxu1 %v11748_v45 }
 0x48b   : > { %5150 = vmatpush1.bf16.msra.mxu0 %v11755_v3  ;;  %5191 = vmatpush1.bf16.msra.mxu1 %v11759_v42 }
 0x48c   : > { %5151 = vmatprep.subr.bf16.mxu0 %v11761_v25  ;;  %5192 = vmatprep.subr.bf16.mxu1 %v11764_v32 }
 0x48f   : > { %5152 = vmatpush1.bf16.msra.mxu0 %v11767_v47  ;;  %5193 = vmatpush1.bf16.msra.mxu1 %v11771_v6 }
 0x490   : > { %5153 = vmatprep.subr.bf16.mxu0 %v11778_v54  ;;  %5194 = vmatprep.subr.bf16.mxu1 %v11787_v56 }
 0x493   : > { %5154 = vmatpush1.bf16.msra.mxu0 %v11781_v27  ;;  %5195 = vmatpush1.bf16.msra.mxu1 %v11785_v49 }
 0x494   : > { %5155 = vmatprep.subr.bf16.mxu0 %v11794_v44  ;;  %5196 = vmatprep.subr.bf16.mxu1 %v11802_v37 }
 0x497   : > { %5156 = vmatpush1.bf16.msra.mxu0 %v11798_v58  ;;  %5197 = vmatpush1.bf16.msra.mxu1 %v11800_v36 }
 0x498   : > { %5157 = vmatprep.subr.bf16.mxu0 %v11810_v18  ;;  %5198 = vmatprep.subr.bf16.mxu1 %v11818_v0 }
 0x49b   : > { %5158 = vmatpush1.bf16.msra.mxu0 %v11814_v40  ;;  %5199 = vmatpush1.bf16.msra.mxu1 %v11816_v26 }
 0x49c   : > { %5159 = vmatprep.subr.bf16.mxu0 %v11826_v10  ;;  %5200 = vmatprep.subr.bf16.mxu1 %v11834_v29 }
 0x49f   : > { %5160 = vmatpush1.bf16.msra.mxu0 %v11830_v59  ;;  %5201 = vmatpush1.bf16.msra.mxu1 %v11832_v24  ;;  %v4489_v24 = vld [vmem:[%s10289_s29 + $0x3c0] sm:$0xff]  ;;  %v11881_v59 = vcombine.low %v4481_v11, %v4485_v16 }
 0x4a0   : > { %5161 = vmatprep.subr.bf16.mxu0 %v11842_v17  ;;  %5202 = vmatprep.subr.bf16.mxu1 %v11850_v51  ;;  %v4482_v51 = vld [vmem:[%s10289_s29 + $0x388] sm:$0xff]  ;;  %v11886_v34 = vcombine.high %v4489_v24, %v4493_v39 }
 0x4a1   : > { %v4486_v17 = vld [vmem:[%s10289_s29 + $0x3a8] sm:$0xff]  ;;  %13655 = vst [vmem:[#allocation25_spill] sm:$0xff] %v11881_v59 }
 0x4a2   : > { %v11876_v12 = vcombine.high %v4482_v51, %v4486_v17  ;;  %13656 = vst [vmem:[#allocation27_spill] sm:$0xff] %v11886_v34 }
 0x4a3   : > { %5162 = vmatpush1.bf16.msra.mxu0 %v11846_v20  ;;  %5203 = vmatpush1.bf16.msra.mxu1 %v11848_v46  ;;  %v11870_v20 = vcombine.high %v4481_v11, %v4485_v16  ;;  %v4490_v46 = vld [vmem:[%s10289_s29 + $0x3c8] sm:$0xff]  ;;  %v11895_v11 = vcombine.low %v4489_v24, %v4493_v39 }
 0x4a4   : > { %5163 = vmatprep.subr.bf16.mxu0 %v11860_v43  ;;  %13654 = vst [vmem:[#allocation24_spill] sm:$0xff] %v11876_v12  ;;  %5204 = vmatprep.subr.bf16.mxu1 %v11868_v13  ;;  %v11889_v43 = vcombine.low %v4482_v51, %v4486_v17  ;;  %v11892_v13 = vcombine.high %v4490_v46, %v4494_v50  ;;  %v4371_v17 = vld [vmem:[%s10289_s29 + $0x10] sm:$0xff] }
 0x4a5   : > { %13653 = vst [vmem:[#allocation23_spill] sm:$0xff] %v11870_v20  ;;  %13659 = vst [vmem:[#allocation29_spill] sm:$0xff] %v11895_v11  ;;  %v11899_v16 = vcombine.low %v4490_v46, %v4494_v50  ;;  %v4375_v51 = vld [vmem:[%s10289_s29 + $0x30] sm:$0xff] }
 0x4a6   : > { %13657 = vst [vmem:[#allocation26_spill] sm:$0xff] %v11889_v43  ;;  %13658 = vst [vmem:[#allocation28_spill] sm:$0xff] %v11892_v13  ;;  %v11910_v24 = vcombine.low %v4371_v17, %v4375_v51 }
 0x4a7   : > { %5164 = vmatpush1.bf16.msra.mxu0 %v11858_v57  ;;  %5205 = vmatpush1.bf16.msra.mxu1 %v11866_v2  ;;  %13660 = vst [vmem:[#allocation30_spill] sm:$0xff] %v11899_v16  ;;  %v4376_v2 = vld [vmem:[%s10289_s29 + $0x38] sm:$0xff] }
 0x4a8   : > { %5165 = vmatprep.subr.bf16.mxu0 %v11870_v20  ;;  %5206 = vmatprep.subr.bf16.mxu1 %v11876_v12  ;;  %v4372_v20 = vld [vmem:[%s10289_s29 + $0x18] sm:$0xff]  ;;  %v11906_v12 = vcombine.high %v4371_v17, %v4375_v51  ;;  %v9044_v17 = vld [vmem:[%s8527_s25 + $0xc0] sm:$0xff]  ;;  %v9046_v51 = vld [vmem:[%s8527_s25 + $0xd0] sm:$0xff] }
 0x4a9   : > { %v11912_v39 = vcombine.low %v4372_v20, %v4376_v2  ;;  %v11914_v46 = vcombine.high %v4372_v20, %v4376_v2  ;;  %v9047_v20 = vld [vmem:[%s8527_s25 + $0xd8] sm:$0xff] }
 0x4aa   : > { %13661 = vst [vmem:[#allocation31_spill] sm:$0xff] %v11906_v12 }
 0x4ab   : > { %5166 = vmatpush1.bf16.msra.mxu0 %v11881_v59  ;;  %5207 = vmatpush1.bf16.msra.mxu1 %v11889_v43  ;;  %13662 = vst [vmem:[#allocation32_spill] sm:$0xff] %v11914_v46 }
 0x4ac   : > { %5167 = vmatprep.subr.bf16.mxu0 %v11886_v34  ;;  %5208 = vmatprep.subr.bf16.mxu1 %v11892_v13 }
 0x4af   : > { %5168 = vmatpush1.bf16.msra.mxu0 %v11895_v11  ;;  %5209 = vmatpush1.bf16.msra.mxu1 %v11899_v16  ;;  %v9045_v16 = vld [vmem:[%s8527_s25 + $0xc8] sm:$0xff] }
 0x4b0   : > { %5219 = vmatprep.subr.bf16.mxu0 %v11906_v12  ;;  %5260 = vmatprep.subr.bf16.mxu1 %v11914_v46 }
 0x505   : > { %v4159_v50 = vpop.f32.mrb[24].mxu0  ;;  %v4200_v11 = vpop.f32.mrb[24].mxu1 }
 0x506   : > { %v4161_v13 = vpop.f32.mrb[25].mxu0  ;;  %v4202_v34 = vpop.f32.mrb[25].mxu1  ;;  %v4289_v10 = vadd.f32 %v9044_v17, %v4159_v50  ;;  %v4291_v2 = vadd.f32 %v9046_v51, %v4200_v11  ;;  %v9048_v17 = vld [vmem:[%s8527_s25 + $0xe0] sm:$0xff]  ;;  %v9050_v11 = vld [vmem:[%s8527_s25 + $0xf0] sm:$0xff] }
 0x507   : > { %v4163_v43 = vpop.f32.mrb[26].mxu0  ;;  %v4204_v59 = vpop.f32.mrb[26].mxu1  ;;  %v4290_v26 = vadd.f32 %v9045_v16, %v4161_v13  ;;  %v4292_v12 = vadd.f32 %v9047_v20, %v4202_v34  ;;  %v9049_v13 = vld [vmem:[%s8527_s25 + $0xe8] sm:$0xff] }
 0x508   : > { %v4164_v57 = vpop.f32.mrb[27].mxu0  ;;  %v4205_v29 = vpop.f32.mrb[27].mxu1  ;;  %v9180_v40 = vmul.f32 -1.442695, %v4289_v10  ;;  %v9182_v46 = vmul.f32 -1.442695, %v4291_v2 }
 0x509   : > { %v9181_v0 = vmul.f32 -1.442695, %v4290_v26  ;;  %v9183_v18 = vmul.f32 -1.442695, %v4292_v12  ;;  %v9051_v10 = vld [vmem:[%s8527_s25 + $0xf8] sm:$0xff]  ;;  %s8417_s25 = scalar_lea.vmem (%p10138_p5), %s13038_s2, %s9187_s26 }
 0x50a   : > { %9907 = vpow2.f32 %v9180_v40 }
 0x50b   : > { %9909 = vpow2.f32 %v9182_v46 }
 0x50c   : > { %9911 = vpow2.f32 %v9181_v0 }
 0x50d   : > { %9913 = vpow2.f32 %v9183_v18 }
 0x514   : > { %v9908_v59 = vpop.eup %9907 }
 0x515   : > { %v9910_v29 = vpop.eup %9909  ;;  %v4303_v36 = vadd.f32 1.0, %v9908_v59 }
 0x516   : > { %v9912_v57 = vpop.eup %9911  ;;  %v4315_v58 = vadd.f32 1.0, %v9910_v29 }
 0x517   : > { %v9914_v43 = vpop.eup %9913  ;;  %v4304_v37 = vadd.f32 1.0, %v9912_v57  ;;  %9915 = vrcp.f32 %v4303_v36 }
 0x518   : > { %v4316_v50 = vadd.f32 1.0, %v9914_v43  ;;  %9917 = vrcp.f32 %v4315_v58 }
 0x519   : > { %9919 = vrcp.f32 %v4304_v37 }
 0x51a   : > { %9921 = vrcp.f32 %v4316_v50 }
 0x521   : > { %v9916_v58 = vpop.eup %9915 }
 0x522   : > { %v9918_v57 = vpop.eup %9917 }
 0x523   : > { %v9920_v37 = vpop.eup %9919  ;;  %v4335_v50 = vmul.f32 %v9918_v57, %v11572_v48 }
 0x524   : > { %v9922_v43 = vpop.eup %9921 }
 0x545   : > { %v4241_v26 = vpop.f32.mrb[28].mxu0  ;;  %v4282_v12 = vpop.f32.mrb[28].mxu1 }
 0x546   : > { %v4293_v40 = vadd.f32 %v9048_v17, %v4241_v26  ;;  %v4295_v0 = vadd.f32 %v9050_v11, %v4282_v12  ;;  %v4243_v18 = vpop.f32.mrb[29].mxu0  ;;  %v4284_v34 = vpop.f32.mrb[29].mxu1  ;;  %v4336_v26 = vmul.f32 %v9922_v43, %v11574_v31 }
 0x547   : > { %v4294_v16 = vadd.f32 %v9049_v13, %v4243_v18  ;;  %v4296_v46 = vadd.f32 %v9051_v10, %v4284_v34  ;;  %v4245_v51 = vpop.f32.mrb[30].mxu0  ;;  %v4286_v20 = vpop.f32.mrb[30].mxu1 }
 0x548   : > { %9923 = vtanh.f32 %v4293_v40  ;;  %v9184_v2 = vmul.f32 -1.442695, %v4295_v0  ;;  %v4246_v59 = vpop.f32.mrb[31].mxu0  ;;  %v4287_v29 = vpop.f32.mrb[31].mxu1 }
 0x549   : > { %9925 = vtanh.f32 %v4294_v16  ;;  %v9185_v36 = vmul.f32 -1.442695, %v4296_v46  ;;  %v4379_v59 = vld [vmem:[%s10289_s29 + $0x50] sm:$0xff] }
 0x54a   : > { %9927 = vpow2.f32 %v9184_v2  ;;  %v4383_v29 = vld [vmem:[%s10289_s29 + $0x70] sm:$0xff] }
 0x54b   : > { %9929 = vpow2.f32 %v9185_v36  ;;  %v4380_v36 = vld [vmem:[%s10289_s29 + $0x58] sm:$0xff] }
 0x552   : > { %v9924_v17 = vpop.eup %9923 }
 0x553   : > { %v9926_v11 = vpop.eup %9925  ;;  %v4337_v13 = vmul.f32 %v9924_v17, %v9916_v58  ;;  %v4384_v58 = vld [vmem:[%s10289_s29 + $0x78] sm:$0xff]  ;;  %v4387_v17 = vld [vmem:[%s10289_s29 + $0x90] sm:$0xff] }
 0x554   : > { %v9928_v10 = vpop.eup %9927  ;;  %v4338_v12 = vmul.f32 %v9926_v11, %v9920_v37  ;;  %v11939_v11 = vcombine.high %v4379_v59, %v4383_v29 }
 0x555   : > { %v9930_v40 = vpop.eup %9929  ;;  %v11922_v0 = vadd.f32 %v4337_v13, %v4335_v50  ;;  %v4329_v18 = vadd.f32 1.0, %v9928_v10  ;;  %v11941_v50 = vcombine.high %v4380_v36, %v4384_v58  ;;  %v4391_v13 = vld [vmem:[%s10289_s29 + $0xb0] sm:$0xff]  ;;  %v4388_v10 = vld [vmem:[%s10289_s29 + $0x98] sm:$0xff] }
 0x556   : > { %v11924_v34 = vadd.f32 %v4338_v12, %v4336_v26  ;;  %v4330_v16 = vadd.f32 1.0, %v9930_v40  ;;  %v4392_v26 = vld [vmem:[%s10289_s29 + $0xb8] sm:$0xff]  ;;  %v11950_v12 = vcombine.low %v4379_v59, %v4383_v29  ;;  %v11952_v40 = vcombine.low %v4380_v36, %v4384_v58  ;;  %v4403_v36 = vld [vmem:[%s10289_s29 + $0x110] sm:$0xff] }
 0x557   : > { %9931 = vtanh.f32 %v11922_v0  ;;  %v4407_v58 = vld [vmem:[%s10289_s29 + $0x130] sm:$0xff] }
 0x558   : > { %9933 = vrcp.f32 %v4329_v18  ;;  %13663 = vst [vmem:[#allocation33_spill] sm:$0xff] %v11950_v12  ;;  %13664 = vst [vmem:[#allocation34_spill] sm:$0xff] %v11952_v40  ;;  %v11954_v18 = vcombine.high %v4387_v17, %v4391_v13 }
 0x559   : > { %9935 = vtanh.f32 %v11924_v34 }
 0x55a   : > { %9937 = vrcp.f32 %v4330_v16  ;;  %13665 = vst [vmem:[#allocation35_spill] sm:$0xff] %v11954_v18  ;;  %v11956_v16 = vcombine.high %v4388_v10, %v4392_v26 }
 0x55c   : > { %13666 = vst [vmem:[#allocation36_spill] sm:$0xff] %v11956_v16 }
 0x561   : > { %v9932_v48 = vpop.eup %9931 }
 0x562   : > { %v9934_v31 = vpop.eup %9933 }
 0x563   : > { %v9936_v46 = vpop.eup %9935  ;;  %v4343_v51 = vmul.f32 %v9934_v31, %v9932_v48  ;;  %v4395_v48 = vld [vmem:[%s10289_s29 + $0xd0] sm:$0xff] }
 0x564   : > { %v9938_v20 = vpop.eup %9937  ;;  %v4399_v31 = vld [vmem:[%s10289_s29 + $0xf0] sm:$0xff] }
 0x565   : > { %v4344_v2 = vmul.f32 %v9938_v20, %v9936_v46  ;;  %v11936_v43 = vpack.c.bf16 %v4343_v51, %v4343_v51  ;;  %v4396_v46 = vld [vmem:[%s10289_s29 + $0xd8] sm:$0xff]  ;;  %v11966_v20 = vcombine.low %v4387_v17, %v4391_v13  ;;  %v11972_v59 = vcombine.high %v4395_v48, %v4399_v31 }
 0x566   : > { %v11982_v17 = vcombine.low %v4395_v48, %v4399_v31  ;;  %v11998_v48 = vcombine.low %v4403_v36, %v4407_v58 }
 0x567   : > { %v4346_v57 = vpack.c.bf16 %v4344_v2, %v4344_v2  ;;  %v9778_v37 = vpack.c.bf16 %v4344_v2, %v4343_v51  ;;  %v4400_v51 = vld [vmem:[%s10289_s29 + $0xf8] sm:$0xff]  ;;  %13667 = vst [vmem:[#allocation37_spill] sm:$0xff] %v11966_v20  ;;  %v11968_v2 = vcombine.low %v4388_v10, %v4392_v26  ;;  %13669 = vst [vmem:[#allocation39_spill] sm:$0xff] %v11972_v59 }
 0x568   : > { %v11974_v29 = vcombine.high %v4396_v46, %v4400_v51  ;;  %13671 = vst [vmem:[#allocation41_spill] sm:$0xff] %v11982_v17  ;;  %v11984_v13 = vcombine.low %v4396_v46, %v4400_v51  ;;  %v11988_v10 = vcombine.high %v4403_v36, %v4407_v58  ;;  %13675 = vst [vmem:[#allocation45_spill] sm:$0xff] %v11998_v48 }
 0x569   : > { %5169 = vmatprep.mubr.bf16.mxu0 %v4346_v57  ;;  %5210 = vmatprep.mubr.bf16.mxu1 %v4346_v57  ;;  %9188 = vst [vmem:[%s8530_s27 + $0x18] sm:$0xff] %v9778_v37  ;;  %13668 = vst [vmem:[#allocation38_spill] sm:$0xff] %v11968_v2  ;;  %v4408_v37 = vld [vmem:[%s10289_s29 + $0x138] sm:$0xff] }
 0x56a   : > { %5170 = vmatmul.mubr.bf16.vlgmr.msra.gmra.mrb[32].mxu0 %v11936_v43  ;;  %5211 = vmatmul.mubr.bf16.vlgmr.msra.gmra.mrb[32].mxu1 %v11936_v43  ;;  %13670 = vst [vmem:[#allocation40_spill] sm:$0xff] %v11974_v29  ;;  %13672 = vst [vmem:[#allocation42_spill] sm:$0xff] %v11984_v13 }
 0x56b   : > { %5220 = vmatpush1.bf16.msra.mxu0 %v11910_v24  ;;  %5261 = vmatpush1.bf16.msra.mxu1 %v11912_v39  ;;  %13673 = vst [vmem:[#allocation43_spill] sm:$0xff] %v11988_v10 }
 0x56c   : > { %5251 = vmatprep.mubr.bf16.mxu0 %v4346_v57  ;;  %5292 = vmatprep.mubr.bf16.mxu1 %v4346_v57  ;;  %v4404_v57 = vld [vmem:[%s10289_s29 + $0x118] sm:$0xff] }
 0x56d   : > { %5221 = vmatprep.subr.bf16.mxu0 %v11939_v11  ;;  %5262 = vmatprep.subr.bf16.mxu1 %v11941_v50  ;;  %v11990_v26 = vcombine.high %v4404_v57, %v4408_v37  ;;  %v12000_v31 = vcombine.low %v4404_v57, %v4408_v37 }
 0x56f   : > { %5222 = vmatpush1.bf16.msra.mxu0 %v11950_v12  ;;  %5263 = vmatpush1.bf16.msra.mxu1 %v11952_v40  ;;  %13674 = vst [vmem:[#allocation44_spill] sm:$0xff] %v11990_v26  ;;  %13676 = vst [vmem:[#allocation46_spill] sm:$0xff] %v12000_v31  ;;  %v4492_v40 = vld [vmem:[%s10289_s29 + $0x3d8] sm:$0xff] }
 0x570   : > { %5223 = vmatprep.subr.bf16.mxu0 %v11954_v18  ;;  %5264 = vmatprep.subr.bf16.mxu1 %v11956_v16  ;;  %v4411_v16 = vld [vmem:[%s10289_s29 + $0x150] sm:$0xff]  ;;  %v4412_v18 = vld [vmem:[%s10289_s29 + $0x158] sm:$0xff] }
 0x571   : > { %v4496_v12 = vld [vmem:[%s10289_s29 + $0x3f8] sm:$0xff] }
 0x573   : > { %5224 = vmatpush1.bf16.msra.mxu0 %v11966_v20  ;;  %5265 = vmatpush1.bf16.msra.mxu1 %v11968_v2  ;;  %v4415_v20 = vld [vmem:[%s10289_s29 + $0x170] sm:$0xff]  ;;  %v4416_v2 = vld [vmem:[%s10289_s29 + $0x178] sm:$0xff] }
 0x574   : > { %5225 = vmatprep.subr.bf16.mxu0 %v11972_v59  ;;  %5266 = vmatprep.subr.bf16.mxu1 %v11974_v29  ;;  %v12004_v46 = vcombine.high %v4411_v16, %v4415_v20  ;;  %v12006_v51 = vcombine.high %v4412_v18, %v4416_v2  ;;  %v4419_v29 = vld [vmem:[%s10289_s29 + $0x190] sm:$0xff]  ;;  %v4420_v59 = vld [vmem:[%s10289_s29 + $0x198] sm:$0xff]  ;;  %v12014_v36 = vcombine.low %v4411_v16, %v4415_v20 }
 0x575   : > { %v12016_v58 = vcombine.low %v4412_v18, %v4416_v2 }
 0x576   : > { %13677 = vst [vmem:[#allocation47_spill] sm:$0xff] %v12004_v46  ;;  %13678 = vst [vmem:[#allocation48_spill] sm:$0xff] %v12006_v51 }
 0x577   : > { %5226 = vmatpush1.bf16.msra.mxu0 %v11982_v17  ;;  %5267 = vmatpush1.bf16.msra.mxu1 %v11984_v13  ;;  %v4423_v17 = vld [vmem:[%s10289_s29 + $0x1b0] sm:$0xff]  ;;  %v4424_v13 = vld [vmem:[%s10289_s29 + $0x1b8] sm:$0xff]  ;;  %13679 = vst [vmem:[#allocation49_spill] sm:$0xff] %v12014_v36  ;;  %13680 = vst [vmem:[#allocation50_spill] sm:$0xff] %v12016_v58 }
 0x578   : > { %5227 = vmatprep.subr.bf16.mxu0 %v11988_v10  ;;  %5268 = vmatprep.subr.bf16.mxu1 %v11990_v26  ;;  %v12020_v57 = vcombine.high %v4419_v29, %v4423_v17  ;;  %v12022_v37 = vcombine.high %v4420_v59, %v4424_v13  ;;  %v4427_v26 = vld [vmem:[%s10289_s29 + $0x1d0] sm:$0xff]  ;;  %v4428_v10 = vld [vmem:[%s10289_s29 + $0x1d8] sm:$0xff]  ;;  %v12030_v18 = vcombine.low %v4419_v29, %v4423_v17 }
 0x579   : > { %v12032_v16 = vcombine.low %v4420_v59, %v4424_v13 }
 0x57a   : > { %13681 = vst [vmem:[#allocation51_spill] sm:$0xff] %v12020_v57  ;;  %13682 = vst [vmem:[#allocation52_spill] sm:$0xff] %v12022_v37 }
 0x57b   : > { %5228 = vmatpush1.bf16.msra.mxu0 %v11998_v48  ;;  %5269 = vmatpush1.bf16.msra.mxu1 %v12000_v31  ;;  %v4431_v48 = vld [vmem:[%s10289_s29 + $0x1f0] sm:$0xff]  ;;  %v4432_v31 = vld [vmem:[%s10289_s29 + $0x1f8] sm:$0xff]  ;;  %13683 = vst [vmem:[#allocation53_spill] sm:$0xff] %v12030_v18  ;;  %13684 = vst [vmem:[#allocation54_spill] sm:$0xff] %v12032_v16 }
 0x57c   : > { %5229 = vmatprep.subr.bf16.mxu0 %v12004_v46  ;;  %5270 = vmatprep.subr.bf16.mxu1 %v12006_v51  ;;  %v12036_v20 = vcombine.high %v4427_v26, %v4431_v48  ;;  %v12038_v2 = vcombine.high %v4428_v10, %v4432_v31  ;;  %v4435_v51 = vld [vmem:[%s10289_s29 + $0x210] sm:$0xff]  ;;  %v4436_v46 = vld [vmem:[%s10289_s29 + $0x218] sm:$0xff]  ;;  %v12046_v59 = vcombine.low %v4427_v26, %v4431_v48 }
 0x57d   : > { %v12048_v29 = vcombine.low %v4428_v10, %v4432_v31 }
 0x57e   : > { %13685 = vst [vmem:[#allocation55_spill] sm:$0xff] %v12036_v20  ;;  %13686 = vst [vmem:[#allocation56_spill] sm:$0xff] %v12038_v2 }
 0x57f   : > { %5230 = vmatpush1.bf16.msra.mxu0 %v12014_v36  ;;  %5271 = vmatpush1.bf16.msra.mxu1 %v12016_v58  ;;  %v4439_v36 = vld [vmem:[%s10289_s29 + $0x230] sm:$0xff]  ;;  %v4440_v58 = vld [vmem:[%s10289_s29 + $0x238] sm:$0xff]  ;;  %13687 = vst [vmem:[#allocation57_spill] sm:$0xff] %v12046_v59  ;;  %13688 = vst [vmem:[#allocation58_spill] sm:$0xff] %v12048_v29 }
 0x580   : > { %5231 = vmatprep.subr.bf16.mxu0 %v12020_v57  ;;  %5272 = vmatprep.subr.bf16.mxu1 %v12022_v37  ;;  %v12052_v17 = vcombine.high %v4435_v51, %v4439_v36  ;;  %v12054_v13 = vcombine.high %v4436_v46, %v4440_v58  ;;  %v4443_v37 = vld [vmem:[%s10289_s29 + $0x250] sm:$0xff]  ;;  %v4444_v57 = vld [vmem:[%s10289_s29 + $0x258] sm:$0xff]  ;;  %v12062_v10 = vcombine.low %v4435_v51, %v4439_v36 }
 0x581   : > { %v12064_v26 = vcombine.low %v4436_v46, %v4440_v58 }
 0x582   : > { %13689 = vst [vmem:[#allocation59_spill] sm:$0xff] %v12052_v17  ;;  %13690 = vst [vmem:[#allocation60_spill] sm:$0xff] %v12054_v13 }
 0x583   : > { %5232 = vmatpush1.bf16.msra.mxu0 %v12030_v18  ;;  %5273 = vmatpush1.bf16.msra.mxu1 %v12032_v16  ;;  %v4447_v18 = vld [vmem:[%s10289_s29 + $0x270] sm:$0xff]  ;;  %v4448_v16 = vld [vmem:[%s10289_s29 + $0x278] sm:$0xff]  ;;  %13691 = vst [vmem:[#allocation61_spill] sm:$0xff] %v12062_v10  ;;  %13692 = vst [vmem:[#allocation62_spill] sm:$0xff] %v12064_v26 }
 0x584   : > { %5233 = vmatprep.subr.bf16.mxu0 %v12036_v20  ;;  %5274 = vmatprep.subr.bf16.mxu1 %v12038_v2  ;;  %v12068_v48 = vcombine.high %v4443_v37, %v4447_v18  ;;  %v12070_v31 = vcombine.high %v4444_v57, %v4448_v16  ;;  %v4451_v2 = vld [vmem:[%s10289_s29 + $0x290] sm:$0xff]  ;;  %v4452_v20 = vld [vmem:[%s10289_s29 + $0x298] sm:$0xff]  ;;  %v12078_v46 = vcombine.low %v4443_v37, %v4447_v18 }
 0x585   : > { %v12080_v51 = vcombine.low %v4444_v57, %v4448_v16 }
 0x586   : > { %13693 = vst [vmem:[#allocation63_spill] sm:$0xff] %v12068_v48  ;;  %13694 = vst [vmem:[#allocation64_spill] sm:$0xff] %v12070_v31 }
 0x587   : > { %5234 = vmatpush1.bf16.msra.mxu0 %v12046_v59  ;;  %5275 = vmatpush1.bf16.msra.mxu1 %v12048_v29  ;;  %v4455_v59 = vld [vmem:[%s10289_s29 + $0x2b0] sm:$0xff]  ;;  %v4456_v29 = vld [vmem:[%s10289_s29 + $0x2b8] sm:$0xff]  ;;  %13695 = vst [vmem:[#allocation65_spill] sm:$0xff] %v12078_v46  ;;  %13696 = vst [vmem:[#allocation66_spill] sm:$0xff] %v12080_v51 }
 0x588   : > { %5235 = vmatprep.subr.bf16.mxu0 %v12052_v17  ;;  %5276 = vmatprep.subr.bf16.mxu1 %v12054_v13  ;;  %v12084_v36 = vcombine.high %v4451_v2, %v4455_v59  ;;  %v12086_v58 = vcombine.high %v4452_v20, %v4456_v29  ;;  %v4459_v13 = vld [vmem:[%s10289_s29 + $0x2d0] sm:$0xff]  ;;  %v4460_v17 = vld [vmem:[%s10289_s29 + $0x2d8] sm:$0xff]  ;;  %v12094_v57 = vcombine.low %v4451_v2, %v4455_v59 }
 0x589   : > { %v12096_v37 = vcombine.low %v4452_v20, %v4456_v29 }
 0x58a   : > { %13697 = vst [vmem:[#allocation67_spill] sm:$0xff] %v12084_v36  ;;  %13698 = vst [vmem:[#allocation68_spill] sm:$0xff] %v12086_v58 }
 0x58b   : > { %5236 = vmatpush1.bf16.msra.mxu0 %v12062_v10  ;;  %5277 = vmatpush1.bf16.msra.mxu1 %v12064_v26  ;;  %v4463_v10 = vld [vmem:[%s10289_s29 + $0x2f0] sm:$0xff]  ;;  %v4464_v26 = vld [vmem:[%s10289_s29 + $0x2f8] sm:$0xff]  ;;  %13699 = vst [vmem:[#allocation69_spill] sm:$0xff] %v12094_v57  ;;  %13700 = vst [vmem:[#allocation70_spill] sm:$0xff] %v12096_v37 }
 0x58c   : > { %5237 = vmatprep.subr.bf16.mxu0 %v12068_v48  ;;  %5278 = vmatprep.subr.bf16.mxu1 %v12070_v31  ;;  %v12100_v18 = vcombine.high %v4459_v13, %v4463_v10  ;;  %v12102_v16 = vcombine.high %v4460_v17, %v4464_v26  ;;  %v4467_v31 = vld [vmem:[%s10289_s29 + $0x310] sm:$0xff]  ;;  %v4468_v48 = vld [vmem:[%s10289_s29 + $0x318] sm:$0xff]  ;;  %v12110_v20 = vcombine.low %v4459_v13, %v4463_v10 }
 0x58d   : > { %v12112_v2 = vcombine.low %v4460_v17, %v4464_v26 }
 0x58e   : > { %13701 = vst [vmem:[#allocation71_spill] sm:$0xff] %v12100_v18  ;;  %13702 = vst [vmem:[#allocation72_spill] sm:$0xff] %v12102_v16 }
 0x58f   : > { %5238 = vmatpush1.bf16.msra.mxu0 %v12078_v46  ;;  %5279 = vmatpush1.bf16.msra.mxu1 %v12080_v51  ;;  %v4471_v46 = vld [vmem:[%s10289_s29 + $0x330] sm:$0xff]  ;;  %v4472_v51 = vld [vmem:[%s10289_s29 + $0x338] sm:$0xff]  ;;  %13703 = vst [vmem:[#allocation73_spill] sm:$0xff] %v12110_v20  ;;  %13704 = vst [vmem:[#allocation74_spill] sm:$0xff] %v12112_v2 }
 0x590   : > { %5239 = vmatprep.subr.bf16.mxu0 %v12084_v36  ;;  %5280 = vmatprep.subr.bf16.mxu1 %v12086_v58  ;;  %v12116_v59 = vcombine.high %v4467_v31, %v4471_v46  ;;  %v12118_v29 = vcombine.high %v4468_v48, %v4472_v51  ;;  %v4475_v58 = vld [vmem:[%s10289_s29 + $0x350] sm:$0xff]  ;;  %v4476_v36 = vld [vmem:[%s10289_s29 + $0x358] sm:$0xff]  ;;  %v12126_v17 = vcombine.low %v4467_v31, %v4471_v46 }
 0x591   : > { %v12128_v13 = vcombine.low %v4468_v48, %v4472_v51 }
 0x592   : > { %13705 = vst [vmem:[#allocation75_spill] sm:$0xff] %v12116_v59  ;;  %13706 = vst [vmem:[#allocation76_spill] sm:$0xff] %v12118_v29 }
 0x593   : > { %5240 = vmatpush1.bf16.msra.mxu0 %v12094_v57  ;;  %5281 = vmatpush1.bf16.msra.mxu1 %v12096_v37  ;;  %v4479_v57 = vld [vmem:[%s10289_s29 + $0x370] sm:$0xff]  ;;  %v4480_v37 = vld [vmem:[%s10289_s29 + $0x378] sm:$0xff] }
 0x594   : > { %5241 = vmatprep.subr.bf16.mxu0 %v12100_v18  ;;  %5282 = vmatprep.subr.bf16.mxu1 %v12102_v16  ;;  %v12132_v10 = vcombine.high %v4475_v58, %v4479_v57  ;;  %v12134_v26 = vcombine.high %v4476_v36, %v4480_v37  ;;  %v4483_v16 = vld [vmem:[%s10289_s29 + $0x390] sm:$0xff]  ;;  %v4484_v18 = vld [vmem:[%s10289_s29 + $0x398] sm:$0xff]  ;;  %v12142_v48 = vcombine.low %v4475_v58, %v4479_v57 }
 0x595   : > { %v12144_v31 = vcombine.low %v4476_v36, %v4480_v37  ;;  %v12166_v37 = vcombine.high %v4492_v40, %v4496_v12 }
 0x596   : > { %13707 = vst [vmem:[#allocation77_spill] sm:$0xff] %v12134_v26  ;;  %13708 = vst [vmem:[#allocation78_spill] sm:$0xff] %v12142_v48 }
 0x597   : > { %5242 = vmatpush1.bf16.msra.mxu0 %v12110_v20  ;;  %5283 = vmatpush1.bf16.msra.mxu1 %v12112_v2  ;;  %v4487_v20 = vld [vmem:[%s10289_s29 + $0x3b0] sm:$0xff]  ;;  %v4488_v2 = vld [vmem:[%s10289_s29 + $0x3b8] sm:$0xff] }
 0x598   : > { %5243 = vmatprep.subr.bf16.mxu0 %v12116_v59  ;;  %5284 = vmatprep.subr.bf16.mxu1 %v12118_v29  ;;  %v12148_v46 = vcombine.high %v4483_v16, %v4487_v20  ;;  %v12150_v51 = vcombine.high %v4484_v18, %v4488_v2  ;;  %v4491_v29 = vld [vmem:[%s10289_s29 + $0x3d0] sm:$0xff]  ;;  %v12158_v58 = vcombine.low %v4483_v16, %v4487_v20  ;;  %v4364_v16 = vld [vmem:[%s4360_s3 + $0x18] sm:$0xff] }
 0x599   : > { %v4495_v59 = vld [vmem:[%s10289_s29 + $0x3f0] sm:$0xff]  ;;  %v12160_v36 = vcombine.low %v4484_v18, %v4488_v2 }
 0x59a   : > { %v12164_v57 = vcombine.high %v4491_v29, %v4495_v59 }
 0x59b   : > { %5244 = vmatpush1.bf16.msra.mxu0 %v12126_v17  ;;  %5285 = vmatpush1.bf16.msra.mxu1 %v12128_v13 }
 0x59c   : > { %5245 = vmatprep.subr.bf16.mxu0 %v12132_v10  ;;  %5286 = vmatprep.subr.bf16.mxu1 %v12134_v26  ;;  %v12170_v26 = vcombine.low %v4491_v29, %v4495_v59 }
 0x59f   : > { %5246 = vmatpush1.bf16.msra.mxu0 %v12142_v48  ;;  %5287 = vmatpush1.bf16.msra.mxu1 %v12144_v31  ;;  %v12172_v48 = vcombine.low %v4492_v40, %v4496_v12  ;;  %v4363_v12 = vld [vmem:[%s4360_s3 + $0x10] sm:$0xff]  ;;  %v4362_v40 = vld [vmem:[%s4360_s3 + $0x8] sm:$0xff] }
 0x5a0   : > { %5247 = vmatprep.subr.bf16.mxu0 %v12148_v46  ;;  %5288 = vmatprep.subr.bf16.mxu1 %v12150_v51 }
 0x5a3   : > { %5248 = vmatpush1.bf16.msra.mxu0 %v12158_v58  ;;  %5289 = vmatpush1.bf16.msra.mxu1 %v12160_v36 }
 0x5a4   : > { %5249 = vmatprep.subr.bf16.mxu0 %v12164_v57  ;;  %5290 = vmatprep.subr.bf16.mxu1 %v12166_v37 }
 0x5a7   : > { %5250 = vmatpush1.bf16.msra.mxu0 %v12170_v26  ;;  %5291 = vmatpush1.bf16.msra.mxu1 %v12172_v48 }
 0x5a8   : > { %6150 = vmatprep.subr.bf16.mxu0 %v11653_v28  ;;  %6191 = vmatprep.subr.bf16.mxu1 %v11660_v62  ;;  %v13710_v28 = vld [vmem:[#allocation6_spill] sm:$0xff]  ;;  %v13712_v62 = vld [vmem:[#allocation7_spill] sm:$0xff] }
 0x5aa   : > { %5252 = vmatmul.mubr.bf16.vlgmr.msra.gmra.mrb[36].mxu0 %v11936_v43  ;;  %5293 = vmatmul.mubr.bf16.vlgmr.msra.gmra.mrb[36].mxu1 %v11936_v43  ;;  %v4361_v43 = vld [vmem:[%s4360_s3] sm:$0xff] }
 0x5ab   : > { %6151 = vmatpush1.bf16.msra.mxu0 %v11651_v8  ;;  %6192 = vmatpush1.bf16.msra.mxu1 %v11658_v22  ;;  %v13709_v8 = vld [vmem:[#allocation5_spill] sm:$0xff]  ;;  %v13711_v22 = vld [vmem:[#allocation4_spill] sm:$0xff] }
 0x5ac   : > { %6152 = vmatprep.subr.bf16.mxu0 %v11662_v61  ;;  %6193 = vmatprep.subr.bf16.mxu1 %v11668_v1  ;;  %v13713_v61 = vld [vmem:[#allocation9_spill] sm:$0xff]  ;;  %v13714_v1 = vld [vmem:[#allocation10_spill] sm:$0xff] }
 0x5af   : > { %6153 = vmatpush1.bf16.msra.mxu0 %v11675_v14  ;;  %6194 = vmatpush1.bf16.msra.mxu1 %v11679_v4  ;;  %v13715_v14 = vld [vmem:[#allocation8_spill] sm:$0xff]  ;;  %v13716_v4 = vld [vmem:[#allocation11_spill] sm:$0xff] }
 0x5b0   : > { %6154 = vmatprep.subr.bf16.mxu0 %v11681_v15  ;;  %6195 = vmatprep.subr.bf16.mxu1 %v11684_v19  ;;  %v13717_v15 = vld [vmem:[#allocation13_spill] sm:$0xff]  ;;  %v13718_v19 = vld [vmem:[#allocation14_spill] sm:$0xff] }
 0x5b3   : > { %6155 = vmatpush1.bf16.msra.mxu0 %v11691_v60  ;;  %6196 = vmatpush1.bf16.msra.mxu1 %v11695_v21  ;;  %v13719_v60 = vld [vmem:[#allocation12_spill] sm:$0xff]  ;;  %v13720_v21 = vld [vmem:[#allocation15_spill] sm:$0xff] }
 0x5b4   : > { %6156 = vmatprep.subr.bf16.mxu0 %v11697_v30  ;;  %6197 = vmatprep.subr.bf16.mxu1 %v11700_v35  ;;  %v13721_v30 = vld [vmem:[#allocation17_spill] sm:$0xff]  ;;  %v13722_v35 = vld [vmem:[#allocation18_spill] sm:$0xff] }
 0x5b7   : > { %6157 = vmatpush1.bf16.msra.mxu0 %v11707_v52  ;;  %6198 = vmatpush1.bf16.msra.mxu1 %v11711_v53  ;;  %v13723_v52 = vld [vmem:[#allocation16_spill] sm:$0xff]  ;;  %v13724_v53 = vld [vmem:[#allocation22_spill] sm:$0xff] }
 0x5b8   : > { %6158 = vmatprep.subr.bf16.mxu0 %v11713_v5  ;;  %6199 = vmatprep.subr.bf16.mxu1 %v11716_v7  ;;  %v13725_v5 = vld [vmem:[#allocation21_spill] sm:$0xff]  ;;  %v13726_v7 = vld [vmem:[#allocation20_spill] sm:$0xff] }
 0x5bb   : > { %6159 = vmatpush1.bf16.msra.mxu0 %v11723_v41  ;;  %6200 = vmatpush1.bf16.msra.mxu1 %v11727_v55  ;;  %v13727_v41 = vld [vmem:[#allocation19_spill] sm:$0xff] }
 0x5bc   : > { %6160 = vmatprep.subr.bf16.mxu0 %v11729_v63  ;;  %6201 = vmatprep.subr.bf16.mxu1 %v11732_v33  ;;  %v13728_v55 = vld [vmem:[#allocation23_spill] sm:$0xff]  ;;  %v13729_v63 = vld [vmem:[#allocation24_spill] sm:$0xff]  ;;  %v13730_v33 = vld [vmem:[#allocation25_spill] sm:$0xff] }
 0x5bf   : > { %6161 = vmatpush1.bf16.msra.mxu0 %v11739_v9  ;;  %6202 = vmatpush1.bf16.msra.mxu1 %v11743_v23  ;;  %v13731_v9 = vld [vmem:[#allocation26_spill] sm:$0xff]  ;;  %v13732_v23 = vld [vmem:[#allocation27_spill] sm:$0xff] }
 0x5c0   : > { %6162 = vmatprep.subr.bf16.mxu0 %v11745_v38  ;;  %6203 = vmatprep.subr.bf16.mxu1 %v11748_v45  ;;  %v13733_v38 = vld [vmem:[#allocation28_spill] sm:$0xff]  ;;  %v13734_v45 = vld [vmem:[#allocation29_spill] sm:$0xff] }
 0x5c3   : > { %6163 = vmatpush1.bf16.msra.mxu0 %v11755_v3  ;;  %6204 = vmatpush1.bf16.msra.mxu1 %v11759_v42  ;;  %v13735_v3 = vld [vmem:[#allocation30_spill] sm:$0xff]  ;;  %v13736_v42 = vld [vmem:[#allocation31_spill] sm:$0xff] }
 0x5c4   : > { %6164 = vmatprep.subr.bf16.mxu0 %v11761_v25  ;;  %6205 = vmatprep.subr.bf16.mxu1 %v11764_v32  ;;  %v13737_v25 = vld [vmem:[#allocation32_spill] sm:$0xff] }
 0x5c7   : > { %6165 = vmatpush1.bf16.msra.mxu0 %v11767_v47  ;;  %6206 = vmatpush1.bf16.msra.mxu1 %v11771_v6 }
 0x5c8   : > { %6166 = vmatprep.subr.bf16.mxu0 %v11778_v54  ;;  %6207 = vmatprep.subr.bf16.mxu1 %v11787_v56 }
 0x5cb   : > { %6167 = vmatpush1.bf16.msra.mxu0 %v11781_v27  ;;  %6208 = vmatpush1.bf16.msra.mxu1 %v11785_v49 }
 0x5cc   : > { %6168 = vmatprep.subr.bf16.mxu0 %v11794_v44  ;;  %6209 = vmatprep.subr.bf16.mxu1 %v13709_v8 }
 0x5cf   : > { %6169 = vmatpush1.bf16.msra.mxu0 %v13710_v28  ;;  %6210 = vmatpush1.bf16.msra.mxu1 %v13711_v22 }
 0x5d0   : > { %6170 = vmatprep.subr.bf16.mxu0 %v13712_v62  ;;  %6211 = vmatprep.subr.bf16.mxu1 %v13713_v61 }
 0x5d3   : > { %6171 = vmatpush1.bf16.msra.mxu0 %v13714_v1  ;;  %6212 = vmatpush1.bf16.msra.mxu1 %v13715_v14 }
 0x5d4   : > { %6172 = vmatprep.subr.bf16.mxu0 %v13716_v4  ;;  %6213 = vmatprep.subr.bf16.mxu1 %v13717_v15 }
 0x5d7   : > { %6173 = vmatpush1.bf16.msra.mxu0 %v13718_v19  ;;  %6214 = vmatpush1.bf16.msra.mxu1 %v13719_v60 }
 0x5d8   : > { %6174 = vmatprep.subr.bf16.mxu0 %v13720_v21  ;;  %6215 = vmatprep.subr.bf16.mxu1 %v13721_v30  ;;  %v4365_v21 = vld [vmem:[%s4360_s3 + $0x20] sm:$0xff]  ;;  %v4367_v30 = vld [vmem:[%s4360_s3 + $0x30] sm:$0xff] }
 0x5db   : > { %6175 = vmatpush1.bf16.msra.mxu0 %v13722_v35  ;;  %6216 = vmatpush1.bf16.msra.mxu1 %v13723_v52  ;;  %v4366_v35 = vld [vmem:[%s4360_s3 + $0x28] sm:$0xff]  ;;  %v4368_v52 = vld [vmem:[%s4360_s3 + $0x38] sm:$0xff] }
 0x5dc   : > { %6176 = vmatprep.subr.bf16.mxu0 %v13724_v53  ;;  %6217 = vmatprep.subr.bf16.mxu1 %v13725_v5 }
 0x5df   : > { %6177 = vmatpush1.bf16.msra.mxu0 %v13726_v7  ;;  %6218 = vmatpush1.bf16.msra.mxu1 %v13727_v41 }
 0x5e0   : > { %6178 = vmatprep.subr.bf16.mxu0 %v13728_v55  ;;  %6219 = vmatprep.subr.bf16.mxu1 %v13729_v63 }
 0x5e3   : > { %6179 = vmatpush1.bf16.msra.mxu0 %v13730_v33  ;;  %6220 = vmatpush1.bf16.msra.mxu1 %v13731_v9 }
 0x5e4   : > { %6180 = vmatprep.subr.bf16.mxu0 %v13732_v23  ;;  %6221 = vmatprep.subr.bf16.mxu1 %v13733_v38 }
 0x5e7   : > { %6181 = vmatpush1.bf16.msra.mxu0 %v13734_v45  ;;  %6222 = vmatpush1.bf16.msra.mxu1 %v13735_v3 }
 0x5e8   : > { %6232 = vmatprep.subr.bf16.mxu0 %v13736_v42  ;;  %6273 = vmatprep.subr.bf16.mxu1 %v13737_v25 }
 0x63d   : > { %v5171_v32 = vpop.f32.mrb[32].mxu0  ;;  %v5212_v47 = vpop.f32.mrb[32].mxu1 }
 0x63e   : > { %v5173_v6 = vpop.f32.mrb[33].mxu0  ;;  %v5214_v54 = vpop.f32.mrb[33].mxu1  ;;  %v5301_v18 = vadd.f32 %v5171_v32, %v4361_v43  ;;  %v5303_v20 = vadd.f32 %v5212_v47, %v4363_v12 }
 0x63f   : > { %v5175_v27 = vpop.f32.mrb[34].mxu0  ;;  %v5216_v49 = vpop.f32.mrb[34].mxu1  ;;  %v5302_v2 = vadd.f32 %v5173_v6, %v4362_v40  ;;  %v5304_v59 = vadd.f32 %v5214_v54, %v4364_v16 }
 0x640   : > { %v5176_v56 = vpop.f32.mrb[35].mxu0  ;;  %v5217_v44 = vpop.f32.mrb[35].mxu1  ;;  %v9319_v29 = vmul.f32 -1.442695, %v5301_v18  ;;  %v9321_v8 = vmul.f32 -1.442695, %v5303_v20 }
 0x641   : > { %v9320_v28 = vmul.f32 -1.442695, %v5302_v2  ;;  %v9322_v22 = vmul.f32 -1.442695, %v5304_v59 }
 0x642   : > { %9939 = vpow2.f32 %v9319_v29 }
 0x643   : > { %9941 = vpow2.f32 %v9321_v8 }
 0x644   : > { %9943 = vpow2.f32 %v9320_v28 }
 0x645   : > { %9945 = vpow2.f32 %v9322_v22 }
 0x64c   : > { %v9940_v62 = vpop.eup %9939 }
 0x64d   : > { %v9942_v61 = vpop.eup %9941  ;;  %v5315_v4 = vadd.f32 1.0, %v9940_v62 }
 0x64e   : > { %v9944_v1 = vpop.eup %9943  ;;  %v5327_v15 = vadd.f32 1.0, %v9942_v61 }
 0x64f   : > { %v9946_v14 = vpop.eup %9945  ;;  %v5316_v19 = vadd.f32 1.0, %v9944_v1  ;;  %9947 = vrcp.f32 %v5315_v4  ;;  %v13739_v4 = vld [vmem:[#allocation34_spill] sm:$0xff] }
 0x650   : > { %v5328_v60 = vadd.f32 1.0, %v9946_v14  ;;  %9949 = vrcp.f32 %v5327_v15  ;;  %v13738_v14 = vld [vmem:[#allocation33_spill] sm:$0xff]  ;;  %v13740_v15 = vld [vmem:[#allocation35_spill] sm:$0xff] }
 0x651   : > { %9951 = vrcp.f32 %v5316_v19  ;;  %v13741_v19 = vld [vmem:[#allocation36_spill] sm:$0xff] }
 0x652   : > { %9953 = vrcp.f32 %v5328_v60  ;;  %v13742_v60 = vld [vmem:[#allocation37_spill] sm:$0xff] }
 0x659   : > { %v9948_v32 = vpop.eup %9947 }
 0x65a   : > { %v9950_v47 = vpop.eup %9949 }
 0x65b   : > { %v9952_v6 = vpop.eup %9951  ;;  %v5347_v56 = vmul.f32 %v9950_v47, %v11922_v0  ;;  %v13766_v47 = vld [vmem:[#allocation61_spill] sm:$0xff] }
 0x65c   : > { %v9954_v54 = vpop.eup %9953 }
 0x65d   : > { %v5348_v12 = vmul.f32 %v9954_v54, %v11924_v34  ;;  %v13768_v54 = vld [vmem:[#allocation63_spill] sm:$0xff] }
 0x67d   : > { %v5253_v53 = vpop.f32.mrb[36].mxu0  ;;  %v5294_v5 = vpop.f32.mrb[36].mxu1 }
 0x67e   : > { %v5305_v7 = vadd.f32 %v5253_v53, %v4365_v21  ;;  %v5307_v41 = vadd.f32 %v5294_v5, %v4367_v30  ;;  %v5255_v55 = vpop.f32.mrb[37].mxu0  ;;  %v5296_v63 = vpop.f32.mrb[37].mxu1  ;;  %v13743_v21 = vld [vmem:[#allocation38_spill] sm:$0xff]  ;;  %v13746_v30 = vld [vmem:[#allocation41_spill] sm:$0xff]  ;;  %v13752_v5 = vld [vmem:[#allocation47_spill] sm:$0xff] }
 0x67f   : > { %v5306_v33 = vadd.f32 %v5255_v55, %v4366_v35  ;;  %v5308_v9 = vadd.f32 %v5296_v63, %v4368_v52  ;;  %v5257_v23 = vpop.f32.mrb[38].mxu0  ;;  %v5298_v38 = vpop.f32.mrb[38].mxu1  ;;  %v13749_v35 = vld [vmem:[#allocation44_spill] sm:$0xff]  ;;  %v13750_v52 = vld [vmem:[#allocation45_spill] sm:$0xff]  ;;  %v13751_v53 = vld [vmem:[#allocation46_spill] sm:$0xff] }
 0x680   : > { %9955 = vtanh.f32 %v5305_v7  ;;  %v9323_v45 = vmul.f32 -1.442695, %v5307_v41  ;;  %v5258_v3 = vpop.f32.mrb[39].mxu0  ;;  %v5299_v42 = vpop.f32.mrb[39].mxu1  ;;  %v13753_v7 = vld [vmem:[#allocation48_spill] sm:$0xff]  ;;  %v13754_v41 = vld [vmem:[#allocation49_spill] sm:$0xff] }
 0x681   : > { %9957 = vtanh.f32 %v5306_v33  ;;  %v9324_v25 = vmul.f32 -1.442695, %v5308_v9  ;;  %v13755_v55 = vld [vmem:[#allocation50_spill] sm:$0xff]  ;;  %v13756_v63 = vld [vmem:[#allocation51_spill] sm:$0xff]  ;;  %v13757_v33 = vld [vmem:[#allocation52_spill] sm:$0xff] }
 0x682   : > { %9959 = vpow2.f32 %v9323_v45  ;;  %v13758_v9 = vld [vmem:[#allocation53_spill] sm:$0xff]  ;;  %v13759_v23 = vld [vmem:[#allocation54_spill] sm:$0xff]  ;;  %v13760_v38 = vld [vmem:[#allocation55_spill] sm:$0xff] }
 0x683   : > { %9961 = vpow2.f32 %v9324_v25  ;;  %v13761_v45 = vld [vmem:[#allocation56_spill] sm:$0xff]  ;;  %v13762_v3 = vld [vmem:[#allocation57_spill] sm:$0xff]  ;;  %v13763_v42 = vld [vmem:[#allocation58_spill] sm:$0xff] }
 0x684   : > { %v13764_v25 = vld [vmem:[#allocation59_spill] sm:$0xff] }
 0x68a   : > { %v9956_v27 = vpop.eup %9955 }
 0x68b   : > { %v9958_v49 = vpop.eup %9957  ;;  %v5349_v44 = vmul.f32 %v9956_v27, %v9948_v32  ;;  %v13765_v32 = vld [vmem:[#allocation60_spill] sm:$0xff] }
 0x68c   : > { %v9960_v43 = vpop.eup %9959  ;;  %v5350_v40 = vmul.f32 %v9958_v49, %v9952_v6  ;;  %v13767_v6 = vld [vmem:[#allocation62_spill] sm:$0xff]  ;;  %v13769_v27 = vld [vmem:[#allocation64_spill] sm:$0xff]  ;;  %v13770_v49 = vld [vmem:[#allocation65_spill] sm:$0xff] }
 0x68d   : > { %v9962_v18 = vpop.eup %9961  ;;  %v12252_v16 = vadd.f32 %v5349_v44, %v5347_v56  ;;  %v5341_v20 = vadd.f32 1.0, %v9960_v43  ;;  %v13771_v56 = vld [vmem:[#allocation66_spill] sm:$0xff]  ;;  %v13772_v44 = vld [vmem:[#allocation67_spill] sm:$0xff]  ;;  %v13773_v43 = vld [vmem:[#allocation68_spill] sm:$0xff] }
 0x68e   : > { %v12254_v2 = vadd.f32 %v5350_v40, %v5348_v12  ;;  %v5342_v59 = vadd.f32 1.0, %v9962_v18  ;;  %v13774_v12 = vld [vmem:[#allocation69_spill] sm:$0xff]  ;;  %v13775_v40 = vld [vmem:[#allocation70_spill] sm:$0xff]  ;;  %v13776_v18 = vld [vmem:[#allocation71_spill] sm:$0xff] }
 0x68f   : > { %9963 = vtanh.f32 %v12252_v16 }
 0x690   : > { %9965 = vrcp.f32 %v5341_v20  ;;  %v13777_v20 = vld [vmem:[#allocation72_spill] sm:$0xff] }
 0x691   : > { %9967 = vtanh.f32 %v12254_v2 }
 0x692   : > { %9969 = vrcp.f32 %v5342_v59  ;;  %v13778_v59 = vld [vmem:[#allocation73_spill] sm:$0xff] }
 0x699   : > { %v9964_v0 = vpop.eup %9963 }
 0x69a   : > { %v9966_v29 = vpop.eup %9965 }
 0x69b   : > { %v9968_v8 = vpop.eup %9967  ;;  %v5355_v34 = vmul.f32 %v9966_v29, %v9964_v0  ;;  %v13779_v0 = vld [vmem:[#allocation74_spill] sm:$0xff]  ;;  %v13780_v29 = vld [vmem:[#allocation75_spill] sm:$0xff] }
 0x69c   : > { %v9970_v28 = vpop.eup %9969 }
 0x69d   : > { %v5356_v22 = vmul.f32 %v9970_v28, %v9968_v8  ;;  %v12261_v1 = vpack.c.bf16 %v5355_v34, %v5355_v34  ;;  %v13781_v8 = vld [vmem:[#allocation76_spill] sm:$0xff]  ;;  %v13783_v28 = vld [vmem:[#allocation78_spill] sm:$0xff] }
 0x69f   : > { %v5358_v62 = vpack.c.bf16 %v5356_v22, %v5356_v22  ;;  %v9780_v61 = vpack.c.bf16 %v5356_v22, %v5355_v34  ;;  %v13782_v34 = vld [vmem:[#allocation77_spill] sm:$0xff] }
 0x6a0   : > { %v6408_v22 = vld [vmem:[%s10289_s29 + $0x68] sm:$0xff] }
 0x6a1   : > { %6182 = vmatprep.mubr.bf16.mxu0 %v5358_v62  ;;  %6223 = vmatprep.mubr.bf16.mxu1 %v5358_v62  ;;  %5368 = vst [vmem:[%s5367_s6] sm:$0xff] %v9780_v61 }
 0x6a2   : > { %6183 = vmatmul.mubr.bf16.vlgmr.msra.gmra.mrb[40].mxu0 %v12261_v1  ;;  %6224 = vmatmul.mubr.bf16.vlgmr.msra.gmra.mrb[40].mxu1 %v12261_v1 }
 0x6a3   : > { %6233 = vmatpush1.bf16.msra.mxu0 %v11910_v24  ;;  %6274 = vmatpush1.bf16.msra.mxu1 %v11912_v39  ;;  %v13744_v24 = vld [vmem:[#allocation39_spill] sm:$0xff]  ;;  %v13745_v39 = vld [vmem:[#allocation40_spill] sm:$0xff] }
 0x6a4   : > { %6264 = vmatprep.mubr.bf16.mxu0 %v5358_v62  ;;  %6305 = vmatprep.mubr.bf16.mxu1 %v5358_v62  ;;  %v6411_v62 = vld [vmem:[%s10289_s29 + $0x80] sm:$0xff] }
 0x6a5   : > { %6234 = vmatprep.subr.bf16.mxu0 %v11939_v11  ;;  %6275 = vmatprep.subr.bf16.mxu1 %v11941_v50  ;;  %v13747_v11 = vld [vmem:[#allocation42_spill] sm:$0xff]  ;;  %v13748_v50 = vld [vmem:[#allocation43_spill] sm:$0xff] }
 0x6a7   : > { %6235 = vmatpush1.bf16.msra.mxu0 %v13738_v14  ;;  %6276 = vmatpush1.bf16.msra.mxu1 %v13739_v4  ;;  %v6412_v14 = vld [vmem:[%s10289_s29 + $0x88] sm:$0xff] }
 0x6a8   : > { %6236 = vmatprep.subr.bf16.mxu0 %v13740_v15  ;;  %6277 = vmatprep.subr.bf16.mxu1 %v13741_v19  ;;  %v6416_v4 = vld [vmem:[%s10289_s29 + $0xa8] sm:$0xff] }
 0x6ab   : > { %6237 = vmatpush1.bf16.msra.mxu0 %v13742_v60  ;;  %6278 = vmatpush1.bf16.msra.mxu1 %v13743_v21  ;;  %v12365_v21 = vcombine.high %v6412_v14, %v6416_v4 }
 0x6ac   : > { %6238 = vmatprep.subr.bf16.mxu0 %v13744_v24  ;;  %6279 = vmatprep.subr.bf16.mxu1 %v13745_v39  ;;  %v6419_v24 = vld [vmem:[%s10289_s29 + $0xc0] sm:$0xff] }
 0x6ad   : > { %v6423_v39 = vld [vmem:[%s10289_s29 + $0xe0] sm:$0xff] }
 0x6af   : > { %6239 = vmatpush1.bf16.msra.mxu0 %v13746_v30  ;;  %6280 = vmatpush1.bf16.msra.mxu1 %v13747_v11  ;;  %v6420_v30 = vld [vmem:[%s10289_s29 + $0xc8] sm:$0xff] }
 0x6b0   : > { %6240 = vmatprep.subr.bf16.mxu0 %v13748_v50  ;;  %6281 = vmatprep.subr.bf16.mxu1 %v13749_v35  ;;  %v6424_v11 = vld [vmem:[%s10289_s29 + $0xe8] sm:$0xff]  ;;  %v12376_v35 = vcombine.low %v6412_v14, %v6416_v4  ;;  %v6467_v14 = vld [vmem:[%s10289_s29 + $0x240] sm:$0xff] }
 0x6b1   : > { %v6471_v4 = vld [vmem:[%s10289_s29 + $0x260] sm:$0xff] }
 0x6b3   : > { %6241 = vmatpush1.bf16.msra.mxu0 %v13750_v52  ;;  %6282 = vmatpush1.bf16.msra.mxu1 %v13751_v53  ;;  %v12378_v52 = vcombine.high %v6419_v24, %v6423_v39  ;;  %v12381_v53 = vcombine.high %v6420_v30, %v6424_v11 }
 0x6b4   : > { %6242 = vmatprep.subr.bf16.mxu0 %v13752_v5  ;;  %6283 = vmatprep.subr.bf16.mxu1 %v13753_v7  ;;  %v6427_v5 = vld [vmem:[%s10289_s29 + $0x100] sm:$0xff] }
 0x6b5   : > { %v6431_v7 = vld [vmem:[%s10289_s29 + $0x120] sm:$0xff] }
 0x6b7   : > { %6243 = vmatpush1.bf16.msra.mxu0 %v13754_v41  ;;  %6284 = vmatpush1.bf16.msra.mxu1 %v13755_v55  ;;  %v6428_v41 = vld [vmem:[%s10289_s29 + $0x108] sm:$0xff] }
 0x6b8   : > { %6244 = vmatprep.subr.bf16.mxu0 %v13756_v63  ;;  %6285 = vmatprep.subr.bf16.mxu1 %v13757_v33  ;;  %v6432_v55 = vld [vmem:[%s10289_s29 + $0x128] sm:$0xff]  ;;  %v12388_v63 = vcombine.low %v6419_v24, %v6423_v39  ;;  %v12392_v33 = vcombine.low %v6420_v30, %v6424_v11  ;;  %v12475_v39 = vcombine.high %v6467_v14, %v6471_v4 }
 0x6b9   : > { %v6468_v24 = vld [vmem:[%s10289_s29 + $0x248] sm:$0xff]  ;;  %v12479_v11 = vcombine.low %v6467_v14, %v6471_v4 }
 0x6ba   : > { %v6472_v30 = vld [vmem:[%s10289_s29 + $0x268] sm:$0xff] }
 0x6bb   : > { %6245 = vmatpush1.bf16.msra.mxu0 %v13758_v9  ;;  %6286 = vmatpush1.bf16.msra.mxu1 %v13759_v23  ;;  %v12394_v9 = vcombine.high %v6427_v5, %v6431_v7  ;;  %v12397_v23 = vcombine.high %v6428_v41, %v6432_v55  ;;  %13784 = vst [vmem:[#allocation5_spill] sm:$0xff] %v12479_v11  ;;  %v6492_v14 = vld [vmem:[%s10289_s29 + $0x308] sm:$0xff] }
 0x6bc   : > { %6246 = vmatprep.subr.bf16.mxu0 %v13760_v38  ;;  %6287 = vmatprep.subr.bf16.mxu1 %v13761_v45  ;;  %v6435_v38 = vld [vmem:[%s10289_s29 + $0x140] sm:$0xff] }
 0x6bd   : > { %v6439_v45 = vld [vmem:[%s10289_s29 + $0x160] sm:$0xff] }
 0x6bf   : > { %6247 = vmatpush1.bf16.msra.mxu0 %v13762_v3  ;;  %6288 = vmatpush1.bf16.msra.mxu1 %v13763_v42  ;;  %v6436_v3 = vld [vmem:[%s10289_s29 + $0x148] sm:$0xff] }
 0x6c0   : > { %6248 = vmatprep.subr.bf16.mxu0 %v13764_v25  ;;  %6289 = vmatprep.subr.bf16.mxu1 %v13765_v32  ;;  %v6440_v42 = vld [vmem:[%s10289_s29 + $0x168] sm:$0xff]  ;;  %v12404_v25 = vcombine.low %v6427_v5, %v6431_v7  ;;  %v12408_v32 = vcombine.low %v6428_v41, %v6432_v55  ;;  %v12481_v5 = vcombine.low %v6468_v24, %v6472_v30  ;;  %v6475_v41 = vld [vmem:[%s10289_s29 + $0x280] sm:$0xff] }
 0x6c1   : > { %v12483_v7 = vcombine.high %v6468_v24, %v6472_v30  ;;  %v6479_v55 = vld [vmem:[%s10289_s29 + $0x2a0] sm:$0xff]  ;;  %v6496_v24 = vld [vmem:[%s10289_s29 + $0x328] sm:$0xff] }
 0x6c2   : > { %13785 = vst [vmem:[#allocation6_spill] sm:$0xff] %v12481_v5 }
 0x6c3   : > { %6249 = vmatpush1.bf16.msra.mxu0 %v13766_v47  ;;  %6290 = vmatpush1.bf16.msra.mxu1 %v13767_v6  ;;  %v12410_v47 = vcombine.high %v6435_v38, %v6439_v45  ;;  %v12413_v6 = vcombine.high %v6436_v3, %v6440_v42  ;;  %13786 = vst [vmem:[#allocation4_spill] sm:$0xff] %v12483_v7 }
 0x6c4   : > { %6250 = vmatprep.subr.bf16.mxu0 %v13768_v54  ;;  %6291 = vmatprep.subr.bf16.mxu1 %v13769_v27  ;;  %v6443_v54 = vld [vmem:[%s10289_s29 + $0x180] sm:$0xff] }
 0x6c5   : > { %v6447_v27 = vld [vmem:[%s10289_s29 + $0x1a0] sm:$0xff] }
 0x6c7   : > { %6251 = vmatpush1.bf16.msra.mxu0 %v13770_v49  ;;  %6292 = vmatpush1.bf16.msra.mxu1 %v13771_v56  ;;  %v6444_v49 = vld [vmem:[%s10289_s29 + $0x188] sm:$0xff] }
 0x6c8   : > { %6252 = vmatprep.subr.bf16.mxu0 %v13772_v44  ;;  %6293 = vmatprep.subr.bf16.mxu1 %v13773_v43  ;;  %v6448_v56 = vld [vmem:[%s10289_s29 + $0x1a8] sm:$0xff]  ;;  %v12420_v44 = vcombine.low %v6435_v38, %v6439_v45  ;;  %v12424_v43 = vcombine.low %v6436_v3, %v6440_v42  ;;  %v12491_v45 = vcombine.high %v6475_v41, %v6479_v55 }
 0x6c9   : > { %v6476_v38 = vld [vmem:[%s10289_s29 + $0x288] sm:$0xff]  ;;  %v12495_v42 = vcombine.low %v6475_v41, %v6479_v55  ;;  %v12529_v41 = vcombine.low %v6492_v14, %v6496_v24  ;;  %v12531_v55 = vcombine.high %v6492_v14, %v6496_v24 }
 0x6ca   : > { %13787 = vst [vmem:[#allocation7_spill] sm:$0xff] %v12491_v45  ;;  %v6480_v3 = vld [vmem:[%s10289_s29 + $0x2a8] sm:$0xff] }
 0x6cb   : > { %6253 = vmatpush1.bf16.msra.mxu0 %v13774_v12  ;;  %6294 = vmatpush1.bf16.msra.mxu1 %v13775_v40  ;;  %v12426_v12 = vcombine.high %v6443_v54, %v6447_v27  ;;  %v12429_v40 = vcombine.high %v6444_v49, %v6448_v56  ;;  %13788 = vst [vmem:[#allocation9_spill] sm:$0xff] %v12495_v42  ;;  %13797 = vst [vmem:[#allocation18_spill] sm:$0xff] %v12529_v41 }
 0x6cc   : > { %6254 = vmatprep.subr.bf16.mxu0 %v13776_v18  ;;  %6295 = vmatprep.subr.bf16.mxu1 %v13777_v20  ;;  %v6451_v18 = vld [vmem:[%s10289_s29 + $0x1c0] sm:$0xff]  ;;  %13798 = vst [vmem:[#allocation16_spill] sm:$0xff] %v12531_v55 }
 0x6cd   : > { %v6455_v20 = vld [vmem:[%s10289_s29 + $0x1e0] sm:$0xff] }
 0x6cf   : > { %6255 = vmatpush1.bf16.msra.mxu0 %v13778_v59  ;;  %6296 = vmatpush1.bf16.msra.mxu1 %v13779_v0  ;;  %v6452_v59 = vld [vmem:[%s10289_s29 + $0x1c8] sm:$0xff] }
 0x6d0   : > { %6256 = vmatprep.subr.bf16.mxu0 %v13780_v29  ;;  %6297 = vmatprep.subr.bf16.mxu1 %v13781_v8  ;;  %v6456_v0 = vld [vmem:[%s10289_s29 + $0x1e8] sm:$0xff]  ;;  %v12436_v29 = vcombine.low %v6443_v54, %v6447_v27  ;;  %v12440_v8 = vcombine.low %v6444_v49, %v6448_v56  ;;  %v12497_v54 = vcombine.low %v6476_v38, %v6480_v3  ;;  %v6483_v49 = vld [vmem:[%s10289_s29 + $0x2c0] sm:$0xff] }
 0x6d1   : > { %v12499_v27 = vcombine.high %v6476_v38, %v6480_v3  ;;  %v6487_v56 = vld [vmem:[%s10289_s29 + $0x2e0] sm:$0xff] }
 0x6d2   : > { %13789 = vst [vmem:[#allocation10_spill] sm:$0xff] %v12497_v54  ;;  %v6499_v38 = vld [vmem:[%s10289_s29 + $0x340] sm:$0xff] }
 0x6d3   : > { %6257 = vmatpush1.bf16.msra.mxu0 %v12126_v17  ;;  %6298 = vmatpush1.bf16.msra.mxu1 %v12128_v13  ;;  %v6395_v17 = vld [vmem:[%s10289_s29] sm:$0xff]  ;;  %13790 = vst [vmem:[#allocation8_spill] sm:$0xff] %v12499_v27 }
 0x6d4   : > { %6258 = vmatprep.subr.bf16.mxu0 %v12132_v10  ;;  %6299 = vmatprep.subr.bf16.mxu1 %v13782_v34  ;;  %v6399_v13 = vld [vmem:[%s10289_s29 + $0x20] sm:$0xff]  ;;  %v6396_v10 = vld [vmem:[%s10289_s29 + $0x8] sm:$0xff]  ;;  %v12442_v34 = vcombine.high %v6451_v18, %v6455_v20 }
 0x6d5   : > { %v6503_v3 = vld [vmem:[%s10289_s29 + $0x360] sm:$0xff] }
 0x6d7   : > { %6259 = vmatpush1.bf16.msra.mxu0 %v13783_v28  ;;  %6300 = vmatpush1.bf16.msra.mxu1 %v12144_v31  ;;  %v12332_v31 = vcombine.low %v6395_v17, %v6399_v13  ;;  %v12445_v28 = vcombine.high %v6452_v59, %v6456_v0 }
 0x6d8   : > { %6260 = vmatprep.subr.bf16.mxu0 %v12148_v46  ;;  %6301 = vmatprep.subr.bf16.mxu1 %v12150_v51  ;;  %v12334_v46 = vcombine.high %v6395_v17, %v6399_v13  ;;  %v6400_v51 = vld [vmem:[%s10289_s29 + $0x28] sm:$0xff]  ;;  %v12448_v17 = vcombine.low %v6451_v18, %v6455_v20  ;;  %v12452_v13 = vcombine.low %v6452_v59, %v6456_v0 }
 0x6d9   : > { %v6484_v18 = vld [vmem:[%s10289_s29 + $0x2c8] sm:$0xff]  ;;  %v12507_v20 = vcombine.high %v6483_v49, %v6487_v56  ;;  %v12511_v0 = vcombine.low %v6483_v49, %v6487_v56  ;;  %v12539_v56 = vcombine.low %v6499_v38, %v6503_v3 }
 0x6da   : > { %v6488_v59 = vld [vmem:[%s10289_s29 + $0x2e8] sm:$0xff] }
 0x6db   : > { %6261 = vmatpush1.bf16.msra.mxu0 %v12158_v58  ;;  %6302 = vmatpush1.bf16.msra.mxu1 %v12160_v36  ;;  %v6407_v58 = vld [vmem:[%s10289_s29 + $0x60] sm:$0xff]  ;;  %v12339_v36 = vcombine.low %v6396_v10, %v6400_v51  ;;  %13791 = vst [vmem:[#allocation11_spill] sm:$0xff] %v12507_v20  ;;  %13792 = vst [vmem:[#allocation13_spill] sm:$0xff] %v12511_v0  ;;  %v6500_v49 = vld [vmem:[%s10289_s29 + $0x348] sm:$0xff] }
 0x6dc   : > { %6262 = vmatprep.subr.bf16.mxu0 %v12164_v57  ;;  %6303 = vmatprep.subr.bf16.mxu1 %v12166_v37  ;;  %v6404_v37 = vld [vmem:[%s10289_s29 + $0x48] sm:$0xff]  ;;  %13799 = vst [vmem:[#allocation22_spill] sm:$0xff] %v12539_v56 }
 0x6dd   : > { %v12349_v61 = vcombine.high %v6404_v37, %v6408_v22  ;;  %v12360_v19 = vcombine.low %v6404_v37, %v6408_v22  ;;  %v6464_v22 = vld [vmem:[%s10289_s29 + $0x228] sm:$0xff] }
 0x6df   : > { %6263 = vmatpush1.bf16.msra.mxu0 %v12170_v26  ;;  %6304 = vmatpush1.bf16.msra.mxu1 %v12172_v48  ;;  %v6403_v26 = vld [vmem:[%s10289_s29 + $0x40] sm:$0xff]  ;;  %v12341_v48 = vcombine.high %v6396_v10, %v6400_v51 }
 0x6e0   : > { %v12343_v57 = vcombine.high %v6403_v26, %v6407_v58  ;;  %7163 = vmatprep.subr.bf16.mxu0 %v12334_v46  ;;  %v12356_v15 = vcombine.low %v6403_v26, %v6407_v58  ;;  %v6459_v10 = vld [vmem:[%s10289_s29 + $0x200] sm:$0xff]  ;;  %v6460_v58 = vld [vmem:[%s10289_s29 + $0x208] sm:$0xff] }
 0x6e1   : > { %7204 = vmatprep.subr.bf16.mxu1 %v12341_v48  ;;  %v6463_v51 = vld [vmem:[%s10289_s29 + $0x220] sm:$0xff] }
 0x6e2   : > { %6265 = vmatmul.mubr.bf16.vlgmr.msra.gmra.mrb[44].mxu0 %v12261_v1  ;;  %6306 = vmatmul.mubr.bf16.vlgmr.msra.gmra.mrb[44].mxu1 %v12261_v1  ;;  %v6415_v1 = vld [vmem:[%s10289_s29 + $0xa0] sm:$0xff]  ;;  %v12459_v26 = vcombine.high %v6459_v10, %v6463_v51  ;;  %v12462_v37 = vcombine.low %v6459_v10, %v6463_v51  ;;  %v12513_v10 = vcombine.low %v6484_v18, %v6488_v59 }
 0x6e3   : > { %7164 = vmatpush1.bf16.msra.mxu0 %v12332_v31  ;;  %7205 = vmatpush1.bf16.msra.mxu1 %v12339_v36  ;;  %v12362_v60 = vcombine.high %v6411_v62, %v6415_v1  ;;  %v12372_v50 = vcombine.low %v6411_v62, %v6415_v1  ;;  %v12466_v62 = vcombine.low %v6460_v58, %v6464_v22 }
 0x6e4   : > { %7165 = vmatprep.subr.bf16.mxu0 %v12343_v57  ;;  %7206 = vmatprep.subr.bf16.mxu1 %v12349_v61  ;;  %v12468_v1 = vcombine.high %v6460_v58, %v6464_v22  ;;  %13793 = vst [vmem:[#allocation14_spill] sm:$0xff] %v12513_v10  ;;  %v12515_v51 = vcombine.high %v6484_v18, %v6488_v59  ;;  %v6491_v58 = vld [vmem:[%s10289_s29 + $0x300] sm:$0xff]  ;;  %v6504_v59 = vld [vmem:[%s10289_s29 + $0x368] sm:$0xff] }
 0x6e5   : > { %v6495_v22 = vld [vmem:[%s10289_s29 + $0x320] sm:$0xff]  ;;  %v12541_v18 = vcombine.high %v6499_v38, %v6503_v3  ;;  %v12547_v14 = vcombine.low %v6500_v49, %v6504_v59  ;;  %v12549_v24 = vcombine.high %v6500_v49, %v6504_v59  ;;  %v6520_v49 = vld [vmem:[%s10289_s29 + $0x3e8] sm:$0xff] }
 0x6e6   : > { %13794 = vst [vmem:[#allocation12_spill] sm:$0xff] %v12515_v51  ;;  %v12523_v4 = vcombine.high %v6491_v58, %v6495_v22  ;;  %v12527_v30 = vcombine.low %v6491_v58, %v6495_v22  ;;  %v6507_v58 = vld [vmem:[%s10289_s29 + $0x380] sm:$0xff] }
 0x6e7   : > { %7166 = vmatpush1.bf16.msra.mxu0 %v12356_v15  ;;  %7207 = vmatpush1.bf16.msra.mxu1 %v12360_v19  ;;  %13800 = vst [vmem:[#allocation21_spill] sm:$0xff] %v12541_v18  ;;  %v6511_v22 = vld [vmem:[%s10289_s29 + $0x3a0] sm:$0xff]  ;;  %13801 = vst [vmem:[#allocation20_spill] sm:$0xff] %v12547_v14 }
 0x6e8   : > { %7167 = vmatprep.subr.bf16.mxu0 %v12362_v60  ;;  %7208 = vmatprep.subr.bf16.mxu1 %v12365_v21  ;;  %13795 = vst [vmem:[#allocation15_spill] sm:$0xff] %v12523_v4  ;;  %13796 = vst [vmem:[#allocation17_spill] sm:$0xff] %v12527_v30  ;;  %v6519_v3 = vld [vmem:[%s10289_s29 + $0x3e0] sm:$0xff] }
 0x6e9   : > { %13802 = vst [vmem:[#allocation19_spill] sm:$0xff] %v12549_v24 }
 0x6eb   : > { %7168 = vmatpush1.bf16.msra.mxu0 %v12372_v50  ;;  %7209 = vmatpush1.bf16.msra.mxu1 %v12376_v35 }
 0x6ec   : > { %7169 = vmatprep.subr.bf16.mxu0 %v12378_v52  ;;  %7210 = vmatprep.subr.bf16.mxu1 %v12381_v53 }
 0x6ef   : > { %7170 = vmatpush1.bf16.msra.mxu0 %v12388_v63  ;;  %7211 = vmatpush1.bf16.msra.mxu1 %v12392_v33 }
 0x6f0   : > { %7171 = vmatprep.subr.bf16.mxu0 %v12394_v9  ;;  %7212 = vmatprep.subr.bf16.mxu1 %v12397_v23 }
 0x6f3   : > { %7172 = vmatpush1.bf16.msra.mxu0 %v12404_v25  ;;  %7213 = vmatpush1.bf16.msra.mxu1 %v12408_v32 }
 0x6f4   : > { %7173 = vmatprep.subr.bf16.mxu0 %v12410_v47  ;;  %7214 = vmatprep.subr.bf16.mxu1 %v12413_v6 }
 0x6f7   : > { %7174 = vmatpush1.bf16.msra.mxu0 %v12420_v44  ;;  %7215 = vmatpush1.bf16.msra.mxu1 %v12424_v43 }
 0x6f8   : > { %7175 = vmatprep.subr.bf16.mxu0 %v12426_v12  ;;  %7216 = vmatprep.subr.bf16.mxu1 %v12429_v40 }
 0x6fb   : > { %7176 = vmatpush1.bf16.msra.mxu0 %v12436_v29  ;;  %7217 = vmatpush1.bf16.msra.mxu1 %v12440_v8 }
 0x6fc   : > { %7177 = vmatprep.subr.bf16.mxu0 %v12442_v34  ;;  %7218 = vmatprep.subr.bf16.mxu1 %v12445_v28 }
 0x6ff   : > { %7178 = vmatpush1.bf16.msra.mxu0 %v12448_v17  ;;  %7219 = vmatpush1.bf16.msra.mxu1 %v12452_v13 }
 0x700   : > { %7179 = vmatprep.subr.bf16.mxu0 %v12459_v26  ;;  %7220 = vmatprep.subr.bf16.mxu1 %v12468_v1 }
 0x703   : > { %7180 = vmatpush1.bf16.msra.mxu0 %v12462_v37  ;;  %7221 = vmatpush1.bf16.msra.mxu1 %v12466_v62 }
 0x704   : > { %7181 = vmatprep.subr.bf16.mxu0 %v12475_v39  ;;  %7222 = vmatprep.subr.bf16.mxu1 %v12483_v7 }
 0x707   : > { %7182 = vmatpush1.bf16.msra.mxu0 %v12479_v11  ;;  %7223 = vmatpush1.bf16.msra.mxu1 %v12481_v5 }
 0x708   : > { %7183 = vmatprep.subr.bf16.mxu0 %v12491_v45  ;;  %7224 = vmatprep.subr.bf16.mxu1 %v12499_v27 }
 0x70b   : > { %7184 = vmatpush1.bf16.msra.mxu0 %v12495_v42  ;;  %7225 = vmatpush1.bf16.msra.mxu1 %v12497_v54 }
 0x70c   : > { %7185 = vmatprep.subr.bf16.mxu0 %v12507_v20  ;;  %7226 = vmatprep.subr.bf16.mxu1 %v12515_v51 }
 0x70f   : > { %7186 = vmatpush1.bf16.msra.mxu0 %v12511_v0  ;;  %7227 = vmatpush1.bf16.msra.mxu1 %v12513_v10  ;;  %v6515_v10 = vld [vmem:[%s10289_s29 + $0x3c0] sm:$0xff]  ;;  %v12562_v0 = vcombine.low %v6507_v58, %v6511_v22 }
 0x710   : > { %7187 = vmatprep.subr.bf16.mxu0 %v12523_v4  ;;  %7228 = vmatprep.subr.bf16.mxu1 %v12531_v55  ;;  %v6508_v55 = vld [vmem:[%s10289_s29 + $0x388] sm:$0xff]  ;;  %v12567_v59 = vcombine.high %v6515_v10, %v6519_v3 }
 0x711   : > { %v6512_v4 = vld [vmem:[%s10289_s29 + $0x3a8] sm:$0xff]  ;;  %13805 = vst [vmem:[#allocation25_spill] sm:$0xff] %v12562_v0 }
 0x712   : > { %v12557_v38 = vcombine.high %v6508_v55, %v6512_v4  ;;  %13806 = vst [vmem:[#allocation26_spill] sm:$0xff] %v12567_v59 }
 0x713   : > { %7188 = vmatpush1.bf16.msra.mxu0 %v12527_v30  ;;  %7229 = vmatpush1.bf16.msra.mxu1 %v12529_v41  ;;  %v12551_v30 = vcombine.high %v6507_v58, %v6511_v22  ;;  %v6516_v41 = vld [vmem:[%s10289_s29 + $0x3c8] sm:$0xff]  ;;  %v12576_v58 = vcombine.low %v6515_v10, %v6519_v3 }
 0x714   : > { %7189 = vmatprep.subr.bf16.mxu0 %v12541_v18  ;;  %13804 = vst [vmem:[#allocation24_spill] sm:$0xff] %v12557_v38  ;;  %7230 = vmatprep.subr.bf16.mxu1 %v12549_v24  ;;  %v12570_v18 = vcombine.low %v6508_v55, %v6512_v4  ;;  %v12573_v24 = vcombine.high %v6516_v41, %v6520_v49  ;;  %v6397_v4 = vld [vmem:[%s10289_s29 + $0x10] sm:$0xff] }
 0x715   : > { %13803 = vst [vmem:[#allocation23_spill] sm:$0xff] %v12551_v30  ;;  %13809 = vst [vmem:[#allocation29_spill] sm:$0xff] %v12576_v58  ;;  %v12580_v22 = vcombine.low %v6516_v41, %v6520_v49  ;;  %v6401_v55 = vld [vmem:[%s10289_s29 + $0x30] sm:$0xff] }
 0x716   : > { %13807 = vst [vmem:[#allocation27_spill] sm:$0xff] %v12570_v18  ;;  %13808 = vst [vmem:[#allocation28_spill] sm:$0xff] %v12573_v24  ;;  %v12591_v10 = vcombine.low %v6397_v4, %v6401_v55 }
 0x717   : > { %7190 = vmatpush1.bf16.msra.mxu0 %v12539_v56  ;;  %7231 = vmatpush1.bf16.msra.mxu1 %v12547_v14  ;;  %13810 = vst [vmem:[#allocation30_spill] sm:$0xff] %v12580_v22  ;;  %v6402_v14 = vld [vmem:[%s10289_s29 + $0x38] sm:$0xff] }
 0x718   : > { %7191 = vmatprep.subr.bf16.mxu0 %v12551_v30  ;;  %7232 = vmatprep.subr.bf16.mxu1 %v12557_v38  ;;  %v6398_v30 = vld [vmem:[%s10289_s29 + $0x18] sm:$0xff]  ;;  %v12587_v38 = vcombine.high %v6397_v4, %v6401_v55  ;;  %v9329_v4 = vld [vmem:[%s8538_s8 + $0x140] sm:$0xff]  ;;  %v9331_v55 = vld [vmem:[%s8538_s8 + $0x150] sm:$0xff] }
 0x719   : > { %v12593_v3 = vcombine.low %v6398_v30, %v6402_v14  ;;  %v12595_v41 = vcombine.high %v6398_v30, %v6402_v14  ;;  %v9332_v30 = vld [vmem:[%s8538_s8 + $0x158] sm:$0xff] }
 0x71a   : > { %13811 = vst [vmem:[#allocation31_spill] sm:$0xff] %v12587_v38 }
 0x71b   : > { %7192 = vmatpush1.bf16.msra.mxu0 %v12562_v0  ;;  %7233 = vmatpush1.bf16.msra.mxu1 %v12570_v18  ;;  %13812 = vst [vmem:[#allocation32_spill] sm:$0xff] %v12595_v41 }
 0x71c   : > { %7193 = vmatprep.subr.bf16.mxu0 %v12567_v59  ;;  %7234 = vmatprep.subr.bf16.mxu1 %v12573_v24 }
 0x71f   : > { %7194 = vmatpush1.bf16.msra.mxu0 %v12576_v58  ;;  %7235 = vmatpush1.bf16.msra.mxu1 %v12580_v22  ;;  %v9330_v22 = vld [vmem:[%s8538_s8 + $0x148] sm:$0xff] }
 0x720   : > { %7245 = vmatprep.subr.bf16.mxu0 %v12587_v38  ;;  %7286 = vmatprep.subr.bf16.mxu1 %v12595_v41 }
 0x775   : > { %v6184_v49 = vpop.f32.mrb[40].mxu0  ;;  %v6225_v58 = vpop.f32.mrb[40].mxu1 }
 0x776   : > { %v6186_v24 = vpop.f32.mrb[41].mxu0  ;;  %v6227_v59 = vpop.f32.mrb[41].mxu1  ;;  %v6314_v20 = vadd.f32 %v9329_v4, %v6184_v49  ;;  %v6316_v14 = vadd.f32 %v9331_v55, %v6225_v58  ;;  %v9333_v4 = vld [vmem:[%s8538_s8 + $0x160] sm:$0xff]  ;;  %v9335_v58 = vld [vmem:[%s8538_s8 + $0x170] sm:$0xff] }
 0x777   : > { %v6188_v18 = vpop.f32.mrb[42].mxu0  ;;  %v6229_v0 = vpop.f32.mrb[42].mxu1  ;;  %v6315_v54 = vadd.f32 %v9330_v22, %v6186_v24  ;;  %v6317_v38 = vadd.f32 %v9332_v30, %v6227_v59  ;;  %v9334_v24 = vld [vmem:[%s8538_s8 + $0x168] sm:$0xff] }
 0x778   : > { %v6189_v56 = vpop.f32.mrb[43].mxu0  ;;  %v6230_v51 = vpop.f32.mrb[43].mxu1  ;;  %v9465_v42 = vmul.f32 -1.442695, %v6314_v20  ;;  %v9467_v41 = vmul.f32 -1.442695, %v6316_v14 }
 0x779   : > { %v9466_v27 = vmul.f32 -1.442695, %v6315_v54  ;;  %v9468_v45 = vmul.f32 -1.442695, %v6317_v38  ;;  %v9336_v20 = vld [vmem:[%s8538_s8 + $0x178] sm:$0xff] }
 0x77a   : > { %9971 = vpow2.f32 %v9465_v42 }
 0x77b   : > { %9973 = vpow2.f32 %v9467_v41 }
 0x77c   : > { %9975 = vpow2.f32 %v9466_v27 }
 0x77d   : > { %9977 = vpow2.f32 %v9468_v45 }
 0x784   : > { %v9972_v0 = vpop.eup %9971 }
 0x785   : > { %v9974_v51 = vpop.eup %9973  ;;  %v6328_v5 = vadd.f32 1.0, %v9972_v0 }
 0x786   : > { %v9976_v56 = vpop.eup %9975  ;;  %v6340_v11 = vadd.f32 1.0, %v9974_v51 }
 0x787   : > { %v9978_v18 = vpop.eup %9977  ;;  %v6329_v7 = vadd.f32 1.0, %v9976_v56  ;;  %9979 = vrcp.f32 %v6328_v5 }
 0x788   : > { %v6341_v49 = vadd.f32 1.0, %v9978_v18  ;;  %9981 = vrcp.f32 %v6340_v11 }
 0x789   : > { %9983 = vrcp.f32 %v6329_v7 }
 0x78a   : > { %9985 = vrcp.f32 %v6341_v49 }
 0x791   : > { %v9980_v11 = vpop.eup %9979 }
 0x792   : > { %v9982_v56 = vpop.eup %9981 }
 0x793   : > { %v9984_v7 = vpop.eup %9983  ;;  %v6360_v49 = vmul.f32 %v9982_v56, %v12252_v16 }
 0x794   : > { %v9986_v18 = vpop.eup %9985 }
 0x7b5   : > { %v6266_v54 = vpop.f32.mrb[44].mxu0  ;;  %v6307_v38 = vpop.f32.mrb[44].mxu1 }
 0x7b6   : > { %v6318_v42 = vadd.f32 %v9333_v4, %v6266_v54  ;;  %v6320_v27 = vadd.f32 %v9335_v58, %v6307_v38  ;;  %v6268_v45 = vpop.f32.mrb[45].mxu0  ;;  %v6309_v59 = vpop.f32.mrb[45].mxu1  ;;  %v6361_v54 = vmul.f32 %v9986_v18, %v12254_v2 }
 0x7b7   : > { %v6319_v22 = vadd.f32 %v9334_v24, %v6268_v45  ;;  %v6321_v41 = vadd.f32 %v9336_v20, %v6309_v59  ;;  %v6270_v55 = vpop.f32.mrb[46].mxu0  ;;  %v6311_v30 = vpop.f32.mrb[46].mxu1 }
 0x7b8   : > { %9987 = vtanh.f32 %v6318_v42  ;;  %v9469_v14 = vmul.f32 -1.442695, %v6320_v27  ;;  %v6271_v0 = vpop.f32.mrb[47].mxu0  ;;  %v6312_v51 = vpop.f32.mrb[47].mxu1 }
 0x7b9   : > { %9989 = vtanh.f32 %v6319_v22  ;;  %v9470_v5 = vmul.f32 -1.442695, %v6321_v41  ;;  %v6405_v0 = vld [vmem:[%s10289_s29 + $0x50] sm:$0xff] }
 0x7ba   : > { %9991 = vpow2.f32 %v9469_v14  ;;  %v6409_v51 = vld [vmem:[%s10289_s29 + $0x70] sm:$0xff] }
 0x7bb   : > { %9993 = vpow2.f32 %v9470_v5  ;;  %v6406_v5 = vld [vmem:[%s10289_s29 + $0x58] sm:$0xff] }
 0x7c2   : > { %v9988_v4 = vpop.eup %9987 }
 0x7c3   : > { %v9990_v58 = vpop.eup %9989  ;;  %v6362_v24 = vmul.f32 %v9988_v4, %v9980_v11  ;;  %v6410_v11 = vld [vmem:[%s10289_s29 + $0x78] sm:$0xff]  ;;  %v6413_v4 = vld [vmem:[%s10289_s29 + $0x90] sm:$0xff] }
 0x7c4   : > { %v9992_v20 = vpop.eup %9991  ;;  %v6363_v38 = vmul.f32 %v9990_v58, %v9984_v7  ;;  %v12618_v58 = vcombine.high %v6405_v0, %v6409_v51 }
 0x7c5   : > { %v9994_v42 = vpop.eup %9993  ;;  %v12603_v27 = vadd.f32 %v6362_v24, %v6360_v49  ;;  %v6354_v45 = vadd.f32 1.0, %v9992_v20  ;;  %v12620_v49 = vcombine.high %v6406_v5, %v6410_v11  ;;  %v6417_v24 = vld [vmem:[%s10289_s29 + $0xb0] sm:$0xff]  ;;  %v6414_v20 = vld [vmem:[%s10289_s29 + $0x98] sm:$0xff] }
 0x7c6   : > { %v12605_v59 = vadd.f32 %v6363_v38, %v6361_v54  ;;  %v6355_v22 = vadd.f32 1.0, %v9994_v42  ;;  %v6418_v54 = vld [vmem:[%s10289_s29 + $0xb8] sm:$0xff]  ;;  %v12629_v38 = vcombine.low %v6405_v0, %v6409_v51  ;;  %v12631_v42 = vcombine.low %v6406_v5, %v6410_v11  ;;  %v6429_v5 = vld [vmem:[%s10289_s29 + $0x110] sm:$0xff] }
 0x7c7   : > { %9995 = vtanh.f32 %v12603_v27  ;;  %v6433_v11 = vld [vmem:[%s10289_s29 + $0x130] sm:$0xff] }
 0x7c8   : > { %9997 = vrcp.f32 %v6354_v45  ;;  %13813 = vst [vmem:[#allocation33_spill] sm:$0xff] %v12629_v38  ;;  %13814 = vst [vmem:[#allocation34_spill] sm:$0xff] %v12631_v42  ;;  %v12633_v45 = vcombine.high %v6413_v4, %v6417_v24 }
 0x7c9   : > { %9999 = vtanh.f32 %v12605_v59 }
 0x7ca   : > { %10001 = vrcp.f32 %v6355_v22  ;;  %13815 = vst [vmem:[#allocation35_spill] sm:$0xff] %v12633_v45  ;;  %v12635_v22 = vcombine.high %v6414_v20, %v6418_v54 }
 0x7cc   : > { %13816 = vst [vmem:[#allocation36_spill] sm:$0xff] %v12635_v22 }
 0x7d1   : > { %v9996_v16 = vpop.eup %9995 }
 0x7d2   : > { %v9998_v2 = vpop.eup %9997 }
 0x7d3   : > { %v10000_v41 = vpop.eup %9999  ;;  %v6368_v55 = vmul.f32 %v9998_v2, %v9996_v16  ;;  %v6421_v16 = vld [vmem:[%s10289_s29 + $0xd0] sm:$0xff] }
 0x7d4   : > { %v10002_v30 = vpop.eup %10001  ;;  %v6425_v2 = vld [vmem:[%s10289_s29 + $0xf0] sm:$0xff] }
 0x7d5   : > { %v6369_v14 = vmul.f32 %v10002_v30, %v10000_v41  ;;  %v12615_v18 = vpack.c.bf16 %v6368_v55, %v6368_v55  ;;  %v6422_v41 = vld [vmem:[%s10289_s29 + $0xd8] sm:$0xff]  ;;  %v12645_v30 = vcombine.low %v6413_v4, %v6417_v24  ;;  %v12651_v0 = vcombine.high %v6421_v16, %v6425_v2 }
 0x7d6   : > { %v12661_v4 = vcombine.low %v6421_v16, %v6425_v2  ;;  %v12677_v16 = vcombine.low %v6429_v5, %v6433_v11 }
 0x7d7   : > { %v6371_v56 = vpack.c.bf16 %v6369_v14, %v6369_v14  ;;  %v9782_v7 = vpack.c.bf16 %v6369_v14, %v6368_v55  ;;  %v6426_v55 = vld [vmem:[%s10289_s29 + $0xf8] sm:$0xff]  ;;  %13817 = vst [vmem:[#allocation37_spill] sm:$0xff] %v12645_v30  ;;  %v12647_v14 = vcombine.low %v6414_v20, %v6418_v54  ;;  %13819 = vst [vmem:[#allocation39_spill] sm:$0xff] %v12651_v0 }
 0x7d8   : > { %v12653_v51 = vcombine.high %v6422_v41, %v6426_v55  ;;  %13821 = vst [vmem:[#allocation41_spill] sm:$0xff] %v12661_v4  ;;  %v12663_v24 = vcombine.low %v6422_v41, %v6426_v55  ;;  %v12667_v20 = vcombine.high %v6429_v5, %v6433_v11  ;;  %13825 = vst [vmem:[#allocation45_spill] sm:$0xff] %v12677_v16 }
 0x7d9   : > { %7195 = vmatprep.mubr.bf16.mxu0 %v6371_v56  ;;  %7236 = vmatprep.mubr.bf16.mxu1 %v6371_v56  ;;  %9473 = vst [vmem:[%s8542_s9 + $0x28] sm:$0xff] %v9782_v7  ;;  %13818 = vst [vmem:[#allocation38_spill] sm:$0xff] %v12647_v14  ;;  %v6434_v7 = vld [vmem:[%s10289_s29 + $0x138] sm:$0xff] }
 0x7da   : > { %7196 = vmatmul.mubr.bf16.vlgmr.msra.gmra.mrb[48].mxu0 %v12615_v18  ;;  %7237 = vmatmul.mubr.bf16.vlgmr.msra.gmra.mrb[48].mxu1 %v12615_v18  ;;  %13820 = vst [vmem:[#allocation40_spill] sm:$0xff] %v12653_v51  ;;  %13822 = vst [vmem:[#allocation42_spill] sm:$0xff] %v12663_v24 }
 0x7db   : > { %7246 = vmatpush1.bf16.msra.mxu0 %v12591_v10  ;;  %7287 = vmatpush1.bf16.msra.mxu1 %v12593_v3  ;;  %13823 = vst [vmem:[#allocation43_spill] sm:$0xff] %v12667_v20 }
 0x7dc   : > { %7277 = vmatprep.mubr.bf16.mxu0 %v6371_v56  ;;  %7318 = vmatprep.mubr.bf16.mxu1 %v6371_v56  ;;  %v6430_v56 = vld [vmem:[%s10289_s29 + $0x118] sm:$0xff] }
 0x7dd   : > { %7247 = vmatprep.subr.bf16.mxu0 %v12618_v58  ;;  %7288 = vmatprep.subr.bf16.mxu1 %v12620_v49  ;;  %v12669_v54 = vcombine.high %v6430_v56, %v6434_v7  ;;  %v12679_v2 = vcombine.low %v6430_v56, %v6434_v7 }
 0x7df   : > { %7248 = vmatpush1.bf16.msra.mxu0 %v12629_v38  ;;  %7289 = vmatpush1.bf16.msra.mxu1 %v12631_v42  ;;  %13824 = vst [vmem:[#allocation44_spill] sm:$0xff] %v12669_v54  ;;  %13826 = vst [vmem:[#allocation46_spill] sm:$0xff] %v12679_v2  ;;  %v6518_v42 = vld [vmem:[%s10289_s29 + $0x3d8] sm:$0xff] }
 0x7e0   : > { %7249 = vmatprep.subr.bf16.mxu0 %v12633_v45  ;;  %7290 = vmatprep.subr.bf16.mxu1 %v12635_v22  ;;  %v6437_v22 = vld [vmem:[%s10289_s29 + $0x150] sm:$0xff]  ;;  %v6438_v45 = vld [vmem:[%s10289_s29 + $0x158] sm:$0xff] }
 0x7e1   : > { %v6522_v38 = vld [vmem:[%s10289_s29 + $0x3f8] sm:$0xff] }
 0x7e3   : > { %7250 = vmatpush1.bf16.msra.mxu0 %v12645_v30  ;;  %7291 = vmatpush1.bf16.msra.mxu1 %v12647_v14  ;;  %v6441_v30 = vld [vmem:[%s10289_s29 + $0x170] sm:$0xff]  ;;  %v6442_v14 = vld [vmem:[%s10289_s29 + $0x178] sm:$0xff] }
 0x7e4   : > { %7251 = vmatprep.subr.bf16.mxu0 %v12651_v0  ;;  %7292 = vmatprep.subr.bf16.mxu1 %v12653_v51  ;;  %v12683_v41 = vcombine.high %v6437_v22, %v6441_v30  ;;  %v12685_v55 = vcombine.high %v6438_v45, %v6442_v14  ;;  %v6445_v51 = vld [vmem:[%s10289_s29 + $0x190] sm:$0xff]  ;;  %v6446_v0 = vld [vmem:[%s10289_s29 + $0x198] sm:$0xff]  ;;  %v12693_v5 = vcombine.low %v6437_v22, %v6441_v30 }
 0x7e5   : > { %v12695_v11 = vcombine.low %v6438_v45, %v6442_v14 }
 0x7e6   : > { %13827 = vst [vmem:[#allocation47_spill] sm:$0xff] %v12683_v41  ;;  %13828 = vst [vmem:[#allocation48_spill] sm:$0xff] %v12685_v55 }
 0x7e7   : > { %7252 = vmatpush1.bf16.msra.mxu0 %v12661_v4  ;;  %7293 = vmatpush1.bf16.msra.mxu1 %v12663_v24  ;;  %v6449_v4 = vld [vmem:[%s10289_s29 + $0x1b0] sm:$0xff]  ;;  %v6450_v24 = vld [vmem:[%s10289_s29 + $0x1b8] sm:$0xff]  ;;  %13829 = vst [vmem:[#allocation49_spill] sm:$0xff] %v12693_v5  ;;  %13830 = vst [vmem:[#allocation50_spill] sm:$0xff] %v12695_v11 }
 0x7e8   : > { %7253 = vmatprep.subr.bf16.mxu0 %v12667_v20  ;;  %7294 = vmatprep.subr.bf16.mxu1 %v12669_v54  ;;  %v12699_v56 = vcombine.high %v6445_v51, %v6449_v4  ;;  %v12701_v7 = vcombine.high %v6446_v0, %v6450_v24  ;;  %v6453_v54 = vld [vmem:[%s10289_s29 + $0x1d0] sm:$0xff]  ;;  %v6454_v20 = vld [vmem:[%s10289_s29 + $0x1d8] sm:$0xff]  ;;  %v12709_v45 = vcombine.low %v6445_v51, %v6449_v4 }
 0x7e9   : > { %v12711_v22 = vcombine.low %v6446_v0, %v6450_v24 }
 0x7ea   : > { %13831 = vst [vmem:[#allocation51_spill] sm:$0xff] %v12699_v56  ;;  %13832 = vst [vmem:[#allocation52_spill] sm:$0xff] %v12701_v7 }
 0x7eb   : > { %7254 = vmatpush1.bf16.msra.mxu0 %v12677_v16  ;;  %7295 = vmatpush1.bf16.msra.mxu1 %v12679_v2  ;;  %v6457_v16 = vld [vmem:[%s10289_s29 + $0x1f0] sm:$0xff]  ;;  %v6458_v2 = vld [vmem:[%s10289_s29 + $0x1f8] sm:$0xff]  ;;  %13833 = vst [vmem:[#allocation53_spill] sm:$0xff] %v12709_v45  ;;  %13834 = vst [vmem:[#allocation54_spill] sm:$0xff] %v12711_v22 }
 0x7ec   : > { %7255 = vmatprep.subr.bf16.mxu0 %v12683_v41  ;;  %7296 = vmatprep.subr.bf16.mxu1 %v12685_v55  ;;  %v12715_v30 = vcombine.high %v6453_v54, %v6457_v16  ;;  %v12717_v14 = vcombine.high %v6454_v20, %v6458_v2  ;;  %v6461_v55 = vld [vmem:[%s10289_s29 + $0x210] sm:$0xff]  ;;  %v6462_v41 = vld [vmem:[%s10289_s29 + $0x218] sm:$0xff]  ;;  %v12725_v0 = vcombine.low %v6453_v54, %v6457_v16 }
 0x7ed   : > { %v12727_v51 = vcombine.low %v6454_v20, %v6458_v2 }
 0x7ee   : > { %13835 = vst [vmem:[#allocation55_spill] sm:$0xff] %v12715_v30  ;;  %13836 = vst [vmem:[#allocation56_spill] sm:$0xff] %v12717_v14 }
 0x7ef   : > { %7256 = vmatpush1.bf16.msra.mxu0 %v12693_v5  ;;  %7297 = vmatpush1.bf16.msra.mxu1 %v12695_v11  ;;  %v6465_v5 = vld [vmem:[%s10289_s29 + $0x230] sm:$0xff]  ;;  %v6466_v11 = vld [vmem:[%s10289_s29 + $0x238] sm:$0xff]  ;;  %13837 = vst [vmem:[#allocation57_spill] sm:$0xff] %v12725_v0  ;;  %13838 = vst [vmem:[#allocation58_spill] sm:$0xff] %v12727_v51 }
 0x7f0   : > { %7257 = vmatprep.subr.bf16.mxu0 %v12699_v56  ;;  %7298 = vmatprep.subr.bf16.mxu1 %v12701_v7  ;;  %v12731_v4 = vcombine.high %v6461_v55, %v6465_v5  ;;  %v12733_v24 = vcombine.high %v6462_v41, %v6466_v11  ;;  %v6469_v7 = vld [vmem:[%s10289_s29 + $0x250] sm:$0xff]  ;;  %v6470_v56 = vld [vmem:[%s10289_s29 + $0x258] sm:$0xff]  ;;  %v12741_v20 = vcombine.low %v6461_v55, %v6465_v5 }
 0x7f1   : > { %v12743_v54 = vcombine.low %v6462_v41, %v6466_v11 }
 0x7f2   : > { %13839 = vst [vmem:[#allocation59_spill] sm:$0xff] %v12731_v4  ;;  %13840 = vst [vmem:[#allocation60_spill] sm:$0xff] %v12733_v24 }
 0x7f3   : > { %7258 = vmatpush1.bf16.msra.mxu0 %v12709_v45  ;;  %7299 = vmatpush1.bf16.msra.mxu1 %v12711_v22  ;;  %v6473_v45 = vld [vmem:[%s10289_s29 + $0x270] sm:$0xff]  ;;  %v6474_v22 = vld [vmem:[%s10289_s29 + $0x278] sm:$0xff]  ;;  %13841 = vst [vmem:[#allocation61_spill] sm:$0xff] %v12741_v20  ;;  %13842 = vst [vmem:[#allocation62_spill] sm:$0xff] %v12743_v54 }
 0x7f4   : > { %7259 = vmatprep.subr.bf16.mxu0 %v12715_v30  ;;  %7300 = vmatprep.subr.bf16.mxu1 %v12717_v14  ;;  %v12747_v16 = vcombine.high %v6469_v7, %v6473_v45  ;;  %v12749_v2 = vcombine.high %v6470_v56, %v6474_v22  ;;  %v6477_v14 = vld [vmem:[%s10289_s29 + $0x290] sm:$0xff]  ;;  %v6478_v30 = vld [vmem:[%s10289_s29 + $0x298] sm:$0xff]  ;;  %v12757_v41 = vcombine.low %v6469_v7, %v6473_v45 }
 0x7f5   : > { %v12759_v55 = vcombine.low %v6470_v56, %v6474_v22 }
 0x7f6   : > { %13843 = vst [vmem:[#allocation63_spill] sm:$0xff] %v12747_v16  ;;  %13844 = vst [vmem:[#allocation64_spill] sm:$0xff] %v12749_v2 }
 0x7f7   : > { %7260 = vmatpush1.bf16.msra.mxu0 %v12725_v0  ;;  %7301 = vmatpush1.bf16.msra.mxu1 %v12727_v51  ;;  %v6481_v0 = vld [vmem:[%s10289_s29 + $0x2b0] sm:$0xff]  ;;  %v6482_v51 = vld [vmem:[%s10289_s29 + $0x2b8] sm:$0xff]  ;;  %13845 = vst [vmem:[#allocation65_spill] sm:$0xff] %v12757_v41  ;;  %13846 = vst [vmem:[#allocation66_spill] sm:$0xff] %v12759_v55 }
 0x7f8   : > { %7261 = vmatprep.subr.bf16.mxu0 %v12731_v4  ;;  %7302 = vmatprep.subr.bf16.mxu1 %v12733_v24  ;;  %v12763_v5 = vcombine.high %v6477_v14, %v6481_v0  ;;  %v12765_v11 = vcombine.high %v6478_v30, %v6482_v51  ;;  %v6485_v24 = vld [vmem:[%s10289_s29 + $0x2d0] sm:$0xff]  ;;  %v6486_v4 = vld [vmem:[%s10289_s29 + $0x2d8] sm:$0xff]  ;;  %v12773_v56 = vcombine.low %v6477_v14, %v6481_v0 }
 0x7f9   : > { %v12775_v7 = vcombine.low %v6478_v30, %v6482_v51 }
 0x7fa   : > { %13847 = vst [vmem:[#allocation67_spill] sm:$0xff] %v12763_v5  ;;  %13848 = vst [vmem:[#allocation68_spill] sm:$0xff] %v12765_v11 }
 0x7fb   : > { %7262 = vmatpush1.bf16.msra.mxu0 %v12741_v20  ;;  %7303 = vmatpush1.bf16.msra.mxu1 %v12743_v54  ;;  %v6489_v20 = vld [vmem:[%s10289_s29 + $0x2f0] sm:$0xff]  ;;  %v6490_v54 = vld [vmem:[%s10289_s29 + $0x2f8] sm:$0xff]  ;;  %13849 = vst [vmem:[#allocation69_spill] sm:$0xff] %v12773_v56  ;;  %13850 = vst [vmem:[#allocation70_spill] sm:$0xff] %v12775_v7 }
 0x7fc   : > { %7263 = vmatprep.subr.bf16.mxu0 %v12747_v16  ;;  %7304 = vmatprep.subr.bf16.mxu1 %v12749_v2  ;;  %v12779_v45 = vcombine.high %v6485_v24, %v6489_v20  ;;  %v12781_v22 = vcombine.high %v6486_v4, %v6490_v54  ;;  %v6493_v2 = vld [vmem:[%s10289_s29 + $0x310] sm:$0xff]  ;;  %v6494_v16 = vld [vmem:[%s10289_s29 + $0x318] sm:$0xff]  ;;  %v12789_v30 = vcombine.low %v6485_v24, %v6489_v20 }
 0x7fd   : > { %v12791_v14 = vcombine.low %v6486_v4, %v6490_v54 }
 0x7fe   : > { %13851 = vst [vmem:[#allocation71_spill] sm:$0xff] %v12779_v45  ;;  %13852 = vst [vmem:[#allocation72_spill] sm:$0xff] %v12781_v22 }
 0x7ff   : > { %7264 = vmatpush1.bf16.msra.mxu0 %v12757_v41  ;;  %7305 = vmatpush1.bf16.msra.mxu1 %v12759_v55  ;;  %v6497_v41 = vld [vmem:[%s10289_s29 + $0x330] sm:$0xff]  ;;  %v6498_v55 = vld [vmem:[%s10289_s29 + $0x338] sm:$0xff]  ;;  %13853 = vst [vmem:[#allocation73_spill] sm:$0xff] %v12789_v30  ;;  %13854 = vst [vmem:[#allocation74_spill] sm:$0xff] %v12791_v14 }
 0x800   : > { %7265 = vmatprep.subr.bf16.mxu0 %v12763_v5  ;;  %7306 = vmatprep.subr.bf16.mxu1 %v12765_v11  ;;  %v12795_v0 = vcombine.high %v6493_v2, %v6497_v41  ;;  %v12797_v51 = vcombine.high %v6494_v16, %v6498_v55  ;;  %v6501_v11 = vld [vmem:[%s10289_s29 + $0x350] sm:$0xff]  ;;  %v6502_v5 = vld [vmem:[%s10289_s29 + $0x358] sm:$0xff]  ;;  %v12805_v4 = vcombine.low %v6493_v2, %v6497_v41 }
 0x801   : > { %v12807_v24 = vcombine.low %v6494_v16, %v6498_v55 }
 0x802   : > { %13855 = vst [vmem:[#allocation75_spill] sm:$0xff] %v12795_v0  ;;  %13856 = vst [vmem:[#allocation76_spill] sm:$0xff] %v12797_v51 }
 0x803   : > { %7266 = vmatpush1.bf16.msra.mxu0 %v12773_v56  ;;  %7307 = vmatpush1.bf16.msra.mxu1 %v12775_v7  ;;  %v6505_v56 = vld [vmem:[%s10289_s29 + $0x370] sm:$0xff]  ;;  %v6506_v7 = vld [vmem:[%s10289_s29 + $0x378] sm:$0xff] }
 0x804   : > { %7267 = vmatprep.subr.bf16.mxu0 %v12779_v45  ;;  %7308 = vmatprep.subr.bf16.mxu1 %v12781_v22  ;;  %v12811_v20 = vcombine.high %v6501_v11, %v6505_v56  ;;  %v12813_v54 = vcombine.high %v6502_v5, %v6506_v7  ;;  %v6509_v22 = vld [vmem:[%s10289_s29 + $0x390] sm:$0xff]  ;;  %v6510_v45 = vld [vmem:[%s10289_s29 + $0x398] sm:$0xff]  ;;  %v12821_v16 = vcombine.low %v6501_v11, %v6505_v56 }
 0x805   : > { %v12823_v2 = vcombine.low %v6502_v5, %v6506_v7  ;;  %v12845_v7 = vcombine.high %v6518_v42, %v6522_v38 }
 0x806   : > { %13857 = vst [vmem:[#allocation77_spill] sm:$0xff] %v12813_v54  ;;  %13858 = vst [vmem:[#allocation78_spill] sm:$0xff] %v12821_v16 }
 0x807   : > { %7268 = vmatpush1.bf16.msra.mxu0 %v12789_v30  ;;  %7309 = vmatpush1.bf16.msra.mxu1 %v12791_v14  ;;  %v6513_v30 = vld [vmem:[%s10289_s29 + $0x3b0] sm:$0xff]  ;;  %v6514_v14 = vld [vmem:[%s10289_s29 + $0x3b8] sm:$0xff] }
 0x808   : > { %7269 = vmatprep.subr.bf16.mxu0 %v12795_v0  ;;  %7310 = vmatprep.subr.bf16.mxu1 %v12797_v51  ;;  %v12827_v41 = vcombine.high %v6509_v22, %v6513_v30  ;;  %v12829_v55 = vcombine.high %v6510_v45, %v6514_v14  ;;  %v6517_v51 = vld [vmem:[%s10289_s29 + $0x3d0] sm:$0xff]  ;;  %v12837_v11 = vcombine.low %v6509_v22, %v6513_v30 }
 0x809   : > { %v6521_v0 = vld [vmem:[%s10289_s29 + $0x3f0] sm:$0xff]  ;;  %v12839_v5 = vcombine.low %v6510_v45, %v6514_v14  ;;  %s9474_s29 = smul.u32 4294966976, %s10123_s12 }
 0x80a   : > { %v12843_v56 = vcombine.high %v6517_v51, %v6521_v0 }
 0x80b   : > { %7270 = vmatpush1.bf16.msra.mxu0 %v12805_v4  ;;  %7311 = vmatpush1.bf16.msra.mxu1 %v12807_v24  ;;  %s8546_s15 = scalar_lea.vmem %s10879_s5, %s9474_s29 [#allocation2]  ;;  %s9764_s5 = smul.u32 4294967240, %s10123_s12 }
 0x80c   : > { %7271 = vmatprep.subr.bf16.mxu0 %v12811_v20  ;;  %7312 = vmatprep.subr.bf16.mxu1 %v12813_v54  ;;  %v12849_v54 = vcombine.low %v6517_v51, %v6521_v0  ;;  %v9478_v22 = vld [vmem:[%s8546_s15 + $0x198] sm:$0xff] }
 0x80d   : > { %s8558_s22 = scalar_lea.vmem %s10901_s11, %s9764_s5 [#allocation3] }
 0x80f   : > { %7272 = vmatpush1.bf16.msra.mxu0 %v12821_v16  ;;  %7313 = vmatpush1.bf16.msra.mxu1 %v12823_v2  ;;  %v12851_v16 = vcombine.low %v6518_v42, %v6522_v38  ;;  %v9477_v38 = vld [vmem:[%s8546_s15 + $0x190] sm:$0xff]  ;;  %v9476_v42 = vld [vmem:[%s8546_s15 + $0x188] sm:$0xff] }
 0x810   : > { %7273 = vmatprep.subr.bf16.mxu0 %v12827_v41  ;;  %7314 = vmatprep.subr.bf16.mxu1 %v12829_v55 }
 0x813   : > { %7274 = vmatpush1.bf16.msra.mxu0 %v12837_v11  ;;  %7315 = vmatpush1.bf16.msra.mxu1 %v12839_v5 }
 0x814   : > { %7275 = vmatprep.subr.bf16.mxu0 %v12843_v56  ;;  %7316 = vmatprep.subr.bf16.mxu1 %v12845_v7 }
 0x817   : > { %7276 = vmatpush1.bf16.msra.mxu0 %v12849_v54  ;;  %7317 = vmatpush1.bf16.msra.mxu1 %v12851_v16 }
 0x818   : > { %8176 = vmatprep.subr.bf16.mxu0 %v12334_v46  ;;  %8217 = vmatprep.subr.bf16.mxu1 %v12341_v48  ;;  %v13860_v46 = vld [vmem:[#allocation5_spill] sm:$0xff]  ;;  %v13862_v48 = vld [vmem:[#allocation7_spill] sm:$0xff] }
 0x81a   : > { %7278 = vmatmul.mubr.bf16.vlgmr.msra.gmra.mrb[52].mxu0 %v12615_v18  ;;  %7319 = vmatmul.mubr.bf16.vlgmr.msra.gmra.mrb[52].mxu1 %v12615_v18  ;;  %v9475_v18 = vld [vmem:[%s8546_s15 + $0x180] sm:$0xff] }
 0x81b   : > { %8177 = vmatpush1.bf16.msra.mxu0 %v12332_v31  ;;  %8218 = vmatpush1.bf16.msra.mxu1 %v12339_v36  ;;  %v13859_v31 = vld [vmem:[#allocation4_spill] sm:$0xff]  ;;  %v13861_v36 = vld [vmem:[#allocation6_spill] sm:$0xff] }
 0x81c   : > { %8178 = vmatprep.subr.bf16.mxu0 %v12343_v57  ;;  %8219 = vmatprep.subr.bf16.mxu1 %v12349_v61  ;;  %v13863_v57 = vld [vmem:[#allocation8_spill] sm:$0xff]  ;;  %v13864_v61 = vld [vmem:[#allocation9_spill] sm:$0xff] }
 0x81f   : > { %8179 = vmatpush1.bf16.msra.mxu0 %v12356_v15  ;;  %8220 = vmatpush1.bf16.msra.mxu1 %v12360_v19  ;;  %v13865_v15 = vld [vmem:[#allocation10_spill] sm:$0xff]  ;;  %v13866_v19 = vld [vmem:[#allocation11_spill] sm:$0xff] }
 0x820   : > { %8180 = vmatprep.subr.bf16.mxu0 %v12362_v60  ;;  %8221 = vmatprep.subr.bf16.mxu1 %v12365_v21  ;;  %v13867_v60 = vld [vmem:[#allocation12_spill] sm:$0xff]  ;;  %v13868_v21 = vld [vmem:[#allocation13_spill] sm:$0xff] }
 0x823   : > { %8181 = vmatpush1.bf16.msra.mxu0 %v12372_v50  ;;  %8222 = vmatpush1.bf16.msra.mxu1 %v12376_v35  ;;  %v13869_v50 = vld [vmem:[#allocation14_spill] sm:$0xff]  ;;  %v13870_v35 = vld [vmem:[#allocation15_spill] sm:$0xff] }
 0x824   : > { %8182 = vmatprep.subr.bf16.mxu0 %v12378_v52  ;;  %8223 = vmatprep.subr.bf16.mxu1 %v12381_v53  ;;  %v13871_v52 = vld [vmem:[#allocation16_spill] sm:$0xff]  ;;  %v13872_v53 = vld [vmem:[#allocation17_spill] sm:$0xff] }
 0x827   : > { %8183 = vmatpush1.bf16.msra.mxu0 %v12388_v63  ;;  %8224 = vmatpush1.bf16.msra.mxu1 %v12392_v33  ;;  %v13873_v63 = vld [vmem:[#allocation18_spill] sm:$0xff]  ;;  %v13874_v33 = vld [vmem:[#allocation21_spill] sm:$0xff] }
 0x828   : > { %8184 = vmatprep.subr.bf16.mxu0 %v12394_v9  ;;  %8225 = vmatprep.subr.bf16.mxu1 %v12397_v23  ;;  %v13875_v9 = vld [vmem:[#allocation19_spill] sm:$0xff]  ;;  %v13876_v23 = vld [vmem:[#allocation22_spill] sm:$0xff] }
 0x82b   : > { %8185 = vmatpush1.bf16.msra.mxu0 %v12404_v25  ;;  %8226 = vmatpush1.bf16.msra.mxu1 %v12408_v32  ;;  %v13877_v25 = vld [vmem:[#allocation20_spill] sm:$0xff]  ;;  %v13878_v32 = vld [vmem:[#allocation23_spill] sm:$0xff] }
 0x82c   : > { %8186 = vmatprep.subr.bf16.mxu0 %v12410_v47  ;;  %8227 = vmatprep.subr.bf16.mxu1 %v12413_v6  ;;  %v13879_v47 = vld [vmem:[#allocation24_spill] sm:$0xff]  ;;  %v13880_v6 = vld [vmem:[#allocation25_spill] sm:$0xff] }
 0x82f   : > { %8187 = vmatpush1.bf16.msra.mxu0 %v12420_v44  ;;  %8228 = vmatpush1.bf16.msra.mxu1 %v12424_v43  ;;  %v13881_v44 = vld [vmem:[#allocation27_spill] sm:$0xff]  ;;  %v13882_v43 = vld [vmem:[#allocation26_spill] sm:$0xff] }
 0x830   : > { %8188 = vmatprep.subr.bf16.mxu0 %v12426_v12  ;;  %8229 = vmatprep.subr.bf16.mxu1 %v12429_v40  ;;  %v13883_v12 = vld [vmem:[#allocation28_spill] sm:$0xff]  ;;  %v13884_v40 = vld [vmem:[#allocation29_spill] sm:$0xff] }
 0x833   : > { %8189 = vmatpush1.bf16.msra.mxu0 %v12436_v29  ;;  %8230 = vmatpush1.bf16.msra.mxu1 %v12440_v8  ;;  %v13885_v29 = vld [vmem:[#allocation30_spill] sm:$0xff]  ;;  %v13886_v8 = vld [vmem:[#allocation31_spill] sm:$0xff] }
 0x834   : > { %8190 = vmatprep.subr.bf16.mxu0 %v12442_v34  ;;  %8231 = vmatprep.subr.bf16.mxu1 %v12445_v28  ;;  %v13887_v34 = vld [vmem:[#allocation32_spill] sm:$0xff] }
 0x837   : > { %8191 = vmatpush1.bf16.msra.mxu0 %v12448_v17  ;;  %8232 = vmatpush1.bf16.msra.mxu1 %v12452_v13 }
 0x838   : > { %8192 = vmatprep.subr.bf16.mxu0 %v12459_v26  ;;  %8233 = vmatprep.subr.bf16.mxu1 %v12468_v1 }
 0x83b   : > { %8193 = vmatpush1.bf16.msra.mxu0 %v12462_v37  ;;  %8234 = vmatpush1.bf16.msra.mxu1 %v12466_v62 }
 0x83c   : > { %8194 = vmatprep.subr.bf16.mxu0 %v12475_v39  ;;  %8235 = vmatprep.subr.bf16.mxu1 %v13859_v31 }
 0x83f   : > { %8195 = vmatpush1.bf16.msra.mxu0 %v13860_v46  ;;  %8236 = vmatpush1.bf16.msra.mxu1 %v13861_v36 }
 0x840   : > { %8196 = vmatprep.subr.bf16.mxu0 %v13862_v48  ;;  %8237 = vmatprep.subr.bf16.mxu1 %v13863_v57 }
 0x843   : > { %8197 = vmatpush1.bf16.msra.mxu0 %v13864_v61  ;;  %8238 = vmatpush1.bf16.msra.mxu1 %v13865_v15 }
 0x844   : > { %8198 = vmatprep.subr.bf16.mxu0 %v13866_v19  ;;  %8239 = vmatprep.subr.bf16.mxu1 %v13867_v60 }
 0x847   : > { %8199 = vmatpush1.bf16.msra.mxu0 %v13868_v21  ;;  %8240 = vmatpush1.bf16.msra.mxu1 %v13869_v50 }
 0x848   : > { %8200 = vmatprep.subr.bf16.mxu0 %v13870_v35  ;;  %8241 = vmatprep.subr.bf16.mxu1 %v13871_v52  ;;  %v9479_v35 = vld [vmem:[%s8546_s15 + $0x1a0] sm:$0xff]  ;;  %v9481_v52 = vld [vmem:[%s8546_s15 + $0x1b0] sm:$0xff] }
 0x84b   : > { %8201 = vmatpush1.bf16.msra.mxu0 %v13872_v53  ;;  %8242 = vmatpush1.bf16.msra.mxu1 %v13873_v63  ;;  %v9480_v53 = vld [vmem:[%s8546_s15 + $0x1a8] sm:$0xff]  ;;  %v9482_v63 = vld [vmem:[%s8546_s15 + $0x1b8] sm:$0xff] }
 0x84c   : > { %8202 = vmatprep.subr.bf16.mxu0 %v13874_v33  ;;  %8243 = vmatprep.subr.bf16.mxu1 %v13875_v9 }
 0x84f   : > { %8203 = vmatpush1.bf16.msra.mxu0 %v13876_v23  ;;  %8244 = vmatpush1.bf16.msra.mxu1 %v13877_v25 }
 0x850   : > { %8204 = vmatprep.subr.bf16.mxu0 %v13878_v32  ;;  %8245 = vmatprep.subr.bf16.mxu1 %v13879_v47 }
 0x853   : > { %8205 = vmatpush1.bf16.msra.mxu0 %v13880_v6  ;;  %8246 = vmatpush1.bf16.msra.mxu1 %v13881_v44 }
 0x854   : > { %8206 = vmatprep.subr.bf16.mxu0 %v13882_v43  ;;  %8247 = vmatprep.subr.bf16.mxu1 %v13883_v12 }
 0x857   : > { %8207 = vmatpush1.bf16.msra.mxu0 %v13884_v40  ;;  %8248 = vmatpush1.bf16.msra.mxu1 %v13885_v29 }
 0x858   : > { %8258 = vmatprep.subr.bf16.mxu0 %v13886_v8  ;;  %8299 = vmatprep.subr.bf16.mxu1 %v13887_v34 }
 0x8ad   : > { %v7197_v28 = vpop.f32.mrb[48].mxu0  ;;  %v7238_v17 = vpop.f32.mrb[48].mxu1 }
 0x8ae   : > { %v7199_v13 = vpop.f32.mrb[49].mxu0  ;;  %v7240_v26 = vpop.f32.mrb[49].mxu1  ;;  %v7327_v45 = vadd.f32 %v9475_v18, %v7197_v28  ;;  %v7329_v30 = vadd.f32 %v9477_v38, %v7238_v17 }
 0x8af   : > { %v7201_v37 = vpop.f32.mrb[50].mxu0  ;;  %v7242_v62 = vpop.f32.mrb[50].mxu1  ;;  %v7328_v14 = vadd.f32 %v9476_v42, %v7199_v13  ;;  %v7330_v0 = vadd.f32 %v9478_v22, %v7240_v26 }
 0x8b0   : > { %v7202_v1 = vpop.f32.mrb[51].mxu0  ;;  %v7243_v39 = vpop.f32.mrb[51].mxu1  ;;  %v9611_v51 = vmul.f32 -1.442695, %v7327_v45  ;;  %v9613_v31 = vmul.f32 -1.442695, %v7329_v30 }
 0x8b1   : > { %v9612_v46 = vmul.f32 -1.442695, %v7328_v14  ;;  %v9614_v36 = vmul.f32 -1.442695, %v7330_v0 }
 0x8b2   : > { %10003 = vpow2.f32 %v9611_v51 }
 0x8b3   : > { %10005 = vpow2.f32 %v9613_v31 }
 0x8b4   : > { %10007 = vpow2.f32 %v9612_v46 }
 0x8b5   : > { %10009 = vpow2.f32 %v9614_v36 }
 0x8bc   : > { %v10004_v48 = vpop.eup %10003 }
 0x8bd   : > { %v10006_v57 = vpop.eup %10005  ;;  %v7341_v19 = vadd.f32 1.0, %v10004_v48 }
 0x8be   : > { %v10008_v61 = vpop.eup %10007  ;;  %v7353_v60 = vadd.f32 1.0, %v10006_v57 }
 0x8bf   : > { %v10010_v15 = vpop.eup %10009  ;;  %v7342_v21 = vadd.f32 1.0, %v10008_v61  ;;  %10011 = vrcp.f32 %v7341_v19  ;;  %v13889_v19 = vld [vmem:[#allocation34_spill] sm:$0xff] }
 0x8c0   : > { %v7354_v50 = vadd.f32 1.0, %v10010_v15  ;;  %10013 = vrcp.f32 %v7353_v60  ;;  %v13888_v15 = vld [vmem:[#allocation33_spill] sm:$0xff]  ;;  %v13890_v60 = vld [vmem:[#allocation35_spill] sm:$0xff] }
 0x8c1   : > { %10015 = vrcp.f32 %v7342_v21  ;;  %v13891_v21 = vld [vmem:[#allocation36_spill] sm:$0xff] }
 0x8c2   : > { %10017 = vrcp.f32 %v7354_v50  ;;  %v13892_v50 = vld [vmem:[#allocation37_spill] sm:$0xff] }
 0x8c9   : > { %v10012_v28 = vpop.eup %10011 }
 0x8ca   : > { %v10014_v17 = vpop.eup %10013 }
 0x8cb   : > { %v10016_v13 = vpop.eup %10015  ;;  %v7373_v1 = vmul.f32 %v10014_v17, %v12603_v27  ;;  %v13916_v17 = vld [vmem:[#allocation61_spill] sm:$0xff] }
 0x8cc   : > { %v10018_v26 = vpop.eup %10017 }
 0x8cd   : > { %v7374_v38 = vmul.f32 %v10018_v26, %v12605_v59  ;;  %v13918_v26 = vld [vmem:[#allocation63_spill] sm:$0xff] }
 0x8ed   : > { %v7279_v33 = vpop.f32.mrb[52].mxu0  ;;  %v7320_v9 = vpop.f32.mrb[52].mxu1 }
 0x8ee   : > { %v7331_v23 = vadd.f32 %v9479_v35, %v7279_v33  ;;  %v7333_v25 = vadd.f32 %v9481_v52, %v7320_v9  ;;  %v7281_v32 = vpop.f32.mrb[53].mxu0  ;;  %v7322_v47 = vpop.f32.mrb[53].mxu1  ;;  %v13893_v35 = vld [vmem:[#allocation38_spill] sm:$0xff]  ;;  %v13896_v52 = vld [vmem:[#allocation41_spill] sm:$0xff]  ;;  %v13902_v9 = vld [vmem:[#allocation47_spill] sm:$0xff] }
 0x8ef   : > { %v7332_v6 = vadd.f32 %v9480_v53, %v7281_v32  ;;  %v7334_v44 = vadd.f32 %v9482_v63, %v7322_v47  ;;  %v7283_v43 = vpop.f32.mrb[54].mxu0  ;;  %v7324_v12 = vpop.f32.mrb[54].mxu1  ;;  %v13899_v53 = vld [vmem:[#allocation44_spill] sm:$0xff]  ;;  %v13900_v63 = vld [vmem:[#allocation45_spill] sm:$0xff]  ;;  %v13901_v33 = vld [vmem:[#allocation46_spill] sm:$0xff] }
 0x8f0   : > { %10019 = vtanh.f32 %v7331_v23  ;;  %v9615_v40 = vmul.f32 -1.442695, %v7333_v25  ;;  %v7284_v29 = vpop.f32.mrb[55].mxu0  ;;  %v7325_v8 = vpop.f32.mrb[55].mxu1  ;;  %v13903_v23 = vld [vmem:[#allocation48_spill] sm:$0xff]  ;;  %v13904_v25 = vld [vmem:[#allocation49_spill] sm:$0xff] }
 0x8f1   : > { %10021 = vtanh.f32 %v7332_v6  ;;  %v9616_v34 = vmul.f32 -1.442695, %v7334_v44  ;;  %v13905_v32 = vld [vmem:[#allocation50_spill] sm:$0xff]  ;;  %v13906_v47 = vld [vmem:[#allocation51_spill] sm:$0xff]  ;;  %v13907_v6 = vld [vmem:[#allocation52_spill] sm:$0xff] }
 0x8f2   : > { %10023 = vpow2.f32 %v9615_v40  ;;  %v13908_v44 = vld [vmem:[#allocation53_spill] sm:$0xff]  ;;  %v13909_v43 = vld [vmem:[#allocation54_spill] sm:$0xff]  ;;  %v13910_v12 = vld [vmem:[#allocation55_spill] sm:$0xff] }
 0x8f3   : > { %10025 = vpow2.f32 %v9616_v34  ;;  %v13911_v40 = vld [vmem:[#allocation56_spill] sm:$0xff]  ;;  %v13912_v29 = vld [vmem:[#allocation57_spill] sm:$0xff]  ;;  %v13913_v8 = vld [vmem:[#allocation58_spill] sm:$0xff] }
 0x8f4   : > { %v13914_v34 = vld [vmem:[#allocation59_spill] sm:$0xff] }
 0x8fa   : > { %v10020_v37 = vpop.eup %10019 }
 0x8fb   : > { %v10022_v62 = vpop.eup %10021  ;;  %v7375_v39 = vmul.f32 %v10020_v37, %v10012_v28  ;;  %v13915_v28 = vld [vmem:[#allocation60_spill] sm:$0xff] }
 0x8fc   : > { %v10024_v18 = vpop.eup %10023  ;;  %v7376_v42 = vmul.f32 %v10022_v62, %v10016_v13  ;;  %v13917_v13 = vld [vmem:[#allocation62_spill] sm:$0xff]  ;;  %v13919_v37 = vld [vmem:[#allocation64_spill] sm:$0xff]  ;;  %v13920_v62 = vld [vmem:[#allocation65_spill] sm:$0xff] }
 0x8fd   : > { %v10026_v45 = vpop.eup %10025  ;;  %v12929_v22 = vadd.f32 %v7375_v39, %v7373_v1  ;;  %v7367_v30 = vadd.f32 1.0, %v10024_v18  ;;  %v13921_v1 = vld [vmem:[#allocation66_spill] sm:$0xff]  ;;  %v13922_v39 = vld [vmem:[#allocation67_spill] sm:$0xff]  ;;  %v13923_v18 = vld [vmem:[#allocation68_spill] sm:$0xff] }
 0x8fe   : > { %v12931_v14 = vadd.f32 %v7376_v42, %v7374_v38  ;;  %v7368_v0 = vadd.f32 1.0, %v10026_v45  ;;  %v13924_v38 = vld [vmem:[#allocation69_spill] sm:$0xff]  ;;  %v13925_v42 = vld [vmem:[#allocation70_spill] sm:$0xff]  ;;  %v13926_v45 = vld [vmem:[#allocation71_spill] sm:$0xff] }
 0x8ff   : > { %10027 = vtanh.f32 %v12929_v22 }
 0x900   : > { %10029 = vrcp.f32 %v7367_v30  ;;  %v13927_v30 = vld [vmem:[#allocation72_spill] sm:$0xff] }
 0x901   : > { %10031 = vtanh.f32 %v12931_v14 }
 0x902   : > { %10033 = vrcp.f32 %v7368_v0  ;;  %v13928_v0 = vld [vmem:[#allocation73_spill] sm:$0xff] }
 0x909   : > { %v10028_v27 = vpop.eup %10027 }
 0x90a   : > { %v10030_v51 = vpop.eup %10029 }
 0x90b   : > { %v10032_v31 = vpop.eup %10031  ;;  %v7381_v59 = vmul.f32 %v10030_v51, %v10028_v27  ;;  %v13929_v27 = vld [vmem:[#allocation74_spill] sm:$0xff]  ;;  %v13930_v51 = vld [vmem:[#allocation75_spill] sm:$0xff] }
 0x90c   : > { %v10034_v46 = vpop.eup %10033 }
 0x90d   : > { %v7382_v36 = vmul.f32 %v10034_v46, %v10032_v31  ;;  %v12937_v61 = vpack.c.bf16 %v7381_v59, %v7381_v59  ;;  %v13931_v31 = vld [vmem:[#allocation76_spill] sm:$0xff]  ;;  %v13933_v46 = vld [vmem:[#allocation78_spill] sm:$0xff] }
 0x90f   : > { %v7384_v48 = vpack.c.bf16 %v7382_v36, %v7382_v36  ;;  %v9783_v57 = vpack.c.bf16 %v7382_v36, %v7381_v59  ;;  %v13932_v59 = vld [vmem:[#allocation77_spill] sm:$0xff] }
 0x910   : > { %v9622_v36 = vld [vmem:[%s8554_s21 + $0x1c8] sm:$0xff] }
 0x911   : > { %8208 = vmatprep.mubr.bf16.mxu0 %v7384_v48  ;;  %8249 = vmatprep.mubr.bf16.mxu1 %v7384_v48  ;;  %9619 = vst [vmem:[%s8550_s19 + $0x30] sm:$0xff] %v9783_v57 }
 0x912   : > { %8209 = vmatmul.mubr.bf16.vlgmr.msra.gmra.mrb[56].mxu0 %v12937_v61  ;;  %8250 = vmatmul.mubr.bf16.vlgmr.msra.gmra.mrb[56].mxu1 %v12937_v61 }
 0x913   : > { %8259 = vmatpush1.bf16.msra.mxu0 %v12591_v10  ;;  %8300 = vmatpush1.bf16.msra.mxu1 %v12593_v3  ;;  %v13894_v10 = vld [vmem:[#allocation39_spill] sm:$0xff]  ;;  %v13895_v3 = vld [vmem:[#allocation40_spill] sm:$0xff] }
 0x914   : > { %8290 = vmatprep.mubr.bf16.mxu0 %v7384_v48  ;;  %8331 = vmatprep.mubr.bf16.mxu1 %v7384_v48  ;;  %v9624_v48 = vld [vmem:[%s8554_s21 + $0x1d8] sm:$0xff] }
 0x915   : > { %8260 = vmatprep.subr.bf16.mxu0 %v12618_v58  ;;  %8301 = vmatprep.subr.bf16.mxu1 %v12620_v49  ;;  %v13897_v58 = vld [vmem:[#allocation42_spill] sm:$0xff]  ;;  %v13898_v49 = vld [vmem:[#allocation43_spill] sm:$0xff] }
 0x917   : > { %8261 = vmatpush1.bf16.msra.mxu0 %v13888_v15  ;;  %8302 = vmatpush1.bf16.msra.mxu1 %v13889_v19 }
 0x918   : > { %8262 = vmatprep.subr.bf16.mxu0 %v13890_v60  ;;  %8303 = vmatprep.subr.bf16.mxu1 %v13891_v21 }
 0x91b   : > { %8263 = vmatpush1.bf16.msra.mxu0 %v13892_v50  ;;  %8304 = vmatpush1.bf16.msra.mxu1 %v13893_v35 }
 0x91c   : > { %8264 = vmatprep.subr.bf16.mxu0 %v13894_v10  ;;  %8305 = vmatprep.subr.bf16.mxu1 %v13895_v3 }
 0x91f   : > { %8265 = vmatpush1.bf16.msra.mxu0 %v13896_v52  ;;  %8306 = vmatpush1.bf16.msra.mxu1 %v13897_v58 }
 0x920   : > { %8266 = vmatprep.subr.bf16.mxu0 %v13898_v49  ;;  %8307 = vmatprep.subr.bf16.mxu1 %v13899_v53 }
 0x923   : > { %8267 = vmatpush1.bf16.msra.mxu0 %v13900_v63  ;;  %8308 = vmatpush1.bf16.msra.mxu1 %v13901_v33  ;;  %v9625_v63 = vld [vmem:[%s8554_s21 + $0x1e0] sm:$0xff]  ;;  %v9627_v33 = vld [vmem:[%s8554_s21 + $0x1f0] sm:$0xff] }
 0x924   : > { %8268 = vmatprep.subr.bf16.mxu0 %v13902_v9  ;;  %8309 = vmatprep.subr.bf16.mxu1 %v13903_v23  ;;  %v9626_v9 = vld [vmem:[%s8554_s21 + $0x1e8] sm:$0xff]  ;;  %v9628_v23 = vld [vmem:[%s8554_s21 + $0x1f8] sm:$0xff] }
 0x927   : > { %8269 = vmatpush1.bf16.msra.mxu0 %v13904_v25  ;;  %8310 = vmatpush1.bf16.msra.mxu1 %v13905_v32 }
 0x928   : > { %8270 = vmatprep.subr.bf16.mxu0 %v13906_v47  ;;  %8311 = vmatprep.subr.bf16.mxu1 %v13907_v6 }
 0x92b   : > { %8271 = vmatpush1.bf16.msra.mxu0 %v13908_v44  ;;  %8312 = vmatpush1.bf16.msra.mxu1 %v13909_v43 }
 0x92c   : > { %8272 = vmatprep.subr.bf16.mxu0 %v13910_v12  ;;  %8313 = vmatprep.subr.bf16.mxu1 %v13911_v40 }
 0x92f   : > { %8273 = vmatpush1.bf16.msra.mxu0 %v13912_v29  ;;  %8314 = vmatpush1.bf16.msra.mxu1 %v13913_v8 }
 0x930   : > { %8274 = vmatprep.subr.bf16.mxu0 %v13914_v34  ;;  %8315 = vmatprep.subr.bf16.mxu1 %v13915_v28 }
 0x933   : > { %8275 = vmatpush1.bf16.msra.mxu0 %v13916_v17  ;;  %8316 = vmatpush1.bf16.msra.mxu1 %v13917_v13 }
 0x934   : > { %8276 = vmatprep.subr.bf16.mxu0 %v13918_v26  ;;  %8317 = vmatprep.subr.bf16.mxu1 %v13919_v37 }
 0x937   : > { %8277 = vmatpush1.bf16.msra.mxu0 %v13920_v62  ;;  %8318 = vmatpush1.bf16.msra.mxu1 %v13921_v1 }
 0x938   : > { %8278 = vmatprep.subr.bf16.mxu0 %v13922_v39  ;;  %8319 = vmatprep.subr.bf16.mxu1 %v13923_v18 }
 0x93b   : > { %8279 = vmatpush1.bf16.msra.mxu0 %v13924_v38  ;;  %8320 = vmatpush1.bf16.msra.mxu1 %v13925_v42 }
 0x93c   : > { %8280 = vmatprep.subr.bf16.mxu0 %v13926_v45  ;;  %8321 = vmatprep.subr.bf16.mxu1 %v13927_v30 }
 0x93f   : > { %8281 = vmatpush1.bf16.msra.mxu0 %v13928_v0  ;;  %8322 = vmatpush1.bf16.msra.mxu1 %v13929_v27 }
 0x940   : > { %8282 = vmatprep.subr.bf16.mxu0 %v13930_v51  ;;  %8323 = vmatprep.subr.bf16.mxu1 %v13931_v31 }
 0x943   : > { %8283 = vmatpush1.bf16.msra.mxu0 %v12805_v4  ;;  %8324 = vmatpush1.bf16.msra.mxu1 %v12807_v24 }
 0x944   : > { %8284 = vmatprep.subr.bf16.mxu0 %v12811_v20  ;;  %8325 = vmatprep.subr.bf16.mxu1 %v13932_v59 }
 0x947   : > { %8285 = vmatpush1.bf16.msra.mxu0 %v13933_v46  ;;  %8326 = vmatpush1.bf16.msra.mxu1 %v12823_v2 }
 0x948   : > { %8286 = vmatprep.subr.bf16.mxu0 %v12827_v41  ;;  %8327 = vmatprep.subr.bf16.mxu1 %v12829_v55 }
 0x94b   : > { %8287 = vmatpush1.bf16.msra.mxu0 %v12837_v11  ;;  %8328 = vmatpush1.bf16.msra.mxu1 %v12839_v5 }
 0x94c   : > { %8288 = vmatprep.subr.bf16.mxu0 %v12843_v56  ;;  %8329 = vmatprep.subr.bf16.mxu1 %v12845_v7  ;;  %v9621_v56 = vld [vmem:[%s8554_s21 + $0x1c0] sm:$0xff]  ;;  %v9623_v7 = vld [vmem:[%s8554_s21 + $0x1d0] sm:$0xff] }
 0x94f   : > { %8289 = vmatpush1.bf16.msra.mxu0 %v12849_v54  ;;  %8330 = vmatpush1.bf16.msra.mxu1 %v12851_v16 }
 0x952   : > { %8291 = vmatmul.mubr.bf16.vlgmr.msra.gmra.mrb[60].mxu0 %v12937_v61  ;;  %8332 = vmatmul.mubr.bf16.vlgmr.msra.gmra.mrb[60].mxu1 %v12937_v61 }
 0x9e5   : > { %v8210_v4 = vpop.f32.mrb[56].mxu0  ;;  %v8251_v24 = vpop.f32.mrb[56].mxu1 }
 0x9e6   : > { %v8212_v20 = vpop.f32.mrb[57].mxu0  ;;  %v8253_v2 = vpop.f32.mrb[57].mxu1  ;;  %v8340_v54 = vadd.f32 %v9621_v56, %v8210_v4  ;;  %v8342_v16 = vadd.f32 %v9623_v7, %v8251_v24 }
 0x9e7   : > { %v8214_v41 = vpop.f32.mrb[58].mxu0  ;;  %v8255_v55 = vpop.f32.mrb[58].mxu1  ;;  %v8341_v57 = vadd.f32 %v9622_v36, %v8212_v20  ;;  %v8343_v15 = vadd.f32 %v9624_v48, %v8253_v2 }
 0x9e8   : > { %v8215_v11 = vpop.f32.mrb[59].mxu0  ;;  %v8256_v5 = vpop.f32.mrb[59].mxu1  ;;  %v9757_v19 = vmul.f32 -1.442695, %v8340_v54  ;;  %v9759_v61 = vmul.f32 -1.442695, %v8342_v16 }
 0x9e9   : > { %v9758_v60 = vmul.f32 -1.442695, %v8341_v57  ;;  %v9760_v21 = vmul.f32 -1.442695, %v8343_v15 }
 0x9ea   : > { %10035 = vpow2.f32 %v9757_v19 }
 0x9eb   : > { %10037 = vpow2.f32 %v9759_v61 }
 0x9ec   : > { %10039 = vpow2.f32 %v9758_v60 }
 0x9ed   : > { %10041 = vpow2.f32 %v9760_v21 }
 0x9f4   : > { %v10036_v50 = vpop.eup %10035 }
 0x9f5   : > { %v10038_v35 = vpop.eup %10037  ;;  %v8354_v52 = vadd.f32 1.0, %v10036_v50 }
 0x9f6   : > { %v10040_v10 = vpop.eup %10039  ;;  %v8366_v58 = vadd.f32 1.0, %v10038_v35 }
 0x9f7   : > { %v10042_v3 = vpop.eup %10041  ;;  %v8355_v49 = vadd.f32 1.0, %v10040_v10  ;;  %10043 = vrcp.f32 %v8354_v52 }
 0x9f8   : > { %v8367_v53 = vadd.f32 1.0, %v10042_v3  ;;  %10045 = vrcp.f32 %v8366_v58 }
 0x9f9   : > { %10047 = vrcp.f32 %v8355_v49 }
 0x9fa   : > { %10049 = vrcp.f32 %v8367_v53 }
 0xa01   : > { %v10044_v26 = vpop.eup %10043 }
 0xa02   : > { %v10046_v37 = vpop.eup %10045 }
 0xa03   : > { %v10048_v62 = vpop.eup %10047  ;;  %v8386_v38 = vmul.f32 %v10046_v37, %v12929_v22 }
 0xa04   : > { %v10050_v1 = vpop.eup %10049 }
 0xa05   : > { %v8387_v30 = vmul.f32 %v10050_v1, %v12931_v14 }
 0xa25   : > { %v8292_v25 = vpop.f32.mrb[60].mxu0  ;;  %v8333_v32 = vpop.f32.mrb[60].mxu1 }
 0xa26   : > { %v8344_v47 = vadd.f32 %v9625_v63, %v8292_v25  ;;  %v8346_v6 = vadd.f32 %v9627_v33, %v8333_v32  ;;  %v8294_v44 = vpop.f32.mrb[61].mxu0  ;;  %v8335_v43 = vpop.f32.mrb[61].mxu1 }
 0xa27   : > { %v8345_v12 = vadd.f32 %v9626_v9, %v8294_v44  ;;  %v8347_v40 = vadd.f32 %v9628_v23, %v8335_v43  ;;  %v8296_v29 = vpop.f32.mrb[62].mxu0  ;;  %v8337_v8 = vpop.f32.mrb[62].mxu1 }
 0xa28   : > { %10051 = vtanh.f32 %v8344_v47  ;;  %v9761_v34 = vmul.f32 -1.442695, %v8346_v6  ;;  %v8297_v28 = vpop.f32.mrb[63].mxu0  ;;  %v8338_v17 = vpop.f32.mrb[63].mxu1 }
 0xa29   : > { %10053 = vtanh.f32 %v8345_v12  ;;  %v9762_v13 = vmul.f32 -1.442695, %v8347_v40 }
 0xa2a   : > { %10055 = vpow2.f32 %v9761_v34 }
 0xa2b   : > { %10057 = vpow2.f32 %v9762_v13 }
 0xa32   : > { %v10052_v39 = vpop.eup %10051 }
 0xa33   : > { %v10054_v18 = vpop.eup %10053  ;;  %v8388_v42 = vmul.f32 %v10052_v39, %v10044_v26 }
 0xa34   : > { %v10056_v45 = vpop.eup %10055  ;;  %v8389_v0 = vmul.f32 %v10054_v18, %v10048_v62 }
 0xa35   : > { %v10058_v27 = vpop.eup %10057  ;;  %v8390_v51 = vadd.f32 %v8388_v42, %v8386_v38  ;;  %v8380_v31 = vadd.f32 1.0, %v10056_v45 }
 0xa36   : > { %v8391_v59 = vadd.f32 %v8389_v0, %v8387_v30  ;;  %v8381_v46 = vadd.f32 1.0, %v10058_v27 }
 0xa37   : > { %10059 = vtanh.f32 %v8390_v51 }
 0xa38   : > { %10061 = vrcp.f32 %v8380_v31 }
 0xa39   : > { %10063 = vtanh.f32 %v8391_v59 }
 0xa3a   : > { %10065 = vrcp.f32 %v8381_v46 }
 0xa41   : > { %v10060_v4 = vpop.eup %10059 }
 0xa42   : > { %v10062_v24 = vpop.eup %10061 }
 0xa43   : > { %v10064_v22 = vpop.eup %10063  ;;  %v8394_v20 = vmul.f32 %v10062_v24, %v10060_v4  ;;  %8414 = sbr.rel (!%p10138_p5) target bundleno = 2645 (0xa55), region = 55 }
 0xa44   : > { %v10066_v2 = vpop.eup %10065 }
 0xa45   : > { %v8395_v41 = vmul.f32 %v10066_v2, %v10064_v22 }
 0xa47   : > { %v9784_v14 = vpack.c.bf16 %v8395_v41, %v8394_v20 }
 0xa49   : > { %9765 = vst [vmem:[%s8558_s22 + $0x38] sm:$0xff] %v9784_v14 }
 0xa50   : > { %v8459_v55 = vld [vmem:[%s10901_s11] sm:$0xff]  ;;  %v8461_v11 = vld [vmem:[%s10901_s11 + $0x8] sm:$0xff]  ;;  %v8463_v5 = vld [vmem:[%s10901_s11 + $0x10] sm:$0xff] }
 0xa51   : > { %8460 = vst [vmem:[%s8417_s25] sm:$0xff] %v8459_v55  ;;  %8462 = vst [vmem:[%s8417_s25 + $0x10] sm:$0xff] %v8461_v11  ;;  %v8465_v56 = vld [vmem:[%s10901_s11 + $0x18] sm:$0xff]  ;;  %v8467_v7 = vld [vmem:[%s10901_s11 + $0x20] sm:$0xff] }
 0xa52   : > { %8464 = vst [vmem:[%s8417_s25 + $0x20] sm:$0xff] %v8463_v5  ;;  %v8469_v36 = vld [vmem:[%s10901_s11 + $0x28] sm:$0xff]  ;;  %8466 = vst [vmem:[%s8417_s25 + $0x30] sm:$0xff] %v8465_v56  ;;  %v8471_v54 = vld [vmem:[%s10901_s11 + $0x30] sm:$0xff] }
 0xa53   : > { %8468 = vst [vmem:[%s8417_s25 + $0x40] sm:$0xff] %v8467_v7  ;;  %8470 = vst [vmem:[%s8417_s25 + $0x50] sm:$0xff] %v8469_v36  ;;  %v8473_v48 = vld [vmem:[%s10901_s11 + $0x38] sm:$0xff] }
 0xa54   : > { %8472 = vst [vmem:[%s8417_s25 + $0x60] sm:$0xff] %v8471_v54  ;;  %8474 = vst [vmem:[%s8417_s25 + $0x70] sm:$0xff] %v8473_v48 }
 0xa55 PF: > { %p9_p11 = scmp.ge.s32.totalorder %s10126_s13, 4   ;;  %s13934_s9 = smov %s10085_s10 }
 0xa56   : > { %s13935_s10 = smov %s10136_s16  ;;  %s13936_s11 = smov %s10126_s13 }
 0xa57   :  { %11 = sbr.rel (!%p9_p11) target bundleno = 2 (0x2), region = 143 }

</bundles_post_ra>
